<compile_context>
chip_gen: v6e
topology: v6e:2x2x1
jax: 0.10.0
libtpu: 0.0.40
codegen_flags: <defaults>
</compile_context>

<pallas_src>
import math

import jax
import jax.numpy as jnp
from jax import lax
from jax.experimental import pallas as pl
from jax.experimental.pallas import tpu as pltpu

# ----- hyperparameters (mirroring the PyTorch module defaults) -----
VOCAB_SIZE = 26
VOCAB_PAD = 128       # lane-dense padded vocab inside the kernel
MAX_LEN = 16          # S
EMBED_DIM = 64        # D
D_FC = 512            # FFN hidden
NUM_HEADS = 4         # H
NUM_ENCODERS = 16     # L
CLS_HIDDEN = 512      # classification hidden layer
BATCH = 2


def _pick_layers_per_step():
    # v7x: fuse more per step (prologue DMA is cheap at 3.2 TB/s); v5e/v6e: keep the
    # 4-step pipeline so per-layer weight streaming overlaps compute.
    try:
        kind = jax.devices()[0].device_kind.lower()
        if "v7" in kind:
            return 8
    except Exception:
        pass
    return 4


LAYERS_PER_STEP = _pick_layers_per_step()


# ----------------------------------------------------------------------------
# Fused Pallas kernel: all encoder layers + classifier head.
# ----------------------------------------------------------------------------
def transformer_kernel(x_ref, wqkv_ref, wo_ref, w1_ref, w2_ref, bvec_ref,
                       bias_ref, mk_ref, mv_ref, bsum_ref, clsb_ref,
                       cw1_hbm, cw2_hbm,
                       o_ref,
                       h_ref, cw1_vmem, cw2_vmem, cls_sem):
    step = pl.program_id(0)
    nsteps = pl.num_programs(0)

    BS, D = h_ref.shape                 # (B*S, D) = (32, 64)
    S = MAX_LEN
    B = BS // S
    H = NUM_HEADS
    LPS = wqkv_ref.shape[0]             # layers handled per grid step

    @pl.when(step == 0)
    def _init():
        h_ref[...] = x_ref[...]                         # embedded + PE input
        o_ref[...] = jnp.zeros_like(o_ref)
        # Deferred classifier-weight DMA: issued now, waited only at the last step,
        # so it overlaps the encoder-layer compute instead of the step-0 prologue.
        pltpu.make_async_copy(cw1_hbm, cw1_vmem, cls_sem.at[0]).start()
        pltpu.make_async_copy(cw2_hbm, cw2_vmem, cls_sem.at[1]).start()

    def layer_norm(x, g, b):
        mu = jnp.mean(x, axis=-1, keepdims=True)
        xc = x - mu
        var = jnp.mean(xc * xc, axis=-1, keepdims=True)
        return xc * jax.lax.rsqrt(var + 1e-5) * g + b

    def one_layer(j, h):
        wqkv = wqkv_ref[j]              # (D, 3D)   bf16, 1/sqrt(dk) folded into Q cols
        wo = wo_ref[j]                  # (D, D)    bf16, rows head-major
        w1 = w1_ref[j]                  # (D, F)    bf16
        w2 = w2_ref[j]                  # (F, D)    bf16
        pv = bvec_ref[j]                # (8, F)    f32 packed small vectors
        b1 = pv[0:1, :]                 # (1, F)
        bqkv = pv[1:2, 0:3 * D]         # (1, 3D)
        bo, g1, be1 = pv[2:3, 0:D], pv[3:4, 0:D], pv[4:5, 0:D]
        b2, g2, be2 = pv[5:6, 0:D], pv[6:7, 0:D], pv[7:8, 0:D]

        # ---- fused QKV projection: one lane-dense (BS,D)@(D,3D) matmul ----
        qkv = jnp.dot(h.astype(jnp.bfloat16), wqkv,
                      preferred_element_type=jnp.float32) + bqkv       # (BS, 3D)
        q = qkv[:, 0:D]                 # heads packed along lanes [h*dk + d]
        k = qkv[:, D:2 * D]
        v = qkv[:, 2 * D:3 * D]

        # ---- heads packed into lanes: scores & ctx as two lane-dense matmuls ----
        # Kbd[d, h*BS+n] = k[n, d] if d belongs to head h else 0.
        kbd = (jnp.concatenate([k.T] * H, axis=1) * mk_ref[...]).astype(jnp.bfloat16)
        s = jnp.dot(q.astype(jnp.bfloat16), kbd,
                    preferred_element_type=jnp.float32) + bias_ref[...]  # (BS, H*BS)
        s = s - jnp.max(s, axis=-1, keepdims=True)                       # row max (all heads)
        e = jnp.exp(s)                                                   # masked entries -> 0
        # per-(query, head) softmax denominator, broadcast across its 32-lane block
        denom = jnp.dot(e, bsum_ref[...], preferred_element_type=jnp.float32)
        p = (e * pl.reciprocal(denom, approx=True)).astype(jnp.bfloat16)
        # Vbd[h*BS+n, d] = v[n, d] if d belongs to head h else 0.
        vbd = (jnp.concatenate([v] * H, axis=0) * mv_ref[...]).astype(jnp.bfloat16)
        ctx = jnp.dot(p, vbd, preferred_element_type=jnp.float32)        # (BS, D), head-packed

        # ---- collapsed output projection: one (BS,D)@(D,D) matmul ----
        attn = jnp.dot(ctx.astype(jnp.bfloat16), wo,
                       preferred_element_type=jnp.float32) + bo

        h1 = layer_norm(h + attn, g1, be1)

        # ---- feed-forward ----
        f = jnp.dot(h1.astype(jnp.bfloat16), w1,
                    preferred_element_type=jnp.float32) + b1
        f = jnp.maximum(f, 0.0)
        f = jnp.dot(f.astype(jnp.bfloat16), w2,
                    preferred_element_type=jnp.float32) + b2
        return layer_norm(h1 + f, g2, be2)

    h = lax.fori_loop(0, LPS, one_layer, h_ref[...], unroll=True)
    h_ref[...] = h

    # ---- classifier head, fused into the last grid step ----
    @pl.when(step == nsteps - 1)
    def _classify():
        # Wait on the deferred classifier-weight copies (started at step 0).
        pltpu.make_async_copy(cw1_hbm, cw1_vmem, cls_sem.at[0]).wait()
        pltpu.make_async_copy(cw2_hbm, cw2_vmem, cls_sem.at[1]).wait()
        # Flatten (B, S, D) -> (B, S*D): S strided row-pair loads + one concatenate.
        pieces = [h_ref[pl.ds(s, B, stride=S), :] for s in range(S)]     # each (B, D)
        flat = jnp.concatenate(pieces, axis=1)                           # (B, S*D)
        clsb = clsb_ref[...]                                             # (8, CLS_HIDDEN)
        hid = jnp.dot(flat.astype(jnp.bfloat16), cw1_vmem[...],
                      preferred_element_type=jnp.float32) + clsb[0:1, :]
        hid = jnp.maximum(hid, 0.0)
        o_ref[...] = jnp.dot(hid.astype(jnp.bfloat16), cw2_vmem[...],
                             preferred_element_type=jnp.float32) + clsb[1:2, 0:VOCAB_PAD]


# ----------------------------------------------------------------------------
# Wrapper (pallas_call plumbing)
# ----------------------------------------------------------------------------
def run_model(x_flat, p):
    BS, D = x_flat.shape
    L, LPS = NUM_ENCODERS, LAYERS_PER_STEP
    assert L % LPS == 0
    H, F = NUM_HEADS, D_FC
    nsteps = L // LPS
    B = BS // MAX_LEN
    SD = MAX_LEN * D

    lmap3 = lambda i: (i, 0, 0)
    cmap2 = lambda i: (0, 0)

    grid_spec = pltpu.PrefetchScalarGridSpec(
        num_scalar_prefetch=0,
        grid=(nsteps,),
        in_specs=[
            pl.BlockSpec((BS, D), cmap2),                     # x (embedded + PE)
            pl.BlockSpec((LPS, D, 3 * D), lmap3),             # fused QKV weights
            pl.BlockSpec((LPS, D, D), lmap3),                 # output projection
            pl.BlockSpec((LPS, D, F), lmap3),                 # FFN w1
            pl.BlockSpec((LPS, F, D), lmap3),                 # FFN w2
            pl.BlockSpec((LPS, 8, F), lmap3),                 # packed small vectors
            pl.BlockSpec((BS, H * BS), cmap2),                # additive batch mask
            pl.BlockSpec((D, H * BS), cmap2),                 # head mask for K
            pl.BlockSpec((H * BS, D), cmap2),                 # head mask for V
            pl.BlockSpec((H * BS, H * BS), cmap2),            # block-sum matrix
            pl.BlockSpec((8, CLS_HIDDEN), cmap2),             # classifier bias slab
            pl.BlockSpec(memory_space=pl.ANY),                # classifier w1 (HBM, manual DMA)
            pl.BlockSpec(memory_space=pl.ANY),                # classifier w2 (HBM, manual DMA)
        ],
        out_specs=pl.BlockSpec((B, VOCAB_PAD), cmap2),
        scratch_shapes=[
            pltpu.VMEM((BS, D), jnp.float32),                  # resident hidden state
            pltpu.VMEM((SD, CLS_HIDDEN), jnp.bfloat16),        # classifier w1 landing buffer
            pltpu.VMEM((CLS_HIDDEN, VOCAB_PAD), jnp.bfloat16), # classifier w2 landing buffer
            pltpu.SemaphoreType.DMA((2,)),
        ],
    )
    out = pl.pallas_call(
        transformer_kernel,
        out_shape=jax.ShapeDtypeStruct((B, VOCAB_PAD), jnp.float32),
        grid_spec=grid_spec,
        compiler_params=pltpu.CompilerParams(
            dimension_semantics=("arbitrary",)),
    )(x_flat, p['wqkv'], p['wo'], p['w1'], p['w2'], p['bvec'],
      p['attn_bias'], p['mk'], p['mv'], p['bsum'], p['clsb'],
      p['cw1'], p['cw2'])
    return out[:, :VOCAB_SIZE]


# ----------------------------------------------------------------------------
# Plain-JAX glue: embedding (with max_norm), positional encoding, params.
# ----------------------------------------------------------------------------
def embed_lookup(tokens, table):
    rows = table[tokens]                                   # (B, S, D) gather
    norm = jnp.sqrt(jnp.sum(rows * rows, axis=-1, keepdims=True))
    scale = jnp.minimum(1.0, 1.0 / jnp.maximum(norm, 1e-12))   # max_norm = 1
    return rows * scale


def positional_encoding(S, D):
    pos = jnp.arange(S, dtype=jnp.float32)[:, None]
    i = jnp.arange(0, D, 2, dtype=jnp.float32)[None, :]
    angle = pos / jnp.power(10000.0, i / D)
    pe = jnp.zeros((S, D), jnp.float32)
    pe = pe.at[:, 0::2].set(jnp.sin(angle))
    pe = pe.at[:, 1::2].set(jnp.cos(angle))
    return pe


def init_params(key):
    L, D, F, H = NUM_ENCODERS, EMBED_DIM, D_FC, NUM_HEADS
    dk = D // H
    S, BS = MAX_LEN, BATCH * MAX_LEN
    ks = jax.random.split(key, 10)

    def nrm(k, shape, scale=0.02):
        return (scale * jax.random.normal(k, shape)).astype(jnp.float32)

    emb = jax.random.normal(ks[0], (VOCAB_SIZE + 2, D), dtype=jnp.float32)
    emb = emb.at[0].set(0.0)                               # padding_idx = 0

    wq = nrm(ks[1], (L, D, D))
    wk = nrm(ks[2], (L, D, D))
    wv = nrm(ks[3], (L, D, D))
    wo = nrm(ks[4], (L, D, D))
    w1 = nrm(ks[5], (L, D, F))
    w2 = nrm(ks[6], (L, F, D))
    bq = jnp.zeros((L, D), jnp.float32)
    bk = jnp.zeros((L, D), jnp.float32)
    bv = jnp.zeros((L, D), jnp.float32)
    bo = jnp.zeros((L, D), jnp.float32)
    b1 = jnp.zeros((L, F), jnp.float32)
    b2 = jnp.zeros((L, D), jnp.float32)
    g1 = jnp.ones((L, D), jnp.float32)
    be1 = jnp.zeros((L, D), jnp.float32)
    g2 = jnp.ones((L, D), jnp.float32)
    be2 = jnp.zeros((L, D), jnp.float32)

    scale = 1.0 / math.sqrt(dk)          # folded into Q weights / bias

    # Fused QKV weight: columns [q (head-packed h*dk+d) | k | v].
    wqkv = jnp.concatenate([wq * scale, wk, wv], axis=-1)           # (L, D, 3D)

    # Packed per-layer small vectors (one DMA per step, no (1,N) tile padding).
    bvec = jnp.zeros((L, 8, F), jnp.float32)
    bvec = bvec.at[:, 0, :].set(b1)
    bvec = bvec.at[:, 1, 0:3 * D].set(jnp.concatenate([bq * scale, bk, bv], axis=-1))
    bvec = bvec.at[:, 2, 0:D].set(bo)
    bvec = bvec.at[:, 3, 0:D].set(g1)
    bvec = bvec.at[:, 4, 0:D].set(be1)
    bvec = bvec.at[:, 5, 0:D].set(b2)
    bvec = bvec.at[:, 6, 0:D].set(g2)
    bvec = bvec.at[:, 7, 0:D].set(be2)

    # Constant attention-structure matrices (loaded once by the kernel).
    q_idx = jnp.arange(BS)[:, None]
    col = jnp.arange(H * BS)[None, :]
    n_of_col = col % BS
    attn_bias = jnp.where((q_idx // S) == (n_of_col // S), 0.0, -1e30).astype(jnp.float32)
    d_idx = jnp.arange(D)[:, None]
    h_of_col = (jnp.arange(H * BS)[None, :]) // BS
    mk = (d_idx // dk == h_of_col).astype(jnp.float32)              # (D, H*BS)
    mv = mk.T                                                        # (H*BS, D)
    jr = jnp.arange(H * BS)
    bsum = (jr[:, None] // BS == jr[None, :] // BS).astype(jnp.float32)  # (H*BS, H*BS)

    # Classifier: cw1 rows ordered s*D + d (standard flatten); vocab padded to 128.
    cw1 = nrm(ks[7], (S * D, CLS_HIDDEN))
    cw2 = jnp.zeros((CLS_HIDDEN, VOCAB_PAD), jnp.float32)
    cw2 = cw2.at[:, :VOCAB_SIZE].set(nrm(ks[8], (CLS_HIDDEN, VOCAB_SIZE)))
    clsb = jnp.zeros((8, CLS_HIDDEN), jnp.float32)        # row0 = cb1, row1[:128] = cb2

    return {
        'emb': emb,
        'wqkv': wqkv.astype(jnp.bfloat16),
        'wo': wo.astype(jnp.bfloat16),
        'w1': w1.astype(jnp.bfloat16),
        'w2': w2.astype(jnp.bfloat16),
        'bvec': bvec,
        'attn_bias': attn_bias,
        'mk': mk,
        'mv': mv,
        'bsum': bsum,
        'clsb': clsb,
        'cw1': cw1.astype(jnp.bfloat16),
        'cw2': cw2.astype(jnp.bfloat16),
    }


@jax.jit
def forward(tokens, params):
    x = embed_lookup(tokens, params['emb'])                    # (B, S, D)
    x = x + positional_encoding(MAX_LEN, EMBED_DIM)[None]      # dropout = identity (eval)
    x_flat = x.reshape(tokens.shape[0] * MAX_LEN, EMBED_DIM).astype(jnp.float32)
    return run_model(x_flat, params)                           # (B, vocab) logits


if __name__ == "__main__":
    key = jax.random.PRNGKey(0)
    k_tok, k_par = jax.random.split(key)
    tokens = jax.random.randint(k_tok, (BATCH, MAX_LEN), 1, VOCAB_SIZE + 2,
                                dtype=jnp.int32)
    params = init_params(k_par)
    logits = forward(tokens, params)
    jax.block_until_ready(logits)
    assert logits.shape == (BATCH, VOCAB_SIZE)
    assert bool(jnp.all(jnp.isfinite(logits)))
    print("KERNEL_OK")
</pallas_src>

<mosaic_0001>
module attributes {stable_mosaic.version = 11 : i64} {
  func.func @transformer_kernel(%arg0: i32, %arg1: memref<32x64xf32, #tpu.memory_space<vmem>>, %arg2: memref<4x64x192xbf16, #tpu.memory_space<vmem>>, %arg3: memref<4x64x64xbf16, #tpu.memory_space<vmem>>, %arg4: memref<4x64x512xbf16, #tpu.memory_space<vmem>>, %arg5: memref<4x512x64xbf16, #tpu.memory_space<vmem>>, %arg6: memref<4x8x512xf32, #tpu.memory_space<vmem>>, %arg7: memref<32x128xf32, #tpu.memory_space<vmem>>, %arg8: memref<64x128xf32, #tpu.memory_space<vmem>>, %arg9: memref<128x64xf32, #tpu.memory_space<vmem>>, %arg10: memref<128x128xf32, #tpu.memory_space<vmem>>, %arg11: memref<8x512xf32, #tpu.memory_space<vmem>>, %arg12: memref<1024x512xbf16, #tpu.memory_space<any>>, %arg13: memref<512x128xbf16, #tpu.memory_space<any>>, %arg14: memref<2x128xf32, #tpu.memory_space<vmem>>, %arg15: memref<32x64xf32, #tpu.memory_space<vmem>>, %arg16: memref<1024x512xbf16, #tpu.memory_space<vmem>>, %arg17: memref<512x128xbf16, #tpu.memory_space<vmem>>, %arg18: memref<2x!tpu.dma_semaphore, #tpu.memory_space<semaphore_mem>>) attributes {dimension_semantics = [#tpu.dimension_semantics<arbitrary>], iteration_bounds = array<i64: 4>, scalar_prefetch = 0 : i64, scratch_operands = 4 : i64, tpu.core_type = #tpu.core_type<tc>, window_params = [{pipeline_mode = #tpu.pipeline_mode<synchronous>, transform_indices = @transform_0, window_bounds = array<i64: 32, 64>}, {transform_indices = @transform_1, window_bounds = array<i64: 4, 64, 192>}, {transform_indices = @transform_2, window_bounds = array<i64: 4, 64, 64>}, {transform_indices = @transform_3, window_bounds = array<i64: 4, 64, 512>}, {transform_indices = @transform_4, window_bounds = array<i64: 4, 512, 64>}, {transform_indices = @transform_5, window_bounds = array<i64: 4, 8, 512>}, {pipeline_mode = #tpu.pipeline_mode<synchronous>, transform_indices = @transform_6, window_bounds = array<i64: 32, 128>}, {pipeline_mode = #tpu.pipeline_mode<synchronous>, transform_indices = @transform_7, window_bounds = array<i64: 64, 128>}, {pipeline_mode = #tpu.pipeline_mode<synchronous>, transform_indices = @transform_8, window_bounds = array<i64: 128, 64>}, {pipeline_mode = #tpu.pipeline_mode<synchronous>, transform_indices = @transform_9, window_bounds = array<i64: 128, 128>}, {pipeline_mode = #tpu.pipeline_mode<synchronous>, transform_indices = @transform_10, window_bounds = array<i64: 8, 512>}, {}, {}, {pipeline_mode = #tpu.pipeline_mode<synchronous>, transform_indices = @transform_13, window_bounds = array<i64: 2, 128>}]} {
    %c0_i32 = arith.constant 0 : i32
    %0 = arith.cmpi eq, %arg0, %c0_i32 : i32
    %1 = arith.extui %0 : i1 to i32
    %c0_i32_0 = arith.constant 0 : i32
    %2 = arith.cmpi ne, %1, %c0_i32_0 : i32
    scf.if %2 {
      %c0_154 = arith.constant 0 : index
      %c0_155 = arith.constant 0 : index
      %448 = vector.load %arg1[%c0_154, %c0_155] : memref<32x64xf32, #tpu.memory_space<vmem>>, vector<32x64xf32>
      %c0_156 = arith.constant 0 : index
      %c0_157 = arith.constant 0 : index
      %449 = vector.load %arg15[%c0_156, %c0_157] : memref<32x64xf32, #tpu.memory_space<vmem>>, vector<32x64xf32>
      tpu.vector_store %arg15[%c0_156, %c0_157], %448 {strides = array<i32>} : memref<32x64xf32, #tpu.memory_space<vmem>>, vector<32x64xf32>,
      %cst_158 = arith.constant 0.000000e+00 : f32
      %450 = vector.broadcast %cst_158 : f32 to vector<2x128xf32>
      %c0_159 = arith.constant 0 : index
      %c0_160 = arith.constant 0 : index
      %451 = vector.load %arg14[%c0_159, %c0_160] : memref<2x128xf32, #tpu.memory_space<vmem>>, vector<2x128xf32>
      tpu.vector_store %arg14[%c0_159, %c0_160], %450 {strides = array<i32>} : memref<2x128xf32, #tpu.memory_space<vmem>>, vector<2x128xf32>,
      %c0_i32_161 = arith.constant 0 : i32
      %452 = tpu.memref_slice %arg18[%c0_i32_161] : memref<2x!tpu.dma_semaphore, #tpu.memory_space<semaphore_mem>> -> memref<1x!tpu.dma_semaphore, #tpu.memory_space<semaphore_mem>>
      %453 = tpu.memref_squeeze %452 : memref<1x!tpu.dma_semaphore, #tpu.memory_space<semaphore_mem>> -> memref<!tpu.dma_semaphore, #tpu.memory_space<semaphore_mem>>
      tpu.enqueue_dma source(%arg12 : memref<1024x512xbf16, #tpu.memory_space<any>>) target(%arg16 : memref<1024x512xbf16, #tpu.memory_space<vmem>>) target_semaphore(%453 : memref<!tpu.dma_semaphore, #tpu.memory_space<semaphore_mem>>)
      %c1_i32_162 = arith.constant 1 : i32
      %454 = tpu.memref_slice %arg18[%c1_i32_162] : memref<2x!tpu.dma_semaphore, #tpu.memory_space<semaphore_mem>> -> memref<1x!tpu.dma_semaphore, #tpu.memory_space<semaphore_mem>>
      %455 = tpu.memref_squeeze %454 : memref<1x!tpu.dma_semaphore, #tpu.memory_space<semaphore_mem>> -> memref<!tpu.dma_semaphore, #tpu.memory_space<semaphore_mem>>
      tpu.enqueue_dma source(%arg13 : memref<512x128xbf16, #tpu.memory_space<any>>) target(%arg17 : memref<512x128xbf16, #tpu.memory_space<vmem>>) target_semaphore(%455 : memref<!tpu.dma_semaphore, #tpu.memory_space<semaphore_mem>>)
    } else {
    }
    %c0 = arith.constant 0 : index
    %c0_1 = arith.constant 0 : index
    %3 = vector.load %arg15[%c0, %c0_1] : memref<32x64xf32, #tpu.memory_space<vmem>>, vector<32x64xf32>
    %c0_i32_2 = arith.constant 0 : i32
    %4 = arith.index_cast %c0_i32_2 : i32 to index
    %c0_3 = arith.constant 0 : index
    %c0_4 = arith.constant 0 : index
    %5 = vector.load %arg2[%4, %c0_3, %c0_4] : memref<4x64x192xbf16, #tpu.memory_space<vmem>>, vector<1x64x192xbf16>
    %6 = vector.shape_cast %5 : vector<1x64x192xbf16> to vector<64x192xbf16>
    %7 = arith.index_cast %c0_i32_2 : i32 to index
    %c0_5 = arith.constant 0 : index
    %c0_6 = arith.constant 0 : index
    %8 = vector.load %arg3[%7, %c0_5, %c0_6] : memref<4x64x64xbf16, #tpu.memory_space<vmem>>, vector<1x64x64xbf16>
    %9 = vector.shape_cast %8 : vector<1x64x64xbf16> to vector<64x64xbf16>
    %10 = arith.index_cast %c0_i32_2 : i32 to index
    %c0_7 = arith.constant 0 : index
    %c0_8 = arith.constant 0 : index
    %11 = vector.load %arg4[%10, %c0_7, %c0_8] : memref<4x64x512xbf16, #tpu.memory_space<vmem>>, vector<1x64x512xbf16>
    %12 = vector.shape_cast %11 : vector<1x64x512xbf16> to vector<64x512xbf16>
    %13 = arith.index_cast %c0_i32_2 : i32 to index
    %c0_9 = arith.constant 0 : index
    %c0_10 = arith.constant 0 : index
    %14 = vector.load %arg5[%13, %c0_9, %c0_10] : memref<4x512x64xbf16, #tpu.memory_space<vmem>>, vector<1x512x64xbf16>
    %15 = vector.shape_cast %14 : vector<1x512x64xbf16> to vector<512x64xbf16>
    %16 = arith.index_cast %c0_i32_2 : i32 to index
    %c0_11 = arith.constant 0 : index
    %c0_12 = arith.constant 0 : index
    %17 = vector.load %arg6[%16, %c0_11, %c0_12] : memref<4x8x512xf32, #tpu.memory_space<vmem>>, vector<1x8x512xf32>
    %18 = vector.shape_cast %17 : vector<1x8x512xf32> to vector<8x512xf32>
    %19 = vector.extract_strided_slice %18 {offsets = [0, 0], sizes = [1, 512], strides = [1, 1]} : vector<8x512xf32> to vector<1x512xf32>
    %20 = vector.extract_strided_slice %18 {offsets = [1, 0], sizes = [1, 192], strides = [1, 1]} : vector<8x512xf32> to vector<1x192xf32>
    %21 = vector.extract_strided_slice %18 {offsets = [2, 0], sizes = [1, 64], strides = [1, 1]} : vector<8x512xf32> to vector<1x64xf32>
    %22 = vector.extract_strided_slice %18 {offsets = [3, 0], sizes = [1, 64], strides = [1, 1]} : vector<8x512xf32> to vector<1x64xf32>
    %23 = vector.extract_strided_slice %18 {offsets = [4, 0], sizes = [1, 64], strides = [1, 1]} : vector<8x512xf32> to vector<1x64xf32>
    %24 = vector.extract_strided_slice %18 {offsets = [5, 0], sizes = [1, 64], strides = [1, 1]} : vector<8x512xf32> to vector<1x64xf32>
    %25 = vector.extract_strided_slice %18 {offsets = [6, 0], sizes = [1, 64], strides = [1, 1]} : vector<8x512xf32> to vector<1x64xf32>
    %26 = vector.extract_strided_slice %18 {offsets = [7, 0], sizes = [1, 64], strides = [1, 1]} : vector<8x512xf32> to vector<1x64xf32>
    %27 = arith.truncf %3 : vector<32x64xf32> to vector<32x64xbf16>
    %cst = arith.constant dense<0.000000e+00> : vector<32x192xf32>
    %28 = tpu.matmul %27, %6, %cst {dimension_numbers = #tpu.dot_dimension_numbers<[1], [0], [0], [1], [0, 0, 1, 1], [], []>} : vector<32x64xbf16>, vector<64x192xbf16>, vector<32x192xf32> -> vector<32x192xf32>
    %29 = vector.broadcast %20 : vector<1x192xf32> to vector<32x192xf32>
    %30 = arith.addf %28, %29 : vector<32x192xf32>
    %31 = vector.extract_strided_slice %30 {offsets = [0, 0], sizes = [32, 64], strides = [1, 1]} : vector<32x192xf32> to vector<32x64xf32>
    %32 = vector.extract_strided_slice %30 {offsets = [0, 64], sizes = [32, 64], strides = [1, 1]} : vector<32x192xf32> to vector<32x64xf32>
    %33 = vector.extract_strided_slice %30 {offsets = [0, 128], sizes = [32, 64], strides = [1, 1]} : vector<32x192xf32> to vector<32x64xf32>
    %34 = tpu.transpose %32, [1, 0] : vector<32x64xf32> -> vector<64x32xf32>
    %35 = tpu.concatenate %34, %34, %34, %34 in 1 : vector<64x32xf32>, vector<64x32xf32>, vector<64x32xf32>, vector<64x32xf32> -> vector<64x128xf32>
    %c0_13 = arith.constant 0 : index
    %c0_14 = arith.constant 0 : index
    %36 = vector.load %arg8[%c0_13, %c0_14] : memref<64x128xf32, #tpu.memory_space<vmem>>, vector<64x128xf32>
    %37 = arith.mulf %35, %36 : vector<64x128xf32>
    %38 = arith.truncf %37 : vector<64x128xf32> to vector<64x128xbf16>
    %39 = arith.truncf %31 : vector<32x64xf32> to vector<32x64xbf16>
    %cst_15 = arith.constant dense<0.000000e+00> : vector<32x128xf32>
    %40 = tpu.matmul %39, %38, %cst_15 {dimension_numbers = #tpu.dot_dimension_numbers<[1], [0], [0], [1], [0, 0, 1, 1], [], []>} : vector<32x64xbf16>, vector<64x128xbf16>, vector<32x128xf32> -> vector<32x128xf32>
    %c0_16 = arith.constant 0 : index
    %c0_17 = arith.constant 0 : index
    %41 = vector.load %arg7[%c0_16, %c0_17] : memref<32x128xf32, #tpu.memory_space<vmem>>, vector<32x128xf32>
    %42 = arith.addf %40, %41 : vector<32x128xf32>
    %cst_18 = arith.constant dense<0xFF800000> : vector<32xf32>
    %43 = vector.multi_reduction <maximumf>, %42, %cst_18 [1] : vector<32x128xf32> to vector<32xf32>
    %44 = vector.shape_cast %43 : vector<32xf32> to vector<32x1xf32>
    %45 = vector.broadcast %44 : vector<32x1xf32> to vector<32x128xf32>
    %46 = arith.subf %42, %45 : vector<32x128xf32>
    %47 = math.exp %46 : vector<32x128xf32>
    %c0_19 = arith.constant 0 : index
    %c0_20 = arith.constant 0 : index
    %48 = vector.load %arg10[%c0_19, %c0_20] : memref<128x128xf32, #tpu.memory_space<vmem>>, vector<128x128xf32>
    %cst_21 = arith.constant dense<0.000000e+00> : vector<32x128xf32>
    %49 = tpu.matmul %47, %48, %cst_21 {dimension_numbers = #tpu.dot_dimension_numbers<[1], [0], [0], [1], [0, 0, 1, 1], [], []>} : vector<32x128xf32>, vector<128x128xf32>, vector<32x128xf32> -> vector<32x128xf32>
    %50 = tpu.reciprocal %49 {approx = true} : vector<32x128xf32> -> vector<32x128xf32>
    %51 = arith.mulf %47, %50 : vector<32x128xf32>
    %52 = arith.truncf %51 : vector<32x128xf32> to vector<32x128xbf16>
    %53 = tpu.concatenate %33, %33, %33, %33 in 0 : vector<32x64xf32>, vector<32x64xf32>, vector<32x64xf32>, vector<32x64xf32> -> vector<128x64xf32>
    %c0_22 = arith.constant 0 : index
    %c0_23 = arith.constant 0 : index
    %54 = vector.load %arg9[%c0_22, %c0_23] : memref<128x64xf32, #tpu.memory_space<vmem>>, vector<128x64xf32>
    %55 = arith.mulf %53, %54 : vector<128x64xf32>
    %56 = arith.truncf %55 : vector<128x64xf32> to vector<128x64xbf16>
    %cst_24 = arith.constant dense<0.000000e+00> : vector<32x64xf32>
    %57 = tpu.matmul %52, %56, %cst_24 {dimension_numbers = #tpu.dot_dimension_numbers<[1], [0], [0], [1], [0, 0, 1, 1], [], []>} : vector<32x128xbf16>, vector<128x64xbf16>, vector<32x64xf32> -> vector<32x64xf32>
    %58 = arith.truncf %57 : vector<32x64xf32> to vector<32x64xbf16>
    %cst_25 = arith.constant dense<0.000000e+00> : vector<32x64xf32>
    %59 = tpu.matmul %58, %9, %cst_25 {dimension_numbers = #tpu.dot_dimension_numbers<[1], [0], [0], [1], [0, 0, 1, 1], [], []>} : vector<32x64xbf16>, vector<64x64xbf16>, vector<32x64xf32> -> vector<32x64xf32>
    %60 = vector.broadcast %21 : vector<1x64xf32> to vector<32x64xf32>
    %61 = arith.addf %59, %60 : vector<32x64xf32>
    %62 = arith.addf %3, %61 : vector<32x64xf32>
    %cst_26 = arith.constant dense<0.000000e+00> : vector<32xf32>
    %63 = vector.multi_reduction <add>, %62, %cst_26 [1] : vector<32x64xf32> to vector<32xf32>
    %64 = vector.shape_cast %63 : vector<32xf32> to vector<32x1xf32>
    %cst_27 = arith.constant 6.400000e+01 : f32
    %65 = vector.broadcast %cst_27 : f32 to vector<32x1xf32>
    %66 = arith.divf %64, %65 : vector<32x1xf32>
    %67 = vector.broadcast %66 : vector<32x1xf32> to vector<32x64xf32>
    %68 = arith.subf %62, %67 : vector<32x64xf32>
    %69 = arith.mulf %68, %68 : vector<32x64xf32>
    %cst_28 = arith.constant dense<0.000000e+00> : vector<32xf32>
    %70 = vector.multi_reduction <add>, %69, %cst_28 [1] : vector<32x64xf32> to vector<32xf32>
    %71 = vector.shape_cast %70 : vector<32xf32> to vector<32x1xf32>
    %cst_29 = arith.constant 6.400000e+01 : f32
    %72 = vector.broadcast %cst_29 : f32 to vector<32x1xf32>
    %73 = arith.divf %71, %72 : vector<32x1xf32>
    %cst_30 = arith.constant 9.99999974E-6 : f32
    %74 = vector.broadcast %cst_30 : f32 to vector<32x1xf32>
    %75 = arith.addf %73, %74 : vector<32x1xf32>
    %76 = math.rsqrt %75 : vector<32x1xf32>
    %77 = vector.broadcast %76 : vector<32x1xf32> to vector<32x64xf32>
    %78 = arith.mulf %68, %77 : vector<32x64xf32>
    %79 = vector.broadcast %22 : vector<1x64xf32> to vector<32x64xf32>
    %80 = arith.mulf %78, %79 : vector<32x64xf32>
    %81 = vector.broadcast %23 : vector<1x64xf32> to vector<32x64xf32>
    %82 = arith.addf %80, %81 : vector<32x64xf32>
    %83 = arith.truncf %82 : vector<32x64xf32> to vector<32x64xbf16>
    %cst_31 = arith.constant dense<0.000000e+00> : vector<32x512xf32>
    %84 = tpu.matmul %83, %12, %cst_31 {dimension_numbers = #tpu.dot_dimension_numbers<[1], [0], [0], [1], [0, 0, 1, 1], [], []>} : vector<32x64xbf16>, vector<64x512xbf16>, vector<32x512xf32> -> vector<32x512xf32>
    %85 = vector.broadcast %19 : vector<1x512xf32> to vector<32x512xf32>
    %86 = arith.addf %84, %85 : vector<32x512xf32>
    %cst_32 = arith.constant 0.000000e+00 : f32
    %87 = vector.broadcast %cst_32 : f32 to vector<32x512xf32>
    %88 = arith.maximumf %86, %87 : vector<32x512xf32>
    %89 = arith.truncf %88 : vector<32x512xf32> to vector<32x512xbf16>
    %cst_33 = arith.constant dense<0.000000e+00> : vector<32x64xf32>
    %90 = tpu.matmul %89, %15, %cst_33 {dimension_numbers = #tpu.dot_dimension_numbers<[1], [0], [0], [1], [0, 0, 1, 1], [], []>} : vector<32x512xbf16>, vector<512x64xbf16>, vector<32x64xf32> -> vector<32x64xf32>
    %91 = vector.broadcast %24 : vector<1x64xf32> to vector<32x64xf32>
    %92 = arith.addf %90, %91 : vector<32x64xf32>
    %93 = arith.addf %82, %92 : vector<32x64xf32>
    %cst_34 = arith.constant dense<0.000000e+00> : vector<32xf32>
    %94 = vector.multi_reduction <add>, %93, %cst_34 [1] : vector<32x64xf32> to vector<32xf32>
    %95 = vector.shape_cast %94 : vector<32xf32> to vector<32x1xf32>
    %cst_35 = arith.constant 6.400000e+01 : f32
    %96 = vector.broadcast %cst_35 : f32 to vector<32x1xf32>
    %97 = arith.divf %95, %96 : vector<32x1xf32>
    %98 = vector.broadcast %97 : vector<32x1xf32> to vector<32x64xf32>
    %99 = arith.subf %93, %98 : vector<32x64xf32>
    %100 = arith.mulf %99, %99 : vector<32x64xf32>
    %cst_36 = arith.constant dense<0.000000e+00> : vector<32xf32>
    %101 = vector.multi_reduction <add>, %100, %cst_36 [1] : vector<32x64xf32> to vector<32xf32>
    %102 = vector.shape_cast %101 : vector<32xf32> to vector<32x1xf32>
    %cst_37 = arith.constant 6.400000e+01 : f32
    %103 = vector.broadcast %cst_37 : f32 to vector<32x1xf32>
    %104 = arith.divf %102, %103 : vector<32x1xf32>
    %cst_38 = arith.constant 9.99999974E-6 : f32
    %105 = vector.broadcast %cst_38 : f32 to vector<32x1xf32>
    %106 = arith.addf %104, %105 : vector<32x1xf32>
    %107 = math.rsqrt %106 : vector<32x1xf32>
    %108 = vector.broadcast %107 : vector<32x1xf32> to vector<32x64xf32>
    %109 = arith.mulf %99, %108 : vector<32x64xf32>
    %110 = vector.broadcast %25 : vector<1x64xf32> to vector<32x64xf32>
    %111 = arith.mulf %109, %110 : vector<32x64xf32>
    %112 = vector.broadcast %26 : vector<1x64xf32> to vector<32x64xf32>
    %113 = arith.addf %111, %112 : vector<32x64xf32>
    %c1_i32 = arith.constant 1 : i32
    %114 = arith.index_cast %c1_i32 : i32 to index
    %c0_39 = arith.constant 0 : index
    %c0_40 = arith.constant 0 : index
    %115 = vector.load %arg2[%114, %c0_39, %c0_40] : memref<4x64x192xbf16, #tpu.memory_space<vmem>>, vector<1x64x192xbf16>
    %116 = vector.shape_cast %115 : vector<1x64x192xbf16> to vector<64x192xbf16>
    %117 = arith.index_cast %c1_i32 : i32 to index
    %c0_41 = arith.constant 0 : index
    %c0_42 = arith.constant 0 : index
    %118 = vector.load %arg3[%117, %c0_41, %c0_42] : memref<4x64x64xbf16, #tpu.memory_space<vmem>>, vector<1x64x64xbf16>
    %119 = vector.shape_cast %118 : vector<1x64x64xbf16> to vector<64x64xbf16>
    %120 = arith.index_cast %c1_i32 : i32 to index
    %c0_43 = arith.constant 0 : index
    %c0_44 = arith.constant 0 : index
    %121 = vector.load %arg4[%120, %c0_43, %c0_44] : memref<4x64x512xbf16, #tpu.memory_space<vmem>>, vector<1x64x512xbf16>
    %122 = vector.shape_cast %121 : vector<1x64x512xbf16> to vector<64x512xbf16>
    %123 = arith.index_cast %c1_i32 : i32 to index
    %c0_45 = arith.constant 0 : index
    %c0_46 = arith.constant 0 : index
    %124 = vector.load %arg5[%123, %c0_45, %c0_46] : memref<4x512x64xbf16, #tpu.memory_space<vmem>>, vector<1x512x64xbf16>
    %125 = vector.shape_cast %124 : vector<1x512x64xbf16> to vector<512x64xbf16>
    %126 = arith.index_cast %c1_i32 : i32 to index
    %c0_47 = arith.constant 0 : index
    %c0_48 = arith.constant 0 : index
    %127 = vector.load %arg6[%126, %c0_47, %c0_48] : memref<4x8x512xf32, #tpu.memory_space<vmem>>, vector<1x8x512xf32>
    %128 = vector.shape_cast %127 : vector<1x8x512xf32> to vector<8x512xf32>
    %129 = vector.extract_strided_slice %128 {offsets = [0, 0], sizes = [1, 512], strides = [1, 1]} : vector<8x512xf32> to vector<1x512xf32>
    %130 = vector.extract_strided_slice %128 {offsets = [1, 0], sizes = [1, 192], strides = [1, 1]} : vector<8x512xf32> to vector<1x192xf32>
    %131 = vector.extract_strided_slice %128 {offsets = [2, 0], sizes = [1, 64], strides = [1, 1]} : vector<8x512xf32> to vector<1x64xf32>
    %132 = vector.extract_strided_slice %128 {offsets = [3, 0], sizes = [1, 64], strides = [1, 1]} : vector<8x512xf32> to vector<1x64xf32>
    %133 = vector.extract_strided_slice %128 {offsets = [4, 0], sizes = [1, 64], strides = [1, 1]} : vector<8x512xf32> to vector<1x64xf32>
    %134 = vector.extract_strided_slice %128 {offsets = [5, 0], sizes = [1, 64], strides = [1, 1]} : vector<8x512xf32> to vector<1x64xf32>
    %135 = vector.extract_strided_slice %128 {offsets = [6, 0], sizes = [1, 64], strides = [1, 1]} : vector<8x512xf32> to vector<1x64xf32>
    %136 = vector.extract_strided_slice %128 {offsets = [7, 0], sizes = [1, 64], strides = [1, 1]} : vector<8x512xf32> to vector<1x64xf32>
    %137 = arith.truncf %113 : vector<32x64xf32> to vector<32x64xbf16>
    %cst_49 = arith.constant dense<0.000000e+00> : vector<32x192xf32>
    %138 = tpu.matmul %137, %116, %cst_49 {dimension_numbers = #tpu.dot_dimension_numbers<[1], [0], [0], [1], [0, 0, 1, 1], [], []>} : vector<32x64xbf16>, vector<64x192xbf16>, vector<32x192xf32> -> vector<32x192xf32>
    %139 = vector.broadcast %130 : vector<1x192xf32> to vector<32x192xf32>
    %140 = arith.addf %138, %139 : vector<32x192xf32>
    %141 = vector.extract_strided_slice %140 {offsets = [0, 0], sizes = [32, 64], strides = [1, 1]} : vector<32x192xf32> to vector<32x64xf32>
    %142 = vector.extract_strided_slice %140 {offsets = [0, 64], sizes = [32, 64], strides = [1, 1]} : vector<32x192xf32> to vector<32x64xf32>
    %143 = vector.extract_strided_slice %140 {offsets = [0, 128], sizes = [32, 64], strides = [1, 1]} : vector<32x192xf32> to vector<32x64xf32>
    %144 = tpu.transpose %142, [1, 0] : vector<32x64xf32> -> vector<64x32xf32>
    %145 = tpu.concatenate %144, %144, %144, %144 in 1 : vector<64x32xf32>, vector<64x32xf32>, vector<64x32xf32>, vector<64x32xf32> -> vector<64x128xf32>
    %c0_50 = arith.constant 0 : index
    %c0_51 = arith.constant 0 : index
    %146 = vector.load %arg8[%c0_50, %c0_51] : memref<64x128xf32, #tpu.memory_space<vmem>>, vector<64x128xf32>
    %147 = arith.mulf %145, %146 : vector<64x128xf32>
    %148 = arith.truncf %147 : vector<64x128xf32> to vector<64x128xbf16>
    %149 = arith.truncf %141 : vector<32x64xf32> to vector<32x64xbf16>
    %cst_52 = arith.constant dense<0.000000e+00> : vector<32x128xf32>
    %150 = tpu.matmul %149, %148, %cst_52 {dimension_numbers = #tpu.dot_dimension_numbers<[1], [0], [0], [1], [0, 0, 1, 1], [], []>} : vector<32x64xbf16>, vector<64x128xbf16>, vector<32x128xf32> -> vector<32x128xf32>
    %c0_53 = arith.constant 0 : index
    %c0_54 = arith.constant 0 : index
    %151 = vector.load %arg7[%c0_53, %c0_54] : memref<32x128xf32, #tpu.memory_space<vmem>>, vector<32x128xf32>
    %152 = arith.addf %150, %151 : vector<32x128xf32>
    %cst_55 = arith.constant dense<0xFF800000> : vector<32xf32>
    %153 = vector.multi_reduction <maximumf>, %152, %cst_55 [1] : vector<32x128xf32> to vector<32xf32>
    %154 = vector.shape_cast %153 : vector<32xf32> to vector<32x1xf32>
    %155 = vector.broadcast %154 : vector<32x1xf32> to vector<32x128xf32>
    %156 = arith.subf %152, %155 : vector<32x128xf32>
    %157 = math.exp %156 : vector<32x128xf32>
    %c0_56 = arith.constant 0 : index
    %c0_57 = arith.constant 0 : index
    %158 = vector.load %arg10[%c0_56, %c0_57] : memref<128x128xf32, #tpu.memory_space<vmem>>, vector<128x128xf32>
    %cst_58 = arith.constant dense<0.000000e+00> : vector<32x128xf32>
    %159 = tpu.matmul %157, %158, %cst_58 {dimension_numbers = #tpu.dot_dimension_numbers<[1], [0], [0], [1], [0, 0, 1, 1], [], []>} : vector<32x128xf32>, vector<128x128xf32>, vector<32x128xf32> -> vector<32x128xf32>
    %160 = tpu.reciprocal %159 {approx = true} : vector<32x128xf32> -> vector<32x128xf32>
    %161 = arith.mulf %157, %160 : vector<32x128xf32>
    %162 = arith.truncf %161 : vector<32x128xf32> to vector<32x128xbf16>
    %163 = tpu.concatenate %143, %143, %143, %143 in 0 : vector<32x64xf32>, vector<32x64xf32>, vector<32x64xf32>, vector<32x64xf32> -> vector<128x64xf32>
    %c0_59 = arith.constant 0 : index
    %c0_60 = arith.constant 0 : index
    %164 = vector.load %arg9[%c0_59, %c0_60] : memref<128x64xf32, #tpu.memory_space<vmem>>, vector<128x64xf32>
    %165 = arith.mulf %163, %164 : vector<128x64xf32>
    %166 = arith.truncf %165 : vector<128x64xf32> to vector<128x64xbf16>
    %cst_61 = arith.constant dense<0.000000e+00> : vector<32x64xf32>
    %167 = tpu.matmul %162, %166, %cst_61 {dimension_numbers = #tpu.dot_dimension_numbers<[1], [0], [0], [1], [0, 0, 1, 1], [], []>} : vector<32x128xbf16>, vector<128x64xbf16>, vector<32x64xf32> -> vector<32x64xf32>
    %168 = arith.truncf %167 : vector<32x64xf32> to vector<32x64xbf16>
    %cst_62 = arith.constant dense<0.000000e+00> : vector<32x64xf32>
    %169 = tpu.matmul %168, %119, %cst_62 {dimension_numbers = #tpu.dot_dimension_numbers<[1], [0], [0], [1], [0, 0, 1, 1], [], []>} : vector<32x64xbf16>, vector<64x64xbf16>, vector<32x64xf32> -> vector<32x64xf32>
    %170 = vector.broadcast %131 : vector<1x64xf32> to vector<32x64xf32>
    %171 = arith.addf %169, %170 : vector<32x64xf32>
    %172 = arith.addf %113, %171 : vector<32x64xf32>
    %cst_63 = arith.constant dense<0.000000e+00> : vector<32xf32>
    %173 = vector.multi_reduction <add>, %172, %cst_63 [1] : vector<32x64xf32> to vector<32xf32>
    %174 = vector.shape_cast %173 : vector<32xf32> to vector<32x1xf32>
    %cst_64 = arith.constant 6.400000e+01 : f32
    %175 = vector.broadcast %cst_64 : f32 to vector<32x1xf32>
    %176 = arith.divf %174, %175 : vector<32x1xf32>
    %177 = vector.broadcast %176 : vector<32x1xf32> to vector<32x64xf32>
    %178 = arith.subf %172, %177 : vector<32x64xf32>
    %179 = arith.mulf %178, %178 : vector<32x64xf32>
    %cst_65 = arith.constant dense<0.000000e+00> : vector<32xf32>
    %180 = vector.multi_reduction <add>, %179, %cst_65 [1] : vector<32x64xf32> to vector<32xf32>
    %181 = vector.shape_cast %180 : vector<32xf32> to vector<32x1xf32>
    %cst_66 = arith.constant 6.400000e+01 : f32
    %182 = vector.broadcast %cst_66 : f32 to vector<32x1xf32>
    %183 = arith.divf %181, %182 : vector<32x1xf32>
    %cst_67 = arith.constant 9.99999974E-6 : f32
    %184 = vector.broadcast %cst_67 : f32 to vector<32x1xf32>
    %185 = arith.addf %183, %184 : vector<32x1xf32>
    %186 = math.rsqrt %185 : vector<32x1xf32>
    %187 = vector.broadcast %186 : vector<32x1xf32> to vector<32x64xf32>
    %188 = arith.mulf %178, %187 : vector<32x64xf32>
    %189 = vector.broadcast %132 : vector<1x64xf32> to vector<32x64xf32>
    %190 = arith.mulf %188, %189 : vector<32x64xf32>
    %191 = vector.broadcast %133 : vector<1x64xf32> to vector<32x64xf32>
    %192 = arith.addf %190, %191 : vector<32x64xf32>
    %193 = arith.truncf %192 : vector<32x64xf32> to vector<32x64xbf16>
    %cst_68 = arith.constant dense<0.000000e+00> : vector<32x512xf32>
    %194 = tpu.matmul %193, %122, %cst_68 {dimension_numbers = #tpu.dot_dimension_numbers<[1], [0], [0], [1], [0, 0, 1, 1], [], []>} : vector<32x64xbf16>, vector<64x512xbf16>, vector<32x512xf32> -> vector<32x512xf32>
    %195 = vector.broadcast %129 : vector<1x512xf32> to vector<32x512xf32>
    %196 = arith.addf %194, %195 : vector<32x512xf32>
    %cst_69 = arith.constant 0.000000e+00 : f32
    %197 = vector.broadcast %cst_69 : f32 to vector<32x512xf32>
    %198 = arith.maximumf %196, %197 : vector<32x512xf32>
    %199 = arith.truncf %198 : vector<32x512xf32> to vector<32x512xbf16>
    %cst_70 = arith.constant dense<0.000000e+00> : vector<32x64xf32>
    %200 = tpu.matmul %199, %125, %cst_70 {dimension_numbers = #tpu.dot_dimension_numbers<[1], [0], [0], [1], [0, 0, 1, 1], [], []>} : vector<32x512xbf16>, vector<512x64xbf16>, vector<32x64xf32> -> vector<32x64xf32>
    %201 = vector.broadcast %134 : vector<1x64xf32> to vector<32x64xf32>
    %202 = arith.addf %200, %201 : vector<32x64xf32>
    %203 = arith.addf %192, %202 : vector<32x64xf32>
    %cst_71 = arith.constant dense<0.000000e+00> : vector<32xf32>
    %204 = vector.multi_reduction <add>, %203, %cst_71 [1] : vector<32x64xf32> to vector<32xf32>
    %205 = vector.shape_cast %204 : vector<32xf32> to vector<32x1xf32>
    %cst_72 = arith.constant 6.400000e+01 : f32
    %206 = vector.broadcast %cst_72 : f32 to vector<32x1xf32>
    %207 = arith.divf %205, %206 : vector<32x1xf32>
    %208 = vector.broadcast %207 : vector<32x1xf32> to vector<32x64xf32>
    %209 = arith.subf %203, %208 : vector<32x64xf32>
    %210 = arith.mulf %209, %209 : vector<32x64xf32>
    %cst_73 = arith.constant dense<0.000000e+00> : vector<32xf32>
    %211 = vector.multi_reduction <add>, %210, %cst_73 [1] : vector<32x64xf32> to vector<32xf32>
    %212 = vector.shape_cast %211 : vector<32xf32> to vector<32x1xf32>
    %cst_74 = arith.constant 6.400000e+01 : f32
    %213 = vector.broadcast %cst_74 : f32 to vector<32x1xf32>
    %214 = arith.divf %212, %213 : vector<32x1xf32>
    %cst_75 = arith.constant 9.99999974E-6 : f32
    %215 = vector.broadcast %cst_75 : f32 to vector<32x1xf32>
    %216 = arith.addf %214, %215 : vector<32x1xf32>
    %217 = math.rsqrt %216 : vector<32x1xf32>
    %218 = vector.broadcast %217 : vector<32x1xf32> to vector<32x64xf32>
    %219 = arith.mulf %209, %218 : vector<32x64xf32>
    %220 = vector.broadcast %135 : vector<1x64xf32> to vector<32x64xf32>
    %221 = arith.mulf %219, %220 : vector<32x64xf32>
    %222 = vector.broadcast %136 : vector<1x64xf32> to vector<32x64xf32>
    %223 = arith.addf %221, %222 : vector<32x64xf32>
    %c2_i32 = arith.constant 2 : i32
    %224 = arith.index_cast %c2_i32 : i32 to index
    %c0_76 = arith.constant 0 : index
    %c0_77 = arith.constant 0 : index
    %225 = vector.load %arg2[%224, %c0_76, %c0_77] : memref<4x64x192xbf16, #tpu.memory_space<vmem>>, vector<1x64x192xbf16>
    %226 = vector.shape_cast %225 : vector<1x64x192xbf16> to vector<64x192xbf16>
    %227 = arith.index_cast %c2_i32 : i32 to index
    %c0_78 = arith.constant 0 : index
    %c0_79 = arith.constant 0 : index
    %228 = vector.load %arg3[%227, %c0_78, %c0_79] : memref<4x64x64xbf16, #tpu.memory_space<vmem>>, vector<1x64x64xbf16>
    %229 = vector.shape_cast %228 : vector<1x64x64xbf16> to vector<64x64xbf16>
    %230 = arith.index_cast %c2_i32 : i32 to index
    %c0_80 = arith.constant 0 : index
    %c0_81 = arith.constant 0 : index
    %231 = vector.load %arg4[%230, %c0_80, %c0_81] : memref<4x64x512xbf16, #tpu.memory_space<vmem>>, vector<1x64x512xbf16>
    %232 = vector.shape_cast %231 : vector<1x64x512xbf16> to vector<64x512xbf16>
    %233 = arith.index_cast %c2_i32 : i32 to index
    %c0_82 = arith.constant 0 : index
    %c0_83 = arith.constant 0 : index
    %234 = vector.load %arg5[%233, %c0_82, %c0_83] : memref<4x512x64xbf16, #tpu.memory_space<vmem>>, vector<1x512x64xbf16>
    %235 = vector.shape_cast %234 : vector<1x512x64xbf16> to vector<512x64xbf16>
    %236 = arith.index_cast %c2_i32 : i32 to index
    %c0_84 = arith.constant 0 : index
    %c0_85 = arith.constant 0 : index
    %237 = vector.load %arg6[%236, %c0_84, %c0_85] : memref<4x8x512xf32, #tpu.memory_space<vmem>>, vector<1x8x512xf32>
    %238 = vector.shape_cast %237 : vector<1x8x512xf32> to vector<8x512xf32>
    %239 = vector.extract_strided_slice %238 {offsets = [0, 0], sizes = [1, 512], strides = [1, 1]} : vector<8x512xf32> to vector<1x512xf32>
    %240 = vector.extract_strided_slice %238 {offsets = [1, 0], sizes = [1, 192], strides = [1, 1]} : vector<8x512xf32> to vector<1x192xf32>
    %241 = vector.extract_strided_slice %238 {offsets = [2, 0], sizes = [1, 64], strides = [1, 1]} : vector<8x512xf32> to vector<1x64xf32>
    %242 = vector.extract_strided_slice %238 {offsets = [3, 0], sizes = [1, 64], strides = [1, 1]} : vector<8x512xf32> to vector<1x64xf32>
    %243 = vector.extract_strided_slice %238 {offsets = [4, 0], sizes = [1, 64], strides = [1, 1]} : vector<8x512xf32> to vector<1x64xf32>
    %244 = vector.extract_strided_slice %238 {offsets = [5, 0], sizes = [1, 64], strides = [1, 1]} : vector<8x512xf32> to vector<1x64xf32>
    %245 = vector.extract_strided_slice %238 {offsets = [6, 0], sizes = [1, 64], strides = [1, 1]} : vector<8x512xf32> to vector<1x64xf32>
    %246 = vector.extract_strided_slice %238 {offsets = [7, 0], sizes = [1, 64], strides = [1, 1]} : vector<8x512xf32> to vector<1x64xf32>
    %247 = arith.truncf %223 : vector<32x64xf32> to vector<32x64xbf16>
    %cst_86 = arith.constant dense<0.000000e+00> : vector<32x192xf32>
    %248 = tpu.matmul %247, %226, %cst_86 {dimension_numbers = #tpu.dot_dimension_numbers<[1], [0], [0], [1], [0, 0, 1, 1], [], []>} : vector<32x64xbf16>, vector<64x192xbf16>, vector<32x192xf32> -> vector<32x192xf32>
    %249 = vector.broadcast %240 : vector<1x192xf32> to vector<32x192xf32>
    %250 = arith.addf %248, %249 : vector<32x192xf32>
    %251 = vector.extract_strided_slice %250 {offsets = [0, 0], sizes = [32, 64], strides = [1, 1]} : vector<32x192xf32> to vector<32x64xf32>
    %252 = vector.extract_strided_slice %250 {offsets = [0, 64], sizes = [32, 64], strides = [1, 1]} : vector<32x192xf32> to vector<32x64xf32>
    %253 = vector.extract_strided_slice %250 {offsets = [0, 128], sizes = [32, 64], strides = [1, 1]} : vector<32x192xf32> to vector<32x64xf32>
    %254 = tpu.transpose %252, [1, 0] : vector<32x64xf32> -> vector<64x32xf32>
    %255 = tpu.concatenate %254, %254, %254, %254 in 1 : vector<64x32xf32>, vector<64x32xf32>, vector<64x32xf32>, vector<64x32xf32> -> vector<64x128xf32>
    %c0_87 = arith.constant 0 : index
    %c0_88 = arith.constant 0 : index
    %256 = vector.load %arg8[%c0_87, %c0_88] : memref<64x128xf32, #tpu.memory_space<vmem>>, vector<64x128xf32>
    %257 = arith.mulf %255, %256 : vector<64x128xf32>
    %258 = arith.truncf %257 : vector<64x128xf32> to vector<64x128xbf16>
    %259 = arith.truncf %251 : vector<32x64xf32> to vector<32x64xbf16>
    %cst_89 = arith.constant dense<0.000000e+00> : vector<32x128xf32>
    %260 = tpu.matmul %259, %258, %cst_89 {dimension_numbers = #tpu.dot_dimension_numbers<[1], [0], [0], [1], [0, 0, 1, 1], [], []>} : vector<32x64xbf16>, vector<64x128xbf16>, vector<32x128xf32> -> vector<32x128xf32>
    %c0_90 = arith.constant 0 : index
    %c0_91 = arith.constant 0 : index
    %261 = vector.load %arg7[%c0_90, %c0_91] : memref<32x128xf32, #tpu.memory_space<vmem>>, vector<32x128xf32>
    %262 = arith.addf %260, %261 : vector<32x128xf32>
    %cst_92 = arith.constant dense<0xFF800000> : vector<32xf32>
    %263 = vector.multi_reduction <maximumf>, %262, %cst_92 [1] : vector<32x128xf32> to vector<32xf32>
    %264 = vector.shape_cast %263 : vector<32xf32> to vector<32x1xf32>
    %265 = vector.broadcast %264 : vector<32x1xf32> to vector<32x128xf32>
    %266 = arith.subf %262, %265 : vector<32x128xf32>
    %267 = math.exp %266 : vector<32x128xf32>
    %c0_93 = arith.constant 0 : index
    %c0_94 = arith.constant 0 : index
    %268 = vector.load %arg10[%c0_93, %c0_94] : memref<128x128xf32, #tpu.memory_space<vmem>>, vector<128x128xf32>
    %cst_95 = arith.constant dense<0.000000e+00> : vector<32x128xf32>
    %269 = tpu.matmul %267, %268, %cst_95 {dimension_numbers = #tpu.dot_dimension_numbers<[1], [0], [0], [1], [0, 0, 1, 1], [], []>} : vector<32x128xf32>, vector<128x128xf32>, vector<32x128xf32> -> vector<32x128xf32>
    %270 = tpu.reciprocal %269 {approx = true} : vector<32x128xf32> -> vector<32x128xf32>
    %271 = arith.mulf %267, %270 : vector<32x128xf32>
    %272 = arith.truncf %271 : vector<32x128xf32> to vector<32x128xbf16>
    %273 = tpu.concatenate %253, %253, %253, %253 in 0 : vector<32x64xf32>, vector<32x64xf32>, vector<32x64xf32>, vector<32x64xf32> -> vector<128x64xf32>
    %c0_96 = arith.constant 0 : index
    %c0_97 = arith.constant 0 : index
    %274 = vector.load %arg9[%c0_96, %c0_97] : memref<128x64xf32, #tpu.memory_space<vmem>>, vector<128x64xf32>
    %275 = arith.mulf %273, %274 : vector<128x64xf32>
    %276 = arith.truncf %275 : vector<128x64xf32> to vector<128x64xbf16>
    %cst_98 = arith.constant dense<0.000000e+00> : vector<32x64xf32>
    %277 = tpu.matmul %272, %276, %cst_98 {dimension_numbers = #tpu.dot_dimension_numbers<[1], [0], [0], [1], [0, 0, 1, 1], [], []>} : vector<32x128xbf16>, vector<128x64xbf16>, vector<32x64xf32> -> vector<32x64xf32>
    %278 = arith.truncf %277 : vector<32x64xf32> to vector<32x64xbf16>
    %cst_99 = arith.constant dense<0.000000e+00> : vector<32x64xf32>
    %279 = tpu.matmul %278, %229, %cst_99 {dimension_numbers = #tpu.dot_dimension_numbers<[1], [0], [0], [1], [0, 0, 1, 1], [], []>} : vector<32x64xbf16>, vector<64x64xbf16>, vector<32x64xf32> -> vector<32x64xf32>
    %280 = vector.broadcast %241 : vector<1x64xf32> to vector<32x64xf32>
    %281 = arith.addf %279, %280 : vector<32x64xf32>
    %282 = arith.addf %223, %281 : vector<32x64xf32>
    %cst_100 = arith.constant dense<0.000000e+00> : vector<32xf32>
    %283 = vector.multi_reduction <add>, %282, %cst_100 [1] : vector<32x64xf32> to vector<32xf32>
    %284 = vector.shape_cast %283 : vector<32xf32> to vector<32x1xf32>
    %cst_101 = arith.constant 6.400000e+01 : f32
    %285 = vector.broadcast %cst_101 : f32 to vector<32x1xf32>
    %286 = arith.divf %284, %285 : vector<32x1xf32>
    %287 = vector.broadcast %286 : vector<32x1xf32> to vector<32x64xf32>
    %288 = arith.subf %282, %287 : vector<32x64xf32>
    %289 = arith.mulf %288, %288 : vector<32x64xf32>
    %cst_102 = arith.constant dense<0.000000e+00> : vector<32xf32>
    %290 = vector.multi_reduction <add>, %289, %cst_102 [1] : vector<32x64xf32> to vector<32xf32>
    %291 = vector.shape_cast %290 : vector<32xf32> to vector<32x1xf32>
    %cst_103 = arith.constant 6.400000e+01 : f32
    %292 = vector.broadcast %cst_103 : f32 to vector<32x1xf32>
    %293 = arith.divf %291, %292 : vector<32x1xf32>
    %cst_104 = arith.constant 9.99999974E-6 : f32
    %294 = vector.broadcast %cst_104 : f32 to vector<32x1xf32>
    %295 = arith.addf %293, %294 : vector<32x1xf32>
    %296 = math.rsqrt %295 : vector<32x1xf32>
    %297 = vector.broadcast %296 : vector<32x1xf32> to vector<32x64xf32>
    %298 = arith.mulf %288, %297 : vector<32x64xf32>
    %299 = vector.broadcast %242 : vector<1x64xf32> to vector<32x64xf32>
    %300 = arith.mulf %298, %299 : vector<32x64xf32>
    %301 = vector.broadcast %243 : vector<1x64xf32> to vector<32x64xf32>
    %302 = arith.addf %300, %301 : vector<32x64xf32>
    %303 = arith.truncf %302 : vector<32x64xf32> to vector<32x64xbf16>
    %cst_105 = arith.constant dense<0.000000e+00> : vector<32x512xf32>
    %304 = tpu.matmul %303, %232, %cst_105 {dimension_numbers = #tpu.dot_dimension_numbers<[1], [0], [0], [1], [0, 0, 1, 1], [], []>} : vector<32x64xbf16>, vector<64x512xbf16>, vector<32x512xf32> -> vector<32x512xf32>
    %305 = vector.broadcast %239 : vector<1x512xf32> to vector<32x512xf32>
    %306 = arith.addf %304, %305 : vector<32x512xf32>
    %cst_106 = arith.constant 0.000000e+00 : f32
    %307 = vector.broadcast %cst_106 : f32 to vector<32x512xf32>
    %308 = arith.maximumf %306, %307 : vector<32x512xf32>
    %309 = arith.truncf %308 : vector<32x512xf32> to vector<32x512xbf16>
    %cst_107 = arith.constant dense<0.000000e+00> : vector<32x64xf32>
    %310 = tpu.matmul %309, %235, %cst_107 {dimension_numbers = #tpu.dot_dimension_numbers<[1], [0], [0], [1], [0, 0, 1, 1], [], []>} : vector<32x512xbf16>, vector<512x64xbf16>, vector<32x64xf32> -> vector<32x64xf32>
    %311 = vector.broadcast %244 : vector<1x64xf32> to vector<32x64xf32>
    %312 = arith.addf %310, %311 : vector<32x64xf32>
    %313 = arith.addf %302, %312 : vector<32x64xf32>
    %cst_108 = arith.constant dense<0.000000e+00> : vector<32xf32>
    %314 = vector.multi_reduction <add>, %313, %cst_108 [1] : vector<32x64xf32> to vector<32xf32>
    %315 = vector.shape_cast %314 : vector<32xf32> to vector<32x1xf32>
    %cst_109 = arith.constant 6.400000e+01 : f32
    %316 = vector.broadcast %cst_109 : f32 to vector<32x1xf32>
    %317 = arith.divf %315, %316 : vector<32x1xf32>
    %318 = vector.broadcast %317 : vector<32x1xf32> to vector<32x64xf32>
    %319 = arith.subf %313, %318 : vector<32x64xf32>
    %320 = arith.mulf %319, %319 : vector<32x64xf32>
    %cst_110 = arith.constant dense<0.000000e+00> : vector<32xf32>
    %321 = vector.multi_reduction <add>, %320, %cst_110 [1] : vector<32x64xf32> to vector<32xf32>
    %322 = vector.shape_cast %321 : vector<32xf32> to vector<32x1xf32>
    %cst_111 = arith.constant 6.400000e+01 : f32
    %323 = vector.broadcast %cst_111 : f32 to vector<32x1xf32>
    %324 = arith.divf %322, %323 : vector<32x1xf32>
    %cst_112 = arith.constant 9.99999974E-6 : f32
    %325 = vector.broadcast %cst_112 : f32 to vector<32x1xf32>
    %326 = arith.addf %324, %325 : vector<32x1xf32>
    %327 = math.rsqrt %326 : vector<32x1xf32>
    %328 = vector.broadcast %327 : vector<32x1xf32> to vector<32x64xf32>
    %329 = arith.mulf %319, %328 : vector<32x64xf32>
    %330 = vector.broadcast %245 : vector<1x64xf32> to vector<32x64xf32>
    %331 = arith.mulf %329, %330 : vector<32x64xf32>
    %332 = vector.broadcast %246 : vector<1x64xf32> to vector<32x64xf32>
    %333 = arith.addf %331, %332 : vector<32x64xf32>
    %c3_i32 = arith.constant 3 : i32
    %334 = arith.index_cast %c3_i32 : i32 to index
    %c0_113 = arith.constant 0 : index
    %c0_114 = arith.constant 0 : index
    %335 = vector.load %arg2[%334, %c0_113, %c0_114] : memref<4x64x192xbf16, #tpu.memory_space<vmem>>, vector<1x64x192xbf16>
    %336 = vector.shape_cast %335 : vector<1x64x192xbf16> to vector<64x192xbf16>
    %337 = arith.index_cast %c3_i32 : i32 to index
    %c0_115 = arith.constant 0 : index
    %c0_116 = arith.constant 0 : index
    %338 = vector.load %arg3[%337, %c0_115, %c0_116] : memref<4x64x64xbf16, #tpu.memory_space<vmem>>, vector<1x64x64xbf16>
    %339 = vector.shape_cast %338 : vector<1x64x64xbf16> to vector<64x64xbf16>
    %340 = arith.index_cast %c3_i32 : i32 to index
    %c0_117 = arith.constant 0 : index
    %c0_118 = arith.constant 0 : index
    %341 = vector.load %arg4[%340, %c0_117, %c0_118] : memref<4x64x512xbf16, #tpu.memory_space<vmem>>, vector<1x64x512xbf16>
    %342 = vector.shape_cast %341 : vector<1x64x512xbf16> to vector<64x512xbf16>
    %343 = arith.index_cast %c3_i32 : i32 to index
    %c0_119 = arith.constant 0 : index
    %c0_120 = arith.constant 0 : index
    %344 = vector.load %arg5[%343, %c0_119, %c0_120] : memref<4x512x64xbf16, #tpu.memory_space<vmem>>, vector<1x512x64xbf16>
    %345 = vector.shape_cast %344 : vector<1x512x64xbf16> to vector<512x64xbf16>
    %346 = arith.index_cast %c3_i32 : i32 to index
    %c0_121 = arith.constant 0 : index
    %c0_122 = arith.constant 0 : index
    %347 = vector.load %arg6[%346, %c0_121, %c0_122] : memref<4x8x512xf32, #tpu.memory_space<vmem>>, vector<1x8x512xf32>
    %348 = vector.shape_cast %347 : vector<1x8x512xf32> to vector<8x512xf32>
    %349 = vector.extract_strided_slice %348 {offsets = [0, 0], sizes = [1, 512], strides = [1, 1]} : vector<8x512xf32> to vector<1x512xf32>
    %350 = vector.extract_strided_slice %348 {offsets = [1, 0], sizes = [1, 192], strides = [1, 1]} : vector<8x512xf32> to vector<1x192xf32>
    %351 = vector.extract_strided_slice %348 {offsets = [2, 0], sizes = [1, 64], strides = [1, 1]} : vector<8x512xf32> to vector<1x64xf32>
    %352 = vector.extract_strided_slice %348 {offsets = [3, 0], sizes = [1, 64], strides = [1, 1]} : vector<8x512xf32> to vector<1x64xf32>
    %353 = vector.extract_strided_slice %348 {offsets = [4, 0], sizes = [1, 64], strides = [1, 1]} : vector<8x512xf32> to vector<1x64xf32>
    %354 = vector.extract_strided_slice %348 {offsets = [5, 0], sizes = [1, 64], strides = [1, 1]} : vector<8x512xf32> to vector<1x64xf32>
    %355 = vector.extract_strided_slice %348 {offsets = [6, 0], sizes = [1, 64], strides = [1, 1]} : vector<8x512xf32> to vector<1x64xf32>
    %356 = vector.extract_strided_slice %348 {offsets = [7, 0], sizes = [1, 64], strides = [1, 1]} : vector<8x512xf32> to vector<1x64xf32>
    %357 = arith.truncf %333 : vector<32x64xf32> to vector<32x64xbf16>
    %cst_123 = arith.constant dense<0.000000e+00> : vector<32x192xf32>
    %358 = tpu.matmul %357, %336, %cst_123 {dimension_numbers = #tpu.dot_dimension_numbers<[1], [0], [0], [1], [0, 0, 1, 1], [], []>} : vector<32x64xbf16>, vector<64x192xbf16>, vector<32x192xf32> -> vector<32x192xf32>
    %359 = vector.broadcast %350 : vector<1x192xf32> to vector<32x192xf32>
    %360 = arith.addf %358, %359 : vector<32x192xf32>
    %361 = vector.extract_strided_slice %360 {offsets = [0, 0], sizes = [32, 64], strides = [1, 1]} : vector<32x192xf32> to vector<32x64xf32>
    %362 = vector.extract_strided_slice %360 {offsets = [0, 64], sizes = [32, 64], strides = [1, 1]} : vector<32x192xf32> to vector<32x64xf32>
    %363 = vector.extract_strided_slice %360 {offsets = [0, 128], sizes = [32, 64], strides = [1, 1]} : vector<32x192xf32> to vector<32x64xf32>
    %364 = tpu.transpose %362, [1, 0] : vector<32x64xf32> -> vector<64x32xf32>
    %365 = tpu.concatenate %364, %364, %364, %364 in 1 : vector<64x32xf32>, vector<64x32xf32>, vector<64x32xf32>, vector<64x32xf32> -> vector<64x128xf32>
    %c0_124 = arith.constant 0 : index
    %c0_125 = arith.constant 0 : index
    %366 = vector.load %arg8[%c0_124, %c0_125] : memref<64x128xf32, #tpu.memory_space<vmem>>, vector<64x128xf32>
    %367 = arith.mulf %365, %366 : vector<64x128xf32>
    %368 = arith.truncf %367 : vector<64x128xf32> to vector<64x128xbf16>
    %369 = arith.truncf %361 : vector<32x64xf32> to vector<32x64xbf16>
    %cst_126 = arith.constant dense<0.000000e+00> : vector<32x128xf32>
    %370 = tpu.matmul %369, %368, %cst_126 {dimension_numbers = #tpu.dot_dimension_numbers<[1], [0], [0], [1], [0, 0, 1, 1], [], []>} : vector<32x64xbf16>, vector<64x128xbf16>, vector<32x128xf32> -> vector<32x128xf32>
    %c0_127 = arith.constant 0 : index
    %c0_128 = arith.constant 0 : index
    %371 = vector.load %arg7[%c0_127, %c0_128] : memref<32x128xf32, #tpu.memory_space<vmem>>, vector<32x128xf32>
    %372 = arith.addf %370, %371 : vector<32x128xf32>
    %cst_129 = arith.constant dense<0xFF800000> : vector<32xf32>
    %373 = vector.multi_reduction <maximumf>, %372, %cst_129 [1] : vector<32x128xf32> to vector<32xf32>
    %374 = vector.shape_cast %373 : vector<32xf32> to vector<32x1xf32>
    %375 = vector.broadcast %374 : vector<32x1xf32> to vector<32x128xf32>
    %376 = arith.subf %372, %375 : vector<32x128xf32>
    %377 = math.exp %376 : vector<32x128xf32>
    %c0_130 = arith.constant 0 : index
    %c0_131 = arith.constant 0 : index
    %378 = vector.load %arg10[%c0_130, %c0_131] : memref<128x128xf32, #tpu.memory_space<vmem>>, vector<128x128xf32>
    %cst_132 = arith.constant dense<0.000000e+00> : vector<32x128xf32>
    %379 = tpu.matmul %377, %378, %cst_132 {dimension_numbers = #tpu.dot_dimension_numbers<[1], [0], [0], [1], [0, 0, 1, 1], [], []>} : vector<32x128xf32>, vector<128x128xf32>, vector<32x128xf32> -> vector<32x128xf32>
    %380 = tpu.reciprocal %379 {approx = true} : vector<32x128xf32> -> vector<32x128xf32>
    %381 = arith.mulf %377, %380 : vector<32x128xf32>
    %382 = arith.truncf %381 : vector<32x128xf32> to vector<32x128xbf16>
    %383 = tpu.concatenate %363, %363, %363, %363 in 0 : vector<32x64xf32>, vector<32x64xf32>, vector<32x64xf32>, vector<32x64xf32> -> vector<128x64xf32>
    %c0_133 = arith.constant 0 : index
    %c0_134 = arith.constant 0 : index
    %384 = vector.load %arg9[%c0_133, %c0_134] : memref<128x64xf32, #tpu.memory_space<vmem>>, vector<128x64xf32>
    %385 = arith.mulf %383, %384 : vector<128x64xf32>
    %386 = arith.truncf %385 : vector<128x64xf32> to vector<128x64xbf16>
    %cst_135 = arith.constant dense<0.000000e+00> : vector<32x64xf32>
    %387 = tpu.matmul %382, %386, %cst_135 {dimension_numbers = #tpu.dot_dimension_numbers<[1], [0], [0], [1], [0, 0, 1, 1], [], []>} : vector<32x128xbf16>, vector<128x64xbf16>, vector<32x64xf32> -> vector<32x64xf32>
    %388 = arith.truncf %387 : vector<32x64xf32> to vector<32x64xbf16>
    %cst_136 = arith.constant dense<0.000000e+00> : vector<32x64xf32>
    %389 = tpu.matmul %388, %339, %cst_136 {dimension_numbers = #tpu.dot_dimension_numbers<[1], [0], [0], [1], [0, 0, 1, 1], [], []>} : vector<32x64xbf16>, vector<64x64xbf16>, vector<32x64xf32> -> vector<32x64xf32>
    %390 = vector.broadcast %351 : vector<1x64xf32> to vector<32x64xf32>
    %391 = arith.addf %389, %390 : vector<32x64xf32>
    %392 = arith.addf %333, %391 : vector<32x64xf32>
    %cst_137 = arith.constant dense<0.000000e+00> : vector<32xf32>
    %393 = vector.multi_reduction <add>, %392, %cst_137 [1] : vector<32x64xf32> to vector<32xf32>
    %394 = vector.shape_cast %393 : vector<32xf32> to vector<32x1xf32>
    %cst_138 = arith.constant 6.400000e+01 : f32
    %395 = vector.broadcast %cst_138 : f32 to vector<32x1xf32>
    %396 = arith.divf %394, %395 : vector<32x1xf32>
    %397 = vector.broadcast %396 : vector<32x1xf32> to vector<32x64xf32>
    %398 = arith.subf %392, %397 : vector<32x64xf32>
    %399 = arith.mulf %398, %398 : vector<32x64xf32>
    %cst_139 = arith.constant dense<0.000000e+00> : vector<32xf32>
    %400 = vector.multi_reduction <add>, %399, %cst_139 [1] : vector<32x64xf32> to vector<32xf32>
    %401 = vector.shape_cast %400 : vector<32xf32> to vector<32x1xf32>
    %cst_140 = arith.constant 6.400000e+01 : f32
    %402 = vector.broadcast %cst_140 : f32 to vector<32x1xf32>
    %403 = arith.divf %401, %402 : vector<32x1xf32>
    %cst_141 = arith.constant 9.99999974E-6 : f32
    %404 = vector.broadcast %cst_141 : f32 to vector<32x1xf32>
    %405 = arith.addf %403, %404 : vector<32x1xf32>
    %406 = math.rsqrt %405 : vector<32x1xf32>
    %407 = vector.broadcast %406 : vector<32x1xf32> to vector<32x64xf32>
    %408 = arith.mulf %398, %407 : vector<32x64xf32>
    %409 = vector.broadcast %352 : vector<1x64xf32> to vector<32x64xf32>
    %410 = arith.mulf %408, %409 : vector<32x64xf32>
    %411 = vector.broadcast %353 : vector<1x64xf32> to vector<32x64xf32>
    %412 = arith.addf %410, %411 : vector<32x64xf32>
    %413 = arith.truncf %412 : vector<32x64xf32> to vector<32x64xbf16>
    %cst_142 = arith.constant dense<0.000000e+00> : vector<32x512xf32>
    %414 = tpu.matmul %413, %342, %cst_142 {dimension_numbers = #tpu.dot_dimension_numbers<[1], [0], [0], [1], [0, 0, 1, 1], [], []>} : vector<32x64xbf16>, vector<64x512xbf16>, vector<32x512xf32> -> vector<32x512xf32>
    %415 = vector.broadcast %349 : vector<1x512xf32> to vector<32x512xf32>
    %416 = arith.addf %414, %415 : vector<32x512xf32>
    %cst_143 = arith.constant 0.000000e+00 : f32
    %417 = vector.broadcast %cst_143 : f32 to vector<32x512xf32>
    %418 = arith.maximumf %416, %417 : vector<32x512xf32>
    %419 = arith.truncf %418 : vector<32x512xf32> to vector<32x512xbf16>
    %cst_144 = arith.constant dense<0.000000e+00> : vector<32x64xf32>
    %420 = tpu.matmul %419, %345, %cst_144 {dimension_numbers = #tpu.dot_dimension_numbers<[1], [0], [0], [1], [0, 0, 1, 1], [], []>} : vector<32x512xbf16>, vector<512x64xbf16>, vector<32x64xf32> -> vector<32x64xf32>
    %421 = vector.broadcast %354 : vector<1x64xf32> to vector<32x64xf32>
    %422 = arith.addf %420, %421 : vector<32x64xf32>
    %423 = arith.addf %412, %422 : vector<32x64xf32>
    %cst_145 = arith.constant dense<0.000000e+00> : vector<32xf32>
    %424 = vector.multi_reduction <add>, %423, %cst_145 [1] : vector<32x64xf32> to vector<32xf32>
    %425 = vector.shape_cast %424 : vector<32xf32> to vector<32x1xf32>
    %cst_146 = arith.constant 6.400000e+01 : f32
    %426 = vector.broadcast %cst_146 : f32 to vector<32x1xf32>
    %427 = arith.divf %425, %426 : vector<32x1xf32>
    %428 = vector.broadcast %427 : vector<32x1xf32> to vector<32x64xf32>
    %429 = arith.subf %423, %428 : vector<32x64xf32>
    %430 = arith.mulf %429, %429 : vector<32x64xf32>
    %cst_147 = arith.constant dense<0.000000e+00> : vector<32xf32>
    %431 = vector.multi_reduction <add>, %430, %cst_147 [1] : vector<32x64xf32> to vector<32xf32>
    %432 = vector.shape_cast %431 : vector<32xf32> to vector<32x1xf32>
    %cst_148 = arith.constant 6.400000e+01 : f32
    %433 = vector.broadcast %cst_148 : f32 to vector<32x1xf32>
    %434 = arith.divf %432, %433 : vector<32x1xf32>
    %cst_149 = arith.constant 9.99999974E-6 : f32
    %435 = vector.broadcast %cst_149 : f32 to vector<32x1xf32>
    %436 = arith.addf %434, %435 : vector<32x1xf32>
    %437 = math.rsqrt %436 : vector<32x1xf32>
    %438 = vector.broadcast %437 : vector<32x1xf32> to vector<32x64xf32>
    %439 = arith.mulf %429, %438 : vector<32x64xf32>
    %440 = vector.broadcast %355 : vector<1x64xf32> to vector<32x64xf32>
    %441 = arith.mulf %439, %440 : vector<32x64xf32>
    %442 = vector.broadcast %356 : vector<1x64xf32> to vector<32x64xf32>
    %443 = arith.addf %441, %442 : vector<32x64xf32>
    %c4_i32 = arith.constant 4 : i32
    %c0_150 = arith.constant 0 : index
    %c0_151 = arith.constant 0 : index
    %444 = vector.load %arg15[%c0_150, %c0_151] : memref<32x64xf32, #tpu.memory_space<vmem>>, vector<32x64xf32>
    tpu.vector_store %arg15[%c0_150, %c0_151], %443 {strides = array<i32>} : memref<32x64xf32, #tpu.memory_space<vmem>>, vector<32x64xf32>,
    %c3_i32_152 = arith.constant 3 : i32
    %445 = arith.cmpi eq, %arg0, %c3_i32_152 : i32
    %446 = arith.extui %445 : i1 to i32
    %c0_i32_153 = arith.constant 0 : i32
    %447 = arith.cmpi ne, %446, %c0_i32_153 : i32
    scf.if %447 {
      %c0_i32_154 = arith.constant 0 : i32
      %448 = tpu.memref_slice %arg18[%c0_i32_154] : memref<2x!tpu.dma_semaphore, #tpu.memory_space<semaphore_mem>> -> memref<1x!tpu.dma_semaphore, #tpu.memory_space<semaphore_mem>>
      %449 = tpu.memref_squeeze %448 : memref<1x!tpu.dma_semaphore, #tpu.memory_space<semaphore_mem>> -> memref<!tpu.dma_semaphore, #tpu.memory_space<semaphore_mem>>
      tpu.wait_dma2 semaphore(%449 : memref<!tpu.dma_semaphore, #tpu.memory_space<semaphore_mem>>) src(%arg12 : memref<1024x512xbf16, #tpu.memory_space<any>>) dst(%arg16 : memref<1024x512xbf16, #tpu.memory_space<vmem>>)
      %c1_i32_155 = arith.constant 1 : i32
      %450 = tpu.memref_slice %arg18[%c1_i32_155] : memref<2x!tpu.dma_semaphore, #tpu.memory_space<semaphore_mem>> -> memref<1x!tpu.dma_semaphore, #tpu.memory_space<semaphore_mem>>
      %451 = tpu.memref_squeeze %450 : memref<1x!tpu.dma_semaphore, #tpu.memory_space<semaphore_mem>> -> memref<!tpu.dma_semaphore, #tpu.memory_space<semaphore_mem>>
      tpu.wait_dma2 semaphore(%451 : memref<!tpu.dma_semaphore, #tpu.memory_space<semaphore_mem>>) src(%arg13 : memref<512x128xbf16, #tpu.memory_space<any>>) dst(%arg17 : memref<512x128xbf16, #tpu.memory_space<vmem>>)
      %c0_156 = arith.constant 0 : index
      %c0_157 = arith.constant 0 : index
      %452 = tpu.strided_load %arg15[%c0_156, %c0_157] {strides = array<i32: 16, 1>} : memref<32x64xf32, #tpu.memory_space<vmem>>, vector<2x64xf32>
      %c1 = arith.constant 1 : index
      %c0_158 = arith.constant 0 : index
      %453 = tpu.strided_load %arg15[%c1, %c0_158] {strides = array<i32: 16, 1>} : memref<32x64xf32, #tpu.memory_space<vmem>>, vector<2x64xf32>
      %c2 = arith.constant 2 : index
      %c0_159 = arith.constant 0 : index
      %454 = tpu.strided_load %arg15[%c2, %c0_159] {strides = array<i32: 16, 1>} : memref<32x64xf32, #tpu.memory_space<vmem>>, vector<2x64xf32>
      %c3 = arith.constant 3 : index
      %c0_160 = arith.constant 0 : index
      %455 = tpu.strided_load %arg15[%c3, %c0_160] {strides = array<i32: 16, 1>} : memref<32x64xf32, #tpu.memory_space<vmem>>, vector<2x64xf32>
      %c4 = arith.constant 4 : index
      %c0_161 = arith.constant 0 : index
      %456 = tpu.strided_load %arg15[%c4, %c0_161] {strides = array<i32: 16, 1>} : memref<32x64xf32, #tpu.memory_space<vmem>>, vector<2x64xf32>
      %c5 = arith.constant 5 : index
      %c0_162 = arith.constant 0 : index
      %457 = tpu.strided_load %arg15[%c5, %c0_162] {strides = array<i32: 16, 1>} : memref<32x64xf32, #tpu.memory_space<vmem>>, vector<2x64xf32>
      %c6 = arith.constant 6 : index
      %c0_163 = arith.constant 0 : index
      %458 = tpu.strided_load %arg15[%c6, %c0_163] {strides = array<i32: 16, 1>} : memref<32x64xf32, #tpu.memory_space<vmem>>, vector<2x64xf32>
      %c7 = arith.constant 7 : index
      %c0_164 = arith.constant 0 : index
      %459 = tpu.strided_load %arg15[%c7, %c0_164] {strides = array<i32: 16, 1>} : memref<32x64xf32, #tpu.memory_space<vmem>>, vector<2x64xf32>
      %c8 = arith.constant 8 : index
      %c0_165 = arith.constant 0 : index
      %460 = tpu.strided_load %arg15[%c8, %c0_165] {strides = array<i32: 16, 1>} : memref<32x64xf32, #tpu.memory_space<vmem>>, vector<2x64xf32>
      %c9 = arith.constant 9 : index
      %c0_166 = arith.constant 0 : index
      %461 = tpu.strided_load %arg15[%c9, %c0_166] {strides = array<i32: 16, 1>} : memref<32x64xf32, #tpu.memory_space<vmem>>, vector<2x64xf32>
      %c10 = arith.constant 10 : index
      %c0_167 = arith.constant 0 : index
      %462 = tpu.strided_load %arg15[%c10, %c0_167] {strides = array<i32: 16, 1>} : memref<32x64xf32, #tpu.memory_space<vmem>>, vector<2x64xf32>
      %c11 = arith.constant 11 : index
      %c0_168 = arith.constant 0 : index
      %463 = tpu.strided_load %arg15[%c11, %c0_168] {strides = array<i32: 16, 1>} : memref<32x64xf32, #tpu.memory_space<vmem>>, vector<2x64xf32>
      %c12 = arith.constant 12 : index
      %c0_169 = arith.constant 0 : index
      %464 = tpu.strided_load %arg15[%c12, %c0_169] {strides = array<i32: 16, 1>} : memref<32x64xf32, #tpu.memory_space<vmem>>, vector<2x64xf32>
      %c13 = arith.constant 13 : index
      %c0_170 = arith.constant 0 : index
      %465 = tpu.strided_load %arg15[%c13, %c0_170] {strides = array<i32: 16, 1>} : memref<32x64xf32, #tpu.memory_space<vmem>>, vector<2x64xf32>
      %c14 = arith.constant 14 : index
      %c0_171 = arith.constant 0 : index
      %466 = tpu.strided_load %arg15[%c14, %c0_171] {strides = array<i32: 16, 1>} : memref<32x64xf32, #tpu.memory_space<vmem>>, vector<2x64xf32>
      %c15 = arith.constant 15 : index
      %c0_172 = arith.constant 0 : index
      %467 = tpu.strided_load %arg15[%c15, %c0_172] {strides = array<i32: 16, 1>} : memref<32x64xf32, #tpu.memory_space<vmem>>, vector<2x64xf32>
      %468 = tpu.concatenate %452, %453, %454, %455, %456, %457, %458, %459, %460, %461, %462, %463, %464, %465, %466, %467 in 1 : vector<2x64xf32>, vector<2x64xf32>, vector<2x64xf32>, vector<2x64xf32>, vector<2x64xf32>, vector<2x64xf32>, vector<2x64xf32>, vector<2x64xf32>, vector<2x64xf32>, vector<2x64xf32>, vector<2x64xf32>, vector<2x64xf32>, vector<2x64xf32>, vector<2x64xf32>, vector<2x64xf32>, vector<2x64xf32> -> vector<2x1024xf32>
      %c0_173 = arith.constant 0 : index
      %c0_174 = arith.constant 0 : index
      %469 = vector.load %arg11[%c0_173, %c0_174] : memref<8x512xf32, #tpu.memory_space<vmem>>, vector<8x512xf32>
      %470 = arith.truncf %468 : vector<2x1024xf32> to vector<2x1024xbf16>
      %c0_175 = arith.constant 0 : index
      %c0_176 = arith.constant 0 : index
      %471 = vector.load %arg16[%c0_175, %c0_176] : memref<1024x512xbf16, #tpu.memory_space<vmem>>, vector<1024x512xbf16>
      %cst_177 = arith.constant dense<0.000000e+00> : vector<2x512xf32>
      %472 = tpu.matmul %470, %471, %cst_177 {dimension_numbers = #tpu.dot_dimension_numbers<[1], [0], [0], [1], [0, 0, 1, 1], [], []>} : vector<2x1024xbf16>, vector<1024x512xbf16>, vector<2x512xf32> -> vector<2x512xf32>
      %473 = vector.extract_strided_slice %469 {offsets = [0, 0], sizes = [1, 512], strides = [1, 1]} : vector<8x512xf32> to vector<1x512xf32>
      %474 = vector.broadcast %473 : vector<1x512xf32> to vector<2x512xf32>
      %475 = arith.addf %472, %474 : vector<2x512xf32>
      %cst_178 = arith.constant 0.000000e+00 : f32
      %476 = vector.broadcast %cst_178 : f32 to vector<2x512xf32>
      %477 = arith.maximumf %475, %476 : vector<2x512xf32>
      %478 = arith.truncf %477 : vector<2x512xf32> to vector<2x512xbf16>
      %c0_179 = arith.constant 0 : index
      %c0_180 = arith.constant 0 : index
      %479 = vector.load %arg17[%c0_179, %c0_180] : memref<512x128xbf16, #tpu.memory_space<vmem>>, vector<512x128xbf16>
      %cst_181 = arith.constant dense<0.000000e+00> : vector<2x128xf32>
      %480 = tpu.matmul %478, %479, %cst_181 {dimension_numbers = #tpu.dot_dimension_numbers<[1], [0], [0], [1], [0, 0, 1, 1], [], []>} : vector<2x512xbf16>, vector<512x128xbf16>, vector<2x128xf32> -> vector<2x128xf32>
      %481 = vector.extract_strided_slice %469 {offsets = [1, 0], sizes = [1, 128], strides = [1, 1]} : vector<8x512xf32> to vector<1x128xf32>
      %482 = vector.broadcast %481 : vector<1x128xf32> to vector<2x128xf32>
      %483 = arith.addf %480, %482 : vector<2x128xf32>
      %c0_182 = arith.constant 0 : index
      %c0_183 = arith.constant 0 : index
      %484 = vector.load %arg14[%c0_182, %c0_183] : memref<2x128xf32, #tpu.memory_space<vmem>>, vector<2x128xf32>
      tpu.vector_store %arg14[%c0_182, %c0_183], %483 {strides = array<i32>} : memref<2x128xf32, #tpu.memory_space<vmem>>, vector<2x128xf32>,
    } else {
    }
    return
  }
  func.func @transform_0(%arg0: i32) -> (i32, i32) {
    %c0_i32 = arith.constant 0 : i32
    %c0_i32_0 = arith.constant 0 : i32
    %c0_i32_1 = arith.constant 0 : i32
    return %c0_i32, %c0_i32_0 : i32, i32
  }
  func.func @transform_1(%arg0: i32) -> (i32, i32, i32) {
    %c0_i32 = arith.constant 0 : i32
    %c0_i32_0 = arith.constant 0 : i32
    %c0_i32_1 = arith.constant 0 : i32
    return %arg0, %c0_i32, %c0_i32_0 : i32, i32, i32
  }
  func.func @transform_2(%arg0: i32) -> (i32, i32, i32) {
    %c0_i32 = arith.constant 0 : i32
    %c0_i32_0 = arith.constant 0 : i32
    %c0_i32_1 = arith.constant 0 : i32
    return %arg0, %c0_i32, %c0_i32_0 : i32, i32, i32
  }
  func.func @transform_3(%arg0: i32) -> (i32, i32, i32) {
    %c0_i32 = arith.constant 0 : i32
    %c0_i32_0 = arith.constant 0 : i32
    %c0_i32_1 = arith.constant 0 : i32
    return %arg0, %c0_i32, %c0_i32_0 : i32, i32, i32
  }
  func.func @transform_4(%arg0: i32) -> (i32, i32, i32) {
    %c0_i32 = arith.constant 0 : i32
    %c0_i32_0 = arith.constant 0 : i32
    %c0_i32_1 = arith.constant 0 : i32
    return %arg0, %c0_i32, %c0_i32_0 : i32, i32, i32
  }
  func.func @transform_5(%arg0: i32) -> (i32, i32, i32) {
    %c0_i32 = arith.constant 0 : i32
    %c0_i32_0 = arith.constant 0 : i32
    %c0_i32_1 = arith.constant 0 : i32
    return %arg0, %c0_i32, %c0_i32_0 : i32, i32, i32
  }
  func.func @transform_6(%arg0: i32) -> (i32, i32) {
    %c0_i32 = arith.constant 0 : i32
    %c0_i32_0 = arith.constant 0 : i32
    %c0_i32_1 = arith.constant 0 : i32
    return %c0_i32, %c0_i32_0 : i32, i32
  }
  func.func @transform_7(%arg0: i32) -> (i32, i32) {
    %c0_i32 = arith.constant 0 : i32
    %c0_i32_0 = arith.constant 0 : i32
    %c0_i32_1 = arith.constant 0 : i32
    return %c0_i32, %c0_i32_0 : i32, i32
  }
  func.func @transform_8(%arg0: i32) -> (i32, i32) {
    %c0_i32 = arith.constant 0 : i32
    %c0_i32_0 = arith.constant 0 : i32
    %c0_i32_1 = arith.constant 0 : i32
    return %c0_i32, %c0_i32_0 : i32, i32
  }
  func.func @transform_9(%arg0: i32) -> (i32, i32) {
    %c0_i32 = arith.constant 0 : i32
    %c0_i32_0 = arith.constant 0 : i32
    %c0_i32_1 = arith.constant 0 : i32
    return %c0_i32, %c0_i32_0 : i32, i32
  }
  func.func @transform_10(%arg0: i32) -> (i32, i32) {
    %c0_i32 = arith.constant 0 : i32
    %c0_i32_0 = arith.constant 0 : i32
    %c0_i32_1 = arith.constant 0 : i32
    return %c0_i32, %c0_i32_0 : i32, i32
  }
  func.func @transform_13(%arg0: i32) -> (i32, i32) {
    %c0_i32 = arith.constant 0 : i32
    %c0_i32_0 = arith.constant 0 : i32
    %c0_i32_1 = arith.constant 0 : i32
    return %c0_i32, %c0_i32_0 : i32, i32
  }
}

</mosaic_0001>

<bundles_post_ra>
// kernel: forward.1
= control target key start
LH: loop header
LB: loop body
LE: loop exit
PB: predicated region body
PF: predicated region fallthrough
CT: control target
= control target key end

     0   :  { %s14558_s0 = inlined_call_operand.vmem [shape: f32[32,64], index: 0, kind: input, shape index: {}]   ;;  %s14559_s1 = inlined_call_operand.vmem [shape: bf16[16,64,192], index: 1, kind: input, shape index: {}]   ;;  %s14560_s2 = inlined_call_operand.vmem [shape: bf16[16,64,64], index: 2, kind: input, shape index: {}]   ;;  %s14561_s3 = inlined_call_operand.vmem [shape: bf16[16,64,512], index: 3, kind: input, shape index: {}]   ;;  %s14562_s4 = inlined_call_operand.vmem [shape: bf16[16,512,64], index: 4, kind: input, shape index: {}]   ;;  %s14563_s5 = inlined_call_operand.vmem [shape: f32[16,8,512], index: 5, kind: input, shape index: {}]   ;;  %s14564_s6 = inlined_call_operand.vmem [shape: f32[32,128], index: 6, kind: input, shape index: {}]   ;;  %s14565_s7 = inlined_call_operand.vmem [shape: f32[64,128], index: 7, kind: input, shape index: {}]   ;;  %s14566_s8 = inlined_call_operand.vmem [shape: f32[128,64], index: 8, kind: input, shape index: {}]   ;;  %s14567_s9 = inlined_call_operand.vmem [shape: f32[128,128], index: 9, kind: input, shape index: {}]   ;;  %s14568_s10 = inlined_call_operand.vmem [shape: f32[8,512], index: 10, kind: input, shape index: {}]   ;;  %s14569_s11 = inlined_call_operand.vmem [shape: bf16[1024,512], index: 11, kind: input, shape index: {}]   ;;  %s14570_s12 = inlined_call_operand.vmem [shape: bf16[512,128], index: 12, kind: input, shape index: {}]   ;;  %s14571_s13 = inlined_call_operand.hbm [shape: f32[2,128], index: 13, kind: output, shape index: {}]  }
   0x1   :  { %14573 = sst [smem:[#allocation14_spill]] %s14571_s13 }
   0x2   :  { %18 = vsyncpa [#allocation7], 0  ;;  %s11861_s25 = smov 0  }
   0x3 LB: > { %14574 = sst [smem:[#allocation13_spill]] %s11782_s25  ;;  %s11867_s26 = sadd.s32 4294967295, %s11782_s25   ;;  %s11782_s25 = sphi %s11861_s25, %s24_s25  }
   0x4   : > { %p9176_p0 = scmp.ge.s32.totalorder %s11782_s25, 1  ;;  %p385_p1 = scmp.lt.s32.totalorder %s11782_s25, 5 }
   0x6   : > { %p386_p2 = pnand %p9176_p0, %p385_p1 }
   0x7   : > { %s9177_s27 = sshll.u32 (!%p386_p2), %s11867_s26, 2  ;;  %p9192_p4 = scmp.ne.s32.totalorder (!%p386_p2), %s11867_s26, 0 }
   0x8   : > { %389 = sbr.rel (%p386_p2) target bundleno = 11646 (0x2d7e), region = 64  ;;  %p446_p3 = scmp.lt.s32.totalorder (!%p386_p2), %s9177_s27, 15 }
   0xd   : > { %s14578_s27 = smov (!%p446_p3, %s9177_s27), 15 }
   0xe   : > { %s10068_s28 = sshll.u32 %s14578_s27, 6  ;;  %s10069_s29 = sshll.u32 %s14578_s27, 5 }
   0xf   : > { %s11875_s15 = scalar_lea.vmem %s14559_s1, %s10068_s28  ;;  %s11880_s18 = scalar_lea.vmem %s14560_s2, %s10069_s29 }
  0x10   : > { %s10070_s19 = sshll.u32 %s14578_s27, 7  ;;  %s10071_s20 = sshll.u32 %s14578_s27, 8 }
  0x11   : > { %s11885_s23 = scalar_lea.vmem %s14561_s3, %s10070_s19  ;;  %s11890_s13 = scalar_lea.vmem %s14562_s4, %s10071_s20 }
  0x12   : > { %s11895_s14 = scalar_lea.vmem %s14563_s5, %s10069_s29  ;;  %484 = sbr.rel (%p9192_p4) target bundleno = 173 (0xad), region = 68 }
  0x17   : > { %v485_v0 = vld [vmem:[%s14558_s0] sm:$0xff]  ;;  %vm489_vm0 = vcmask 523264   ;;  %v486_v1 = vld [vmem:[%s14558_s0 + $0x8] sm:$0xff]  ;;  %v487_v2 = vld [vmem:[%s14558_s0 + $0x10] sm:$0xff]  ;;  %v11784_v4 = vmov 0.0  }
  0x18   : > { %490 = vst.msk [vmem:[#allocation2] sm:$0xff] %vm489_vm0, %v485_v0  ;;  %491 = vst.msk [vmem:[#allocation2 + $0x8] sm:$0xff] %vm489_vm0, %v486_v1  ;;  %v488_v3 = vld [vmem:[%s14558_s0 + $0x18] sm:$0xff]  ;;  %v528_v5 = vld [vmem:[%s14569_s11] sm:$0xff] }
  0x19   : > { %492 = vst.msk [vmem:[#allocation2 + $0x10] sm:$0xff] %vm489_vm0, %v487_v2  ;;  %494 = vst [vmem:[#allocation6] sm:$0x3] %v11784_v4  ;;  %v530_v6 = vld [vmem:[%s14569_s11 + $0x8] sm:$0xff]  ;;  %v532_v7 = vld [vmem:[%s14569_s11 + $0x10] sm:$0xff] }
  0x1a   : > { %493 = vst.msk [vmem:[#allocation2 + $0x18] sm:$0xff] %vm489_vm0, %v488_v3  ;;  %529 = vst [vmem:[#allocation3 + $0x2b0] sm:$0xff] %v528_v5  ;;  %v534_v8 = vld [vmem:[%s14569_s11 + $0x18] sm:$0xff]  ;;  %v536_v9 = vld [vmem:[%s14569_s11 + $0x20] sm:$0xff] }
  0x1b   : > { %531 = vst [vmem:[#allocation3 + $0x3b0] sm:$0xff] %v530_v6  ;;  %533 = vst [vmem:[#allocation3 + $0x4d8] sm:$0xff] %v532_v7  ;;  %v538_v10 = vld [vmem:[%s14569_s11 + $0x28] sm:$0xff]  ;;  %v540_v11 = vld [vmem:[%s14569_s11 + $0x30] sm:$0xff] }
  0x1c   : > { %535 = vst [vmem:[#allocation3 + $0x18] sm:$0xff] %v534_v8  ;;  %537 = vst [vmem:[#allocation3 + $0x450] sm:$0xff] %v536_v9  ;;  %v542_v12 = vld [vmem:[%s14569_s11 + $0x38] sm:$0xff]  ;;  %v544_v13 = vld [vmem:[%s14569_s11 + $0x40] sm:$0xff] }
  0x1d   : > { %539 = vst [vmem:[#allocation3 + $0x768] sm:$0xff] %v538_v10  ;;  %541 = vst [vmem:[#allocation3 + $0x330] sm:$0xff] %v540_v11  ;;  %v546_v14 = vld [vmem:[%s14569_s11 + $0x48] sm:$0xff]  ;;  %v548_v15 = vld [vmem:[%s14569_s11 + $0x50] sm:$0xff] }
  0x1e   : > { %543 = vst [vmem:[#allocation3 + $0x448] sm:$0xff] %v542_v12  ;;  %545 = vst [vmem:[#allocation3 + $0x380] sm:$0xff] %v544_v13  ;;  %v550_v16 = vld [vmem:[%s14569_s11 + $0x58] sm:$0xff]  ;;  %v552_v17 = vld [vmem:[%s14569_s11 + $0x60] sm:$0xff] }
  0x1f   : > { %547 = vst [vmem:[#allocation3 + $0x110] sm:$0xff] %v546_v14  ;;  %549 = vst [vmem:[#allocation3 + $0x518] sm:$0xff] %v548_v15  ;;  %v554_v18 = vld [vmem:[%s14569_s11 + $0x68] sm:$0xff]  ;;  %v556_v19 = vld [vmem:[%s14569_s11 + $0x70] sm:$0xff] }
  0x20   : > { %551 = vst [vmem:[#allocation3 + $0x498] sm:$0xff] %v550_v16  ;;  %553 = vst [vmem:[#allocation3 + $0x320] sm:$0xff] %v552_v17  ;;  %v558_v20 = vld [vmem:[%s14569_s11 + $0x78] sm:$0xff]  ;;  %v560_v21 = vld [vmem:[%s14569_s11 + $0x80] sm:$0xff] }
  0x21   : > { %555 = vst [vmem:[#allocation3 + $0x550] sm:$0xff] %v554_v18  ;;  %557 = vst [vmem:[#allocation3 + $0x508] sm:$0xff] %v556_v19  ;;  %v562_v22 = vld [vmem:[%s14569_s11 + $0x88] sm:$0xff]  ;;  %v564_v23 = vld [vmem:[%s14569_s11 + $0x90] sm:$0xff] }
  0x22   : > { %559 = vst [vmem:[#allocation3 + $0x720] sm:$0xff] %v558_v20  ;;  %561 = vst [vmem:[#allocation3 + $0x6e0] sm:$0xff] %v560_v21  ;;  %v566_v24 = vld [vmem:[%s14569_s11 + $0x98] sm:$0xff]  ;;  %v568_v25 = vld [vmem:[%s14569_s11 + $0xa0] sm:$0xff] }
  0x23   : > { %563 = vst [vmem:[#allocation3 + $0x788] sm:$0xff] %v562_v22  ;;  %565 = vst [vmem:[#allocation3 + $0x338] sm:$0xff] %v564_v23  ;;  %v570_v26 = vld [vmem:[%s14569_s11 + $0xa8] sm:$0xff]  ;;  %v572_v27 = vld [vmem:[%s14569_s11 + $0xb0] sm:$0xff] }
  0x24   : > { %567 = vst [vmem:[#allocation3 + $0x740] sm:$0xff] %v566_v24  ;;  %569 = vst [vmem:[#allocation3 + $0x2e0] sm:$0xff] %v568_v25  ;;  %v574_v28 = vld [vmem:[%s14569_s11 + $0xb8] sm:$0xff]  ;;  %v576_v29 = vld [vmem:[%s14569_s11 + $0xc0] sm:$0xff] }
  0x25   : > { %571 = vst [vmem:[#allocation3 + $0x5a8] sm:$0xff] %v570_v26  ;;  %573 = vst [vmem:[#allocation3 + $0x5b8] sm:$0xff] %v572_v27  ;;  %v578_v30 = vld [vmem:[%s14569_s11 + $0xc8] sm:$0xff]  ;;  %v580_v31 = vld [vmem:[%s14569_s11 + $0xd0] sm:$0xff] }
  0x26   : > { %575 = vst [vmem:[#allocation3 + $0x568] sm:$0xff] %v574_v28  ;;  %577 = vst [vmem:[#allocation3 + $0x3e8] sm:$0xff] %v576_v29  ;;  %v582_v32 = vld [vmem:[%s14569_s11 + $0xd8] sm:$0xff]  ;;  %v584_v33 = vld [vmem:[%s14569_s11 + $0xe0] sm:$0xff] }
  0x27   : > { %579 = vst [vmem:[#allocation3 + $0x6f8] sm:$0xff] %v578_v30  ;;  %581 = vst [vmem:[#allocation3 + $0x690] sm:$0xff] %v580_v31  ;;  %v586_v34 = vld [vmem:[%s14569_s11 + $0xe8] sm:$0xff]  ;;  %v588_v35 = vld [vmem:[%s14569_s11 + $0xf0] sm:$0xff] }
  0x28   : > { %583 = vst [vmem:[#allocation3 + $0x368] sm:$0xff] %v582_v32  ;;  %585 = vst [vmem:[#allocation3 + $0x138] sm:$0xff] %v584_v33  ;;  %v590_v36 = vld [vmem:[%s14569_s11 + $0xf8] sm:$0xff]  ;;  %v592_v37 = vld [vmem:[%s14569_s11 + $0x100] sm:$0xff] }
  0x29   : > { %587 = vst [vmem:[#allocation3 + $0xc0] sm:$0xff] %v586_v34  ;;  %589 = vst [vmem:[#allocation3 + $0x1c0] sm:$0xff] %v588_v35  ;;  %v594_v38 = vld [vmem:[%s14569_s11 + $0x108] sm:$0xff]  ;;  %v596_v39 = vld [vmem:[%s14569_s11 + $0x110] sm:$0xff] }
  0x2a   : > { %591 = vst [vmem:[#allocation3 + $0x280] sm:$0xff] %v590_v36  ;;  %593 = vst [vmem:[#allocation3 + $0x100] sm:$0xff] %v592_v37  ;;  %v598_v40 = vld [vmem:[%s14569_s11 + $0x118] sm:$0xff]  ;;  %v600_v41 = vld [vmem:[%s14569_s11 + $0x120] sm:$0xff] }
  0x2b   : > { %595 = vst [vmem:[#allocation3 + $0x3c0] sm:$0xff] %v594_v38  ;;  %597 = vst [vmem:[#allocation3 + $0x558] sm:$0xff] %v596_v39  ;;  %v602_v42 = vld [vmem:[%s14569_s11 + $0x128] sm:$0xff]  ;;  %v604_v43 = vld [vmem:[%s14569_s11 + $0x130] sm:$0xff] }
  0x2c   : > { %599 = vst [vmem:[#allocation3 + $0x3e0] sm:$0xff] %v598_v40  ;;  %601 = vst [vmem:[#allocation3 + $0x618] sm:$0xff] %v600_v41  ;;  %v606_v44 = vld [vmem:[%s14569_s11 + $0x138] sm:$0xff]  ;;  %v608_v45 = vld [vmem:[%s14569_s11 + $0x140] sm:$0xff] }
  0x2d   : > { %603 = vst [vmem:[#allocation3 + $0x4c0] sm:$0xff] %v602_v42  ;;  %605 = vst [vmem:[#allocation3 + $0x70] sm:$0xff] %v604_v43  ;;  %v610_v46 = vld [vmem:[%s14569_s11 + $0x148] sm:$0xff]  ;;  %v612_v47 = vld [vmem:[%s14569_s11 + $0x150] sm:$0xff] }
  0x2e   : > { %607 = vst [vmem:[#allocation3 + $0x7b8] sm:$0xff] %v606_v44  ;;  %609 = vst [vmem:[#allocation3 + $0x400] sm:$0xff] %v608_v45  ;;  %v614_v48 = vld [vmem:[%s14569_s11 + $0x158] sm:$0xff]  ;;  %v616_v49 = vld [vmem:[%s14569_s11 + $0x160] sm:$0xff] }
  0x2f   : > { %611 = vst [vmem:[#allocation3 + $0x6a8] sm:$0xff] %v610_v46  ;;  %613 = vst [vmem:[#allocation3 + $0x3f8] sm:$0xff] %v612_v47  ;;  %v618_v50 = vld [vmem:[%s14569_s11 + $0x168] sm:$0xff]  ;;  %v620_v51 = vld [vmem:[%s14569_s11 + $0x170] sm:$0xff] }
  0x30   : > { %615 = vst [vmem:[#allocation3 + $0x2e8] sm:$0xff] %v614_v48  ;;  %617 = vst [vmem:[#allocation3 + $0x6c8] sm:$0xff] %v616_v49  ;;  %v622_v52 = vld [vmem:[%s14569_s11 + $0x178] sm:$0xff]  ;;  %v624_v53 = vld [vmem:[%s14569_s11 + $0x180] sm:$0xff] }
  0x31   : > { %619 = vst [vmem:[#allocation3 + $0x5c0] sm:$0xff] %v618_v50  ;;  %621 = vst [vmem:[#allocation3 + $0x5e8] sm:$0xff] %v620_v51  ;;  %v626_v54 = vld [vmem:[%s14569_s11 + $0x188] sm:$0xff]  ;;  %v628_v55 = vld [vmem:[%s14569_s11 + $0x190] sm:$0xff] }
  0x32   : > { %623 = vst [vmem:[#allocation3 + $0x5f8] sm:$0xff] %v622_v52  ;;  %625 = vst [vmem:[#allocation3 + $0x770] sm:$0xff] %v624_v53  ;;  %v630_v56 = vld [vmem:[%s14569_s11 + $0x198] sm:$0xff]  ;;  %v632_v57 = vld [vmem:[%s14569_s11 + $0x1a0] sm:$0xff] }
  0x33   : > { %627 = vst [vmem:[#allocation3 + $0x520] sm:$0xff] %v626_v54  ;;  %629 = vst [vmem:[#allocation3 + $0x640] sm:$0xff] %v628_v55  ;;  %v634_v58 = vld [vmem:[%s14569_s11 + $0x1a8] sm:$0xff]  ;;  %v636_v59 = vld [vmem:[%s14569_s11 + $0x1b0] sm:$0xff] }
  0x34   : > { %631 = vst [vmem:[#allocation3 + $0x250] sm:$0xff] %v630_v56  ;;  %633 = vst [vmem:[#allocation3 + $0x348] sm:$0xff] %v632_v57  ;;  %v638_v60 = vld [vmem:[%s14569_s11 + $0x1b8] sm:$0xff]  ;;  %v640_v61 = vld [vmem:[%s14569_s11 + $0x1c0] sm:$0xff] }
  0x35   : > { %635 = vst [vmem:[#allocation3 + $0x420] sm:$0xff] %v634_v58  ;;  %637 = vst [vmem:[#allocation3 + $0xe0] sm:$0xff] %v636_v59  ;;  %v642_v62 = vld [vmem:[%s14569_s11 + $0x1c8] sm:$0xff]  ;;  %v644_v63 = vld [vmem:[%s14569_s11 + $0x1d0] sm:$0xff] }
  0x36   : > { %639 = vst [vmem:[#allocation3 + $0x620] sm:$0xff] %v638_v60  ;;  %641 = vst [vmem:[#allocation3 + $0x148] sm:$0xff] %v640_v61  ;;  %v646_v0 = vld [vmem:[%s14569_s11 + $0x1d8] sm:$0xff]  ;;  %v648_v1 = vld [vmem:[%s14569_s11 + $0x1e0] sm:$0xff] }
  0x37   : > { %643 = vst [vmem:[#allocation3 + $0x3a0] sm:$0xff] %v642_v62  ;;  %645 = vst [vmem:[#allocation3 + $0x4e8] sm:$0xff] %v644_v63  ;;  %v650_v2 = vld [vmem:[%s14569_s11 + $0x1e8] sm:$0xff]  ;;  %v652_v3 = vld [vmem:[%s14569_s11 + $0x1f0] sm:$0xff] }
  0x38   : > { %647 = vst [vmem:[#allocation3 + $0x310] sm:$0xff] %v646_v0  ;;  %649 = vst [vmem:[#allocation3 + $0x38] sm:$0xff] %v648_v1  ;;  %v654_v4 = vld [vmem:[%s14569_s11 + $0x1f8] sm:$0xff]  ;;  %v656_v5 = vld [vmem:[%s14569_s11 + $0x200] sm:$0xff] }
  0x39   : > { %651 = vst [vmem:[#allocation3 + $0x440] sm:$0xff] %v650_v2  ;;  %653 = vst [vmem:[#allocation3 + $0x50] sm:$0xff] %v652_v3  ;;  %v658_v6 = vld [vmem:[%s14569_s11 + $0x208] sm:$0xff]  ;;  %v660_v7 = vld [vmem:[%s14569_s11 + $0x210] sm:$0xff] }
  0x3a   : > { %655 = vst [vmem:[#allocation3 + $0x390] sm:$0xff] %v654_v4  ;;  %657 = vst [vmem:[#allocation3 + $0x538] sm:$0xff] %v656_v5  ;;  %v662_v8 = vld [vmem:[%s14569_s11 + $0x218] sm:$0xff]  ;;  %v664_v9 = vld [vmem:[%s14569_s11 + $0x220] sm:$0xff] }
  0x3b   : > { %659 = vst [vmem:[#allocation3 + $0xf0] sm:$0xff] %v658_v6  ;;  %661 = vst [vmem:[#allocation3 + $0x790] sm:$0xff] %v660_v7  ;;  %v666_v10 = vld [vmem:[%s14569_s11 + $0x228] sm:$0xff]  ;;  %v668_v11 = vld [vmem:[%s14569_s11 + $0x230] sm:$0xff] }
  0x3c   : > { %663 = vst [vmem:[#allocation3 + $0x680] sm:$0xff] %v662_v8  ;;  %665 = vst [vmem:[#allocation3 + $0xb8] sm:$0xff] %v664_v9  ;;  %v670_v12 = vld [vmem:[%s14569_s11 + $0x238] sm:$0xff]  ;;  %v672_v13 = vld [vmem:[%s14569_s11 + $0x240] sm:$0xff] }
  0x3d   : > { %667 = vst [vmem:[#allocation3 + $0x120] sm:$0xff] %v666_v10  ;;  %669 = vst [vmem:[#allocation3 + $0xd0] sm:$0xff] %v668_v11  ;;  %v674_v14 = vld [vmem:[%s14569_s11 + $0x248] sm:$0xff]  ;;  %v676_v15 = vld [vmem:[%s14569_s11 + $0x250] sm:$0xff] }
  0x3e   : > { %671 = vst [vmem:[#allocation3 + $0x40] sm:$0xff] %v670_v12  ;;  %673 = vst [vmem:[#allocation3 + $0x6f0] sm:$0xff] %v672_v13  ;;  %v678_v16 = vld [vmem:[%s14569_s11 + $0x258] sm:$0xff]  ;;  %v680_v17 = vld [vmem:[%s14569_s11 + $0x260] sm:$0xff] }
  0x3f   : > { %675 = vst [vmem:[#allocation3 + $0x2f8] sm:$0xff] %v674_v14  ;;  %677 = vst [vmem:[#allocation3 + $0x758] sm:$0xff] %v676_v15  ;;  %v682_v18 = vld [vmem:[%s14569_s11 + $0x268] sm:$0xff]  ;;  %v684_v19 = vld [vmem:[%s14569_s11 + $0x270] sm:$0xff] }
  0x40   : > { %679 = vst [vmem:[#allocation3 + $0x178] sm:$0xff] %v678_v16  ;;  %681 = vst [vmem:[#allocation3 + $0x738] sm:$0xff] %v680_v17  ;;  %v686_v20 = vld [vmem:[%s14569_s11 + $0x278] sm:$0xff]  ;;  %v688_v21 = vld [vmem:[%s14569_s11 + $0x280] sm:$0xff] }
  0x41   : > { %683 = vst [vmem:[#allocation3 + $0x598] sm:$0xff] %v682_v18  ;;  %685 = vst [vmem:[#allocation3 + $0x7d8] sm:$0xff] %v684_v19  ;;  %v690_v22 = vld [vmem:[%s14569_s11 + $0x288] sm:$0xff]  ;;  %v692_v23 = vld [vmem:[%s14569_s11 + $0x290] sm:$0xff] }
  0x42   : > { %687 = vst [vmem:[#allocation3 + $0x6d8] sm:$0xff] %v686_v20  ;;  %689 = vst [vmem:[#allocation3 + $0x398] sm:$0xff] %v688_v21  ;;  %v694_v24 = vld [vmem:[%s14569_s11 + $0x298] sm:$0xff]  ;;  %v696_v25 = vld [vmem:[%s14569_s11 + $0x2a0] sm:$0xff] }
  0x43   : > { %691 = vst [vmem:[#allocation3 + $0x1a8] sm:$0xff] %v690_v22  ;;  %693 = vst [vmem:[#allocation3 + $0x698] sm:$0xff] %v692_v23  ;;  %v698_v26 = vld [vmem:[%s14569_s11 + $0x2a8] sm:$0xff]  ;;  %v700_v27 = vld [vmem:[%s14569_s11 + $0x2b0] sm:$0xff] }
  0x44   : > { %695 = vst [vmem:[#allocation3 + $0x3b8] sm:$0xff] %v694_v24  ;;  %697 = vst [vmem:[#allocation3 + $0x5d8] sm:$0xff] %v696_v25  ;;  %v702_v28 = vld [vmem:[%s14569_s11 + $0x2b8] sm:$0xff]  ;;  %v704_v29 = vld [vmem:[%s14569_s11 + $0x2c0] sm:$0xff] }
  0x45   : > { %699 = vst [vmem:[#allocation3 + $0x610] sm:$0xff] %v698_v26  ;;  %701 = vst [vmem:[#allocation3 + $0x218] sm:$0xff] %v700_v27  ;;  %v706_v30 = vld [vmem:[%s14569_s11 + $0x2c8] sm:$0xff]  ;;  %v708_v31 = vld [vmem:[%s14569_s11 + $0x2d0] sm:$0xff] }
  0x46   : > { %703 = vst [vmem:[#allocation3 + $0x1d8] sm:$0xff] %v702_v28  ;;  %705 = vst [vmem:[#allocation3 + $0x628] sm:$0xff] %v704_v29  ;;  %v710_v32 = vld [vmem:[%s14569_s11 + $0x2d8] sm:$0xff]  ;;  %v712_v33 = vld [vmem:[%s14569_s11 + $0x2e0] sm:$0xff] }
  0x47   : > { %707 = vst [vmem:[#allocation3 + $0x1f8] sm:$0xff] %v706_v30  ;;  %709 = vst [vmem:[#allocation3 + $0x388] sm:$0xff] %v708_v31  ;;  %v714_v34 = vld [vmem:[%s14569_s11 + $0x2e8] sm:$0xff]  ;;  %v716_v35 = vld [vmem:[%s14569_s11 + $0x2f0] sm:$0xff] }
  0x48   : > { %711 = vst [vmem:[#allocation3 + $0x278] sm:$0xff] %v710_v32  ;;  %713 = vst [vmem:[#allocation3 + $0x478] sm:$0xff] %v712_v33  ;;  %v718_v36 = vld [vmem:[%s14569_s11 + $0x2f8] sm:$0xff]  ;;  %v720_v37 = vld [vmem:[%s14569_s11 + $0x300] sm:$0xff] }
  0x49   : > { %715 = vst [vmem:[#allocation3 + $0x2c0] sm:$0xff] %v714_v34  ;;  %717 = vst [vmem:[#allocation3 + $0x1c8] sm:$0xff] %v716_v35  ;;  %v722_v38 = vld [vmem:[%s14569_s11 + $0x308] sm:$0xff]  ;;  %v724_v39 = vld [vmem:[%s14569_s11 + $0x310] sm:$0xff] }
  0x4a   : > { %719 = vst [vmem:[#allocation3 + $0x7c0] sm:$0xff] %v718_v36  ;;  %721 = vst [vmem:[#allocation3 + $0x418] sm:$0xff] %v720_v37  ;;  %v726_v40 = vld [vmem:[%s14569_s11 + $0x318] sm:$0xff]  ;;  %v728_v41 = vld [vmem:[%s14569_s11 + $0x320] sm:$0xff] }
  0x4b   : > { %723 = vst [vmem:[#allocation3 + $0x7f0] sm:$0xff] %v722_v38  ;;  %725 = vst [vmem:[#allocation3 + $0x4b0] sm:$0xff] %v724_v39  ;;  %v730_v42 = vld [vmem:[%s14569_s11 + $0x328] sm:$0xff]  ;;  %v732_v43 = vld [vmem:[%s14569_s11 + $0x330] sm:$0xff] }
  0x4c   : > { %727 = vst [vmem:[#allocation3 + $0x318] sm:$0xff] %v726_v40  ;;  %729 = vst [vmem:[#allocation3 + $0x90] sm:$0xff] %v728_v41  ;;  %v734_v44 = vld [vmem:[%s14569_s11 + $0x338] sm:$0xff]  ;;  %v736_v45 = vld [vmem:[%s14569_s11 + $0x340] sm:$0xff] }
  0x4d   : > { %731 = vst [vmem:[#allocation3 + $0x540] sm:$0xff] %v730_v42  ;;  %733 = vst [vmem:[#allocation3 + $0x588] sm:$0xff] %v732_v43  ;;  %v738_v46 = vld [vmem:[%s14569_s11 + $0x348] sm:$0xff]  ;;  %v740_v47 = vld [vmem:[%s14569_s11 + $0x350] sm:$0xff] }
  0x4e   : > { %735 = vst [vmem:[#allocation3 + $0x648] sm:$0xff] %v734_v44  ;;  %737 = vst [vmem:[#allocation3 + $0x58] sm:$0xff] %v736_v45  ;;  %v742_v48 = vld [vmem:[%s14569_s11 + $0x358] sm:$0xff]  ;;  %v744_v49 = vld [vmem:[%s14569_s11 + $0x360] sm:$0xff] }
  0x4f   : > { %739 = vst [vmem:[#allocation3 + $0x198] sm:$0xff] %v738_v46  ;;  %741 = vst [vmem:[#allocation3 + $0x68] sm:$0xff] %v740_v47  ;;  %v746_v50 = vld [vmem:[%s14569_s11 + $0x368] sm:$0xff]  ;;  %v748_v51 = vld [vmem:[%s14569_s11 + $0x370] sm:$0xff] }
  0x50   : > { %743 = vst [vmem:[#allocation3 + $0x600] sm:$0xff] %v742_v48  ;;  %745 = vst [vmem:[#allocation3 + $0x3a8] sm:$0xff] %v744_v49  ;;  %v750_v52 = vld [vmem:[%s14569_s11 + $0x378] sm:$0xff]  ;;  %v752_v53 = vld [vmem:[%s14569_s11 + $0x380] sm:$0xff] }
  0x51   : > { %747 = vst [vmem:[#allocation3 + $0xb0] sm:$0xff] %v746_v50  ;;  %749 = vst [vmem:[#allocation3 + $0x630] sm:$0xff] %v748_v51  ;;  %v754_v54 = vld [vmem:[%s14569_s11 + $0x388] sm:$0xff]  ;;  %v756_v55 = vld [vmem:[%s14569_s11 + $0x390] sm:$0xff] }
  0x52   : > { %751 = vst [vmem:[#allocation3 + $0x158] sm:$0xff] %v750_v52  ;;  %753 = vst [vmem:[#allocation3 + $0x370] sm:$0xff] %v752_v53  ;;  %v758_v56 = vld [vmem:[%s14569_s11 + $0x398] sm:$0xff]  ;;  %v760_v57 = vld [vmem:[%s14569_s11 + $0x3a0] sm:$0xff] }
  0x53   : > { %755 = vst [vmem:[#allocation3 + $0x1e0] sm:$0xff] %v754_v54  ;;  %757 = vst [vmem:[#allocation3 + $0x7b0] sm:$0xff] %v756_v55  ;;  %v762_v58 = vld [vmem:[%s14569_s11 + $0x3a8] sm:$0xff]  ;;  %v764_v59 = vld [vmem:[%s14569_s11 + $0x3b0] sm:$0xff] }
  0x54   : > { %759 = vst [vmem:[#allocation3 + $0x6c0] sm:$0xff] %v758_v56  ;;  %761 = vst [vmem:[#allocation3 + $0xd8] sm:$0xff] %v760_v57  ;;  %v766_v60 = vld [vmem:[%s14569_s11 + $0x3b8] sm:$0xff]  ;;  %v768_v61 = vld [vmem:[%s14569_s11 + $0x3c0] sm:$0xff] }
  0x55   : > { %763 = vst [vmem:[#allocation3 + $0x6b8] sm:$0xff] %v762_v58  ;;  %765 = vst [vmem:[#allocation3 + $0x140] sm:$0xff] %v764_v59  ;;  %v770_v62 = vld [vmem:[%s14569_s11 + $0x3c8] sm:$0xff]  ;;  %v772_v63 = vld [vmem:[%s14569_s11 + $0x3d0] sm:$0xff] }
  0x56   : > { %767 = vst [vmem:[#allocation3 + $0x5b0] sm:$0xff] %v766_v60  ;;  %769 = vst [vmem:[#allocation3 + $0x30] sm:$0xff] %v768_v61  ;;  %v774_v0 = vld [vmem:[%s14569_s11 + $0x3d8] sm:$0xff]  ;;  %v776_v1 = vld [vmem:[%s14569_s11 + $0x3e0] sm:$0xff] }
  0x57   : > { %771 = vst [vmem:[#allocation3 + $0x128] sm:$0xff] %v770_v62  ;;  %773 = vst [vmem:[#allocation3 + $0x1a0] sm:$0xff] %v772_v63  ;;  %v778_v2 = vld [vmem:[%s14569_s11 + $0x3e8] sm:$0xff]  ;;  %v780_v3 = vld [vmem:[%s14569_s11 + $0x3f0] sm:$0xff] }
  0x58   : > { %775 = vst [vmem:[#allocation3 + $0x5f0] sm:$0xff] %v774_v0  ;;  %777 = vst [vmem:[#allocation3 + $0x670] sm:$0xff] %v776_v1  ;;  %v782_v4 = vld [vmem:[%s14569_s11 + $0x3f8] sm:$0xff]  ;;  %v784_v5 = vld [vmem:[%s14569_s11 + $0x400] sm:$0xff] }
  0x59   : > { %779 = vst [vmem:[#allocation3 + $0x240] sm:$0xff] %v778_v2  ;;  %781 = vst [vmem:[#allocation3 + $0x118] sm:$0xff] %v780_v3  ;;  %v786_v6 = vld [vmem:[%s14569_s11 + $0x408] sm:$0xff]  ;;  %v788_v7 = vld [vmem:[%s14569_s11 + $0x410] sm:$0xff] }
  0x5a   : > { %783 = vst [vmem:[#allocation3 + $0x268] sm:$0xff] %v782_v4  ;;  %785 = vst [vmem:[#allocation3 + $0x4a8] sm:$0xff] %v784_v5  ;;  %v790_v8 = vld [vmem:[%s14569_s11 + $0x418] sm:$0xff]  ;;  %v792_v9 = vld [vmem:[%s14569_s11 + $0x420] sm:$0xff] }
  0x5b   : > { %787 = vst [vmem:[#allocation3 + $0x5c8] sm:$0xff] %v786_v6  ;;  %789 = vst [vmem:[#allocation3 + $0x438] sm:$0xff] %v788_v7  ;;  %v794_v10 = vld [vmem:[%s14569_s11 + $0x428] sm:$0xff]  ;;  %v796_v11 = vld [vmem:[%s14569_s11 + $0x430] sm:$0xff] }
  0x5c   : > { %791 = vst [vmem:[#allocation3 + $0x350] sm:$0xff] %v790_v8  ;;  %793 = vst [vmem:[#allocation3 + $0x2c8] sm:$0xff] %v792_v9  ;;  %v798_v12 = vld [vmem:[%s14569_s11 + $0x438] sm:$0xff]  ;;  %v800_v13 = vld [vmem:[%s14569_s11 + $0x440] sm:$0xff] }
  0x5d   : > { %795 = vst [vmem:[#allocation3 + $0xf8] sm:$0xff] %v794_v10  ;;  %797 = vst [vmem:[#allocation3 + $0x488] sm:$0xff] %v796_v11  ;;  %v802_v14 = vld [vmem:[%s14569_s11 + $0x448] sm:$0xff]  ;;  %v804_v15 = vld [vmem:[%s14569_s11 + $0x450] sm:$0xff] }
  0x5e   : > { %799 = vst [vmem:[#allocation3 + $0x6a0] sm:$0xff] %v798_v12  ;;  %801 = vst [vmem:[#allocation3 + $0x3c8] sm:$0xff] %v800_v13  ;;  %v806_v16 = vld [vmem:[%s14569_s11 + $0x458] sm:$0xff]  ;;  %v808_v17 = vld [vmem:[%s14569_s11 + $0x460] sm:$0xff] }
  0x5f   : > { %803 = vst [vmem:[#allocation3 + $0x1e8] sm:$0xff] %v802_v14  ;;  %805 = vst [vmem:[#allocation3 + $0x6d0] sm:$0xff] %v804_v15  ;;  %v810_v18 = vld [vmem:[%s14569_s11 + $0x468] sm:$0xff]  ;;  %v812_v19 = vld [vmem:[%s14569_s11 + $0x470] sm:$0xff] }
  0x60   : > { %807 = vst [vmem:[#allocation3 + $0x688] sm:$0xff] %v806_v16  ;;  %809 = vst [vmem:[#allocation3 + $0x730] sm:$0xff] %v808_v17  ;;  %v814_v20 = vld [vmem:[%s14569_s11 + $0x478] sm:$0xff]  ;;  %v816_v21 = vld [vmem:[%s14569_s11 + $0x480] sm:$0xff] }
  0x61   : > { %811 = vst [vmem:[#allocation3 + $0x658] sm:$0xff] %v810_v18  ;;  %813 = vst [vmem:[#allocation3 + $0x458] sm:$0xff] %v812_v19  ;;  %v818_v22 = vld [vmem:[%s14569_s11 + $0x488] sm:$0xff]  ;;  %v820_v23 = vld [vmem:[%s14569_s11 + $0x490] sm:$0xff] }
  0x62   : > { %815 = vst [vmem:[#allocation3 + $0x1b8] sm:$0xff] %v814_v20  ;;  %817 = vst [vmem:[#allocation3 + $0x460] sm:$0xff] %v816_v21  ;;  %v822_v24 = vld [vmem:[%s14569_s11 + $0x498] sm:$0xff]  ;;  %v824_v25 = vld [vmem:[%s14569_s11 + $0x4a0] sm:$0xff] }
  0x63   : > { %819 = vst [vmem:[#allocation3 + $0x4f0] sm:$0xff] %v818_v22  ;;  %821 = vst [vmem:[#allocation3 + $0x528] sm:$0xff] %v820_v23  ;;  %v826_v26 = vld [vmem:[%s14569_s11 + $0x4a8] sm:$0xff]  ;;  %v828_v27 = vld [vmem:[%s14569_s11 + $0x4b0] sm:$0xff] }
  0x64   : > { %823 = vst [vmem:[#allocation3 + $0x258] sm:$0xff] %v822_v24  ;;  %825 = vst [vmem:[#allocation3 + $0x4d0] sm:$0xff] %v824_v25  ;;  %v830_v28 = vld [vmem:[%s14569_s11 + $0x4b8] sm:$0xff]  ;;  %v832_v29 = vld [vmem:[%s14569_s11 + $0x4c0] sm:$0xff] }
  0x65   : > { %827 = vst [vmem:[#allocation3 + $0x4f8] sm:$0xff] %v826_v26  ;;  %829 = vst [vmem:[#allocation3 + $0x78] sm:$0xff] %v828_v27  ;;  %v834_v30 = vld [vmem:[%s14569_s11 + $0x4c8] sm:$0xff]  ;;  %v836_v31 = vld [vmem:[%s14569_s11 + $0x4d0] sm:$0xff] }
  0x66   : > { %831 = vst [vmem:[#allocation3 + $0x2a0] sm:$0xff] %v830_v28  ;;  %833 = vst [vmem:[#allocation3 + $0x10] sm:$0xff] %v832_v29  ;;  %v838_v32 = vld [vmem:[%s14569_s11 + $0x4d8] sm:$0xff]  ;;  %v840_v33 = vld [vmem:[%s14569_s11 + $0x4e0] sm:$0xff] }
  0x67   : > { %835 = vst [vmem:[#allocation3 + $0x778] sm:$0xff] %v834_v30  ;;  %837 = vst [vmem:[#allocation3 + $0x7a8] sm:$0xff] %v836_v31  ;;  %v842_v34 = vld [vmem:[%s14569_s11 + $0x4e8] sm:$0xff]  ;;  %v844_v35 = vld [vmem:[%s14569_s11 + $0x4f0] sm:$0xff] }
  0x68   : > { %839 = vst [vmem:[#allocation3 + $0x530] sm:$0xff] %v838_v32  ;;  %841 = vst [vmem:[#allocation3 + $0x590] sm:$0xff] %v840_v33  ;;  %v846_v36 = vld [vmem:[%s14569_s11 + $0x4f8] sm:$0xff]  ;;  %v848_v37 = vld [vmem:[%s14569_s11 + $0x500] sm:$0xff] }
  0x69   : > { %843 = vst [vmem:[#allocation3 + $0x660] sm:$0xff] %v842_v34  ;;  %845 = vst [vmem:[#allocation3 + $0x358] sm:$0xff] %v844_v35  ;;  %v850_v38 = vld [vmem:[%s14569_s11 + $0x508] sm:$0xff]  ;;  %v852_v39 = vld [vmem:[%s14569_s11 + $0x510] sm:$0xff] }
  0x6a   : > { %847 = vst [vmem:[#allocation3 + $0x700] sm:$0xff] %v846_v36  ;;  %849 = vst [vmem:[#allocation3 + $0x340] sm:$0xff] %v848_v37  ;;  %v854_v40 = vld [vmem:[%s14569_s11 + $0x518] sm:$0xff]  ;;  %v856_v41 = vld [vmem:[%s14569_s11 + $0x520] sm:$0xff] }
  0x6b   : > { %851 = vst [vmem:[#allocation3 + $0x5a0] sm:$0xff] %v850_v38  ;;  %853 = vst [vmem:[#allocation3 + $0x3d0] sm:$0xff] %v852_v39  ;;  %v858_v42 = vld [vmem:[%s14569_s11 + $0x528] sm:$0xff]  ;;  %v860_v43 = vld [vmem:[%s14569_s11 + $0x530] sm:$0xff] }
  0x6c   : > { %855 = vst [vmem:[#allocation3 + $0x230] sm:$0xff] %v854_v40  ;;  %857 = vst [vmem:[#allocation3 + $0x560] sm:$0xff] %v856_v41  ;;  %v862_v44 = vld [vmem:[%s14569_s11 + $0x538] sm:$0xff]  ;;  %v864_v45 = vld [vmem:[%s14569_s11 + $0x540] sm:$0xff] }
  0x6d   : > { %859 = vst [vmem:[#allocation3 + $0x7f8] sm:$0xff] %v858_v42  ;;  %861 = vst [vmem:[#allocation3 + $0x4e0] sm:$0xff] %v860_v43  ;;  %v866_v46 = vld [vmem:[%s14569_s11 + $0x548] sm:$0xff]  ;;  %v868_v47 = vld [vmem:[%s14569_s11 + $0x550] sm:$0xff] }
  0x6e   : > { %863 = vst [vmem:[#allocation3 + $0x200] sm:$0xff] %v862_v44  ;;  %865 = vst [vmem:[#allocation3 + $0x468] sm:$0xff] %v864_v45  ;;  %v870_v48 = vld [vmem:[%s14569_s11 + $0x558] sm:$0xff]  ;;  %v872_v49 = vld [vmem:[%s14569_s11 + $0x560] sm:$0xff] }
  0x6f   : > { %867 = vst [vmem:[#allocation3 + $0x2a8] sm:$0xff] %v866_v46  ;;  %869 = vst [vmem:[#allocation3 + $0x1d0] sm:$0xff] %v868_v47  ;;  %v874_v50 = vld [vmem:[%s14569_s11 + $0x568] sm:$0xff]  ;;  %v876_v51 = vld [vmem:[%s14569_s11 + $0x570] sm:$0xff] }
  0x70   : > { %871 = vst [vmem:[#allocation3 + $0x510] sm:$0xff] %v870_v48  ;;  %873 = vst [vmem:[#allocation3 + $0x750] sm:$0xff] %v872_v49  ;;  %v878_v52 = vld [vmem:[%s14569_s11 + $0x578] sm:$0xff]  ;;  %v880_v53 = vld [vmem:[%s14569_s11 + $0x580] sm:$0xff] }
  0x71   : > { %875 = vst [vmem:[#allocation3 + $0x130] sm:$0xff] %v874_v50  ;;  %877 = vst [vmem:[#allocation3 + $0x28] sm:$0xff] %v876_v51  ;;  %v882_v54 = vld [vmem:[%s14569_s11 + $0x588] sm:$0xff]  ;;  %v884_v55 = vld [vmem:[%s14569_s11 + $0x590] sm:$0xff] }
  0x72   : > { %879 = vst [vmem:[#allocation3 + $0x760] sm:$0xff] %v878_v52  ;;  %881 = vst [vmem:[#allocation3 + $0x5d0] sm:$0xff] %v880_v53  ;;  %v886_v56 = vld [vmem:[%s14569_s11 + $0x598] sm:$0xff]  ;;  %v888_v57 = vld [vmem:[%s14569_s11 + $0x5a0] sm:$0xff] }
  0x73   : > { %883 = vst [vmem:[#allocation3 + $0x228] sm:$0xff] %v882_v54  ;;  %885 = vst [vmem:[#allocation3 + $0x208] sm:$0xff] %v884_v55  ;;  %v890_v58 = vld [vmem:[%s14569_s11 + $0x5a8] sm:$0xff]  ;;  %v892_v59 = vld [vmem:[%s14569_s11 + $0x5b0] sm:$0xff] }
  0x74   : > { %887 = vst [vmem:[#allocation3 + $0x290] sm:$0xff] %v886_v56  ;;  %889 = vst [vmem:[#allocation3 + $0x7a0] sm:$0xff] %v888_v57  ;;  %v894_v60 = vld [vmem:[%s14569_s11 + $0x5b8] sm:$0xff]  ;;  %v896_v61 = vld [vmem:[%s14569_s11 + $0x5c0] sm:$0xff] }
  0x75   : > { %891 = vst [vmem:[#allocation3 + $0x80] sm:$0xff] %v890_v58  ;;  %893 = vst [vmem:[#allocation3 + $0x4c8] sm:$0xff] %v892_v59  ;;  %v898_v62 = vld [vmem:[%s14569_s11 + $0x5c8] sm:$0xff]  ;;  %v900_v63 = vld [vmem:[%s14569_s11 + $0x5d0] sm:$0xff] }
  0x76   : > { %895 = vst [vmem:[#allocation3 + $0x3f0] sm:$0xff] %v894_v60  ;;  %897 = vst [vmem:[#allocation3 + $0x798] sm:$0xff] %v896_v61  ;;  %v902_v0 = vld [vmem:[%s14569_s11 + $0x5d8] sm:$0xff]  ;;  %v904_v1 = vld [vmem:[%s14569_s11 + $0x5e0] sm:$0xff] }
  0x77   : > { %899 = vst [vmem:[#allocation3 + $0x378] sm:$0xff] %v898_v62  ;;  %901 = vst [vmem:[#allocation3 + $0x160] sm:$0xff] %v900_v63  ;;  %v906_v2 = vld [vmem:[%s14569_s11 + $0x5e8] sm:$0xff]  ;;  %v908_v3 = vld [vmem:[%s14569_s11 + $0x5f0] sm:$0xff] }
  0x78   : > { %903 = vst [vmem:[#allocation3 + $0x260] sm:$0xff] %v902_v0  ;;  %905 = vst [vmem:[#allocation3 + $0x728] sm:$0xff] %v904_v1  ;;  %v910_v4 = vld [vmem:[%s14569_s11 + $0x5f8] sm:$0xff]  ;;  %v912_v5 = vld [vmem:[%s14569_s11 + $0x600] sm:$0xff] }
  0x79   : > { %907 = vst [vmem:[#allocation3 + $0x288] sm:$0xff] %v906_v2  ;;  %909 = vst [vmem:[#allocation3 + $0x188] sm:$0xff] %v908_v3  ;;  %v914_v6 = vld [vmem:[%s14569_s11 + $0x608] sm:$0xff]  ;;  %v916_v7 = vld [vmem:[%s14569_s11 + $0x610] sm:$0xff] }
  0x7a   : > { %911 = vst [vmem:[#allocation3 + $0x408] sm:$0xff] %v910_v4  ;;  %913 = vst [vmem:[#allocation3 + $0x678] sm:$0xff] %v912_v5  ;;  %v918_v8 = vld [vmem:[%s14569_s11 + $0x618] sm:$0xff]  ;;  %v920_v9 = vld [vmem:[%s14569_s11 + $0x620] sm:$0xff] }
  0x7b   : > { %915 = vst [vmem:[#allocation3 + $0x98] sm:$0xff] %v914_v6  ;;  %917 = vst [vmem:[#allocation3 + $0x470] sm:$0xff] %v916_v7  ;;  %v922_v10 = vld [vmem:[%s14569_s11 + $0x628] sm:$0xff]  ;;  %v924_v11 = vld [vmem:[%s14569_s11 + $0x630] sm:$0xff] }
  0x7c   : > { %919 = vst [vmem:[#allocation3 + $0x410] sm:$0xff] %v918_v8  ;;  %921 = vst [vmem:[#allocation3 + $0x248] sm:$0xff] %v920_v9  ;;  %v926_v12 = vld [vmem:[%s14569_s11 + $0x638] sm:$0xff]  ;;  %v928_v13 = vld [vmem:[%s14569_s11 + $0x640] sm:$0xff] }
  0x7d   : > { %923 = vst [vmem:[#allocation3 + $0x548] sm:$0xff] %v922_v10  ;;  %925 = vst [vmem:[#allocation3 + $0x220] sm:$0xff] %v924_v11  ;;  %v930_v14 = vld [vmem:[%s14569_s11 + $0x648] sm:$0xff]  ;;  %v932_v15 = vld [vmem:[%s14569_s11 + $0x650] sm:$0xff] }
  0x7e   : > { %927 = vst [vmem:[#allocation3 + $0x780] sm:$0xff] %v926_v12  ;;  %929 = vst [vmem:[#allocation3 + $0x708] sm:$0xff] %v928_v13  ;;  %v934_v16 = vld [vmem:[%s14569_s11 + $0x658] sm:$0xff]  ;;  %v936_v17 = vld [vmem:[%s14569_s11 + $0x660] sm:$0xff] }
  0x7f   : > { %931 = vst [vmem:[#allocation3 + $0x8] sm:$0xff] %v930_v14  ;;  %933 = vst [vmem:[#allocation3 + $0x428] sm:$0xff] %v932_v15  ;;  %v938_v18 = vld [vmem:[%s14569_s11 + $0x668] sm:$0xff]  ;;  %v940_v19 = vld [vmem:[%s14569_s11 + $0x670] sm:$0xff] }
  0x80   : > { %935 = vst [vmem:[#allocation3 + $0x170] sm:$0xff] %v934_v16  ;;  %937 = vst [vmem:[#allocation3 + $0x7e0] sm:$0xff] %v936_v17  ;;  %v942_v20 = vld [vmem:[%s14569_s11 + $0x678] sm:$0xff]  ;;  %v944_v21 = vld [vmem:[%s14569_s11 + $0x680] sm:$0xff] }
  0x81   : > { %939 = vst [vmem:[#allocation3 + $0x20] sm:$0xff] %v938_v18  ;;  %941 = vst [vmem:[#allocation3 + $0x308] sm:$0xff] %v940_v19  ;;  %v946_v22 = vld [vmem:[%s14569_s11 + $0x688] sm:$0xff]  ;;  %v948_v23 = vld [vmem:[%s14569_s11 + $0x690] sm:$0xff] }
  0x82   : > { %943 = vst [vmem:[#allocation3 + $0x88] sm:$0xff] %v942_v20  ;;  %945 = vst [vmem:[#allocation3 + $0x6e8] sm:$0xff] %v944_v21  ;;  %v950_v24 = vld [vmem:[%s14569_s11 + $0x698] sm:$0xff]  ;;  %v952_v25 = vld [vmem:[%s14569_s11 + $0x6a0] sm:$0xff] }
  0x83   : > { %947 = vst [vmem:[#allocation3 + $0x6b0] sm:$0xff] %v946_v22  ;;  %949 = vst [vmem:[#allocation3 + $0x300] sm:$0xff] %v948_v23  ;;  %v954_v26 = vld [vmem:[%s14569_s11 + $0x6a8] sm:$0xff]  ;;  %v956_v27 = vld [vmem:[%s14569_s11 + $0x6b0] sm:$0xff] }
  0x84   : > { %951 = vst [vmem:[#allocation3 + $0x108] sm:$0xff] %v950_v24  ;;  %953 = vst [vmem:[#allocation3 + $0x180] sm:$0xff] %v952_v25  ;;  %v958_v28 = vld [vmem:[%s14569_s11 + $0x6b8] sm:$0xff]  ;;  %v960_v29 = vld [vmem:[%s14569_s11 + $0x6c0] sm:$0xff] }
  0x85   : > { %955 = vst [vmem:[#allocation3 + $0x490] sm:$0xff] %v954_v26  ;;  %957 = vst [vmem:[#allocation3 + $0x570] sm:$0xff] %v956_v27  ;;  %v962_v30 = vld [vmem:[%s14569_s11 + $0x6c8] sm:$0xff]  ;;  %v964_v31 = vld [vmem:[%s14569_s11 + $0x6d0] sm:$0xff] }
  0x86   : > { %959 = vst [vmem:[#allocation3 + $0x500] sm:$0xff] %v958_v28  ;;  %961 = vst [vmem:[#allocation3 + $0xe8] sm:$0xff] %v960_v29  ;;  %v966_v32 = vld [vmem:[%s14569_s11 + $0x6d8] sm:$0xff]  ;;  %v968_v33 = vld [vmem:[%s14569_s11 + $0x6e0] sm:$0xff] }
  0x87   : > { %963 = vst [vmem:[#allocation3 + $0x2f0] sm:$0xff] %v962_v30  ;;  %965 = vst [vmem:[#allocation3 + $0x7e8] sm:$0xff] %v964_v31  ;;  %v970_v34 = vld [vmem:[%s14569_s11 + $0x6e8] sm:$0xff]  ;;  %v972_v35 = vld [vmem:[%s14569_s11 + $0x6f0] sm:$0xff] }
  0x88   : > { %967 = vst [vmem:[#allocation3 + $0x360] sm:$0xff] %v966_v32  ;;  %969 = vst [vmem:[#allocation3 + $0x60] sm:$0xff] %v968_v33  ;;  %v974_v36 = vld [vmem:[%s14569_s11 + $0x6f8] sm:$0xff]  ;;  %v976_v37 = vld [vmem:[%s14569_s11 + $0x700] sm:$0xff] }
  0x89   : > { %971 = vst [vmem:[#allocation3 + $0x210] sm:$0xff] %v970_v34  ;;  %973 = vst [vmem:[#allocation3 + $0x4a0] sm:$0xff] %v972_v35  ;;  %v978_v38 = vld [vmem:[%s14569_s11 + $0x708] sm:$0xff]  ;;  %v980_v39 = vld [vmem:[%s14569_s11 + $0x710] sm:$0xff] }
  0x8a   : > { %975 = vst [vmem:[#allocation3 + $0x748] sm:$0xff] %v974_v36  ;;  %977 = vst [vmem:[#allocation3 + $0x168] sm:$0xff] %v976_v37  ;;  %v982_v40 = vld [vmem:[%s14569_s11 + $0x718] sm:$0xff]  ;;  %v984_v41 = vld [vmem:[%s14569_s11 + $0x720] sm:$0xff] }
  0x8b   : > { %979 = vst [vmem:[#allocation3 + $0x668] sm:$0xff] %v978_v38  ;;  %981 = vst [vmem:[#allocation3 + $0x270] sm:$0xff] %v980_v39  ;;  %v986_v42 = vld [vmem:[%s14569_s11 + $0x728] sm:$0xff]  ;;  %v988_v43 = vld [vmem:[%s14569_s11 + $0x730] sm:$0xff] }
  0x8c   : > { %983 = vst [vmem:[#allocation3 + $0x2d8] sm:$0xff] %v982_v40  ;;  %985 = vst [vmem:[#allocation3 + $0xc8] sm:$0xff] %v984_v41  ;;  %v990_v44 = vld [vmem:[%s14569_s11 + $0x738] sm:$0xff]  ;;  %v992_v45 = vld [vmem:[%s14569_s11 + $0x740] sm:$0xff] }
  0x8d   : > { %987 = vst [vmem:[#allocation3 + $0xa0] sm:$0xff] %v986_v42  ;;  %989 = vst [vmem:[#allocation3 + $0x48] sm:$0xff] %v988_v43  ;;  %v994_v46 = vld [vmem:[%s14569_s11 + $0x748] sm:$0xff]  ;;  %v996_v47 = vld [vmem:[%s14569_s11 + $0x750] sm:$0xff] }
  0x8e   : > { %991 = vst [vmem:[#allocation3 + $0x328] sm:$0xff] %v990_v44  ;;  %993 = vst [vmem:[#allocation3 + $0x7c8] sm:$0xff] %v992_v45  ;;  %v998_v48 = vld [vmem:[%s14569_s11 + $0x758] sm:$0xff]  ;;  %v1000_v49 = vld [vmem:[%s14569_s11 + $0x760] sm:$0xff] }
  0x8f   : > { %995 = vst [vmem:[#allocation3 + $0x430] sm:$0xff] %v994_v46  ;;  %997 = vst [vmem:[#allocation3 + $0x578] sm:$0xff] %v996_v47  ;;  %v1002_v50 = vld [vmem:[%s14569_s11 + $0x768] sm:$0xff]  ;;  %v1004_v51 = vld [vmem:[%s14569_s11 + $0x770] sm:$0xff] }
  0x90   : > { %999 = vst [vmem:[#allocation3 + $0x608] sm:$0xff] %v998_v48  ;;  %1001 = vst [vmem:[#allocation3 + $0x638] sm:$0xff] %v1000_v49  ;;  %v1006_v52 = vld [vmem:[%s14569_s11 + $0x778] sm:$0xff]  ;;  %v1008_v53 = vld [vmem:[%s14569_s11 + $0x780] sm:$0xff] }
  0x91   : > { %1003 = vst [vmem:[#allocation3 + $0x4b8] sm:$0xff] %v1002_v50  ;;  %1005 = vst [vmem:[#allocation3 + $0x298] sm:$0xff] %v1004_v51  ;;  %v1010_v54 = vld [vmem:[%s14569_s11 + $0x788] sm:$0xff]  ;;  %v1012_v55 = vld [vmem:[%s14569_s11 + $0x790] sm:$0xff] }
  0x92   : > { %1007 = vst [vmem:[#allocation3 + $0x1f0] sm:$0xff] %v1006_v52  ;;  %1009 = vst [vmem:[#allocation3] sm:$0xff] %v1008_v53  ;;  %v1014_v56 = vld [vmem:[%s14569_s11 + $0x798] sm:$0xff]  ;;  %v1016_v57 = vld [vmem:[%s14569_s11 + $0x7a0] sm:$0xff] }
  0x93   : > { %1011 = vst [vmem:[#allocation3 + $0x2d0] sm:$0xff] %v1010_v54  ;;  %1013 = vst [vmem:[#allocation3 + $0x650] sm:$0xff] %v1012_v55  ;;  %v1018_v58 = vld [vmem:[%s14569_s11 + $0x7a8] sm:$0xff]  ;;  %v1020_v59 = vld [vmem:[%s14569_s11 + $0x7b0] sm:$0xff] }
  0x94   : > { %1015 = vst [vmem:[#allocation3 + $0x480] sm:$0xff] %v1014_v56  ;;  %1017 = vst [vmem:[#allocation3 + $0x3d8] sm:$0xff] %v1016_v57  ;;  %v1022_v60 = vld [vmem:[%s14569_s11 + $0x7b8] sm:$0xff]  ;;  %v1024_v61 = vld [vmem:[%s14569_s11 + $0x7c0] sm:$0xff] }
  0x95   : > { %1019 = vst [vmem:[#allocation3 + $0x718] sm:$0xff] %v1018_v58  ;;  %1021 = vst [vmem:[#allocation3 + $0x7d0] sm:$0xff] %v1020_v59  ;;  %v1026_v62 = vld [vmem:[%s14569_s11 + $0x7c8] sm:$0xff]  ;;  %v1028_v63 = vld [vmem:[%s14569_s11 + $0x7d0] sm:$0xff] }
  0x96   : > { %1023 = vst [vmem:[#allocation3 + $0x190] sm:$0xff] %v1022_v60  ;;  %1025 = vst [vmem:[#allocation3 + $0x710] sm:$0xff] %v1024_v61  ;;  %v1030_v0 = vld [vmem:[%s14569_s11 + $0x7d8] sm:$0xff]  ;;  %v1032_v1 = vld [vmem:[%s14569_s11 + $0x7e0] sm:$0xff] }
  0x97   : > { %1027 = vst [vmem:[#allocation3 + $0xa8] sm:$0xff] %v1026_v62  ;;  %1029 = vst [vmem:[#allocation3 + $0x2b8] sm:$0xff] %v1028_v63  ;;  %v1034_v2 = vld [vmem:[%s14569_s11 + $0x7e8] sm:$0xff]  ;;  %v1036_v3 = vld [vmem:[%s14569_s11 + $0x7f0] sm:$0xff] }
  0x98   : > { %1031 = vst [vmem:[#allocation3 + $0x238] sm:$0xff] %v1030_v0  ;;  %1033 = vst [vmem:[#allocation3 + $0x1b0] sm:$0xff] %v1032_v1  ;;  %v1038_v4 = vld [vmem:[%s14569_s11 + $0x7f8] sm:$0xff] }
  0x99   : > { %1035 = vst [vmem:[#allocation3 + $0x5e0] sm:$0xff] %v1034_v2  ;;  %1037 = vst [vmem:[#allocation3 + $0x580] sm:$0xff] %v1036_v3 }
  0x9a   : > { %1039 = vst [vmem:[#allocation3 + $0x150] sm:$0xff] %v1038_v4 }
  0x9b   : > { %1047 = vsyncadd [#allocation5], 32768  ;;  %v1082_v5 = vld [vmem:[%s14570_s12] sm:$0xff]  ;;  %v1084_v6 = vld [vmem:[%s14570_s12 + $0x8] sm:$0xff] }
  0x9c   : > { %1083 = vst [vmem:[#allocation4] sm:$0xff] %v1082_v5  ;;  %1085 = vst [vmem:[#allocation4 + $0x8] sm:$0xff] %v1084_v6  ;;  %v1086_v7 = vld [vmem:[%s14570_s12 + $0x10] sm:$0xff]  ;;  %v1088_v8 = vld [vmem:[%s14570_s12 + $0x18] sm:$0xff] }
  0x9d   : > { %v1090_v9 = vld [vmem:[%s14570_s12 + $0x20] sm:$0xff]  ;;  %1087 = vst [vmem:[#allocation4 + $0x10] sm:$0xff] %v1086_v7  ;;  %1089 = vst [vmem:[#allocation4 + $0x18] sm:$0xff] %v1088_v8  ;;  %v1092_v10 = vld [vmem:[%s14570_s12 + $0x28] sm:$0xff] }
  0x9e   : > { %1091 = vst [vmem:[#allocation4 + $0x20] sm:$0xff] %v1090_v9  ;;  %v1094_v11 = vld [vmem:[%s14570_s12 + $0x30] sm:$0xff]  ;;  %v1096_v12 = vld [vmem:[%s14570_s12 + $0x38] sm:$0xff]  ;;  %1093 = vst [vmem:[#allocation4 + $0x28] sm:$0xff] %v1092_v10 }
  0x9f   : > { %1095 = vst [vmem:[#allocation4 + $0x30] sm:$0xff] %v1094_v11  ;;  %1097 = vst [vmem:[#allocation4 + $0x38] sm:$0xff] %v1096_v12  ;;  %v1098_v13 = vld [vmem:[%s14570_s12 + $0x40] sm:$0xff]  ;;  %v1100_v14 = vld [vmem:[%s14570_s12 + $0x48] sm:$0xff] }
  0xa0   : > { %v1102_v15 = vld [vmem:[%s14570_s12 + $0x50] sm:$0xff]  ;;  %1099 = vst [vmem:[#allocation4 + $0x40] sm:$0xff] %v1098_v13  ;;  %1101 = vst [vmem:[#allocation4 + $0x48] sm:$0xff] %v1100_v14  ;;  %v1104_v16 = vld [vmem:[%s14570_s12 + $0x58] sm:$0xff] }
  0xa1   : > { %1103 = vst [vmem:[#allocation4 + $0x50] sm:$0xff] %v1102_v15  ;;  %v1106_v17 = vld [vmem:[%s14570_s12 + $0x60] sm:$0xff]  ;;  %v1108_v18 = vld [vmem:[%s14570_s12 + $0x68] sm:$0xff]  ;;  %1105 = vst [vmem:[#allocation4 + $0x58] sm:$0xff] %v1104_v16 }
  0xa2   : > { %1107 = vst [vmem:[#allocation4 + $0x60] sm:$0xff] %v1106_v17  ;;  %1109 = vst [vmem:[#allocation4 + $0x68] sm:$0xff] %v1108_v18  ;;  %v1110_v19 = vld [vmem:[%s14570_s12 + $0x70] sm:$0xff]  ;;  %v1112_v20 = vld [vmem:[%s14570_s12 + $0x78] sm:$0xff] }
  0xa3   : > { %v1114_v21 = vld [vmem:[%s14570_s12 + $0x80] sm:$0xff]  ;;  %1111 = vst [vmem:[#allocation4 + $0x70] sm:$0xff] %v1110_v19  ;;  %1113 = vst [vmem:[#allocation4 + $0x78] sm:$0xff] %v1112_v20  ;;  %v1116_v22 = vld [vmem:[%s14570_s12 + $0x88] sm:$0xff] }
  0xa4   : > { %1115 = vst [vmem:[#allocation4 + $0x80] sm:$0xff] %v1114_v21  ;;  %v1118_v23 = vld [vmem:[%s14570_s12 + $0x90] sm:$0xff]  ;;  %v1120_v24 = vld [vmem:[%s14570_s12 + $0x98] sm:$0xff]  ;;  %1117 = vst [vmem:[#allocation4 + $0x88] sm:$0xff] %v1116_v22 }
  0xa5   : > { %1119 = vst [vmem:[#allocation4 + $0x90] sm:$0xff] %v1118_v23  ;;  %1121 = vst [vmem:[#allocation4 + $0x98] sm:$0xff] %v1120_v24  ;;  %v1122_v25 = vld [vmem:[%s14570_s12 + $0xa0] sm:$0xff]  ;;  %v1124_v26 = vld [vmem:[%s14570_s12 + $0xa8] sm:$0xff] }
  0xa6   : > { %v1126_v27 = vld [vmem:[%s14570_s12 + $0xb0] sm:$0xff]  ;;  %1123 = vst [vmem:[#allocation4 + $0xa0] sm:$0xff] %v1122_v25  ;;  %1125 = vst [vmem:[#allocation4 + $0xa8] sm:$0xff] %v1124_v26  ;;  %v1128_v28 = vld [vmem:[%s14570_s12 + $0xb8] sm:$0xff] }
  0xa7   : > { %1127 = vst [vmem:[#allocation4 + $0xb0] sm:$0xff] %v1126_v27  ;;  %v1130_v29 = vld [vmem:[%s14570_s12 + $0xc0] sm:$0xff]  ;;  %v1132_v30 = vld [vmem:[%s14570_s12 + $0xc8] sm:$0xff]  ;;  %1129 = vst [vmem:[#allocation4 + $0xb8] sm:$0xff] %v1128_v28 }
  0xa8   : > { %1131 = vst [vmem:[#allocation4 + $0xc0] sm:$0xff] %v1130_v29  ;;  %1133 = vst [vmem:[#allocation4 + $0xc8] sm:$0xff] %v1132_v30  ;;  %v1134_v31 = vld [vmem:[%s14570_s12 + $0xd0] sm:$0xff]  ;;  %v1136_v32 = vld [vmem:[%s14570_s12 + $0xd8] sm:$0xff] }
  0xa9   : > { %v1138_v33 = vld [vmem:[%s14570_s12 + $0xe0] sm:$0xff]  ;;  %1135 = vst [vmem:[#allocation4 + $0xd0] sm:$0xff] %v1134_v31  ;;  %1137 = vst [vmem:[#allocation4 + $0xd8] sm:$0xff] %v1136_v32  ;;  %v1140_v34 = vld [vmem:[%s14570_s12 + $0xe8] sm:$0xff] }
  0xaa   : > { %1139 = vst [vmem:[#allocation4 + $0xe0] sm:$0xff] %v1138_v33  ;;  %v1142_v35 = vld [vmem:[%s14570_s12 + $0xf0] sm:$0xff]  ;;  %v1144_v36 = vld [vmem:[%s14570_s12 + $0xf8] sm:$0xff]  ;;  %1141 = vst [vmem:[#allocation4 + $0xe8] sm:$0xff] %v1140_v34 }
  0xab   : > { %1143 = vst [vmem:[#allocation4 + $0xf0] sm:$0xff] %v1142_v35  ;;  %1145 = vst [vmem:[#allocation4 + $0xf8] sm:$0xff] %v1144_v36 }
  0xac   : > { %1153 = vsyncadd [#allocation5 + $0x1], 4096 }
  0xad PF: > { %v10859_v37 = vld [vmem:[%s11875_s15 + $0x34] ss:$8 sps:$4 sm:$0xff]   ;;  %v10861_v38 = vld [vmem:[%s11875_s15 + $0x30] ss:$8 sps:$4 sm:$0xff]   ;;  %v11785_v39 = vmov 0   ;;  %v1154_v46 = vld [vmem:[#allocation2] sm:$0xff]  ;;  %v1260_v52 = vlaneseq }
  0xae   : > { %1347 = vmatprep.mubr.bf16.mxu0 %v11785_v39  ;;  %1323 = vmatprep.subr.bf16.mxu0 %v10859_v37  ;;  %v10862_v40 = vld [vmem:[%s11875_s15 + $0x24] ss:$8 sps:$4 sm:$0xff]   ;;  %v10864_v41 = vld [vmem:[%s11875_s15 + $0x20] ss:$8 sps:$4 sm:$0xff]   ;;  %v10865_v42 = vld [vmem:[%s11875_s15 + $0x14] ss:$8 sps:$4 sm:$0xff]  }
  0xaf   : > { %1324 = vmatpush1.bf16.msra.mxu0 %v10861_v38  ;;  %v10867_v43 = vld [vmem:[%s11875_s15 + $0x10] ss:$8 sps:$4 sm:$0xff]   ;;  %v10868_v44 = vld [vmem:[%s11875_s15 + $0x4] ss:$8 sps:$4 sm:$0xff]   ;;  %v10870_v45 = vld [vmem:[%s11875_s15] ss:$8 sps:$4 sm:$0xff]  }
  0xb0   : > { %1325 = vmatprep.subr.bf16.mxu0 %v10862_v40  ;;  %v1155_v47 = vld [vmem:[#allocation2 + $0x8] sm:$0xff]  ;;  %vm1308_vm1 = vcmask 523264   ;;  %v1156_v49 = vld [vmem:[#allocation2 + $0x10] sm:$0xff]  ;;  %v1157_v50 = vld [vmem:[#allocation2 + $0x18] sm:$0xff]  ;;  %v12786_v53 = vshrl.u32 %v1260_v52, 7  ;;  %s11786_s22 = smov 64  }
  0xb1   : > { %v1258_v48 = vpack.c.bf16 %v1155_v47, %v1154_v46  ;;  %v1259_v51 = vpack.c.bf16 %v1157_v50, %v1156_v49  ;;  %v12792_v55 = vld [vmem:[%s11895_s14] sm:$0xff]  ;;  %v1255_v57 = vld [vmem:[%s11895_s14 + $0x8] sm:$0xff]  ;;  %s11787_s17 = smov 32   ;;  %s11788_s19 = smov 96   ;;  %vm1496_vm2 = vcmask 261120   ;;  %vm1513_vm3 = vcmask 785408  }
  0xb2   : > { %v12789_v54 = vsub.s32 1, %v12786_v53  ;;  %v1746_v1 = vld [vmem:[%s14566_s8 + $0x60] sm:$0xff]  ;;  %v1747_v5 = vld [vmem:[%s14566_s8 + $0x68] sm:$0xff]  ;;  %p9773_p5 = scmp.ne.s32.totalorder %s11867_s26, 3 }
  0xb3   : > { %1326 = vmatpush1.bf16.msra.mxu0 %v10864_v41  ;;  %v1742_v2 = vld [vmem:[%s14566_s8 + $0x40] sm:$0xff]  ;;  %v1743_v6 = vld [vmem:[%s14566_s8 + $0x48] sm:$0xff] }
  0xb4   : > { %1327 = vmatprep.subr.bf16.mxu0 %v10865_v42  ;;  %v1263_v56 = vrot.slane %v12792_v55, %v12789_v54  ;;  %v12798_v59 = vrot.slane %v1255_v57, %v12789_v54  ;;  %v1738_v3 = vld [vmem:[%s14566_s8 + $0x20] sm:$0xff]  ;;  %v1739_v7 = vld [vmem:[%s14566_s8 + $0x28] sm:$0xff] }
  0xb5   : > { %v1734_v10 = vld [vmem:[%s14566_s8] sm:$0xff]  ;;  %v1735_v11 = vld [vmem:[%s14566_s8 + $0x8] sm:$0xff] }
  0xb7   : > { %1328 = vmatpush1.bf16.msra.mxu0 %v10867_v43 }
  0xb8   : > { %1329 = vmatprep.subr.bf16.mxu0 %v10868_v44 }
  0xbb   : > { %1330 = vmatpush1.bf16.msra.mxu0 %v10870_v45 }
  0xbe   : > { %9201 = vmatmul.mubr.msk.bf16.vlgmr.msra.gmra.mxu0 %vm1308_vm1, %v1258_v48 }
  0xbf   : > { %1357 = vmatprep.mubr.bf16.mxu0 %v11785_v39 }
  0xc6   : > { %9202 = vmatmul.mubr.msk.bf16.gmra.mxu0 %vm1308_vm1, %v1259_v51 }
 0x17e   : > { %v1349_v58 = vpop.f32.mrf.mxu0 }
 0x17f   : > { %v1350_v60 = vadd.f32 %v1349_v58, %v1263_v56 }
 0x180   : > { %v1351_v61 = vpop.f32.mrf.mxu0 }
 0x181   : > { %1372 = vrot.lane.b32.xlu0 %v1350_v60, %s11786_s22  ;;  %v1352_v62 = vadd.f32 %v1351_v61, %v12798_v59 }
 0x182   : > { %v1353_v63 = vpop.f32.mrf.mxu0 }
 0x183   : > { %v1354_v0 = vadd.f32 %v1353_v63, %v1263_v56  ;;  %v1762_v13 = vmul.f32 %v1746_v1, %v1352_v62  ;;  %v1758_v14 = vmul.f32 %v1742_v2, %v1352_v62  ;;  %v1754_v15 = vmul.f32 %v1738_v3, %v1352_v62 }
 0x184   : > { %v1355_v4 = vpop.f32.mrf.mxu0  ;;  %v1750_v21 = vmul.f32 %v1734_v10, %v1352_v62  ;;  %v1528_v10 = vld [vmem:[%s14565_s7 + $0x30] sm:$0xff] }
 0x185   : > { %v1356_v8 = vadd.f32 %v1355_v4, %v12798_v59  ;;  %1374 = vrot.lane.b32.xlu0 %v1354_v0, %s11786_s22  ;;  %v1542_v9 = vpack.c.bf16 %v1354_v0, %v1350_v60 }
 0x186   : > { %v1359_v12 = vpop.f32.mrf.mxu0 }
 0x187   : > { %v12828_v16 = vadd.f32 %v1359_v12, %v1263_v56  ;;  %10517 = vmatprep.mubr.msk.bf16.mxu1 %vm1308_vm1, %v1542_v9  ;;  %v1763_v17 = vmul.f32 %v1747_v5, %v1356_v8  ;;  %v1759_v18 = vmul.f32 %v1743_v6, %v1356_v8  ;;  %v1755_v19 = vmul.f32 %v1739_v7, %v1356_v8 }
 0x188   : > { %v12831_v20 = vpop.f32.mrf.mxu0  ;;  %v1751_v22 = vmul.f32 %v1735_v11, %v1356_v8  ;;  %v1527_v8 = vld [vmem:[%s14565_s7 + $0x28] sm:$0xff] }
 0x189   : > { %1376 = vrot.lane.b32.xlu1 %v12828_v16, %s11786_s22  ;;  %v12835_v23 = vpack.c.bf16 %v1763_v17, %v1762_v13  ;;  %v12837_v24 = vpack.c.bf16 %v1759_v18, %v1758_v14  ;;  %v12839_v25 = vpack.c.bf16 %v1755_v19, %v1754_v15  ;;  %v1529_v13 = vld [vmem:[%s14565_s7 + $0x38] sm:$0xff]  ;;  %v1526_v18 = vld [vmem:[%s14565_s7 + $0x20] sm:$0xff] }
 0x18a   : > { %v1363_v26 = vpop.f32.mrf.mxu0  ;;  %v12841_v27 = vpack.c.bf16 %v1751_v22, %v1750_v21 }
 0x18b   : > { %v12843_v28 = vadd.f32 %v1363_v26, %v1263_v56 }
 0x18d   : > { %v1543_v29 = vpack.c.bf16 %v12843_v28, %v12828_v16  ;;  %1378 = vrot.lane.b32.xlu1 %v12843_v28, %s11786_s22 }
 0x1f3   : > { %v1373_v30 = vpop.permute.xlu0 %1372 }
 0x1f4   : > { %1384 = vxpose.xlu0.b32.start [1/4] (short) (narrow) %v1373_v30, 64 }
 0x1f7   : > { %v1375_v31 = vpop.permute.xlu0 %1374 }
 0x1f8   : > { %1385 = vxpose.xlu0.b32.cont [2/4] (short) (narrow) %v1375_v31, 64 }
 0x1fb   : > { %v1377_v32 = vpop.permute.xlu1 %1376 }
 0x1fc   : > { %1386 = vxpose.xlu0.b32.cont [3/4] (short) (narrow) %v1377_v32, 64 }
 0x1ff   : > { %v1379_v33 = vpop.permute.xlu1 %1378 }
 0x200   : > { %1387 = vxpose.xlu0.b32.end [4/4] (short) (narrow) %v1379_v33, 64 }
 0x270   : > { %v12849_v34 = vpop.trf.xlu0 }
 0x274   : > { %v12851_v35 = vpop.trf.xlu0 }
 0x278   : > { %v12853_v36 = vpop.trf.xlu0 }
 0x27c   : > { %v12855_v37 = vpop.trf.xlu0 }
 0x280   : > { %v1404_v38 = vpop.trf.xlu0 }
 0x281   : > { %1432 = vrot.lane.b32.xlu1 %v1404_v38, %s11787_s17 }
 0x284   : > { %v1405_v40 = vpop.trf.xlu0 }
 0x285   : > { %1456 = vrot.lane.b32.xlu1 %v1404_v38, %s11786_s22  ;;  %1482 = vrot.lane.b32.xlu0 %v1405_v40, %s11788_s19 }
 0x288   : > { %v1406_v41 = vpop.trf.xlu0 }
 0x289   : > { %1480 = vrot.lane.b32.xlu1 %v1404_v38, %s11788_s19 }
 0x28c   : > { %v1407_v42 = vpop.trf.xlu0 }
 0x28d   : > { %1434 = vrot.lane.b32.xlu1 %v1405_v40, %s11787_s17 }
 0x291   : > { %1458 = vrot.lane.b32.xlu1 %v1405_v40, %s11786_s22 }
 0x295   : > { %1428 = vrot.lane.b32.xlu1 %v12853_v36, %s11787_s17 }
 0x299   : > { %1430 = vrot.lane.b32.xlu1 %v12855_v37, %s11787_s17 }
 0x29d   : > { %1452 = vrot.lane.b32.xlu1 %v12853_v36, %s11786_s22 }
 0x2a1   : > { %1454 = vrot.lane.b32.xlu1 %v12855_v37, %s11786_s22 }
 0x2a5   : > { %1476 = vrot.lane.b32.xlu1 %v12853_v36, %s11788_s19 }
 0x2a9   : > { %1478 = vrot.lane.b32.xlu1 %v12855_v37, %s11788_s19 }
 0x2ad   : > { %1424 = vrot.lane.b32.xlu1 %v12849_v34, %s11787_s17 }
 0x2b1   : > { %1426 = vrot.lane.b32.xlu1 %v12851_v35, %s11787_s17 }
 0x2b5   : > { %1448 = vrot.lane.b32.xlu1 %v12849_v34, %s11786_s22 }
 0x2b9   : > { %1436 = vrot.lane.b32.xlu1 %v1406_v41, %s11787_s17 }
 0x2bd   : > { %1460 = vrot.lane.b32.xlu1 %v1406_v41, %s11786_s22 }
 0x2c1   : > { %1484 = vrot.lane.b32.xlu1 %v1406_v41, %s11788_s19 }
 0x2c5   : > { %1438 = vrot.lane.b32.xlu1 %v1407_v42, %s11787_s17 }
 0x2c9   : > { %1462 = vrot.lane.b32.xlu1 %v1407_v42, %s11786_s22 }
 0x2cd   : > { %1486 = vrot.lane.b32.xlu1 %v1407_v42, %s11788_s19 }
 0x2d1   : > { %1450 = vrot.lane.b32.xlu1 %v12851_v35, %s11786_s22 }
 0x2d5   : > { %1472 = vrot.lane.b32.xlu1 %v12849_v34, %s11788_s19 }
 0x2d9   : > { %1474 = vrot.lane.b32.xlu1 %v12851_v35, %s11788_s19 }
 0x2f3   : > { %v1433_v43 = vpop.permute.xlu1 %1432 }
 0x2f4   : > { %v1501_v7 = vsel %vm1496_vm2, %v1404_v38, %v1433_v43  ;;  %v1525_v38 = vld [vmem:[%s14565_s7 + $0x18] sm:$0xff] }
 0x2f7   : > { %v1457_v44 = vpop.permute.xlu1 %1456  ;;  %v1483_v5 = vpop.permute.xlu0 %1482 }
 0x2f8   : > { %v1509_v14 = vsel %vm1308_vm1, %v1501_v7, %v1457_v44  ;;  %v1524_v44 = vld [vmem:[%s14565_s7 + $0x10] sm:$0xff] }
 0x2fb   : > { %v1481_v45 = vpop.permute.xlu1 %1480 }
 0x2fc   : > { %v1518_v19 = vsel %vm1513_vm3, %v1509_v14, %v1481_v45 }
 0x2ff   : > { %v1435_v46 = vpop.permute.xlu1 %1434 }
 0x300   : > { %v1502_v1 = vsel %vm1496_vm2, %v1405_v40, %v1435_v46 }
 0x303   : > { %v1459_v47 = vpop.permute.xlu1 %1458 }
 0x304   : > { %v1510_v2 = vsel %vm1308_vm1, %v1502_v1, %v1459_v47  ;;  %v1365_v47 = vpop.f32.mrf.mxu0  ;;  %v1748_v1 = vld [vmem:[%s14566_s8 + $0x70] sm:$0xff] }
 0x305   : > { %v1519_v9 = vsel %vm1513_vm3, %v1510_v2, %v1483_v5 }
 0x306   : > { %v1535_v26 = vmul.f32 %v1527_v8, %v1519_v9 }
 0x307   : > { %v1429_v48 = vpop.permute.xlu1 %1428 }
 0x308   : > { %v1499_v33 = vsel %vm1496_vm2, %v12853_v36, %v1429_v48 }
 0x30b   : > { %v1431_v49 = vpop.permute.xlu1 %1430 }
 0x30c   : > { %v1500_v21 = vsel %vm1496_vm2, %v12855_v37, %v1431_v49 }
 0x30f   : > { %v1453_v50 = vpop.permute.xlu1 %1452 }
 0x313   : > { %v1455_v51 = vpop.permute.xlu1 %1454 }
 0x314   : > { %v1508_v30 = vsel %vm1308_vm1, %v1500_v21, %v1455_v51 }
 0x317   : > { %v1477_v52 = vpop.permute.xlu1 %1476 }
 0x31b   : > { %v1479_v56 = vpop.permute.xlu1 %1478 }
 0x31c   : > { %v1517_v40 = vsel %vm1513_vm3, %v1508_v30, %v1479_v56 }
 0x31d   : > { %v1533_v46 = vmul.f32 %v1525_v38, %v1517_v40 }
 0x31f   : > { %v1425_v57 = vpop.permute.xlu1 %1424 }
 0x320   : > { %v1497_v51 = vsel %vm1496_vm2, %v12849_v34, %v1425_v57  ;;  %v1749_v34 = vld [vmem:[%s14566_s8 + $0x78] sm:$0xff]  ;;  %v1362_v57 = vadd.f32 %v12831_v20, %v12798_v59  ;;  %v1744_v20 = vld [vmem:[%s14566_s8 + $0x50] sm:$0xff] }
 0x322   : > { %v1760_v9 = vmul.f32 %v1744_v20, %v1362_v57 }
 0x323   : > { %v1427_v58 = vpop.permute.xlu1 %1426 }
 0x327   : > { %v1449_v60 = vpop.permute.xlu1 %1448 }
 0x328   : > { %v1505_v56 = vsel %vm1308_vm1, %v1497_v51, %v1449_v60  ;;  %v13072_v51 = vld [vmem:[%s14567_s9 + $0x10] sm:$0xff] }
 0x32b   : > { %v1437_v61 = vpop.permute.xlu1 %1436 }
 0x32c   : > { %v1503_v4 = vsel %vm1496_vm2, %v1406_v41, %v1437_v61  ;;  %v1534_v41 = vmul.f32 %v1526_v18, %v1518_v19  ;;  %v1637_v18 = vld [vmem:[%s14567_s9 + $0x70] sm:$0xff]  ;;  %v1634_v19 = vld [vmem:[%s14567_s9 + $0x58] sm:$0xff] }
 0x32e   : > { %v1540_v36 = vpack.c.bf16 %v1535_v26, %v1534_v41 }
 0x32f   : > { %v1461_v62 = vpop.permute.xlu1 %1460 }
 0x330   : > { %v1511_v6 = vsel %vm1308_vm1, %v1503_v4, %v1461_v62  ;;  %v1498_v62 = vsel %vm1496_vm2, %v12851_v35, %v1427_v58 }
 0x333   : > { %v1485_v63 = vpop.permute.xlu1 %1484 }
 0x334   : > { %v1520_v11 = vsel %vm1513_vm3, %v1511_v6, %v1485_v63  ;;  %v1764_v6 = vmul.f32 %v1748_v1, %v1362_v57 }
 0x335   : > { %v1536_v31 = vmul.f32 %v1528_v10, %v1520_v11  ;;  %v1741_v11 = vld [vmem:[%s14566_s8 + $0x38] sm:$0xff] }
 0x337   : > { %v1439_v0 = vpop.permute.xlu1 %1438 }
 0x338   : > { %v1504_v12 = vsel %vm1496_vm2, %v1407_v42, %v1439_v0  ;;  %v1507_v42 = vsel %vm1308_vm1, %v1499_v33, %v1453_v50  ;;  %v1366_v50 = vadd.f32 %v1365_v47, %v12798_v59  ;;  %v1523_v0 = vld [vmem:[%s14565_s7 + $0x8] sm:$0xff]  ;;  %v1745_v59 = vld [vmem:[%s14566_s8 + $0x58] sm:$0xff] }
 0x339   : > { %v1516_v45 = vsel %vm1513_vm3, %v1507_v42, %v1477_v52  ;;  %v1522_v52 = vld [vmem:[%s14565_s7] sm:$0xff]  ;;  %v1545_v33 = vld [vmem:[%s14564_s6 + $0x8] sm:$0xff]  ;;  %v1547_v42 = vld [vmem:[%s14564_s6 + $0x18] sm:$0xff] }
 0x33a   : > { %v1532_v48 = vmul.f32 %v1524_v44, %v1516_v45  ;;  %v1765_v4 = vmul.f32 %v1749_v34, %v1366_v50  ;;  %v1761_v8 = vmul.f32 %v1745_v59, %v1366_v50  ;;  %v1757_v16 = vmul.f32 %v1741_v11, %v1366_v50  ;;  %v13025_v44 = vld [vmem:[%s14567_s9 + $0x48] sm:$0xff]  ;;  %v13032_v45 = vld [vmem:[%s14567_s9 + $0x40] sm:$0xff]  ;;  %v10872_v59 = vld [vmem:[%s11880_s18 + $0x10] sm:$0xff]  }
 0x33b   : > { %v1463_v3 = vpop.permute.xlu1 %1462  ;;  %v13053_v47 = vld [vmem:[%s14567_s9 + $0x28] sm:$0xff] }
 0x33c   : > { %v1512_v15 = vsel %vm1308_vm1, %v1504_v12, %v1463_v3  ;;  %v1539_v61 = vpack.c.bf16 %v1533_v46, %v1532_v48  ;;  %v1773_v7 = vpack.c.bf16 %v1765_v4, %v1764_v6  ;;  %v1771_v10 = vpack.c.bf16 %v1761_v8, %v1760_v9  ;;  %v1740_v12 = vld [vmem:[%s14566_s8 + $0x30] sm:$0xff]  ;;  %v13039_v46 = vld [vmem:[%s14567_s9 + $0x38] sm:$0xff]  ;;  %v13060_v48 = vld [vmem:[%s14567_s9 + $0x20] sm:$0xff] }
 0x33d   : > { %v1756_v28 = vmul.f32 %v1740_v12, %v1362_v57 }
 0x33f   : > { %v1487_v17 = vpop.permute.xlu1 %1486 }
 0x340   : > { %v1521_v22 = vsel %vm1513_vm3, %v1512_v15, %v1487_v17 }
 0x341   : > { %v1537_v32 = vmul.f32 %v1529_v13, %v1521_v22  ;;  %v1736_v13 = vld [vmem:[%s14566_s8 + $0x10] sm:$0xff]  ;;  %v1544_v22 = vld [vmem:[%s14564_s6] sm:$0xff] }
 0x342   : > { %v1752_v15 = vmul.f32 %v1736_v13, %v1362_v57 }
 0x343   : > { %v1451_v37 = vpop.permute.xlu1 %1450  ;;  %v1541_v43 = vpack.c.bf16 %v1537_v32, %v1536_v31  ;;  %v1546_v31 = vld [vmem:[%s14564_s6 + $0x10] sm:$0xff] }
 0x344   : > { %v1506_v35 = vsel %vm1308_vm1, %v1498_v62, %v1451_v37 }
 0x345   : > { %10509 = vmatprep.subr.bf16.mxu1 %v1541_v43 }
 0x346   : > { %10510 = vmatpush3.bf16.msra.mxu1 %v1541_v43  ;;  %v13018_v43 = vld [vmem:[%s14567_s9 + $0x50] sm:$0xff] }
 0x347   : > { %v1473_v49 = vpop.permute.xlu1 %1472  ;;  %10511 = vmatprep.subr.bf16.mxu1 %v1540_v36 }
 0x348   : > { %v1514_v63 = vsel %vm1513_vm3, %v1505_v56, %v1473_v49  ;;  %v13065_v49 = vld [vmem:[%s14567_s9 + $0x18] sm:$0xff]  ;;  %v13086_v56 = vld [vmem:[%s14567_s9] sm:$0xff] }
 0x349   : > { %v1530_v2 = vmul.f32 %v1522_v52, %v1514_v63 }
 0x34a   : > { %10512 = vmatpush3.bf16.msra.mxu1 %v1540_v36  ;;  %v13046_v36 = vld [vmem:[%s14567_s9 + $0x30] sm:$0xff] }
 0x34b   : > { %v1475_v58 = vpop.permute.xlu1 %1474  ;;  %10513 = vmatprep.subr.bf16.mxu1 %v1539_v61 }
 0x34c   : > { %v1515_v60 = vsel %vm1513_vm3, %v1506_v35, %v1475_v58 }
 0x34d   : > { %v1531_v3 = vmul.f32 %v1523_v0, %v1515_v60 }
 0x34e   : > { %10514 = vmatpush3.bf16.msra.mxu1 %v1539_v61 }
 0x34f   : > { %v1538_v5 = vpack.c.bf16 %v1531_v3, %v1530_v2 }
 0x351   : > { %10515 = vmatprep.subr.bf16.mxu1 %v1538_v5 }
 0x352   : > { %10516 = vmatpush3.bf16.msra.mxu1 %v1538_v5 }
 0x353   : > { %10559 = vmatprep.subr.bf16.mxu1 %v1773_v7 }
 0x355   : > { %10518 = vmatmul.mubr.msk.bf16.vlgmr.msra.gmra.mxu1 %vm1308_vm1, %v1543_v29  ;;  %v1769_v29 = vpack.c.bf16 %v1757_v16, %v1756_v28 }
 0x356   : > { %10560 = vmatpush3.bf16.msra.mxu1 %v1773_v7  ;;  %v10871_v7 = vld [vmem:[%s11880_s18 + $0x18] sm:$0xff]  }
 0x357   : > { %10561 = vmatprep.subr.bf16.mxu1 %v12835_v23 }
 0x35a   : > { %10562 = vmatpush3.bf16.msra.mxu1 %v12835_v23  ;;  %v1737_v23 = vld [vmem:[%s14566_s8 + $0x18] sm:$0xff] }
 0x35b   : > { %10563 = vmatprep.subr.bf16.mxu1 %v1771_v10  ;;  %v1753_v14 = vmul.f32 %v1737_v23, %v1366_v50  ;;  %v13079_v50 = vld [vmem:[%s14567_s9 + $0x8] sm:$0xff] }
 0x35d   : > { %v1767_v17 = vpack.c.bf16 %v1753_v14, %v1752_v15 }
 0x35e   : > { %10564 = vmatpush3.bf16.msra.mxu1 %v1771_v10 }
 0x35f   : > { %10565 = vmatprep.subr.bf16.mxu1 %v12837_v24 }
 0x362   : > { %10566 = vmatpush3.bf16.msra.mxu1 %v12837_v24  ;;  %v12987_v24 = vld [vmem:[%s14567_s9 + $0x78] sm:$0xff] }
 0x363   : > { %10567 = vmatprep.subr.bf16.mxu1 %v1769_v29  ;;  %10521 = vmatprep.subr.mxu0 %v12987_v24 }
 0x364   : > { %10522 = vmatpush3.msra.mxu0 %v12987_v24 }
 0x365   : > { %10523 = vmatprep.subr.mxu0 %v1637_v18 }
 0x366   : > { %10568 = vmatpush3.bf16.msra.mxu1 %v1769_v29  ;;  %10524 = vmatpush3.msra.mxu0 %v1637_v18  ;;  %v10873_v18 = vld [vmem:[%s11880_s18 + $0x8] sm:$0xff]  }
 0x367   : > { %10569 = vmatprep.subr.bf16.mxu1 %v12839_v25 }
 0x36a   : > { %10570 = vmatpush3.bf16.msra.mxu1 %v12839_v25  ;;  %v1636_v25 = vld [vmem:[%s14567_s9 + $0x68] sm:$0xff] }
 0x36b   : > { %10571 = vmatprep.subr.bf16.mxu1 %v1767_v17  ;;  %10525 = vmatprep.subr.mxu0 %v1636_v25 }
 0x36c   : > { %10526 = vmatpush3.msra.mxu0 %v1636_v25  ;;  %v10874_v25 = vld [vmem:[%s11880_s18] sm:$0xff]  }
 0x36e   : > { %10572 = vmatpush3.bf16.msra.mxu1 %v1767_v17 }
 0x36f   : > { %10573 = vmatprep.subr.bf16.mxu1 %v12841_v27 }
 0x372   : > { %10574 = vmatpush3.bf16.msra.mxu1 %v12841_v27  ;;  %v1635_v27 = vld [vmem:[%s14567_s9 + $0x60] sm:$0xff] }
 0x373   : > { %10527 = vmatprep.subr.mxu0 %v1635_v27 }
 0x374   : > { %10528 = vmatpush3.msra.mxu0 %v1635_v27 }
 0x375   : > { %10529 = vmatprep.subr.mxu0 %v1634_v19 }
 0x376   : > { %10530 = vmatpush3.msra.mxu0 %v1634_v19 }
 0x377   : > { %10531 = vmatprep.subr.mxu0 %v13018_v43 }
 0x378   : > { %10532 = vmatpush3.msra.mxu0 %v13018_v43 }
 0x379   : > { %10533 = vmatprep.subr.mxu0 %v13025_v44 }
 0x37a   : > { %10534 = vmatpush3.msra.mxu0 %v13025_v44 }
 0x37b   : > { %10535 = vmatprep.subr.mxu0 %v13032_v45 }
 0x37c   : > { %10536 = vmatpush3.msra.mxu0 %v13032_v45 }
 0x37d   : > { %10537 = vmatprep.subr.mxu0 %v13039_v46 }
 0x37e   : > { %10538 = vmatpush3.msra.mxu0 %v13039_v46 }
 0x37f   : > { %10539 = vmatprep.subr.mxu0 %v13046_v36 }
 0x380   : > { %10540 = vmatpush3.msra.mxu0 %v13046_v36 }
 0x381   : > { %10541 = vmatprep.subr.mxu0 %v13053_v47 }
 0x382   : > { %10542 = vmatpush3.msra.mxu0 %v13053_v47 }
 0x383   : > { %10543 = vmatprep.subr.mxu0 %v13060_v48 }
 0x384   : > { %10544 = vmatpush3.msra.mxu0 %v13060_v48 }
 0x385   : > { %10545 = vmatprep.subr.mxu0 %v13065_v49 }
 0x386   : > { %10546 = vmatpush3.msra.mxu0 %v13065_v49 }
 0x387   : > { %10547 = vmatprep.subr.mxu0 %v13072_v51 }
 0x388   : > { %10548 = vmatpush3.msra.mxu0 %v13072_v51 }
 0x389   : > { %10549 = vmatprep.subr.mxu0 %v13079_v50 }
 0x38a   : > { %10550 = vmatpush3.msra.mxu0 %v13079_v50 }
 0x38b   : > { %10551 = vmatprep.subr.mxu0 %v13086_v56 }
 0x38c   : > { %10552 = vmatpush3.msra.mxu0 %v13086_v56 }
 0x38d   : > { %10579 = vmatprep.subr.bf16.mxu0 %v10871_v7 }
 0x415   : > { %v10519_v21 = vpop.f32.mrf.mxu1 }
 0x416   : > { %v1597_v40 = vadd.f32 %v10519_v21, %v1546_v31  ;;  %v13101_v31 = vsub.s32 2, %v12786_v53 }
 0x417   : > { %v1588_v26 = vpop.f32.mrf.mxu1 }
 0x418   : > { %v1589_v30 = vadd.f32 %v1588_v26, %v1544_v22 }
 0x419   : > { %v10520_v32 = vpop.f32.mrf.mxu1 }
 0x41a   : > { %1603 = vmax.xlane.f32.xlu1 %v1589_v30  ;;  %v1600_v37 = vadd.f32 %v10520_v32, %v1547_v42  ;;  %v1828_v32 = vrot.slane %v12792_v55, %v13101_v31 }
 0x41b   : > { %v1591_v38 = vpop.f32.mrf.mxu1 }
 0x41c   : > { %v1592_v41 = vadd.f32 %v1591_v38, %v1545_v33 }
 0x41e   : > { %1605 = vmax.xlane.f32.xlu0 %v1592_v41  ;;  %1607 = vmax.xlane.f32.xlu1 %v1597_v40 }
 0x422   : > { %1609 = vmax.xlane.f32.xlu0 %v1600_v37 }
 0x4a3   : > { %v1604_v61 = vpop.xlane.xlu1 %1603 }
 0x4a4   : > { %v1611_v62 = vsub.f32 %v1589_v30, %v1604_v61 }
 0x4a6   : > { %v1615_v52 = vmul.f32 1.442695, %v1611_v62 }
 0x4a7   : > { %v1606_v63 = vpop.xlane.xlu0 %1605  ;;  %v1608_v0 = vpop.xlane.xlu1 %1607 }
 0x4a8   : > { %11147 = vpow2.f32 %v1615_v52  ;;  %v1612_v34 = vsub.f32 %v1592_v41, %v1606_v63  ;;  %v1613_v57 = vsub.f32 %v1597_v40, %v1608_v0 }
 0x4aa   : > { %v1617_v35 = vmul.f32 1.442695, %v1612_v34  ;;  %v1619_v58 = vmul.f32 1.442695, %v1613_v57  ;;  %v11276_v34 = vld [vmem:[#allocation2 + $0x10] sm:$0xff] }
 0x4ab   : > { %v1610_v60 = vpop.xlane.xlu0 %1609 }
 0x4ac   : > { %11149 = vpow2.f32 %v1617_v35  ;;  %v1614_v1 = vsub.f32 %v1600_v37, %v1610_v60  ;;  %v11275_v37 = vld [vmem:[#allocation2] sm:$0xff]  ;;  %v11277_v35 = vld [vmem:[#allocation2 + $0x8] sm:$0xff] }
 0x4ad   : > { %11151 = vpow2.f32 %v1619_v58 }
 0x4ae   : > { %v1621_v2 = vmul.f32 1.442695, %v1614_v1 }
 0x4b0   : > { %11153 = vpow2.f32 %v1621_v2  ;;  %v11278_v2 = vld [vmem:[#allocation2 + $0x18] sm:$0xff] }
 0x4b5   : > { %v11148_v3 = vpop.eup %11147 }
 0x4b6   : > { %10553 = vmatprep.mubr.f32.mxu0 %v11148_v3 }
 0x4b9   : > { %v11150_v4 = vpop.eup %11149 }
 0x4ba   : > { %v11152_v5 = vpop.eup %11151  ;;  %10554 = vmatmul.mubr.f32.vlgmr.msra.gmra.mxu0 %v11150_v4 }
 0x4bb   : > { %10556 = vmatprep.mubr.f32.mxu0 %v11152_v5  ;;  %10580 = vmatpush3.bf16.msra.mxu0 %v10871_v7 }
 0x4bc   : > { %10581 = vmatprep.subr.bf16.mxu0 %v10872_v59 }
 0x4bd   : > { %v11154_v6 = vpop.eup %11153 }
 0x4be   : > { %10557 = vmatmul.mubr.f32.gmra.mxu0 %v11154_v6 }
 0x4bf   : > { %10582 = vmatpush3.bf16.msra.mxu0 %v10872_v59 }
 0x4c0   : > { %10583 = vmatprep.subr.bf16.mxu0 %v10873_v18 }
 0x4c3   : > { %10584 = vmatpush3.bf16.msra.mxu0 %v10873_v18 }
 0x4c4   : > { %10585 = vmatprep.subr.bf16.mxu0 %v10874_v25 }
 0x4c7   : > { %10586 = vmatpush3.bf16.msra.mxu0 %v10874_v25 }
 0x57a   : > { %v10555_v20 = vpop.f32.mrf.mxu0 }
 0x57b   : > { %11155 = vrcp.f32 %v10555_v20 }
 0x57c   : > { %v1705_v8 = vpop.f32.mrf.mxu0 }
 0x57d   : > { %11157 = vrcp.f32 %v1705_v8 }
 0x57e   : > { %v10558_v9 = vpop.f32.mrf.mxu0 }
 0x57f   : > { %11159 = vrcp.f32 %v10558_v9 }
 0x580   : > { %v1715_v10 = vpop.f32.mrf.mxu0 }
 0x581   : > { %11161 = vrcp.f32 %v1715_v10 }
 0x588   : > { %v11156_v11 = vpop.eup %11155 }
 0x589   : > { %v1729_v28 = vmul.f32 %v11156_v11, %v11150_v4 }
 0x58a   : > { %v11158_v12 = vpop.eup %11157 }
 0x58b   : > { %v1728_v16 = vmul.f32 %v11158_v12, %v11148_v3 }
 0x58c   : > { %v11160_v29 = vpop.eup %11159 }
 0x58d   : > { %v1732_v23 = vpack.c.bf16 %v1729_v28, %v1728_v16  ;;  %v1731_v15 = vmul.f32 %v11160_v29, %v11154_v6 }
 0x58e   : > { %v11162_v13 = vpop.eup %11161 }
 0x58f   : > { %10575 = vmatprep.mubr.bf16.mxu1 %v1732_v23  ;;  %v1730_v14 = vmul.f32 %v11162_v13, %v11152_v5 }
 0x591   : > { %v1733_v17 = vpack.c.bf16 %v1731_v15, %v1730_v14 }
 0x593   : > { %10576 = vmatmul.mubr.bf16.vlgmr.msra.gmra.mxu1 %v1733_v17 }
 0x594   : > { %2117 = vmatprep.mubr.bf16.mxu1 %v11785_v39 }
 0x653   : > { %v10577_v27 = vpop.f32.mrf.mxu1 }
 0x655   : > { %v1808_v19 = vpop.f32.mrf.mxu1 }
 0x657   : > { %v10578_v21 = vpop.f32.mrf.mxu1 }
 0x658   : > { %v1824_v30 = vpack.c.bf16 %v10578_v21, %v10577_v27  ;;  %v10877_v27 = vld [vmem:[%s11885_s23 + $0x64] ss:$16 sps:$4 sm:$0xff]   ;;  %v10875_v21 = vld [vmem:[%s11885_s23 + $0x60] ss:$16 sps:$4 sm:$0xff]  }
 0x659   : > { %v1811_v22 = vpop.f32.mrf.mxu1  ;;  %2093 = vmatprep.subr.bf16.mxu1 %v10877_v27 }
 0x65a   : > { %v1823_v26 = vpack.c.bf16 %v1811_v22, %v1808_v19  ;;  %v10880_v19 = vld [vmem:[%s11885_s23 + $0x6c] ss:$16 sps:$4 sm:$0xff]   ;;  %v10878_v22 = vld [vmem:[%s11885_s23 + $0x68] ss:$16 sps:$4 sm:$0xff]   ;;  %2094 = vmatpush1.bf16.msra.mxu1 %v10875_v21 }
 0x65b   : > { %2146 = vmatprep.subr.bf16.mxu0 %v10880_v19 }
 0x65c   : > { %10587 = vmatprep.mubr.msk.bf16.mxu0 %vm1308_vm1, %v1823_v26  ;;  %v10883_v26 = vld [vmem:[%s11885_s23 + $0x44] ss:$16 sps:$4 sm:$0xff]  }
 0x65d   : > { %10588 = vmatmul.mubr.msk.bf16.vlgmr.msra.gmra.mxu0 %vm1308_vm1, %v1824_v30  ;;  %v10886_v30 = vld [vmem:[%s11885_s23 + $0x4c] ss:$16 sps:$4 sm:$0xff]   ;;  %2095 = vmatprep.subr.bf16.mxu1 %v10883_v26  ;;  %v10903_v26 = vld [vmem:[%s11890_s13 + $0x70] sm:$0xff]  }
 0x65e   : > { %2170 = vmatprep.mubr.bf16.mxu0 %v11785_v39  ;;  %2147 = vmatpush1.bf16.msra.mxu0 %v10878_v22  ;;  %v10901_v22 = vld [vmem:[%s11890_s13 + $0x38] sm:$0xff]  }
 0x65f   : > { %2148 = vmatprep.subr.bf16.mxu0 %v10886_v30  ;;  %v10904_v30 = vld [vmem:[%s11890_s13 + $0xf0] sm:$0xff]  }
 0x71d   : > { %v10589_v33 = vpop.f32.mrf.mxu0 }
 0x71e   : > { %v1902_v40 = vadd.f32 %v10589_v33, %v1828_v32  ;;  %v10884_v33 = vld [vmem:[%s11885_s23 + $0x48] ss:$16 sps:$4 sm:$0xff]  }
 0x71f   : > { %v1893_v38 = vpop.f32.mrf.mxu0  ;;  %2149 = vmatpush1.bf16.msra.mxu0 %v10884_v33  ;;  %v10906_v33 = vld [vmem:[%s11890_s13 + $0xb0] sm:$0xff]  }
 0x720   : > { %v1894_v41 = vadd.f32 %v1893_v38, %v1828_v32  ;;  %v1910_v57 = vadd.f32 %v11276_v34, %v1902_v40  ;;  %v10889_v38 = vld [vmem:[%s11885_s23 + $0x24] ss:$16 sps:$4 sm:$0xff]   ;;  %v10892_v40 = vld [vmem:[%s11885_s23 + $0x2c] ss:$16 sps:$4 sm:$0xff]  }
 0x721   : > { %v10590_v42 = vpop.f32.mrf.mxu0  ;;  %2150 = vmatprep.subr.bf16.mxu0 %v10892_v40  ;;  %v10908_v40 = vld [vmem:[%s11890_s13 + $0xe8] sm:$0xff]  }
 0x722   : > { %v1908_v61 = vadd.f32 %v11275_v37, %v1894_v41  ;;  %v1905_v52 = vadd.f32 %v10590_v42, %v1828_v32  ;;  %v1918_v1 = vsel %vm1308_vm1, %v1910_v57, 0.0  ;;  %v10887_v41 = vld [vmem:[%s11885_s23 + $0x20] ss:$16 sps:$4 sm:$0xff]   ;;  %v10890_v42 = vld [vmem:[%s11885_s23 + $0x28] ss:$16 sps:$4 sm:$0xff]  }
 0x723   : > { %v1896_v62 = vpop.f32.mrf.mxu0  ;;  %v10895_v37 = vld [vmem:[%s11885_s23 + $0x4] ss:$16 sps:$4 sm:$0xff]   ;;  %2151 = vmatpush1.bf16.msra.mxu0 %v10890_v42 }
 0x724   : > { %v1897_v63 = vadd.f32 %v1896_v62, %v1828_v32  ;;  %v1912_v0 = vsel %vm1308_vm1, %v1908_v61, 0.0  ;;  %v1911_v3 = vadd.f32 %v11278_v2, %v1905_v52  ;;  %v10881_v32 = vld [vmem:[%s11885_s23 + $0x40] ss:$16 sps:$4 sm:$0xff]   ;;  %v10896_v52 = vld [vmem:[%s11885_s23 + $0x8] ss:$16 sps:$4 sm:$0xff]  }
 0x725   : > { %1913 = vadd.xlane.f32.xlu1 %v1912_v0  ;;  %2096 = vmatpush1.bf16.msra.mxu1 %v10881_v32  ;;  %v10893_v62 = vld [vmem:[%s11885_s23] ss:$16 sps:$4 sm:$0xff]   ;;  %v10900_v0 = vld [vmem:[%s11890_s13 + $0xf8] sm:$0xff]  }
 0x726   : > { %v1909_v58 = vadd.f32 %v11277_v35, %v1897_v63  ;;  %v1921_v4 = vsel %vm1308_vm1, %v1911_v3, 0.0  ;;  %2097 = vmatprep.subr.bf16.mxu1 %v10889_v38  ;;  %v10899_v63 = vld [vmem:[%s11890_s13 + $0x78] sm:$0xff]   ;;  %v10907_v38 = vld [vmem:[%s11890_s13 + $0x68] sm:$0xff]  }
 0x728   : > { %v1915_v60 = vsel %vm1308_vm1, %v1909_v58, 0.0 }
 0x729   : > { %1916 = vadd.xlane.f32.xlu0 %v1915_v60  ;;  %1919 = vadd.xlane.f32.xlu1 %v1918_v1 }
 0x72a   : > { %2098 = vmatpush1.bf16.msra.mxu1 %v10887_v41 }
 0x72b   : > { %2099 = vmatprep.subr.bf16.mxu1 %v10895_v37  ;;  %v10909_v37 = vld [vmem:[%s11890_s13 + $0x28] sm:$0xff]  }
 0x72d   : > { %1922 = vadd.xlane.f32.xlu0 %v1921_v4 }
 0x72e   : > { %2100 = vmatpush1.bf16.msra.mxu1 %v10893_v62  ;;  %v10911_v62 = vld [vmem:[%s11890_s13 + $0x60] sm:$0xff]  }
 0x72f   : > { %10115 = vmatprep.subr.bf16.mxu1 %v10899_v63  ;;  %v10913_v63 = vld [vmem:[%s11890_s13 + $0x20] sm:$0xff]  }
 0x7ae   : > { %v1914_v5 = vpop.xlane.xlu1 %1913 }
 0x7af   : > { %v1925_v6 = vmul.f32 0.015625, %v1914_v5 }
 0x7b1   : > { %v13109_v7 = vsub.f32 %v1908_v61, %v1925_v6  ;;  %v10898_v61 = vld [vmem:[%s11885_s23 + $0xc] ss:$16 sps:$4 sm:$0xff]  }
 0x7b2   : > { %v1917_v59 = vpop.xlane.xlu0 %1916  ;;  %v1920_v20 = vpop.xlane.xlu1 %1919  ;;  %2152 = vmatprep.subr.bf16.mxu0 %v10898_v61  ;;  %v10910_v61 = vld [vmem:[%s11890_s13 + $0xa8] sm:$0xff]  }
 0x7b3   : > { %v1926_v8 = vmul.f32 0.015625, %v1917_v59  ;;  %v1927_v9 = vmul.f32 0.015625, %v1920_v20  ;;  %v1933_v10 = vmul.f32 %v13109_v7, %v13109_v7  ;;  %2153 = vmatpush1.bf16.msra.mxu0 %v10896_v52  ;;  %v13148_v20 = vsub.s32 3, %v12786_v53  ;;  %v10912_v52 = vld [vmem:[%s11890_s13 + $0xe0] sm:$0xff]  }
 0x7b4   : > { %10143 = vmatprep.subr.bf16.mxu0 %v10900_v0  ;;  %v10914_v0 = vld [vmem:[%s11890_s13 + $0xa0] sm:$0xff]  }
 0x7b5   : > { %v13113_v11 = vsub.f32 %v1909_v58, %v1926_v8  ;;  %v13115_v12 = vsub.f32 %v1910_v57, %v1927_v9  ;;  %v1937_v16 = vsel %vm1308_vm1, %v1933_v10, 0.0  ;;  %v1968_v10 = vrot.slane %v12792_v55, %v13148_v20 }
 0x7b6   : > { %v1923_v28 = vpop.xlane.xlu0 %1922  ;;  %1938 = vadd.xlane.f32.xlu1 %v1937_v16  ;;  %v13154_v16 = vsub.s32 4, %v12786_v53 }
 0x7b7   : > { %v1928_v29 = vmul.f32 0.015625, %v1923_v28  ;;  %v1934_v23 = vmul.f32 %v13113_v11, %v13113_v11  ;;  %v1935_v13 = vmul.f32 %v13115_v12, %v13115_v12 }
 0x7b9   : > { %v13122_v14 = vsub.f32 %v1911_v3, %v1928_v29  ;;  %v1940_v15 = vsel %vm1308_vm1, %v1934_v23, 0.0  ;;  %v1943_v17 = vsel %vm1308_vm1, %v1935_v13, 0.0  ;;  %v1976_v13 = vrot.slane %v12792_v55, %v13154_v16  ;;  %v10902_v55 = vld [vmem:[%s11890_s13 + $0xb8] sm:$0xff]  }
 0x7ba   : > { %1941 = vadd.xlane.f32.xlu0 %v1940_v15  ;;  %1944 = vadd.xlane.f32.xlu1 %v1943_v17 }
 0x7bb   : > { %v1936_v18 = vmul.f32 %v13122_v14, %v13122_v14 }
 0x7bd   : > { %v1946_v25 = vsel %vm1308_vm1, %v1936_v18, 0.0 }
 0x7be   : > { %1947 = vadd.xlane.f32.xlu0 %v1946_v25 }
 0x83f   : > { %v1939_v34 = vpop.xlane.xlu1 %1938 }
 0x840   : > { %v1949_v57 = vmul.f32 0.015625, %v1939_v34  ;;  %v10915_v34 = vld [vmem:[%s11890_s13 + $0x58] sm:$0xff]  }
 0x842   : > { %v1953_v35 = vadd.f32 1e-05, %v1949_v57  ;;  %v10916_v57 = vld [vmem:[%s11890_s13 + $0xd8] sm:$0xff]  }
 0x843   : > { %v1942_v58 = vpop.xlane.xlu0 %1941  ;;  %v1945_v60 = vpop.xlane.xlu1 %1944 }
 0x844   : > { %11163 = vrsqrt.f32 %v1953_v35  ;;  %v1950_v1 = vmul.f32 0.015625, %v1942_v58  ;;  %v1951_v2 = vmul.f32 0.015625, %v1945_v60  ;;  %v10917_v35 = vld [vmem:[%s11890_s13 + $0x18] sm:$0xff]   ;;  %v10919_v60 = vld [vmem:[%s11890_s13 + $0x50] sm:$0xff]  }
 0x845   : > { %v10918_v58 = vld [vmem:[%s11890_s13 + $0x98] sm:$0xff]  }
 0x846   : > { %v1954_v3 = vadd.f32 1e-05, %v1950_v1  ;;  %v1955_v4 = vadd.f32 1e-05, %v1951_v2  ;;  %v10920_v1 = vld [vmem:[%s11890_s13 + $0xd0] sm:$0xff]  }
 0x847   : > { %v1948_v5 = vpop.xlane.xlu0 %1947  ;;  %v10921_v2 = vld [vmem:[%s11890_s13 + $0x10] sm:$0xff]  }
 0x848   : > { %11165 = vrsqrt.f32 %v1954_v3  ;;  %v1952_v6 = vmul.f32 0.015625, %v1948_v5  ;;  %v10922_v3 = vld [vmem:[%s11890_s13 + $0x90] sm:$0xff]   ;;  %v10924_v5 = vld [vmem:[%s11890_s13 + $0xc8] sm:$0xff]  }
 0x849   : > { %11167 = vrsqrt.f32 %v1955_v4  ;;  %v10923_v4 = vld [vmem:[%s11890_s13 + $0x48] sm:$0xff]  }
 0x84a   : > { %v1956_v59 = vadd.f32 1e-05, %v1952_v6  ;;  %v10925_v6 = vld [vmem:[%s11890_s13 + $0x8] sm:$0xff]  }
 0x84c   : > { %11169 = vrsqrt.f32 %v1956_v59  ;;  %v10926_v59 = vld [vmem:[%s11890_s13 + $0x88] sm:$0xff]  }
 0x851   : > { %v11164_v8 = vpop.eup %11163 }
 0x852   : > { %v1961_v9 = vmul.f32 %v11164_v8, %v13109_v7  ;;  %v10927_v8 = vld [vmem:[%s11890_s13 + $0x40] sm:$0xff]  }
 0x854   : > { %v1969_v23 = vmul.f32 %v1968_v10, %v1961_v9  ;;  %v10928_v9 = vld [vmem:[%s11890_s13 + $0xc0] sm:$0xff]  }
 0x855   : > { %v11166_v28 = vpop.eup %11165 }
 0x856   : > { %v1962_v29 = vmul.f32 %v11166_v28, %v13113_v11  ;;  %v11168_v15 = vpop.eup %11167  ;;  %v13159_v18 = vadd.f32 %v1976_v13, %v1969_v23  ;;  %v10930_v28 = vld [vmem:[%s11890_s13 + $0x80] sm:$0xff]   ;;  %v1257_v23 = vld [vmem:[%s11895_s14 + $0x18] sm:$0xff] }
 0x857   : > { %v1963_v27 = vmul.f32 %v11168_v15, %v13115_v12 }
 0x858   : > { %v1970_v17 = vmul.f32 %v1968_v10, %v1962_v29  ;;  %v13210_v29 = vsub.s32 0, %v12786_v53 }
 0x859   : > { %v11170_v7 = vpop.eup %11169  ;;  %v1971_v32 = vmul.f32 %v1968_v10, %v1963_v27 }
 0x85a   : > { %v13161_v25 = vadd.f32 %v1976_v13, %v1970_v17  ;;  %v1964_v19 = vmul.f32 %v11170_v7, %v13122_v14  ;;  %v10905_v14 = vld [vmem:[%s11890_s13 + $0x30] sm:$0xff]   ;;  %v11279_v7 = vld [vmem:[%s11895_s14 + $0x8] sm:$0xff] }
 0x85b   : > { %v13181_v41 = vadd.f32 %v1976_v13, %v1971_v32  ;;  %v1990_v27 = vrot.slane %v11279_v7, %v13210_v29 }
 0x85c   : > { %v1981_v11 = vpack.c.bf16 %v13161_v25, %v13159_v18  ;;  %v1972_v21 = vmul.f32 %v1968_v10, %v1964_v19  ;;  %v10929_v10 = vld [vmem:[%s11890_s13] sm:$0xff]   ;;  %v1998_v19 = vrot.slane %v1257_v23, %v13210_v29 }
 0x85e   : > { %9227 = vmatmul.mubr.msk.bf16.vlgmr.msra.gmra.mxu1 %vm1308_vm1, %v1981_v11  ;;  %9229 = vmatmul.mubr.msk.bf16.vlgmr.msra.gmra.mxu0 %vm1308_vm1, %v1981_v11  ;;  %v13175_v12 = vadd.f32 %v1976_v13, %v1972_v21  ;;  %v1256_v13 = vld [vmem:[%s11895_s14 + $0x10] sm:$0xff]  ;;  %v13218_v11 = vld [vmem:[%s11895_s14] sm:$0xff] }
 0x85f   : > { %2127 = vmatprep.mubr.bf16.mxu1 %v11785_v39  ;;  %2180 = vmatprep.mubr.bf16.mxu0 %v11785_v39  ;;  %v1986_v21 = vrot.slane %v13218_v11, %v13210_v29 }
 0x860   : > { %10116 = vmatpush3.bf16.msra.mxu1 %v10901_v22  ;;  %10144 = vmatpush3.bf16.msra.mxu0 %v10902_v55  ;;  %v1982_v42 = vpack.c.bf16 %v13175_v12, %v13181_v41  ;;  %v1994_v22 = vrot.slane %v1256_v13, %v13210_v29 }
 0x861   : > { %10117 = vmatprep.subr.bf16.mxu1 %v10903_v26  ;;  %10145 = vmatprep.subr.bf16.mxu0 %v10904_v30 }
 0x864   : > { %10118 = vmatpush3.bf16.msra.mxu1 %v10905_v14  ;;  %10146 = vmatpush3.bf16.msra.mxu0 %v10906_v33 }
 0x865   : > { %10119 = vmatprep.subr.bf16.mxu1 %v10907_v38  ;;  %10147 = vmatprep.subr.bf16.mxu0 %v10908_v40 }
 0x866   : > { %9228 = vmatmul.mubr.msk.bf16.gmra.mxu1 %vm1308_vm1, %v1982_v42  ;;  %9230 = vmatmul.mubr.msk.bf16.gmra.mxu0 %vm1308_vm1, %v1982_v42 }
 0x868   : > { %10120 = vmatpush3.bf16.msra.mxu1 %v10909_v37  ;;  %10148 = vmatpush3.bf16.msra.mxu0 %v10910_v61 }
 0x869   : > { %10121 = vmatprep.subr.bf16.mxu1 %v10911_v62  ;;  %10149 = vmatprep.subr.bf16.mxu0 %v10912_v52 }
 0x86c   : > { %10122 = vmatpush3.bf16.msra.mxu1 %v10913_v63  ;;  %10150 = vmatpush3.bf16.msra.mxu0 %v10914_v0 }
 0x86d   : > { %10123 = vmatprep.subr.bf16.mxu1 %v10915_v34  ;;  %10151 = vmatprep.subr.bf16.mxu0 %v10916_v57 }
 0x870   : > { %10124 = vmatpush3.bf16.msra.mxu1 %v10917_v35  ;;  %10152 = vmatpush3.bf16.msra.mxu0 %v10918_v58 }
 0x871   : > { %10125 = vmatprep.subr.bf16.mxu1 %v10919_v60  ;;  %10153 = vmatprep.subr.bf16.mxu0 %v10920_v1 }
 0x874   : > { %10126 = vmatpush3.bf16.msra.mxu1 %v10921_v2  ;;  %10154 = vmatpush3.bf16.msra.mxu0 %v10922_v3 }
 0x875   : > { %10127 = vmatprep.subr.bf16.mxu1 %v10923_v4  ;;  %10155 = vmatprep.subr.bf16.mxu0 %v10924_v5 }
 0x878   : > { %10128 = vmatpush3.bf16.msra.mxu1 %v10925_v6  ;;  %10156 = vmatpush3.bf16.msra.mxu0 %v10926_v59 }
 0x879   : > { %10129 = vmatprep.subr.bf16.mxu1 %v10927_v8  ;;  %10157 = vmatprep.subr.bf16.mxu0 %v10928_v9 }
 0x87c   : > { %10130 = vmatpush3.bf16.msra.mxu1 %v10929_v10  ;;  %10158 = vmatpush3.bf16.msra.mxu0 %v10930_v28 }
 0x91e   : > { %v2119_v15 = vpop.f32.mrf.mxu1  ;;  %v2172_v17 = vpop.f32.mrf.mxu0 }
 0x91f   : > { %v2120_v42 = vadd.f32 %v2119_v15, %v1986_v21  ;;  %v2173_v37 = vadd.f32 %v2172_v17, %v1994_v22 }
 0x920   : > { %v2121_v55 = vpop.f32.mrf.mxu1  ;;  %v2174_v26 = vpop.f32.mrf.mxu0 }
 0x921   : > { %v2122_v14 = vadd.f32 %v2121_v55, %v1990_v27  ;;  %v2175_v33 = vadd.f32 %v2174_v26, %v1998_v19  ;;  %v2191_v3 = vmax.f32 %v2120_v42, 0.0  ;;  %v2193_v4 = vmax.f32 %v2173_v37, 0.0 }
 0x922   : > { %v2123_v30 = vpop.f32.mrf.mxu1  ;;  %v2176_v32 = vpop.f32.mrf.mxu0 }
 0x923   : > { %v2124_v38 = vadd.f32 %v2123_v30, %v1986_v21  ;;  %v2177_v40 = vadd.f32 %v2176_v32, %v1994_v22  ;;  %v2192_v58 = vmax.f32 %v2122_v14, 0.0  ;;  %v2194_v60 = vmax.f32 %v2175_v33, 0.0 }
 0x924   : > { %v2125_v61 = vpop.f32.mrf.mxu1  ;;  %v2178_v62 = vpop.f32.mrf.mxu0 }
 0x925   : > { %v2126_v52 = vadd.f32 %v2125_v61, %v1990_v27  ;;  %v2179_v63 = vadd.f32 %v2178_v62, %v1998_v19  ;;  %v2195_v0 = vmax.f32 %v2124_v38, 0.0  ;;  %v2197_v34 = vmax.f32 %v2177_v40, 0.0 }
 0x926   : > { %v2129_v57 = vpop.f32.mrf.mxu1  ;;  %v2182_v35 = vpop.f32.mrf.mxu0 }
 0x927   : > { %v2196_v1 = vmax.f32 %v2126_v52, 0.0  ;;  %v2198_v2 = vmax.f32 %v2179_v63, 0.0  ;;  %v2207_v9 = vpack.c.bf16 %v2195_v0, %v2191_v3  ;;  %v2209_v10 = vpack.c.bf16 %v2197_v34, %v2193_v4 }
 0x928   : > { %v2131_v5 = vpop.f32.mrf.mxu1  ;;  %v2184_v6 = vpop.f32.mrf.mxu0  ;;  %v2130_v55 = vadd.f32 %v2129_v57, %v1986_v21  ;;  %v2183_v26 = vadd.f32 %v2182_v35, %v1994_v22 }
 0x929   : > { %v2208_v59 = vpack.c.bf16 %v2196_v1, %v2192_v58  ;;  %v2210_v8 = vpack.c.bf16 %v2198_v2, %v2194_v60  ;;  %v2132_v28 = vadd.f32 %v2131_v5, %v1990_v27  ;;  %v2185_v15 = vadd.f32 %v2184_v6, %v1998_v19 }
 0x92a   : > { %v2133_v23 = vpop.f32.mrf.mxu1  ;;  %v2186_v13 = vpop.f32.mrf.mxu0  ;;  %v2199_v52 = vmax.f32 %v2130_v55, 0.0  ;;  %v2201_v63 = vmax.f32 %v2183_v26, 0.0 }
 0x92b   : > { %v2134_v17 = vadd.f32 %v2133_v23, %v1986_v21  ;;  %v2187_v7 = vadd.f32 %v2186_v13, %v1994_v22  ;;  %2443 = vmatprep.mubr.bf16.mxu1 %v2208_v59  ;;  %2492 = vmatprep.mubr.bf16.mxu0 %v2210_v8  ;;  %v2200_v42 = vmax.f32 %v2132_v28, 0.0  ;;  %v2202_v37 = vmax.f32 %v2185_v15, 0.0 }
 0x92c   : > { %v2135_v30 = vpop.f32.mrf.mxu1  ;;  %v2188_v32 = vpop.f32.mrf.mxu0  ;;  %2444 = vmatmul.mubr.bf16.vlgmr.msra.gmra.mxu1 %v2207_v9  ;;  %2493 = vmatmul.mubr.bf16.vlgmr.msra.gmra.mxu0 %v2209_v10 }
 0x92d   : > { %v2136_v14 = vadd.f32 %v2135_v30, %v1990_v27  ;;  %v2189_v33 = vadd.f32 %v2188_v32, %v1998_v19  ;;  %v2203_v38 = vmax.f32 %v2134_v17, 0.0  ;;  %v2205_v40 = vmax.f32 %v2187_v7, 0.0 }
 0x92e   : > { %v13225_v27 = vsub.s32 5, %v12786_v53 }
 0x92f   : > { %v2204_v61 = vmax.f32 %v2136_v14, 0.0  ;;  %v2206_v62 = vmax.f32 %v2189_v33, 0.0  ;;  %v2211_v58 = vpack.c.bf16 %v2203_v38, %v2199_v52  ;;  %v2213_v60 = vpack.c.bf16 %v2205_v40, %v2201_v63 }
 0x930   : > { %v2218_v22 = vrot.slane %v13218_v11, %v13225_v27 }
 0x931   : > { %v2212_v0 = vpack.c.bf16 %v2204_v61, %v2200_v42  ;;  %v2214_v34 = vpack.c.bf16 %v2206_v62, %v2202_v37 }
 0x933   : > { %2451 = vmatprep.mubr.bf16.mxu1 %v2212_v0  ;;  %2500 = vmatprep.mubr.bf16.mxu0 %v2214_v34 }
 0x934   : > { %2452 = vmatmul.mubr.bf16.gmra.mxu1 %v2211_v58  ;;  %2501 = vmatmul.mubr.bf16.gmra.mxu0 %v2213_v60 }
 0x935   : > { %2774 = vmatprep.mubr.bf16.mxu1 %v11785_v39 }
 0x9ec   : > { %v10131_v19 = vpop.f32.mrf.mxu1  ;;  %v10159_v21 = vpop.f32.mrf.mxu0 }
 0x9ee   : > { %v10132_v57 = vpop.f32.mrf.mxu1  ;;  %v10160_v35 = vpop.f32.mrf.mxu0 }
 0x9ef   : > { %v10133_v1 = vadd.f32 %v10132_v57, %v10131_v19  ;;  %v10161_v5 = vadd.f32 %v10160_v35, %v10159_v21 }
 0x9f0   : > { %v10134_v2 = vpop.f32.mrf.mxu1  ;;  %v10162_v3 = vpop.f32.mrf.mxu0 }
 0x9f1   : > { %v2446_v4 = vadd.f32 %v10133_v1, %v2218_v22 }
 0x9f2   : > { %v10135_v6 = vpop.f32.mrf.mxu1  ;;  %v10163_v59 = vpop.f32.mrf.mxu0 }
 0x9f3   : > { %v2495_v8 = vadd.f32 %v10161_v5, %v2446_v4  ;;  %v10136_v9 = vadd.f32 %v10135_v6, %v10134_v2  ;;  %v10164_v13 = vadd.f32 %v10163_v59, %v10162_v3 }
 0x9f4   : > { %v10137_v10 = vpop.f32.mrf.mxu1  ;;  %v10165_v28 = vpop.f32.mrf.mxu0 }
 0x9f5   : > { %v2449_v23 = vadd.f32 %v10136_v9, %v2218_v22  ;;  %v2509_v15 = vadd.f32 %v2495_v8, %v13159_v18 }
 0x9f6   : > { %v10138_v17 = vpop.f32.mrf.mxu1  ;;  %v10166_v7 = vpop.f32.mrf.mxu0 }
 0x9f7   : > { %v2498_v55 = vadd.f32 %v10164_v13, %v2449_v23  ;;  %v10139_v26 = vadd.f32 %v10138_v17, %v10137_v10  ;;  %v2513_v30 = vsel %vm1308_vm1, %v2509_v15, 0.0  ;;  %v10167_v38 = vadd.f32 %v10166_v7, %v10165_v28  ;;  %v10931_v17 = vld [vmem:[%s11875_s15 + $0x70] ss:$8 sps:$4 sm:$0xff]   ;;  %v10936_v7 = vld [vmem:[%s11875_s15 + $0x64] ss:$8 sps:$4 sm:$0xff]  }
 0x9f8   : > { %v10168_v32 = vpop.f32.mrf.mxu0  ;;  %2514 = vadd.xlane.f32.xlu1 %v2513_v30  ;;  %v10140_v14 = vpop.f32.mrf.mxu1  ;;  %v10937_v30 = vld [vmem:[%s11875_s15 + $0x50] ss:$8 sps:$4 sm:$0xff]  }
 0x9f9   : > { %v2454_v33 = vadd.f32 %v10139_v26, %v2218_v22  ;;  %v2510_v40 = vadd.f32 %v2498_v55, %v13161_v25  ;;  %v10934_v55 = vld [vmem:[%s11875_s15 + $0x60] ss:$8 sps:$4 sm:$0xff]   ;;  %v10939_v26 = vld [vmem:[%s11875_s15 + $0x54] ss:$8 sps:$4 sm:$0xff]  }
 0x9fa   : > { %v10141_v42 = vpop.f32.mrf.mxu1  ;;  %v10169_v37 = vpop.f32.mrf.mxu0 }
 0x9fb   : > { %v2503_v61 = vadd.f32 %v10167_v38, %v2454_v33  ;;  %v10142_v62 = vadd.f32 %v10141_v42, %v10140_v14  ;;  %v2516_v52 = vsel %vm1308_vm1, %v2510_v40, 0.0  ;;  %v10170_v63 = vadd.f32 %v10169_v37, %v10168_v32  ;;  %v10940_v32 = vld [vmem:[%s11875_s15 + $0x40] ss:$8 sps:$4 sm:$0xff]   ;;  %v10942_v14 = vld [vmem:[%s11875_s15 + $0x44] ss:$8 sps:$4 sm:$0xff]  }
 0x9fc   : > { %2517 = vadd.xlane.f32.xlu0 %v2516_v52 }
 0x9fd   : > { %v2457_v18 = vadd.f32 %v10142_v62, %v2218_v22  ;;  %v2511_v0 = vadd.f32 %v2503_v61, %v13181_v41 }
 0x9ff   : > { %v2506_v34 = vadd.f32 %v10170_v63, %v2457_v18  ;;  %v2519_v58 = vsel %vm1308_vm1, %v2511_v0, 0.0 }
 0xa00   : > { %2520 = vadd.xlane.f32.xlu1 %v2519_v58 }
 0xa01   : > { %v2512_v60 = vadd.f32 %v2506_v34, %v13175_v12  ;;  %v13251_v34 = vsub.s32 6, %v12786_v53 }
 0xa03   : > { %v2522_v19 = vsel %vm1308_vm1, %v2512_v60, 0.0 }
 0xa04   : > { %2523 = vadd.xlane.f32.xlu0 %v2522_v19  ;;  %v2568_v19 = vrot.slane %v13218_v11, %v13251_v34 }
 0xa81   : > { %v2515_v25 = vpop.xlane.xlu1 %2514 }
 0xa82   : > { %v2525_v21 = vmul.f32 0.015625, %v2515_v25 }
 0xa84   : > { %v2529_v57 = vsub.f32 %v2509_v15, %v2525_v21  ;;  %v10933_v15 = vld [vmem:[%s11875_s15 + $0x74] ss:$8 sps:$4 sm:$0xff]   ;;  %v13256_v21 = vsub.s32 7, %v12786_v53 }
 0xa85   : > { %v2518_v35 = vpop.xlane.xlu0 %2517  ;;  %2750 = vmatprep.subr.bf16.mxu1 %v10933_v15 }
 0xa86   : > { %v2526_v1 = vmul.f32 0.015625, %v2518_v35  ;;  %v2533_v2 = vmul.f32 %v2529_v57, %v2529_v57  ;;  %2751 = vmatpush1.bf16.msra.mxu1 %v10931_v17 }
 0xa87   : > { %2752 = vmatprep.subr.bf16.mxu1 %v10936_v7 }
 0xa88   : > { %v2530_v3 = vsub.f32 %v2510_v40, %v2526_v1  ;;  %v2537_v22 = vsel %vm1308_vm1, %v2533_v2, 0.0 }
 0xa89   : > { %2538 = vadd.xlane.f32.xlu1 %v2537_v22  ;;  %v2521_v41 = vpop.xlane.xlu1 %2520  ;;  %v2576_v22 = vrot.slane %v13218_v11, %v13256_v21 }
 0xa8a   : > { %v2527_v4 = vmul.f32 0.015625, %v2521_v41  ;;  %v2534_v5 = vmul.f32 %v2530_v3, %v2530_v3  ;;  %2753 = vmatpush1.bf16.msra.mxu1 %v10934_v55  ;;  %v11285_v55 = vld [vmem:[%s14566_s8 + $0x60] sm:$0xff] }
 0xa8b   : > { %2754 = vmatprep.subr.bf16.mxu1 %v10939_v26 }
 0xa8c   : > { %v2531_v6 = vsub.f32 %v2511_v0, %v2527_v4  ;;  %v2540_v12 = vsel %vm1308_vm1, %v2534_v5, 0.0 }
 0xa8d   : > { %2541 = vadd.xlane.f32.xlu0 %v2540_v12  ;;  %v2524_v59 = vpop.xlane.xlu0 %2523 }
 0xa8e   : > { %v2528_v8 = vmul.f32 0.015625, %v2524_v59  ;;  %v2535_v9 = vmul.f32 %v2531_v6, %v2531_v6  ;;  %2755 = vmatpush1.bf16.msra.mxu1 %v10937_v30  ;;  %v11286_v30 = vld [vmem:[%s14566_s8 + $0x40] sm:$0xff] }
 0xa8f   : > { %2756 = vmatprep.subr.bf16.mxu1 %v10942_v14  ;;  %v11287_v14 = vld [vmem:[%s14566_s8 + $0x20] sm:$0xff] }
 0xa90   : > { %v2532_v10 = vsub.f32 %v2512_v60, %v2528_v8  ;;  %v2543_v28 = vsel %vm1308_vm1, %v2535_v9, 0.0 }
 0xa91   : > { %2544 = vadd.xlane.f32.xlu1 %v2543_v28 }
 0xa92   : > { %v2536_v23 = vmul.f32 %v2532_v10, %v2532_v10  ;;  %2757 = vmatpush1.bf16.msra.mxu1 %v10940_v32 }
 0xa93   : > { %10603 = vmatprep.subr.mxu1 %v12987_v24 }
 0xa94   : > { %v2546_v13 = vsel %vm1308_vm1, %v2536_v23, 0.0  ;;  %v11283_v23 = vld [vmem:[%s14567_s9 + $0x60] sm:$0xff] }
 0xa95   : > { %2547 = vadd.xlane.f32.xlu0 %v2546_v13  ;;  %v11284_v13 = vld [vmem:[%s14567_s9 + $0x58] sm:$0xff] }
 0xb12   : > { %v2539_v33 = vpop.xlane.xlu1 %2538 }
 0xb13   : > { %v2549_v38 = vmul.f32 0.015625, %v2539_v33 }
 0xb15   : > { %v2553_v40 = vadd.f32 1e-05, %v2549_v38 }
 0xb16   : > { %v2542_v42 = vpop.xlane.xlu0 %2541 }
 0xb17   : > { %11171 = vrsqrt.f32 %v2553_v40  ;;  %v2550_v37 = vmul.f32 0.015625, %v2542_v42  ;;  %v11288_v40 = vld [vmem:[%s14566_s8 + $0x68] sm:$0xff] }
 0xb19   : > { %v2554_v61 = vadd.f32 1e-05, %v2550_v37  ;;  %v11289_v37 = vld [vmem:[%s14566_s8 + $0x48] sm:$0xff] }
 0xb1a   : > { %v2545_v62 = vpop.xlane.xlu1 %2544 }
 0xb1b   : > { %11173 = vrsqrt.f32 %v2554_v61  ;;  %v2551_v52 = vmul.f32 0.015625, %v2545_v62  ;;  %v11290_v62 = vld [vmem:[%s14566_s8 + $0x28] sm:$0xff] }
 0xb1d   : > { %v2555_v18 = vadd.f32 1e-05, %v2551_v52 }
 0xb1e   : > { %v2548_v63 = vpop.xlane.xlu0 %2547 }
 0xb1f   : > { %11175 = vrsqrt.f32 %v2555_v18  ;;  %v2552_v0 = vmul.f32 0.015625, %v2548_v63  ;;  %v11291_v63 = vld [vmem:[%s14566_s8] sm:$0xff] }
 0xb21   : > { %v2556_v58 = vadd.f32 1e-05, %v2552_v0 }
 0xb23   : > { %11177 = vrsqrt.f32 %v2556_v58  ;;  %v11292_v58 = vld [vmem:[%s14566_s8 + $0x8] sm:$0xff] }
 0xb24   : > { %v11172_v60 = vpop.eup %11171 }
 0xb25   : > { %v2561_v25 = vmul.f32 %v11172_v60, %v2529_v57 }
 0xb27   : > { %v2569_v1 = vmul.f32 %v2568_v19, %v2561_v25 }
 0xb28   : > { %v11174_v35 = vpop.eup %11173 }
 0xb29   : > { %v2562_v2 = vmul.f32 %v11174_v35, %v2530_v3  ;;  %v13260_v5 = vadd.f32 %v2576_v22, %v2569_v1  ;;  %v11281_v3 = vld [vmem:[%s14567_s9 + $0x70] sm:$0xff] }
 0xb2b   : > { %v2570_v41 = vmul.f32 %v2568_v19, %v2562_v2 }
 0xb2c   : > { %v11176_v4 = vpop.eup %11175 }
 0xb2d   : > { %v13262_v12 = vadd.f32 %v2576_v22, %v2570_v41  ;;  %v2563_v59 = vmul.f32 %v11176_v4, %v2531_v6 }
 0xb2f   : > { %v2686_v8 = vpack.c.bf16 %v13262_v12, %v13260_v5  ;;  %v2571_v9 = vmul.f32 %v2568_v19, %v2563_v59 }
 0xb30   : > { %v11178_v57 = vpop.eup %11177 }
 0xb31   : > { %9371 = vmatmul.mubr.msk.bf16.vlgmr.msra.gmra.mxu1 %vm1308_vm1, %v2686_v8  ;;  %v2564_v53 = vmul.f32 %v11178_v57, %v2532_v10  ;;  %v13272_v6 = vadd.f32 %v2576_v22, %v2571_v9  ;;  %v11282_v10 = vld [vmem:[%s14567_s9 + $0x68] sm:$0xff] }
 0xb32   : > { %2784 = vmatprep.mubr.bf16.mxu1 %v11785_v39  ;;  %10604 = vmatpush3.msra.mxu1 %v12987_v24 }
 0xb33   : > { %v2572_v11 = vmul.f32 %v2568_v19, %v2564_v53  ;;  %10605 = vmatprep.subr.mxu1 %v11281_v3 }
 0xb34   : > { %10606 = vmatpush3.msra.mxu1 %v11281_v3 }
 0xb35   : > { %v13274_v28 = vadd.f32 %v2576_v22, %v2572_v11  ;;  %10607 = vmatprep.subr.mxu1 %v11282_v10 }
 0xb36   : > { %10608 = vmatpush3.msra.mxu1 %v11282_v10 }
 0xb37   : > { %v2687_v24 = vpack.c.bf16 %v13274_v28, %v13272_v6  ;;  %10609 = vmatprep.subr.mxu1 %v11283_v23 }
 0xb38   : > { %10610 = vmatpush3.msra.mxu1 %v11283_v23 }
 0xb39   : > { %9372 = vmatmul.mubr.msk.bf16.gmra.mxu1 %vm1308_vm1, %v2687_v24  ;;  %10611 = vmatprep.subr.mxu1 %v11284_v13 }
 0xb3a   : > { %10612 = vmatpush3.msra.mxu1 %v11284_v13 }
 0xb3b   : > { %10613 = vmatprep.subr.mxu1 %v13018_v43 }
 0xb3c   : > { %10614 = vmatpush3.msra.mxu1 %v13018_v43  ;;  %v13311_v43 = vld [vmem:[%s11895_s14 + $0x20] sm:$0xff] }
 0xb3d   : > { %10615 = vmatprep.subr.mxu1 %v13025_v44 }
 0xb3e   : > { %10616 = vmatpush3.msra.mxu1 %v13025_v44  ;;  %v2691_v44 = vrot.slane %v13311_v43, %v12789_v54 }
 0xb3f   : > { %10617 = vmatprep.subr.mxu1 %v13032_v45 }
 0xb40   : > { %10618 = vmatpush3.msra.mxu1 %v13032_v45  ;;  %v13316_v45 = vld [vmem:[%s11895_s14 + $0x28] sm:$0xff] }
 0xb41   : > { %10619 = vmatprep.subr.mxu1 %v13039_v46 }
 0xb42   : > { %10620 = vmatpush3.msra.mxu1 %v13039_v46 }
 0xb43   : > { %10621 = vmatprep.subr.mxu1 %v13046_v36 }
 0xb44   : > { %10622 = vmatpush3.msra.mxu1 %v13046_v36  ;;  %v13320_v36 = vrot.slane %v13316_v45, %v12789_v54 }
 0xb45   : > { %10623 = vmatprep.subr.mxu1 %v13053_v47 }
 0xb46   : > { %10624 = vmatpush3.msra.mxu1 %v13053_v47 }
 0xb47   : > { %10625 = vmatprep.subr.mxu1 %v13060_v48 }
 0xb48   : > { %10626 = vmatpush3.msra.mxu1 %v13060_v48 }
 0xb49   : > { %10627 = vmatprep.subr.mxu1 %v13065_v49 }
 0xb4a   : > { %10628 = vmatpush3.msra.mxu1 %v13065_v49 }
 0xb4b   : > { %10629 = vmatprep.subr.mxu1 %v13072_v51 }
 0xb4c   : > { %10630 = vmatpush3.msra.mxu1 %v13072_v51 }
 0xb4d   : > { %10631 = vmatprep.subr.mxu1 %v13079_v50 }
 0xb4e   : > { %10632 = vmatpush3.msra.mxu1 %v13079_v50 }
 0xb4f   : > { %10633 = vmatprep.subr.mxu1 %v13086_v56 }
 0xb50   : > { %10634 = vmatpush3.msra.mxu1 %v13086_v56 }
 0xbf1   : > { %v2776_v46 = vpop.f32.mrf.mxu1 }
 0xbf2   : > { %v2777_v47 = vadd.f32 %v2776_v46, %v2691_v44 }
 0xbf3   : > { %v2778_v48 = vpop.f32.mrf.mxu1 }
 0xbf4   : > { %2799 = vrot.lane.b32.xlu1 %v2777_v47, %s11786_s22  ;;  %v2779_v49 = vadd.f32 %v2778_v48, %v13320_v36 }
 0xbf5   : > { %v2780_v51 = vpop.f32.mrf.mxu1 }
 0xbf6   : > { %v2781_v50 = vadd.f32 %v2780_v51, %v2691_v44  ;;  %v3143_v26 = vmul.f32 %v11285_v55, %v2779_v49  ;;  %v3139_v32 = vmul.f32 %v11286_v30, %v2779_v49  ;;  %v3135_v33 = vmul.f32 %v11287_v14, %v2779_v49 }
 0xbf7   : > { %v2782_v56 = vpop.f32.mrf.mxu1  ;;  %v3131_v0 = vmul.f32 %v11291_v63, %v2779_v49 }
 0xbf8   : > { %v2959_v15 = vpack.c.bf16 %v2781_v50, %v2777_v47  ;;  %v2783_v17 = vadd.f32 %v2782_v56, %v13320_v36  ;;  %2801 = vrot.lane.b32.xlu0 %v2781_v50, %s11786_s22 }
 0xbf9   : > { %v2786_v7 = vpop.f32.mrf.mxu1 }
 0xbfa   : > { %v13335_v38 = vadd.f32 %v2786_v7, %v2691_v44  ;;  %10599 = vmatprep.mubr.msk.bf16.mxu0 %vm1308_vm1, %v2959_v15  ;;  %v3144_v42 = vmul.f32 %v11288_v40, %v2783_v17  ;;  %v3140_v61 = vmul.f32 %v11289_v37, %v2783_v17  ;;  %v3136_v52 = vmul.f32 %v11290_v62, %v2783_v17 }
 0xbfb   : > { %v13347_v18 = vpop.f32.mrf.mxu1  ;;  %v3132_v60 = vmul.f32 %v11292_v58, %v2783_v17 }
 0xbfc   : > { %2803 = vrot.lane.b32.xlu1 %v13335_v38, %s11786_s22  ;;  %v13357_v19 = vpack.c.bf16 %v3144_v42, %v3143_v26  ;;  %v13359_v25 = vpack.c.bf16 %v3140_v61, %v3139_v32  ;;  %v13361_v35 = vpack.c.bf16 %v3136_v52, %v3135_v33 }
 0xbfd   : > { %v2790_v1 = vpop.f32.mrf.mxu1  ;;  %v13363_v2 = vpack.c.bf16 %v3132_v60, %v3131_v0 }
 0xbfe   : > { %v13365_v22 = vadd.f32 %v2790_v1, %v2691_v44 }
 0xc00   : > { %v2960_v41 = vpack.c.bf16 %v13365_v22, %v13335_v38  ;;  %2805 = vrot.lane.b32.xlu1 %v13365_v22, %s11786_s22  ;;  %v11305_v38 = vld [vmem:[%s14566_s8 + $0x38] sm:$0xff] }
 0xc66   : > { %v2800_v4 = vpop.permute.xlu1 %2799 }
 0xc67   : > { %2811 = vxpose.xlu0.b32.start [1/4] (short) (narrow) %v2800_v4, 64 }
 0xc6a   : > { %v2802_v59 = vpop.permute.xlu0 %2801 }
 0xc6b   : > { %2812 = vxpose.xlu0.b32.cont [2/4] (short) (narrow) %v2802_v59, 64 }
 0xc6e   : > { %v2804_v8 = vpop.permute.xlu1 %2803 }
 0xc6f   : > { %2813 = vxpose.xlu0.b32.cont [3/4] (short) (narrow) %v2804_v8, 64 }
 0xc72   : > { %v2806_v57 = vpop.permute.xlu1 %2805 }
 0xc73   : > { %2814 = vxpose.xlu0.b32.end [4/4] (short) (narrow) %v2806_v57, 64 }
 0xce3   : > { %v13371_v53 = vpop.trf.xlu0 }
 0xce7   : > { %v13373_v9 = vpop.trf.xlu0 }
 0xceb   : > { %v13375_v11 = vpop.trf.xlu0 }
 0xcef   : > { %v2830_v3 = vpop.trf.xlu0 }
 0xcf3   : > { %v2831_v10 = vpop.trf.xlu0 }
 0xcf4   : > { %2859 = vrot.lane.b32.xlu1 %v2831_v10, %s11787_s17 }
 0xcf7   : > { %v2832_v24 = vpop.trf.xlu0 }
 0xcf8   : > { %2883 = vrot.lane.b32.xlu1 %v2831_v10, %s11786_s22  ;;  %2909 = vrot.lane.b32.xlu0 %v2832_v24, %s11788_s19 }
 0xcfb   : > { %v2833_v23 = vpop.trf.xlu0 }
 0xcfc   : > { %2907 = vrot.lane.b32.xlu1 %v2831_v10, %s11788_s19 }
 0xcff   : > { %v2834_v13 = vpop.trf.xlu0 }
 0xd00   : > { %2861 = vrot.lane.b32.xlu1 %v2832_v24, %s11787_s17 }
 0xd04   : > { %2885 = vrot.lane.b32.xlu1 %v2832_v24, %s11786_s22 }
 0xd08   : > { %2855 = vrot.lane.b32.xlu1 %v13375_v11, %s11787_s17 }
 0xd0c   : > { %2857 = vrot.lane.b32.xlu1 %v2830_v3, %s11787_s17 }
 0xd10   : > { %2879 = vrot.lane.b32.xlu1 %v13375_v11, %s11786_s22 }
 0xd14   : > { %2881 = vrot.lane.b32.xlu1 %v2830_v3, %s11786_s22 }
 0xd18   : > { %2903 = vrot.lane.b32.xlu1 %v13375_v11, %s11788_s19 }
 0xd1c   : > { %2905 = vrot.lane.b32.xlu1 %v2830_v3, %s11788_s19 }
 0xd20   : > { %2851 = vrot.lane.b32.xlu1 %v13371_v53, %s11787_s17 }
 0xd24   : > { %2853 = vrot.lane.b32.xlu1 %v13373_v9, %s11787_s17 }
 0xd28   : > { %2875 = vrot.lane.b32.xlu1 %v13371_v53, %s11786_s22 }
 0xd2c   : > { %2863 = vrot.lane.b32.xlu1 %v2833_v23, %s11787_s17 }
 0xd30   : > { %2887 = vrot.lane.b32.xlu1 %v2833_v23, %s11786_s22 }
 0xd34   : > { %2911 = vrot.lane.b32.xlu1 %v2833_v23, %s11788_s19 }
 0xd38   : > { %2865 = vrot.lane.b32.xlu1 %v2834_v13, %s11787_s17 }
 0xd3c   : > { %2889 = vrot.lane.b32.xlu1 %v2834_v13, %s11786_s22 }
 0xd40   : > { %2913 = vrot.lane.b32.xlu1 %v2834_v13, %s11788_s19 }
 0xd44   : > { %2877 = vrot.lane.b32.xlu1 %v13373_v9, %s11786_s22 }
 0xd48   : > { %2899 = vrot.lane.b32.xlu1 %v13371_v53, %s11788_s19 }
 0xd4c   : > { %2901 = vrot.lane.b32.xlu1 %v13373_v9, %s11788_s19 }
 0xd66   : > { %v2860_v44 = vpop.permute.xlu1 %2859 }
 0xd67   : > { %v2927_v0 = vsel %vm1496_vm2, %v2831_v10, %v2860_v44  ;;  %v11293_v10 = vld [vmem:[%s14565_s7 + $0x28] sm:$0xff] }
 0xd6a   : > { %v2884_v46 = vpop.permute.xlu1 %2883  ;;  %v2910_v52 = vpop.permute.xlu0 %2909 }
 0xd6b   : > { %v2935_v4 = vsel %vm1308_vm1, %v2927_v0, %v2884_v46 }
 0xd6e   : > { %v2908_v47 = vpop.permute.xlu1 %2907 }
 0xd6f   : > { %v2943_v57 = vsel %vm1513_vm3, %v2935_v4, %v2908_v47  ;;  %v11295_v47 = vld [vmem:[%s14565_s7 + $0x38] sm:$0xff] }
 0xd72   : > { %v2862_v48 = vpop.permute.xlu1 %2861 }
 0xd73   : > { %v2928_v42 = vsel %vm1496_vm2, %v2832_v24, %v2862_v48 }
 0xd76   : > { %v2886_v49 = vpop.permute.xlu1 %2885 }
 0xd77   : > { %v2936_v37 = vsel %vm1308_vm1, %v2928_v42, %v2886_v49 }
 0xd78   : > { %v2944_v58 = vsel %vm1513_vm3, %v2936_v37, %v2910_v52  ;;  %v11297_v37 = vld [vmem:[%s14565_s7 + $0x18] sm:$0xff] }
 0xd79   : > { %v2952_v44 = vmul.f32 %v11293_v10, %v2944_v58  ;;  %v11303_v10 = vld [vmem:[%s14566_s8 + $0x58] sm:$0xff] }
 0xd7a   : > { %v2856_v51 = vpop.permute.xlu1 %2855 }
 0xd7e   : > { %v2858_v50 = vpop.permute.xlu1 %2857 }
 0xd7f   : > { %v2926_v24 = vsel %vm1496_vm2, %v2830_v3, %v2858_v50  ;;  %v2925_v3 = vsel %vm1496_vm2, %v13375_v11, %v2856_v51  ;;  %v2792_v51 = vpop.f32.mrf.mxu1 }
 0xd82   : > { %v2880_v56 = vpop.permute.xlu1 %2879 }
 0xd86   : > { %v2882_v15 = vpop.permute.xlu1 %2881 }
 0xd87   : > { %v2934_v48 = vsel %vm1308_vm1, %v2926_v24, %v2882_v15 }
 0xd8a   : > { %v2904_v17 = vpop.permute.xlu1 %2903 }
 0xd8e   : > { %v2906_v7 = vpop.permute.xlu1 %2905 }
 0xd8f   : > { %v2942_v50 = vsel %vm1513_vm3, %v2934_v48, %v2906_v7  ;;  %v11298_v7 = vld [vmem:[%s14565_s7 + $0x10] sm:$0xff] }
 0xd90   : > { %v11304_v48 = vld [vmem:[%s14566_s8 + $0x50] sm:$0xff] }
 0xd92   : > { %v2852_v55 = vpop.permute.xlu1 %2851 }
 0xd96   : > { %v2854_v26 = vpop.permute.xlu1 %2853 }
 0xd97   : > { %v2924_v58 = vsel %vm1496_vm2, %v13373_v9, %v2854_v26  ;;  %v11300_v9 = vld [vmem:[%s14565_s7 + $0x8] sm:$0xff] }
 0xd9a   : > { %v2876_v30 = vpop.permute.xlu1 %2875 }
 0xd9e   : > { %v2864_v32 = vpop.permute.xlu1 %2863 }
 0xd9f   : > { %v2929_v62 = vsel %vm1496_vm2, %v2833_v23, %v2864_v32  ;;  %v11296_v32 = vld [vmem:[%s14565_s7 + $0x20] sm:$0xff] }
 0xda0   : > { %v2951_v15 = vmul.f32 %v11296_v32, %v2943_v57  ;;  %v11302_v57 = vld [vmem:[%s14566_s8 + $0x70] sm:$0xff] }
 0xda2   : > { %v2888_v14 = vpop.permute.xlu1 %2887  ;;  %v2957_v11 = vpack.c.bf16 %v2952_v44, %v2951_v15 }
 0xda3   : > { %v2937_v63 = vsel %vm1308_vm1, %v2929_v62, %v2888_v14  ;;  %v2933_v14 = vsel %vm1308_vm1, %v2925_v3, %v2880_v56  ;;  %v2923_v56 = vsel %vm1496_vm2, %v13371_v53, %v2852_v55  ;;  %v11299_v55 = vld [vmem:[%s14565_s7] sm:$0xff] }
 0xda4   : > { %v2941_v42 = vsel %vm1513_vm3, %v2933_v14, %v2904_v17  ;;  %v2793_v17 = vadd.f32 %v2792_v51, %v13320_v36  ;;  %v11312_v51 = vld [vmem:[%s14564_s6 + $0x18] sm:$0xff] }
 0xda5   : > { %v2949_v62 = vmul.f32 %v11298_v7, %v2941_v42 }
 0xda6   : > { %v2912_v33 = vpop.permute.xlu1 %2911  ;;  %v3142_v44 = vmul.f32 %v11303_v10, %v2793_v17  ;;  %v3138_v22 = vmul.f32 %v11305_v38, %v2793_v17 }
 0xda7   : > { %v2945_v60 = vsel %vm1513_vm3, %v2937_v63, %v2912_v33  ;;  %v2931_v63 = vsel %vm1308_vm1, %v2923_v56, %v2876_v30 }
 0xdaa   : > { %v2866_v40 = vpop.permute.xlu1 %2865 }
 0xdab   : > { %v2930_v1 = vsel %vm1496_vm2, %v2834_v13, %v2866_v40  ;;  %v11294_v13 = vld [vmem:[%s14565_s7 + $0x30] sm:$0xff] }
 0xdac   : > { %v2953_v46 = vmul.f32 %v11294_v13, %v2945_v60 }
 0xdae   : > { %v2890_v61 = vpop.permute.xlu1 %2889 }
 0xdaf   : > { %v2938_v59 = vsel %vm1308_vm1, %v2930_v1, %v2890_v61  ;;  %v2950_v61 = vmul.f32 %v11297_v37, %v2942_v50  ;;  %v2789_v1 = vadd.f32 %v13347_v18, %v13320_v36  ;;  %v11301_v36 = vld [vmem:[%s14566_s8 + $0x78] sm:$0xff]  ;;  %v11308_v50 = vld [vmem:[%s14566_s8 + $0x10] sm:$0xff] }
 0xdb0   : > { %v3146_v18 = vmul.f32 %v11301_v36, %v2793_v17  ;;  %v10943_v36 = vld [vmem:[%s11880_s18 + $0x38] sm:$0xff]  }
 0xdb1   : > { %v2956_v0 = vpack.c.bf16 %v2950_v61, %v2949_v62  ;;  %v3145_v24 = vmul.f32 %v11302_v57, %v2789_v1  ;;  %v3141_v13 = vmul.f32 %v11304_v48, %v2789_v1  ;;  %v3133_v32 = vmul.f32 %v11308_v50, %v2789_v1  ;;  %10661 = vmatprep.subr.bf16.mxu1 %v10943_v36 }
 0xdb2   : > { %v2914_v8 = vpop.permute.xlu1 %2913 }
 0xdb3   : > { %v2946_v23 = vsel %vm1513_vm3, %v2938_v59, %v2914_v8 }
 0xdb4   : > { %v2954_v49 = vmul.f32 %v11295_v47, %v2946_v23  ;;  %v3154_v23 = vpack.c.bf16 %v3146_v18, %v3145_v24  ;;  %v10944_v18 = vld [vmem:[%s11880_s18 + $0x30] sm:$0xff]  }
 0xdb6   : > { %v2878_v33 = vpop.permute.xlu1 %2877  ;;  %v2958_v40 = vpack.c.bf16 %v2954_v49, %v2953_v46  ;;  %v3152_v46 = vpack.c.bf16 %v3142_v44, %v3141_v13 }
 0xdb7   : > { %v2932_v4 = vsel %vm1308_vm1, %v2924_v58, %v2878_v33  ;;  %v11309_v33 = vld [vmem:[%s14564_s6] sm:$0xff] }
 0xdb8   : > { %10591 = vmatprep.subr.bf16.mxu0 %v2958_v40 }
 0xdb9   : > { %10592 = vmatpush3.bf16.msra.mxu0 %v2958_v40 }
 0xdba   : > { %v2900_v52 = vpop.permute.xlu1 %2899  ;;  %10593 = vmatprep.subr.bf16.mxu0 %v2957_v11 }
 0xdbb   : > { %v2939_v60 = vsel %vm1513_vm3, %v2931_v63, %v2900_v52 }
 0xdbc   : > { %v2947_v30 = vmul.f32 %v11299_v55, %v2939_v60 }
 0xdbd   : > { %10594 = vmatpush3.bf16.msra.mxu0 %v2957_v11  ;;  %v11311_v11 = vld [vmem:[%s14564_s6 + $0x8] sm:$0xff] }
 0xdbe   : > { %v2902_v59 = vpop.permute.xlu1 %2901  ;;  %10595 = vmatprep.subr.bf16.mxu0 %v2956_v0 }
 0xdbf   : > { %v2940_v53 = vsel %vm1513_vm3, %v2932_v4, %v2902_v59 }
 0xdc0   : > { %v2948_v26 = vmul.f32 %v11300_v9, %v2940_v53 }
 0xdc1   : > { %10596 = vmatpush3.bf16.msra.mxu0 %v2956_v0 }
 0xdc2   : > { %v2955_v8 = vpack.c.bf16 %v2948_v26, %v2947_v30 }
 0xdc4   : > { %10597 = vmatprep.subr.bf16.mxu0 %v2955_v8 }
 0xdc5   : > { %10598 = vmatpush3.bf16.msra.mxu0 %v2955_v8 }
 0xdc6   : > { %10641 = vmatprep.subr.bf16.mxu0 %v3154_v23 }
 0xdc8   : > { %10600 = vmatmul.mubr.msk.bf16.vlgmr.msra.gmra.mxu0 %vm1308_vm1, %v2960_v41  ;;  %v11306_v41 = vld [vmem:[%s14566_s8 + $0x30] sm:$0xff] }
 0xdc9   : > { %10642 = vmatpush3.bf16.msra.mxu0 %v3154_v23  ;;  %v3137_v47 = vmul.f32 %v11306_v41, %v2789_v1 }
 0xdca   : > { %10643 = vmatprep.subr.bf16.mxu0 %v13357_v19 }
 0xdcb   : > { %v3150_v49 = vpack.c.bf16 %v3138_v22, %v3137_v47 }
 0xdcd   : > { %10644 = vmatpush3.bf16.msra.mxu0 %v13357_v19  ;;  %v11307_v19 = vld [vmem:[%s14566_s8 + $0x18] sm:$0xff] }
 0xdce   : > { %10645 = vmatprep.subr.bf16.mxu0 %v3152_v46  ;;  %v3134_v3 = vmul.f32 %v11307_v19, %v2793_v17  ;;  %v10945_v19 = vld [vmem:[%s11880_s18 + $0x28] sm:$0xff]  }
 0xdd0   : > { %v3148_v15 = vpack.c.bf16 %v3134_v3, %v3133_v32  ;;  %v10946_v3 = vld [vmem:[%s11880_s18 + $0x20] sm:$0xff]  }
 0xdd1   : > { %10646 = vmatpush3.bf16.msra.mxu0 %v3152_v46 }
 0xdd2   : > { %10647 = vmatprep.subr.bf16.mxu0 %v13359_v25 }
 0xdd5   : > { %10648 = vmatpush3.bf16.msra.mxu0 %v13359_v25 }
 0xdd6   : > { %10649 = vmatprep.subr.bf16.mxu0 %v3150_v49 }
 0xdd9   : > { %10650 = vmatpush3.bf16.msra.mxu0 %v3150_v49 }
 0xdda   : > { %10651 = vmatprep.subr.bf16.mxu0 %v13361_v35 }
 0xddd   : > { %10652 = vmatpush3.bf16.msra.mxu0 %v13361_v35  ;;  %v11310_v35 = vld [vmem:[%s14564_s6 + $0x10] sm:$0xff] }
 0xdde   : > { %10653 = vmatprep.subr.bf16.mxu0 %v3148_v15 }
 0xde1   : > { %10654 = vmatpush3.bf16.msra.mxu0 %v3148_v15 }
 0xde2   : > { %10655 = vmatprep.subr.bf16.mxu0 %v13363_v2 }
 0xde5   : > { %10656 = vmatpush3.bf16.msra.mxu0 %v13363_v2 }
 0xe88   : > { %v10601_v25 = vpop.f32.mrf.mxu0 }
 0xe89   : > { %v3010_v61 = vadd.f32 %v11310_v35, %v10601_v25 }
 0xe8a   : > { %v3001_v14 = vpop.f32.mrf.mxu0 }
 0xe8b   : > { %v3002_v40 = vadd.f32 %v11309_v33, %v3001_v14 }
 0xe8c   : > { %v10602_v42 = vpop.f32.mrf.mxu0 }
 0xe8d   : > { %3016 = vmax.xlane.f32.xlu1 %v3002_v40  ;;  %v3013_v7 = vadd.f32 %v11312_v51, %v10602_v42 }
 0xe8e   : > { %v3004_v37 = vpop.f32.mrf.mxu0 }
 0xe8f   : > { %v3005_v2 = vadd.f32 %v11311_v11, %v3004_v37 }
 0xe91   : > { %3018 = vmax.xlane.f32.xlu0 %v3005_v2  ;;  %3020 = vmax.xlane.f32.xlu1 %v3010_v61 }
 0xe95   : > { %3022 = vmax.xlane.f32.xlu0 %v3013_v7 }
 0xf16   : > { %v3017_v62 = vpop.xlane.xlu1 %3016 }
 0xf17   : > { %v3024_v52 = vsub.f32 %v3002_v40, %v3017_v62  ;;  %v3209_v40 = vrot.slane %v13311_v43, %v13101_v31 }
 0xf19   : > { %v3028_v56 = vmul.f32 1.442695, %v3024_v52 }
 0xf1a   : > { %v3019_v17 = vpop.xlane.xlu0 %3018  ;;  %v3021_v63 = vpop.xlane.xlu1 %3020 }
 0xf1b   : > { %11179 = vpow2.f32 %v3028_v56  ;;  %v3025_v0 = vsub.f32 %v3005_v2, %v3019_v17  ;;  %v3026_v58 = vsub.f32 %v3010_v61, %v3021_v63 }
 0xf1d   : > { %v3030_v60 = vmul.f32 1.442695, %v3025_v0  ;;  %v3032_v1 = vmul.f32 1.442695, %v3026_v58 }
 0xf1e   : > { %v3023_v4 = vpop.xlane.xlu0 %3022 }
 0xf1f   : > { %11181 = vpow2.f32 %v3030_v60  ;;  %v3027_v59 = vsub.f32 %v3013_v7, %v3023_v4 }
 0xf20   : > { %11183 = vpow2.f32 %v3032_v1 }
 0xf21   : > { %v3034_v53 = vmul.f32 1.442695, %v3027_v59 }
 0xf23   : > { %11185 = vpow2.f32 %v3034_v53 }
 0xf28   : > { %v11180_v55 = vpop.eup %11179 }
 0xf29   : > { %10635 = vmatprep.mubr.f32.mxu1 %v11180_v55 }
 0xf2c   : > { %v11182_v30 = vpop.eup %11181 }
 0xf2d   : > { %v11184_v9 = vpop.eup %11183  ;;  %10636 = vmatmul.mubr.f32.vlgmr.msra.gmra.mxu1 %v11182_v30 }
 0xf2e   : > { %10638 = vmatprep.mubr.f32.mxu1 %v11184_v9  ;;  %10662 = vmatpush3.bf16.msra.mxu1 %v10943_v36 }
 0xf2f   : > { %10663 = vmatprep.subr.bf16.mxu1 %v10944_v18 }
 0xf30   : > { %v11186_v26 = vpop.eup %11185 }
 0xf31   : > { %10639 = vmatmul.mubr.f32.gmra.mxu1 %v11186_v26 }
 0xf32   : > { %10664 = vmatpush3.bf16.msra.mxu1 %v10944_v18 }
 0xf33   : > { %10665 = vmatprep.subr.bf16.mxu1 %v10945_v19 }
 0xf36   : > { %10666 = vmatpush3.bf16.msra.mxu1 %v10945_v19  ;;  %v10961_v19 = vld [vmem:[%s11885_s23 + $0xa4] ss:$16 sps:$4 sm:$0xff]  }
 0xf37   : > { %10667 = vmatprep.subr.bf16.mxu1 %v10946_v3 }
 0xf3a   : > { %10668 = vmatpush3.bf16.msra.mxu1 %v10946_v3  ;;  %v10964_v3 = vld [vmem:[%s11885_s23 + $0xac] ss:$16 sps:$4 sm:$0xff]  }
 0xfed   : > { %v10637_v8 = vpop.f32.mrf.mxu1 }
 0xfee   : > { %11187 = vrcp.f32 %v10637_v8 }
 0xfef   : > { %v3102_v57 = vpop.f32.mrf.mxu1 }
 0xff0   : > { %11189 = vrcp.f32 %v3102_v57 }
 0xff1   : > { %v10640_v24 = vpop.f32.mrf.mxu1 }
 0xff2   : > { %11191 = vrcp.f32 %v10640_v24 }
 0xff3   : > { %v3112_v23 = vpop.f32.mrf.mxu1 }
 0xff4   : > { %11193 = vrcp.f32 %v3112_v23 }
 0xffb   : > { %v11188_v10 = vpop.eup %11187 }
 0xffc   : > { %v3126_v13 = vmul.f32 %v11188_v10, %v11182_v30 }
 0xffd   : > { %v11190_v44 = vpop.eup %11189 }
 0xffe   : > { %v3125_v48 = vmul.f32 %v11190_v44, %v11180_v55 }
 0xfff   : > { %v11192_v46 = vpop.eup %11191 }
0x1000   : > { %v3129_v38 = vpack.c.bf16 %v3126_v13, %v3125_v48  ;;  %v3128_v47 = vmul.f32 %v11192_v46, %v11186_v26  ;;  %v10949_v48 = vld [vmem:[%s11885_s23 + $0xe4] ss:$16 sps:$4 sm:$0xff]   ;;  %v10952_v13 = vld [vmem:[%s11885_s23 + $0xec] ss:$16 sps:$4 sm:$0xff]   ;;  %v10947_v46 = vld [vmem:[%s11885_s23 + $0xe0] ss:$16 sps:$4 sm:$0xff]  }
0x1001   : > { %v11194_v22 = vpop.eup %11193  ;;  %3473 = vmatprep.subr.bf16.mxu0 %v10949_v48  ;;  %3526 = vmatprep.subr.bf16.mxu1 %v10952_v13  ;;  %v10978_v48 = vld [vmem:[%s11890_s13 + $0x1b0] sm:$0xff]   ;;  %v10979_v13 = vld [vmem:[%s11890_s13 + $0x168] sm:$0xff]  }
0x1002   : > { %10657 = vmatprep.mubr.bf16.mxu0 %v3129_v38  ;;  %v3127_v41 = vmul.f32 %v11194_v22, %v11184_v9  ;;  %v10950_v38 = vld [vmem:[%s11885_s23 + $0xe8] ss:$16 sps:$4 sm:$0xff]   ;;  %v10955_v22 = vld [vmem:[%s11885_s23 + $0xc4] ss:$16 sps:$4 sm:$0xff]  }
0x1004   : > { %v3130_v49 = vpack.c.bf16 %v3128_v47, %v3127_v41  ;;  %v10958_v41 = vld [vmem:[%s11885_s23 + $0xcc] ss:$16 sps:$4 sm:$0xff]   ;;  %v10953_v47 = vld [vmem:[%s11885_s23 + $0xc0] ss:$16 sps:$4 sm:$0xff]  }
0x1006   : > { %10658 = vmatmul.mubr.bf16.vlgmr.msra.gmra.mxu0 %v3130_v49  ;;  %v10956_v49 = vld [vmem:[%s11885_s23 + $0xc8] ss:$16 sps:$4 sm:$0xff]  }
0x1007   : > { %3497 = vmatprep.mubr.bf16.mxu0 %v11785_v39  ;;  %3474 = vmatpush1.bf16.msra.mxu0 %v10947_v46  ;;  %v10980_v46 = vld [vmem:[%s11890_s13 + $0x1e8] sm:$0xff]  }
0x1008   : > { %3475 = vmatprep.subr.bf16.mxu0 %v10955_v22 }
0x100b   : > { %3476 = vmatpush1.bf16.msra.mxu0 %v10953_v47  ;;  %v10982_v47 = vld [vmem:[%s11890_s13 + $0x1a8] sm:$0xff]  }
0x100c   : > { %3477 = vmatprep.subr.bf16.mxu0 %v10961_v19  ;;  %v10984_v19 = vld [vmem:[%s11890_s13 + $0x1e0] sm:$0xff]  }
0x10c6   : > { %v10659_v50 = vpop.f32.mrf.mxu0 }
0x10c8   : > { %v3189_v32 = vpop.f32.mrf.mxu0 }
0x10ca   : > { %v10660_v15 = vpop.f32.mrf.mxu0 }
0x10cb   : > { %v3205_v33 = vpack.c.bf16 %v10660_v15, %v10659_v50  ;;  %v10959_v50 = vld [vmem:[%s11885_s23 + $0xa0] ss:$16 sps:$4 sm:$0xff]   ;;  %v10967_v15 = vld [vmem:[%s11885_s23 + $0x84] ss:$16 sps:$4 sm:$0xff]  }
0x10cc   : > { %v3192_v25 = vpop.f32.mrf.mxu0  ;;  %3478 = vmatpush1.bf16.msra.mxu0 %v10959_v50  ;;  %v10986_v50 = vld [vmem:[%s11890_s13 + $0x1a0] sm:$0xff]  }
0x10cd   : > { %v3204_v14 = vpack.c.bf16 %v3192_v25, %v3189_v32  ;;  %v10962_v32 = vld [vmem:[%s11885_s23 + $0xa8] ss:$16 sps:$4 sm:$0xff]   ;;  %v10970_v25 = vld [vmem:[%s11885_s23 + $0x8c] ss:$16 sps:$4 sm:$0xff]   ;;  %3479 = vmatprep.subr.bf16.mxu0 %v10967_v15 }
0x10ce   : > { %v10988_v15 = vld [vmem:[%s11890_s13 + $0x1d8] sm:$0xff]  }
0x10cf   : > { %10669 = vmatprep.mubr.msk.bf16.mxu1 %vm1308_vm1, %v3204_v14  ;;  %v10965_v14 = vld [vmem:[%s11885_s23 + $0x80] ss:$16 sps:$4 sm:$0xff]  }
0x10d0   : > { %10670 = vmatmul.mubr.msk.bf16.vlgmr.msra.gmra.mxu1 %vm1308_vm1, %v3205_v33  ;;  %v10968_v33 = vld [vmem:[%s11885_s23 + $0x88] ss:$16 sps:$4 sm:$0xff]   ;;  %3480 = vmatpush1.bf16.msra.mxu0 %v10965_v14 }
0x10d1   : > { %3550 = vmatprep.mubr.bf16.mxu1 %v11785_v39  ;;  %3527 = vmatpush1.bf16.msra.mxu1 %v10950_v38  ;;  %v10990_v14 = vld [vmem:[%s11890_s13 + $0x198] sm:$0xff]  }
0x10d2   : > { %3528 = vmatprep.subr.bf16.mxu1 %v10958_v41  ;;  %v10981_v41 = vld [vmem:[%s11890_s13 + $0x128] sm:$0xff]  }
0x10d5   : > { %3529 = vmatpush1.bf16.msra.mxu1 %v10956_v49  ;;  %v10983_v49 = vld [vmem:[%s11890_s13 + $0x160] sm:$0xff]  }
0x10d6   : > { %3530 = vmatprep.subr.bf16.mxu1 %v10964_v3  ;;  %v10985_v3 = vld [vmem:[%s11890_s13 + $0x120] sm:$0xff]  }
0x10d9   : > { %3531 = vmatpush1.bf16.msra.mxu1 %v10962_v32  ;;  %v10987_v32 = vld [vmem:[%s11890_s13 + $0x158] sm:$0xff]  }
0x10da   : > { %3532 = vmatprep.subr.bf16.mxu1 %v10970_v25  ;;  %v10989_v25 = vld [vmem:[%s11890_s13 + $0x118] sm:$0xff]  }
0x10dd   : > { %3533 = vmatpush1.bf16.msra.mxu1 %v10968_v33  ;;  %v10991_v33 = vld [vmem:[%s11890_s13 + $0x150] sm:$0xff]  }
0x1190   : > { %v10671_v42 = vpop.f32.mrf.mxu1 }
0x1191   : > { %v3283_v35 = vadd.f32 %v10671_v42, %v3209_v40  ;;  %v10972_v42 = vld [vmem:[%s11890_s13 + $0x1f8] sm:$0xff]  }
0x1192   : > { %v3274_v37 = vpop.f32.mrf.mxu1  ;;  %10241 = vmatprep.subr.bf16.mxu1 %v10972_v42  ;;  %v10993_v42 = vld [vmem:[%s11890_s13 + $0x110] sm:$0xff]  }
0x1193   : > { %v3275_v61 = vadd.f32 %v3274_v37, %v3209_v40  ;;  %v3291_v7 = vadd.f32 %v3283_v35, %v13272_v6 }
0x1194   : > { %v10672_v11 = vpop.f32.mrf.mxu1 }
0x1195   : > { %v3289_v2 = vadd.f32 %v3275_v61, %v13260_v5  ;;  %v3286_v62 = vadd.f32 %v10672_v11, %v3209_v40  ;;  %v3299_v0 = vsel %vm1308_vm1, %v3291_v7, 0.0 }
0x1196   : > { %v3277_v51 = vpop.f32.mrf.mxu1 }
0x1197   : > { %v3278_v52 = vadd.f32 %v3277_v51, %v3209_v40  ;;  %v3293_v56 = vsel %vm1308_vm1, %v3289_v2, 0.0  ;;  %v3292_v58 = vadd.f32 %v3286_v62, %v13274_v28  ;;  %v10971_v40 = vld [vmem:[%s11890_s13 + $0x178] sm:$0xff]  }
0x1198   : > { %3294 = vadd.xlane.f32.xlu1 %v3293_v56  ;;  %10213 = vmatprep.subr.bf16.mxu0 %v10971_v40  ;;  %v10992_v40 = vld [vmem:[%s11890_s13 + $0x1d0] sm:$0xff]  }
0x1199   : > { %v3290_v17 = vadd.f32 %v3278_v52, %v13262_v12  ;;  %v3302_v5 = vsel %vm1308_vm1, %v3292_v58, 0.0 }
0x119b   : > { %v3296_v63 = vsel %vm1308_vm1, %v3290_v17, 0.0 }
0x119c   : > { %3297 = vadd.xlane.f32.xlu0 %v3296_v63  ;;  %3300 = vadd.xlane.f32.xlu1 %v3299_v0 }
0x11a0   : > { %3303 = vadd.xlane.f32.xlu0 %v3302_v5  ;;  %v3348_v5 = vrot.slane %v13311_v43, %v13148_v20 }
0x1221   : > { %v3295_v60 = vpop.xlane.xlu1 %3294 }
0x1222   : > { %v3305_v6 = vmul.f32 0.015625, %v3295_v60 }
0x1224   : > { %v13530_v1 = vsub.f32 %v3289_v2, %v3305_v6 }
0x1225   : > { %v3298_v4 = vpop.xlane.xlu0 %3297  ;;  %v3301_v59 = vpop.xlane.xlu1 %3300 }
0x1226   : > { %v3306_v53 = vmul.f32 0.015625, %v3298_v4  ;;  %v3307_v55 = vmul.f32 0.015625, %v3301_v59  ;;  %v3313_v12 = vmul.f32 %v13530_v1, %v13530_v1  ;;  %v3356_v59 = vrot.slane %v13311_v43, %v13154_v16 }
0x1228   : > { %v13534_v30 = vsub.f32 %v3290_v17, %v3306_v53  ;;  %v13536_v28 = vsub.f32 %v3291_v7, %v3307_v55  ;;  %v3317_v9 = vsel %vm1308_vm1, %v3313_v12, 0.0 }
0x1229   : > { %v3304_v26 = vpop.xlane.xlu0 %3303  ;;  %3318 = vadd.xlane.f32.xlu1 %v3317_v9 }
0x122a   : > { %v3308_v36 = vmul.f32 0.015625, %v3304_v26  ;;  %v3314_v18 = vmul.f32 %v13534_v30, %v13534_v30  ;;  %v3315_v8 = vmul.f32 %v13536_v28, %v13536_v28 }
0x122c   : > { %v13543_v57 = vsub.f32 %v3292_v58, %v3308_v36  ;;  %v3320_v24 = vsel %vm1308_vm1, %v3314_v18, 0.0  ;;  %v3323_v23 = vsel %vm1308_vm1, %v3315_v8, 0.0  ;;  %v10973_v8 = vld [vmem:[%s11890_s13 + $0x138] sm:$0xff]  }
0x122d   : > { %3321 = vadd.xlane.f32.xlu0 %v3320_v24  ;;  %3324 = vadd.xlane.f32.xlu1 %v3323_v23  ;;  %v10974_v24 = vld [vmem:[%s11890_s13 + $0x1b8] sm:$0xff]   ;;  %v10975_v23 = vld [vmem:[%s11890_s13 + $0x170] sm:$0xff]  }
0x122e   : > { %v3316_v10 = vmul.f32 %v13543_v57, %v13543_v57 }
0x1230   : > { %v3326_v44 = vsel %vm1308_vm1, %v3316_v10, 0.0  ;;  %v10976_v10 = vld [vmem:[%s11890_s13 + $0x1f0] sm:$0xff]  }
0x1231   : > { %3327 = vadd.xlane.f32.xlu0 %v3326_v44 }
0x12b2   : > { %v3319_v37 = vpop.xlane.xlu1 %3318 }
0x12b3   : > { %v3329_v35 = vmul.f32 0.015625, %v3319_v37  ;;  %v10994_v37 = vld [vmem:[%s11890_s13 + $0x190] sm:$0xff]  }
0x12b5   : > { %v3333_v61 = vadd.f32 1e-05, %v3329_v35  ;;  %v10995_v35 = vld [vmem:[%s11890_s13 + $0x148] sm:$0xff]  }
0x12b6   : > { %v3322_v11 = vpop.xlane.xlu0 %3321  ;;  %v3325_v2 = vpop.xlane.xlu1 %3324 }
0x12b7   : > { %11195 = vrsqrt.f32 %v3333_v61  ;;  %v3330_v51 = vmul.f32 0.015625, %v3322_v11  ;;  %v3331_v7 = vmul.f32 0.015625, %v3325_v2  ;;  %v10996_v61 = vld [vmem:[%s11890_s13 + $0x1c8] sm:$0xff]  }
0x12b8   : > { %v10997_v11 = vld [vmem:[%s11890_s13 + $0x108] sm:$0xff]  }
0x12b9   : > { %v3334_v62 = vadd.f32 1e-05, %v3330_v51  ;;  %v3335_v52 = vadd.f32 1e-05, %v3331_v7  ;;  %v10998_v2 = vld [vmem:[%s11890_s13 + $0x188] sm:$0xff]   ;;  %v10999_v51 = vld [vmem:[%s11890_s13 + $0x140] sm:$0xff]  }
0x12ba   : > { %v3328_v56 = vpop.xlane.xlu0 %3327  ;;  %v11000_v7 = vld [vmem:[%s11890_s13 + $0x1c0] sm:$0xff]  }
0x12bb   : > { %11197 = vrsqrt.f32 %v3334_v62  ;;  %v3332_v17 = vmul.f32 0.015625, %v3328_v56  ;;  %v11001_v62 = vld [vmem:[%s11890_s13 + $0x100] sm:$0xff]   ;;  %v9362_v56 = vld [vmem:[%s11895_s14 + $0x38] sm:$0xff] }
0x12bc   : > { %11199 = vrsqrt.f32 %v3335_v52  ;;  %v11002_v52 = vld [vmem:[%s11890_s13 + $0x180] sm:$0xff]  }
0x12bd   : > { %v3336_v63 = vadd.f32 1e-05, %v3332_v17  ;;  %v9361_v17 = vld [vmem:[%s11895_s14 + $0x30] sm:$0xff] }
0x12bf   : > { %11201 = vrsqrt.f32 %v3336_v63 }
0x12c4   : > { %v11196_v0 = vpop.eup %11195 }
0x12c5   : > { %v3341_v58 = vmul.f32 %v11196_v0, %v13530_v1 }
0x12c7   : > { %v3349_v4 = vmul.f32 %v3348_v5, %v3341_v58  ;;  %v3370_v58 = vrot.slane %v13316_v45, %v13210_v29 }
0x12c8   : > { %v11198_v60 = vpop.eup %11197 }
0x12c9   : > { %v3342_v6 = vmul.f32 %v11198_v60, %v13534_v30  ;;  %v11200_v53 = vpop.eup %11199  ;;  %v13574_v9 = vadd.f32 %v3356_v59, %v3349_v4  ;;  %v3366_v60 = vrot.slane %v13311_v43, %v13210_v29 }
0x12ca   : > { %v3343_v1 = vmul.f32 %v11200_v53, %v13536_v28 }
0x12cb   : > { %v3350_v55 = vmul.f32 %v3348_v5, %v3342_v6  ;;  %v3374_v6 = vrot.slane %v9361_v17, %v13210_v29 }
0x12cc   : > { %v11202_v12 = vpop.eup %11201  ;;  %v3351_v44 = vmul.f32 %v3348_v5, %v3343_v1 }
0x12cd   : > { %v13576_v26 = vadd.f32 %v3356_v59, %v3350_v55  ;;  %v3344_v36 = vmul.f32 %v11202_v12, %v13543_v57  ;;  %v10977_v57 = vld [vmem:[%s11890_s13 + $0x130] sm:$0xff]  }
0x12ce   : > { %v13596_v38 = vadd.f32 %v3356_v59, %v3351_v44 }
0x12cf   : > { %v3361_v30 = vpack.c.bf16 %v13576_v26, %v13574_v9  ;;  %v3352_v18 = vmul.f32 %v3348_v5, %v3344_v36  ;;  %v3378_v5 = vrot.slane %v9362_v56, %v13210_v29 }
0x12d1   : > { %9397 = vmatmul.mubr.msk.bf16.vlgmr.msra.gmra.mxu0 %vm1308_vm1, %v3361_v30  ;;  %9399 = vmatmul.mubr.msk.bf16.vlgmr.msra.gmra.mxu1 %vm1308_vm1, %v3361_v30  ;;  %v13590_v28 = vadd.f32 %v3356_v59, %v3352_v18 }
0x12d2   : > { %3507 = vmatprep.mubr.bf16.mxu0 %v11785_v39  ;;  %3560 = vmatprep.mubr.bf16.mxu1 %v11785_v39 }
0x12d3   : > { %10214 = vmatpush3.bf16.msra.mxu0 %v10973_v8  ;;  %10242 = vmatpush3.bf16.msra.mxu1 %v10974_v24  ;;  %v3362_v22 = vpack.c.bf16 %v13590_v28, %v13596_v38 }
0x12d4   : > { %10215 = vmatprep.subr.bf16.mxu0 %v10975_v23  ;;  %10243 = vmatprep.subr.bf16.mxu1 %v10976_v10 }
0x12d7   : > { %10216 = vmatpush3.bf16.msra.mxu0 %v10977_v57  ;;  %10244 = vmatpush3.bf16.msra.mxu1 %v10978_v48 }
0x12d8   : > { %10217 = vmatprep.subr.bf16.mxu0 %v10979_v13  ;;  %10245 = vmatprep.subr.bf16.mxu1 %v10980_v46 }
0x12d9   : > { %9398 = vmatmul.mubr.msk.bf16.gmra.mxu0 %vm1308_vm1, %v3362_v22  ;;  %9400 = vmatmul.mubr.msk.bf16.gmra.mxu1 %vm1308_vm1, %v3362_v22 }
0x12db   : > { %10218 = vmatpush3.bf16.msra.mxu0 %v10981_v41  ;;  %10246 = vmatpush3.bf16.msra.mxu1 %v10982_v47 }
0x12dc   : > { %10219 = vmatprep.subr.bf16.mxu0 %v10983_v49  ;;  %10247 = vmatprep.subr.bf16.mxu1 %v10984_v19 }
0x12df   : > { %10220 = vmatpush3.bf16.msra.mxu0 %v10985_v3  ;;  %10248 = vmatpush3.bf16.msra.mxu1 %v10986_v50 }
0x12e0   : > { %10221 = vmatprep.subr.bf16.mxu0 %v10987_v32  ;;  %10249 = vmatprep.subr.bf16.mxu1 %v10988_v15 }
0x12e3   : > { %10222 = vmatpush3.bf16.msra.mxu0 %v10989_v25  ;;  %10250 = vmatpush3.bf16.msra.mxu1 %v10990_v14 }
0x12e4   : > { %10223 = vmatprep.subr.bf16.mxu0 %v10991_v33  ;;  %10251 = vmatprep.subr.bf16.mxu1 %v10992_v40 }
0x12e7   : > { %10224 = vmatpush3.bf16.msra.mxu0 %v10993_v42  ;;  %10252 = vmatpush3.bf16.msra.mxu1 %v10994_v37 }
0x12e8   : > { %10225 = vmatprep.subr.bf16.mxu0 %v10995_v35  ;;  %10253 = vmatprep.subr.bf16.mxu1 %v10996_v61 }
0x12eb   : > { %10226 = vmatpush3.bf16.msra.mxu0 %v10997_v11  ;;  %10254 = vmatpush3.bf16.msra.mxu1 %v10998_v2 }
0x12ec   : > { %10227 = vmatprep.subr.bf16.mxu0 %v10999_v51  ;;  %10255 = vmatprep.subr.bf16.mxu1 %v11000_v7 }
0x12ef   : > { %10228 = vmatpush3.bf16.msra.mxu0 %v11001_v62  ;;  %10256 = vmatpush3.bf16.msra.mxu1 %v11002_v52 }
0x1391   : > { %v3499_v63 = vpop.f32.mrf.mxu0  ;;  %v3552_v0 = vpop.f32.mrf.mxu1 }
0x1392   : > { %v3500_v18 = vadd.f32 %v3499_v63, %v3366_v60  ;;  %v3553_v8 = vadd.f32 %v3552_v0, %v3374_v6 }
0x1393   : > { %v3501_v4 = vpop.f32.mrf.mxu0  ;;  %v3554_v59 = vpop.f32.mrf.mxu1 }
0x1394   : > { %v3502_v12 = vadd.f32 %v3501_v4, %v3370_v58  ;;  %v3555_v1 = vadd.f32 %v3554_v59, %v3378_v5  ;;  %v3571_v49 = vmax.f32 %v3500_v18, 0.0  ;;  %v3573_v19 = vmax.f32 %v3553_v8, 0.0 }
0x1395   : > { %v3503_v53 = vpop.f32.mrf.mxu0  ;;  %v3556_v55 = vpop.f32.mrf.mxu1 }
0x1396   : > { %v3504_v36 = vadd.f32 %v3503_v53, %v3366_v60  ;;  %v3557_v30 = vadd.f32 %v3556_v55, %v3374_v6  ;;  %v3572_v46 = vmax.f32 %v3502_v12, 0.0  ;;  %v3574_v22 = vmax.f32 %v3555_v1, 0.0 }
0x1397   : > { %v3505_v24 = vpop.f32.mrf.mxu0  ;;  %v3558_v23 = vpop.f32.mrf.mxu1 }
0x1398   : > { %v3506_v45 = vadd.f32 %v3505_v24, %v3370_v58  ;;  %v3559_v10 = vadd.f32 %v3558_v23, %v3378_v5  ;;  %v3575_v44 = vmax.f32 %v3504_v36, 0.0  ;;  %v3577_v57 = vmax.f32 %v3557_v30, 0.0 }
0x1399   : > { %v3509_v48 = vpop.f32.mrf.mxu0  ;;  %v3562_v13 = vpop.f32.mrf.mxu1 }
0x139a   : > { %v3576_v41 = vmax.f32 %v3506_v45, 0.0  ;;  %v3578_v47 = vmax.f32 %v3559_v10, 0.0  ;;  %v3587_v25 = vpack.c.bf16 %v3575_v44, %v3571_v49  ;;  %v3589_v14 = vpack.c.bf16 %v3577_v57, %v3573_v19 }
0x139b   : > { %v3511_v3 = vpop.f32.mrf.mxu0  ;;  %v3564_v50 = vpop.f32.mrf.mxu1  ;;  %v3510_v11 = vadd.f32 %v3509_v48, %v3366_v60  ;;  %v3563_v2 = vadd.f32 %v3562_v13, %v3374_v6 }
0x139c   : > { %v3588_v32 = vpack.c.bf16 %v3576_v41, %v3572_v46  ;;  %v3590_v15 = vpack.c.bf16 %v3578_v47, %v3574_v22  ;;  %v3512_v33 = vadd.f32 %v3511_v3, %v3370_v58  ;;  %v3565_v37 = vadd.f32 %v3564_v50, %v3378_v5 }
0x139d   : > { %v3513_v40 = vpop.f32.mrf.mxu0  ;;  %v3566_v42 = vpop.f32.mrf.mxu1  ;;  %v3579_v53 = vmax.f32 %v3510_v11, 0.0  ;;  %v3581_v55 = vmax.f32 %v3563_v2, 0.0 }
0x139e   : > { %v3514_v35 = vadd.f32 %v3513_v40, %v3366_v60  ;;  %v3567_v61 = vadd.f32 %v3566_v42, %v3374_v6  ;;  %3823 = vmatprep.mubr.bf16.mxu0 %v3588_v32  ;;  %3872 = vmatprep.mubr.bf16.mxu1 %v3590_v15  ;;  %v3580_v63 = vmax.f32 %v3512_v33, 0.0  ;;  %v3582_v0 = vmax.f32 %v3565_v37, 0.0 }
0x139f   : > { %v3515_v51 = vpop.f32.mrf.mxu0  ;;  %v3568_v7 = vpop.f32.mrf.mxu1  ;;  %3824 = vmatmul.mubr.bf16.vlgmr.msra.gmra.mxu0 %v3587_v25  ;;  %3873 = vmatmul.mubr.bf16.vlgmr.msra.gmra.mxu1 %v3589_v14  ;;  %v3598_v60 = vrot.slane %v13311_v43, %v13225_v27 }
0x13a0   : > { %v3516_v62 = vadd.f32 %v3515_v51, %v3370_v58  ;;  %v3569_v52 = vadd.f32 %v3568_v7, %v3378_v5  ;;  %v3583_v56 = vmax.f32 %v3514_v35, 0.0  ;;  %v3585_v17 = vmax.f32 %v3567_v61, 0.0 }
0x13a2   : > { %v3584_v4 = vmax.f32 %v3516_v62, 0.0  ;;  %v3586_v59 = vmax.f32 %v3569_v52, 0.0  ;;  %v3591_v36 = vpack.c.bf16 %v3583_v56, %v3579_v53  ;;  %v3593_v30 = vpack.c.bf16 %v3585_v17, %v3581_v55 }
0x13a4   : > { %v3592_v12 = vpack.c.bf16 %v3584_v4, %v3580_v63  ;;  %v3594_v1 = vpack.c.bf16 %v3586_v59, %v3582_v0 }
0x13a6   : > { %3831 = vmatprep.mubr.bf16.mxu0 %v3592_v12  ;;  %3880 = vmatprep.mubr.bf16.mxu1 %v3594_v1 }
0x13a7   : > { %3832 = vmatmul.mubr.bf16.gmra.mxu0 %v3591_v36  ;;  %3881 = vmatmul.mubr.bf16.gmra.mxu1 %v3593_v30 }
0x13a8   : > { %4154 = vmatprep.mubr.bf16.mxu0 %v11785_v39 }
0x145f   : > { %v10229_v58 = vpop.f32.mrf.mxu0  ;;  %v10257_v5 = vpop.f32.mrf.mxu1 }
0x1461   : > { %v10230_v6 = vpop.f32.mrf.mxu0  ;;  %v10258_v18 = vpop.f32.mrf.mxu1 }
0x1462   : > { %v10231_v8 = vadd.f32 %v10230_v6, %v10229_v58  ;;  %v10259_v10 = vadd.f32 %v10258_v18, %v10257_v5 }
0x1463   : > { %v10232_v24 = vpop.f32.mrf.mxu0  ;;  %v10260_v23 = vpop.f32.mrf.mxu1 }
0x1464   : > { %v3826_v45 = vadd.f32 %v10231_v8, %v3598_v60 }
0x1465   : > { %v10233_v44 = vpop.f32.mrf.mxu0  ;;  %v10261_v57 = vpop.f32.mrf.mxu1 }
0x1466   : > { %v3875_v48 = vadd.f32 %v10259_v10, %v3826_v45  ;;  %v10234_v13 = vadd.f32 %v10233_v44, %v10232_v24  ;;  %v10262_v47 = vadd.f32 %v10261_v57, %v10260_v23  ;;  %v11005_v24 = vld [vmem:[%s11875_s15 + $0xb4] ss:$8 sps:$4 sm:$0xff]   ;;  %v11003_v23 = vld [vmem:[%s11875_s15 + $0xb0] ss:$8 sps:$4 sm:$0xff]   ;;  %v11008_v45 = vld [vmem:[%s11875_s15 + $0xa4] ss:$8 sps:$4 sm:$0xff]  }
0x1467   : > { %v10235_v46 = vpop.f32.mrf.mxu0  ;;  %v10263_v22 = vpop.f32.mrf.mxu1  ;;  %4130 = vmatprep.subr.bf16.mxu0 %v11005_v24  ;;  %v11006_v10 = vld [vmem:[%s11875_s15 + $0xa0] ss:$8 sps:$4 sm:$0xff]   ;;  %v11011_v44 = vld [vmem:[%s11875_s15 + $0x94] ss:$8 sps:$4 sm:$0xff]   ;;  %v11009_v57 = vld [vmem:[%s11875_s15 + $0x90] ss:$8 sps:$4 sm:$0xff]  }
0x1468   : > { %v3829_v41 = vadd.f32 %v10234_v13, %v3598_v60  ;;  %v3889_v49 = vadd.f32 %v3875_v48, %v13574_v9  ;;  %4131 = vmatpush1.bf16.msra.mxu0 %v11003_v23  ;;  %v11012_v48 = vld [vmem:[%s11875_s15 + $0x80] ss:$8 sps:$4 sm:$0xff]   ;;  %v11014_v13 = vld [vmem:[%s11875_s15 + $0x84] ss:$8 sps:$4 sm:$0xff]  }
0x1469   : > { %v10236_v19 = vpop.f32.mrf.mxu0  ;;  %v10264_v3 = vpop.f32.mrf.mxu1  ;;  %4132 = vmatprep.subr.bf16.mxu0 %v11008_v45  ;;  %v11328_v24 = vld [vmem:[%s14567_s9 + $0x8] sm:$0xff]  ;;  %v11329_v23 = vld [vmem:[%s14567_s9] sm:$0xff] }
0x146a   : > { %v3878_v43 = vadd.f32 %v10262_v47, %v3829_v41  ;;  %v10237_v50 = vadd.f32 %v10236_v19, %v10235_v46  ;;  %v3893_v32 = vsel %vm1308_vm1, %v3889_v49, 0.0  ;;  %v10265_v33 = vadd.f32 %v10264_v3, %v10263_v22  ;;  %v11313_v46 = vld [vmem:[%s14567_s9 + $0x78] sm:$0xff]  ;;  %v13722_v45 = vld [vmem:[%s11895_s14 + $0x40] sm:$0xff] }
0x146b   : > { %v10266_v15 = vpop.f32.mrf.mxu1  ;;  %3894 = vadd.xlane.f32.xlu1 %v3893_v32  ;;  %v10238_v25 = vpop.f32.mrf.mxu0 }
0x146c   : > { %v3834_v14 = vadd.f32 %v10237_v50, %v3598_v60  ;;  %v3890_v40 = vadd.f32 %v3878_v43, %v13576_v26  ;;  %4133 = vmatpush1.bf16.msra.mxu0 %v11006_v10  ;;  %v4071_v10 = vrot.slane %v13722_v45, %v12789_v54 }
0x146d   : > { %v10239_v42 = vpop.f32.mrf.mxu0  ;;  %v10267_v37 = vpop.f32.mrf.mxu1  ;;  %4134 = vmatprep.subr.bf16.mxu0 %v11011_v44  ;;  %v13727_v44 = vld [vmem:[%s11895_s14 + $0x48] sm:$0xff] }
0x146e   : > { %v3883_v35 = vadd.f32 %v10265_v33, %v3834_v14  ;;  %v10240_v61 = vadd.f32 %v10239_v42, %v10238_v25  ;;  %v3896_v11 = vsel %vm1308_vm1, %v3890_v40, 0.0  ;;  %v10268_v2 = vadd.f32 %v10267_v37, %v10266_v15 }
0x146f   : > { %3897 = vadd.xlane.f32.xlu0 %v3896_v11 }
0x1470   : > { %v3837_v9 = vadd.f32 %v10240_v61, %v3598_v60  ;;  %v3891_v51 = vadd.f32 %v3883_v35, %v13596_v38  ;;  %4135 = vmatpush1.bf16.msra.mxu0 %v11009_v57 }
0x1471   : > { %4136 = vmatprep.subr.bf16.mxu0 %v11014_v13 }
0x1472   : > { %v3886_v7 = vadd.f32 %v10268_v2, %v3837_v9  ;;  %v3899_v62 = vsel %vm1308_vm1, %v3891_v51, 0.0 }
0x1473   : > { %3900 = vadd.xlane.f32.xlu1 %v3899_v62 }
0x1474   : > { %v3892_v52 = vadd.f32 %v3886_v7, %v13590_v28  ;;  %4137 = vmatpush1.bf16.msra.mxu0 %v11012_v48  ;;  %v13731_v48 = vrot.slane %v13727_v44, %v12789_v54 }
0x1475   : > { %10685 = vmatprep.subr.mxu0 %v11313_v46 }
0x1476   : > { %v3902_v56 = vsel %vm1308_vm1, %v3892_v52, 0.0 }
0x1477   : > { %3903 = vadd.xlane.f32.xlu0 %v3902_v56 }
0x14f4   : > { %v3895_v26 = vpop.xlane.xlu1 %3894 }
0x14f5   : > { %v3905_v17 = vmul.f32 0.015625, %v3895_v26 }
0x14f7   : > { %v3909_v63 = vsub.f32 %v3889_v49, %v3905_v17 }
0x14f8   : > { %v3898_v0 = vpop.xlane.xlu0 %3897 }
0x14f9   : > { %v3906_v4 = vmul.f32 0.015625, %v3898_v0  ;;  %v3913_v59 = vmul.f32 %v3909_v63, %v3909_v63 }
0x14fb   : > { %v3910_v53 = vsub.f32 %v3890_v40, %v3906_v4  ;;  %v3917_v55 = vsel %vm1308_vm1, %v3913_v59, 0.0  ;;  %v11314_v40 = vld [vmem:[%s11895_s14 + $0x20] sm:$0xff]  ;;  %v11315_v4 = vld [vmem:[%s14567_s9 + $0x70] sm:$0xff] }
0x14fc   : > { %3918 = vadd.xlane.f32.xlu1 %v3917_v55  ;;  %v3901_v38 = vpop.xlane.xlu1 %3900  ;;  %v3948_v42 = vrot.slane %v11314_v40, %v13251_v34  ;;  %v3956_v9 = vrot.slane %v11314_v40, %v13256_v21  ;;  %v11316_v55 = vld [vmem:[%s14567_s9 + $0x68] sm:$0xff] }
0x14fd   : > { %v3907_v12 = vmul.f32 0.015625, %v3901_v38  ;;  %v3914_v1 = vmul.f32 %v3910_v53, %v3910_v53 }
0x14ff   : > { %v3911_v36 = vsub.f32 %v3891_v51, %v3907_v12  ;;  %v3920_v28 = vsel %vm1308_vm1, %v3914_v1, 0.0  ;;  %v11317_v12 = vld [vmem:[%s14567_s9 + $0x60] sm:$0xff]  ;;  %v11318_v1 = vld [vmem:[%s14567_s9 + $0x58] sm:$0xff] }
0x1500   : > { %3921 = vadd.xlane.f32.xlu0 %v3920_v28  ;;  %v3904_v30 = vpop.xlane.xlu0 %3903  ;;  %v11320_v28 = vld [vmem:[%s14567_s9 + $0x48] sm:$0xff] }
0x1501   : > { %v3908_v58 = vmul.f32 0.015625, %v3904_v30  ;;  %v3915_v5 = vmul.f32 %v3911_v36, %v3911_v36  ;;  %v11321_v30 = vld [vmem:[%s14567_s9 + $0x40] sm:$0xff] }
0x1503   : > { %v3912_v60 = vsub.f32 %v3892_v52, %v3908_v58  ;;  %v3923_v6 = vsel %vm1308_vm1, %v3915_v5, 0.0  ;;  %v11322_v58 = vld [vmem:[%s14567_s9 + $0x38] sm:$0xff]  ;;  %v11323_v5 = vld [vmem:[%s14567_s9 + $0x30] sm:$0xff] }
0x1504   : > { %3924 = vadd.xlane.f32.xlu1 %v3923_v6  ;;  %v11325_v6 = vld [vmem:[%s14567_s9 + $0x20] sm:$0xff] }
0x1505   : > { %v3916_v18 = vmul.f32 %v3912_v60, %v3912_v60 }
0x1507   : > { %v3926_v8 = vsel %vm1308_vm1, %v3916_v18, 0.0  ;;  %v11326_v18 = vld [vmem:[%s14567_s9 + $0x18] sm:$0xff] }
0x1508   : > { %3927 = vadd.xlane.f32.xlu0 %v3926_v8  ;;  %v11327_v8 = vld [vmem:[%s14567_s9 + $0x10] sm:$0xff] }
0x1585   : > { %v3919_v22 = vpop.xlane.xlu1 %3918 }
0x1586   : > { %v3929_v41 = vmul.f32 0.015625, %v3919_v22 }
0x1588   : > { %v3933_v47 = vadd.f32 1e-05, %v3929_v41 }
0x1589   : > { %v3922_v49 = vpop.xlane.xlu0 %3921 }
0x158a   : > { %11203 = vrsqrt.f32 %v3933_v47  ;;  %v3930_v19 = vmul.f32 0.015625, %v3922_v49 }
0x158c   : > { %v3934_v3 = vadd.f32 1e-05, %v3930_v19 }
0x158d   : > { %v3925_v43 = vpop.xlane.xlu1 %3924 }
0x158e   : > { %11205 = vrsqrt.f32 %v3934_v3  ;;  %v3931_v50 = vmul.f32 0.015625, %v3925_v43 }
0x1590   : > { %v3935_v32 = vadd.f32 1e-05, %v3931_v50  ;;  %v11330_v50 = vld [vmem:[%s14566_s8 + $0x60] sm:$0xff] }
0x1591   : > { %v3928_v15 = vpop.xlane.xlu0 %3927 }
0x1592   : > { %11207 = vrsqrt.f32 %v3935_v32  ;;  %v3932_v25 = vmul.f32 0.015625, %v3928_v15  ;;  %v11331_v15 = vld [vmem:[%s14566_s8 + $0x40] sm:$0xff] }
0x1594   : > { %v3936_v14 = vadd.f32 1e-05, %v3932_v25 }
0x1596   : > { %11209 = vrsqrt.f32 %v3936_v14  ;;  %v11332_v14 = vld [vmem:[%s14566_s8 + $0x20] sm:$0xff] }
0x1597   : > { %v11204_v33 = vpop.eup %11203 }
0x1598   : > { %v3941_v37 = vmul.f32 %v11204_v33, %v3909_v63 }
0x159a   : > { %v3949_v61 = vmul.f32 %v3948_v42, %v3941_v37 }
0x159b   : > { %v11206_v35 = vpop.eup %11205 }
0x159c   : > { %v3942_v11 = vmul.f32 %v11206_v35, %v3910_v53  ;;  %v13661_v7 = vadd.f32 %v3956_v9, %v3949_v61  ;;  %v11334_v35 = vld [vmem:[%s14566_s8 + $0x48] sm:$0xff] }
0x159e   : > { %v3950_v2 = vmul.f32 %v3948_v42, %v3942_v11  ;;  %v11335_v11 = vld [vmem:[%s14566_s8 + $0x28] sm:$0xff] }
0x159f   : > { %v11208_v51 = vpop.eup %11207 }
0x15a0   : > { %v13663_v62 = vadd.f32 %v3956_v9, %v3950_v2  ;;  %v3943_v52 = vmul.f32 %v11208_v51, %v3911_v36  ;;  %v11319_v36 = vld [vmem:[%s14567_s9 + $0x50] sm:$0xff]  ;;  %v11336_v51 = vld [vmem:[%s14566_s8] sm:$0xff] }
0x15a2   : > { %v4066_v56 = vpack.c.bf16 %v13663_v62, %v13661_v7  ;;  %v3951_v63 = vmul.f32 %v3948_v42, %v3943_v52 }
0x15a3   : > { %v11210_v26 = vpop.eup %11209 }
0x15a4   : > { %9541 = vmatmul.mubr.msk.bf16.vlgmr.msra.gmra.mxu0 %vm1308_vm1, %v4066_v56  ;;  %v3944_v17 = vmul.f32 %v11210_v26, %v3912_v60  ;;  %v13672_v59 = vadd.f32 %v3956_v9, %v3951_v63  ;;  %v11324_v60 = vld [vmem:[%s14567_s9 + $0x28] sm:$0xff] }
0x15a5   : > { %4164 = vmatprep.mubr.bf16.mxu0 %v11785_v39  ;;  %10686 = vmatpush3.msra.mxu0 %v11313_v46  ;;  %v11337_v56 = vld [vmem:[%s14566_s8 + $0x8] sm:$0xff] }
0x15a6   : > { %v3952_v0 = vmul.f32 %v3948_v42, %v3944_v17  ;;  %10687 = vmatprep.subr.mxu0 %v11315_v4  ;;  %v11333_v42 = vld [vmem:[%s14566_s8 + $0x68] sm:$0xff] }
0x15a7   : > { %10688 = vmatpush3.msra.mxu0 %v11315_v4 }
0x15a8   : > { %v13674_v53 = vadd.f32 %v3956_v9, %v3952_v0  ;;  %10689 = vmatprep.subr.mxu0 %v11316_v55 }
0x15a9   : > { %10690 = vmatpush3.msra.mxu0 %v11316_v55 }
0x15aa   : > { %v4067_v38 = vpack.c.bf16 %v13674_v53, %v13672_v59  ;;  %10691 = vmatprep.subr.mxu0 %v11317_v12 }
0x15ab   : > { %10692 = vmatpush3.msra.mxu0 %v11317_v12 }
0x15ac   : > { %9542 = vmatmul.mubr.msk.bf16.gmra.mxu0 %vm1308_vm1, %v4067_v38  ;;  %10693 = vmatprep.subr.mxu0 %v11318_v1 }
0x15ad   : > { %10694 = vmatpush3.msra.mxu0 %v11318_v1 }
0x15ae   : > { %10695 = vmatprep.subr.mxu0 %v11319_v36 }
0x15af   : > { %10696 = vmatpush3.msra.mxu0 %v11319_v36 }
0x15b0   : > { %10697 = vmatprep.subr.mxu0 %v11320_v28 }
0x15b1   : > { %10698 = vmatpush3.msra.mxu0 %v11320_v28 }
0x15b2   : > { %10699 = vmatprep.subr.mxu0 %v11321_v30 }
0x15b3   : > { %10700 = vmatpush3.msra.mxu0 %v11321_v30 }
0x15b4   : > { %10701 = vmatprep.subr.mxu0 %v11322_v58 }
0x15b5   : > { %10702 = vmatpush3.msra.mxu0 %v11322_v58 }
0x15b6   : > { %10703 = vmatprep.subr.mxu0 %v11323_v5 }
0x15b7   : > { %10704 = vmatpush3.msra.mxu0 %v11323_v5 }
0x15b8   : > { %10705 = vmatprep.subr.mxu0 %v11324_v60 }
0x15b9   : > { %10706 = vmatpush3.msra.mxu0 %v11324_v60 }
0x15ba   : > { %10707 = vmatprep.subr.mxu0 %v11325_v6 }
0x15bb   : > { %10708 = vmatpush3.msra.mxu0 %v11325_v6 }
0x15bc   : > { %10709 = vmatprep.subr.mxu0 %v11326_v18 }
0x15bd   : > { %10710 = vmatpush3.msra.mxu0 %v11326_v18 }
0x15be   : > { %10711 = vmatprep.subr.mxu0 %v11327_v8 }
0x15bf   : > { %10712 = vmatpush3.msra.mxu0 %v11327_v8 }
0x15c0   : > { %10713 = vmatprep.subr.mxu0 %v11328_v24 }
0x15c1   : > { %10714 = vmatpush3.msra.mxu0 %v11328_v24 }
0x15c2   : > { %10715 = vmatprep.subr.mxu0 %v11329_v23 }
0x15c3   : > { %10716 = vmatpush3.msra.mxu0 %v11329_v23 }
0x1664   : > { %v4156_v57 = vpop.f32.mrf.mxu0 }
0x1665   : > { %v4157_v13 = vadd.f32 %v4156_v57, %v4071_v10 }
0x1666   : > { %v4158_v46 = vpop.f32.mrf.mxu0 }
0x1667   : > { %4179 = vrot.lane.b32.xlu1 %v4157_v13, %s11786_s22  ;;  %v4159_v22 = vadd.f32 %v4158_v46, %v13731_v48 }
0x1668   : > { %v4160_v41 = vpop.f32.mrf.mxu0 }
0x1669   : > { %v4161_v47 = vadd.f32 %v4160_v41, %v4071_v10  ;;  %v4523_v32 = vmul.f32 %v11330_v50, %v4159_v22  ;;  %v4519_v25 = vmul.f32 %v11331_v15, %v4159_v22  ;;  %v4515_v33 = vmul.f32 %v11332_v14, %v4159_v22 }
0x166a   : > { %v4162_v49 = vpop.f32.mrf.mxu0  ;;  %v4511_v52 = vmul.f32 %v11336_v51, %v4159_v22 }
0x166b   : > { %v4339_v19 = vpack.c.bf16 %v4161_v47, %v4157_v13  ;;  %v4163_v3 = vadd.f32 %v4162_v49, %v13731_v48  ;;  %4181 = vrot.lane.b32.xlu0 %v4161_v47, %s11786_s22 }
0x166c   : > { %v4166_v43 = vpop.f32.mrf.mxu0 }
0x166d   : > { %v13746_v40 = vadd.f32 %v4166_v43, %v4071_v10  ;;  %10681 = vmatprep.mubr.msk.bf16.mxu1 %vm1308_vm1, %v4339_v19  ;;  %v4524_v37 = vmul.f32 %v11333_v42, %v4163_v3  ;;  %v4520_v61 = vmul.f32 %v11334_v35, %v4163_v3  ;;  %v4516_v9 = vmul.f32 %v11335_v11, %v4163_v3 }
0x166e   : > { %v13758_v2 = vpop.f32.mrf.mxu0  ;;  %v4512_v26 = vmul.f32 %v11337_v56, %v4163_v3 }
0x166f   : > { %4183 = vrot.lane.b32.xlu1 %v13746_v40, %s11786_s22  ;;  %v13768_v17 = vpack.c.bf16 %v4524_v37, %v4523_v32  ;;  %v13770_v63 = vpack.c.bf16 %v4520_v61, %v4519_v25  ;;  %v13772_v0 = vpack.c.bf16 %v4516_v9, %v4515_v33 }
0x1670   : > { %v4170_v4 = vpop.f32.mrf.mxu0  ;;  %v13774_v55 = vpack.c.bf16 %v4512_v26, %v4511_v52 }
0x1671   : > { %v13776_v38 = vadd.f32 %v4170_v4, %v4071_v10 }
0x1673   : > { %v4340_v12 = vpack.c.bf16 %v13776_v38, %v13746_v40  ;;  %4185 = vrot.lane.b32.xlu1 %v13776_v38, %s11786_s22  ;;  %v11350_v40 = vld [vmem:[%s14566_s8 + $0x38] sm:$0xff] }
0x16d9   : > { %v4180_v1 = vpop.permute.xlu1 %4179 }
0x16da   : > { %4191 = vxpose.xlu0.b32.start [1/4] (short) (narrow) %v4180_v1, 64 }
0x16dd   : > { %v4182_v36 = vpop.permute.xlu0 %4181 }
0x16de   : > { %4192 = vxpose.xlu0.b32.cont [2/4] (short) (narrow) %v4182_v36, 64 }
0x16e1   : > { %v4184_v28 = vpop.permute.xlu1 %4183 }
0x16e2   : > { %4193 = vxpose.xlu0.b32.cont [3/4] (short) (narrow) %v4184_v28, 64 }
0x16e5   : > { %v4186_v30 = vpop.permute.xlu1 %4185 }
0x16e6   : > { %4194 = vxpose.xlu0.b32.end [4/4] (short) (narrow) %v4186_v30, 64 }
0x1756   : > { %v13782_v58 = vpop.trf.xlu0 }
0x175a   : > { %v13784_v5 = vpop.trf.xlu0 }
0x175e   : > { %v13786_v60 = vpop.trf.xlu0 }
0x1762   : > { %v4210_v6 = vpop.trf.xlu0 }
0x1766   : > { %v4211_v18 = vpop.trf.xlu0 }
0x1767   : > { %4287 = vrot.lane.b32.xlu0 %v4211_v18, %s11788_s19  ;;  %4239 = vrot.lane.b32.xlu1 %v4211_v18, %s11787_s17 }
0x176a   : > { %v4212_v8 = vpop.trf.xlu0 }
0x176b   : > { %4263 = vrot.lane.b32.xlu1 %v4211_v18, %s11786_s22 }
0x176e   : > { %v4213_v24 = vpop.trf.xlu0 }
0x176f   : > { %4235 = vrot.lane.b32.xlu1 %v13786_v60, %s11787_s17 }
0x1772   : > { %v4214_v23 = vpop.trf.xlu0 }
0x1773   : > { %4237 = vrot.lane.b32.xlu1 %v4210_v6, %s11787_s17 }
0x1777   : > { %4259 = vrot.lane.b32.xlu1 %v13786_v60, %s11786_s22 }
0x177b   : > { %4261 = vrot.lane.b32.xlu1 %v4210_v6, %s11786_s22 }
0x177f   : > { %4283 = vrot.lane.b32.xlu1 %v13786_v60, %s11788_s19 }
0x1783   : > { %4285 = vrot.lane.b32.xlu1 %v4210_v6, %s11788_s19 }
0x1787   : > { %4231 = vrot.lane.b32.xlu1 %v13782_v58, %s11787_s17 }
0x178b   : > { %4233 = vrot.lane.b32.xlu1 %v13784_v5, %s11787_s17 }
0x178f   : > { %4255 = vrot.lane.b32.xlu1 %v13782_v58, %s11786_s22 }
0x1793   : > { %4241 = vrot.lane.b32.xlu1 %v4212_v8, %s11787_s17 }
0x1797   : > { %4265 = vrot.lane.b32.xlu1 %v4212_v8, %s11786_s22 }
0x179b   : > { %4289 = vrot.lane.b32.xlu1 %v4212_v8, %s11788_s19 }
0x179f   : > { %4243 = vrot.lane.b32.xlu1 %v4213_v24, %s11787_s17 }
0x17a3   : > { %4267 = vrot.lane.b32.xlu1 %v4213_v24, %s11786_s22 }
0x17a7   : > { %4291 = vrot.lane.b32.xlu1 %v4213_v24, %s11788_s19 }
0x17ab   : > { %4245 = vrot.lane.b32.xlu1 %v4214_v23, %s11787_s17 }
0x17af   : > { %4269 = vrot.lane.b32.xlu1 %v4214_v23, %s11786_s22 }
0x17b3   : > { %4293 = vrot.lane.b32.xlu1 %v4214_v23, %s11788_s19 }
0x17b7   : > { %4257 = vrot.lane.b32.xlu1 %v13784_v5, %s11786_s22 }
0x17bb   : > { %4279 = vrot.lane.b32.xlu1 %v13782_v58, %s11788_s19 }
0x17bf   : > { %4281 = vrot.lane.b32.xlu1 %v13784_v5, %s11788_s19 }
0x17d9   : > { %v4240_v10 = vpop.permute.xlu1 %4239  ;;  %v4288_v1 = vpop.permute.xlu0 %4287 }
0x17da   : > { %v4307_v35 = vsel %vm1496_vm2, %v4211_v18, %v4240_v10  ;;  %v11338_v10 = vld [vmem:[%s14565_s7 + $0x28] sm:$0xff] }
0x17dd   : > { %v4264_v57 = vpop.permute.xlu1 %4263 }
0x17de   : > { %v4315_v9 = vsel %vm1308_vm1, %v4307_v35, %v4264_v57  ;;  %v11342_v35 = vld [vmem:[%s14565_s7 + $0x18] sm:$0xff] }
0x17df   : > { %v4323_v30 = vsel %vm1513_vm3, %v4315_v9, %v4288_v1 }
0x17e1   : > { %v4236_v13 = vpop.permute.xlu1 %4235 }
0x17e5   : > { %v4238_v46 = vpop.permute.xlu1 %4237 }
0x17e6   : > { %v4306_v18 = vsel %vm1496_vm2, %v4210_v6, %v4238_v46  ;;  %v4305_v6 = vsel %vm1496_vm2, %v13786_v60, %v4236_v13  ;;  %v4172_v13 = vpop.f32.mrf.mxu0 }
0x17e9   : > { %v4260_v22 = vpop.permute.xlu1 %4259 }
0x17ed   : > { %v4262_v41 = vpop.permute.xlu1 %4261 }
0x17f1   : > { %v4284_v47 = vpop.permute.xlu1 %4283 }
0x17f5   : > { %v4286_v49 = vpop.permute.xlu1 %4285 }
0x17f9   : > { %v4232_v19 = vpop.permute.xlu1 %4231 }
0x17fd   : > { %v4234_v3 = vpop.permute.xlu1 %4233 }
0x1801   : > { %v4256_v43 = vpop.permute.xlu1 %4255 }
0x1805   : > { %v4242_v50 = vpop.permute.xlu1 %4241 }
0x1806   : > { %v4308_v61 = vsel %vm1496_vm2, %v4212_v8, %v4242_v50 }
0x1809   : > { %v4266_v32 = vpop.permute.xlu1 %4265 }
0x180a   : > { %v4316_v51 = vsel %vm1308_vm1, %v4308_v61, %v4266_v32  ;;  %v11340_v32 = vld [vmem:[%s14565_s7 + $0x38] sm:$0xff] }
0x180d   : > { %v4290_v15 = vpop.permute.xlu1 %4289 }
0x180e   : > { %v4324_v56 = vsel %vm1513_vm3, %v4316_v51, %v4290_v15 }
0x180f   : > { %v4332_v57 = vmul.f32 %v11338_v10, %v4324_v56  ;;  %v4304_v56 = vsel %vm1496_vm2, %v13784_v5, %v4234_v3  ;;  %v11345_v5 = vld [vmem:[%s14565_s7 + $0x8] sm:$0xff] }
0x1811   : > { %v4244_v25 = vpop.permute.xlu1 %4243 }
0x1812   : > { %v4309_v11 = vsel %vm1496_vm2, %v4213_v24, %v4244_v25  ;;  %v4314_v24 = vsel %vm1308_vm1, %v4306_v18, %v4262_v41  ;;  %v11341_v41 = vld [vmem:[%s14565_s7 + $0x20] sm:$0xff] }
0x1813   : > { %v4322_v46 = vsel %vm1513_vm3, %v4314_v24, %v4286_v49  ;;  %v4331_v25 = vmul.f32 %v11341_v41, %v4323_v30  ;;  %v11343_v49 = vld [vmem:[%s14565_s7 + $0x10] sm:$0xff]  ;;  %v11348_v24 = vld [vmem:[%s14566_s8 + $0x58] sm:$0xff] }
0x1814   : > { %v4330_v61 = vmul.f32 %v11342_v35, %v4322_v46  ;;  %v11347_v30 = vld [vmem:[%s14566_s8 + $0x70] sm:$0xff] }
0x1815   : > { %v4268_v14 = vpop.permute.xlu1 %4267  ;;  %v4337_v60 = vpack.c.bf16 %v4332_v57, %v4331_v25  ;;  %v11349_v57 = vld [vmem:[%s14566_s8 + $0x50] sm:$0xff] }
0x1816   : > { %v4317_v52 = vsel %vm1308_vm1, %v4309_v11, %v4268_v14  ;;  %v4313_v14 = vsel %vm1308_vm1, %v4305_v6, %v4260_v22  ;;  %v4303_v22 = vsel %vm1496_vm2, %v13782_v58, %v4232_v19  ;;  %v11344_v19 = vld [vmem:[%s14565_s7] sm:$0xff]  ;;  %v11353_v46 = vld [vmem:[%s14566_s8 + $0x10] sm:$0xff] }
0x1817   : > { %v4311_v51 = vsel %vm1308_vm1, %v4303_v22, %v4256_v43 }
0x1819   : > { %v4292_v33 = vpop.permute.xlu1 %4291 }
0x181a   : > { %v4325_v26 = vsel %vm1513_vm3, %v4317_v52, %v4292_v33 }
0x181d   : > { %v4246_v42 = vpop.permute.xlu1 %4245 }
0x181e   : > { %v4310_v4 = vsel %vm1496_vm2, %v4214_v23, %v4246_v42  ;;  %v11339_v23 = vld [vmem:[%s14565_s7 + $0x30] sm:$0xff] }
0x181f   : > { %v4333_v50 = vmul.f32 %v11339_v23, %v4325_v26 }
0x1821   : > { %v4270_v37 = vpop.permute.xlu1 %4269 }
0x1822   : > { %v4318_v36 = vsel %vm1308_vm1, %v4310_v4, %v4270_v37  ;;  %v4321_v37 = vsel %vm1513_vm3, %v4313_v14, %v4284_v47  ;;  %v4173_v47 = vadd.f32 %v4172_v13, %v13731_v48  ;;  %v4169_v4 = vadd.f32 %v13758_v2, %v13731_v48  ;;  %v11346_v48 = vld [vmem:[%s14566_s8 + $0x78] sm:$0xff]  ;;  %v11357_v13 = vld [vmem:[%s14564_s6 + $0x10] sm:$0xff] }
0x1823   : > { %v4329_v11 = vmul.f32 %v11343_v49, %v4321_v37 }
0x1824   : > { %v4526_v2 = vmul.f32 %v11346_v48, %v4173_v47  ;;  %v4525_v18 = vmul.f32 %v11347_v30, %v4169_v4  ;;  %v4522_v10 = vmul.f32 %v11348_v24, %v4173_v47  ;;  %v4521_v23 = vmul.f32 %v11349_v57, %v4169_v4  ;;  %v11015_v48 = vld [vmem:[%s11880_s18 + $0x58] sm:$0xff]  }
0x1825   : > { %v4294_v28 = vpop.permute.xlu1 %4293  ;;  %v4336_v52 = vpack.c.bf16 %v4330_v61, %v4329_v11  ;;  %v4518_v38 = vmul.f32 %v11350_v40, %v4173_v47  ;;  %v4513_v41 = vmul.f32 %v11353_v46, %v4169_v4  ;;  %10743 = vmatprep.subr.bf16.mxu0 %v11015_v48 }
0x1826   : > { %v4326_v8 = vsel %vm1513_vm3, %v4318_v36, %v4294_v28 }
0x1827   : > { %v4334_v15 = vmul.f32 %v11340_v32, %v4326_v8  ;;  %v4534_v8 = vpack.c.bf16 %v4526_v2, %v4525_v18  ;;  %v11016_v2 = vld [vmem:[%s11880_s18 + $0x50] sm:$0xff]  }
0x1829   : > { %v4258_v33 = vpop.permute.xlu1 %4257  ;;  %v4338_v42 = vpack.c.bf16 %v4334_v15, %v4333_v50  ;;  %v4532_v50 = vpack.c.bf16 %v4522_v10, %v4521_v23 }
0x182a   : > { %v4312_v1 = vsel %vm1308_vm1, %v4304_v56, %v4258_v33  ;;  %v11354_v33 = vld [vmem:[%s14564_s6] sm:$0xff] }
0x182b   : > { %10673 = vmatprep.subr.bf16.mxu1 %v4338_v42 }
0x182c   : > { %10674 = vmatpush3.bf16.msra.mxu1 %v4338_v42 }
0x182d   : > { %v4280_v9 = vpop.permute.xlu1 %4279  ;;  %10675 = vmatprep.subr.bf16.mxu1 %v4337_v60 }
0x182e   : > { %v4319_v26 = vsel %vm1513_vm3, %v4311_v51, %v4280_v9 }
0x182f   : > { %v4327_v43 = vmul.f32 %v11344_v19, %v4319_v26 }
0x1830   : > { %10676 = vmatpush3.bf16.msra.mxu1 %v4337_v60  ;;  %v11356_v60 = vld [vmem:[%s14564_s6 + $0x8] sm:$0xff] }
0x1831   : > { %v4282_v36 = vpop.permute.xlu1 %4281  ;;  %10677 = vmatprep.subr.bf16.mxu1 %v4336_v52 }
0x1832   : > { %v4320_v58 = vsel %vm1513_vm3, %v4312_v1, %v4282_v36 }
0x1833   : > { %v4328_v3 = vmul.f32 %v11345_v5, %v4320_v58 }
0x1834   : > { %10678 = vmatpush3.bf16.msra.mxu1 %v4336_v52 }
0x1835   : > { %v4335_v28 = vpack.c.bf16 %v4328_v3, %v4327_v43 }
0x1837   : > { %10679 = vmatprep.subr.bf16.mxu1 %v4335_v28 }
0x1838   : > { %10680 = vmatpush3.bf16.msra.mxu1 %v4335_v28 }
0x1839   : > { %10723 = vmatprep.subr.bf16.mxu1 %v4534_v8 }
0x183b   : > { %10682 = vmatmul.mubr.msk.bf16.vlgmr.msra.gmra.mxu1 %vm1308_vm1, %v4340_v12  ;;  %v11351_v12 = vld [vmem:[%s14566_s8 + $0x30] sm:$0xff] }
0x183c   : > { %10724 = vmatpush3.bf16.msra.mxu1 %v4534_v8  ;;  %v4517_v32 = vmul.f32 %v11351_v12, %v4169_v4 }
0x183d   : > { %10725 = vmatprep.subr.bf16.mxu1 %v13768_v17 }
0x183e   : > { %v4530_v15 = vpack.c.bf16 %v4518_v38, %v4517_v32 }
0x1840   : > { %10726 = vmatpush3.bf16.msra.mxu1 %v13768_v17  ;;  %v11352_v17 = vld [vmem:[%s14566_s8 + $0x18] sm:$0xff] }
0x1841   : > { %10727 = vmatprep.subr.bf16.mxu1 %v4532_v50  ;;  %v4514_v6 = vmul.f32 %v11352_v17, %v4173_v47  ;;  %v11017_v17 = vld [vmem:[%s11880_s18 + $0x48] sm:$0xff]  }
0x1843   : > { %v4528_v25 = vpack.c.bf16 %v4514_v6, %v4513_v41  ;;  %v11018_v6 = vld [vmem:[%s11880_s18 + $0x40] sm:$0xff]  }
0x1844   : > { %10728 = vmatpush3.bf16.msra.mxu1 %v4532_v50 }
0x1845   : > { %10729 = vmatprep.subr.bf16.mxu1 %v13770_v63 }
0x1848   : > { %10730 = vmatpush3.bf16.msra.mxu1 %v13770_v63 }
0x1849   : > { %10731 = vmatprep.subr.bf16.mxu1 %v4530_v15 }
0x184c   : > { %10732 = vmatpush3.bf16.msra.mxu1 %v4530_v15 }
0x184d   : > { %10733 = vmatprep.subr.bf16.mxu1 %v13772_v0 }
0x1850   : > { %10734 = vmatpush3.bf16.msra.mxu1 %v13772_v0  ;;  %v11355_v0 = vld [vmem:[%s14564_s6 + $0x18] sm:$0xff] }
0x1851   : > { %10735 = vmatprep.subr.bf16.mxu1 %v4528_v25 }
0x1854   : > { %10736 = vmatpush3.bf16.msra.mxu1 %v4528_v25 }
0x1855   : > { %10737 = vmatprep.subr.bf16.mxu1 %v13774_v55 }
0x1858   : > { %10738 = vmatpush3.bf16.msra.mxu1 %v13774_v55 }
0x18fb   : > { %v10683_v63 = vpop.f32.mrf.mxu1 }
0x18fc   : > { %v4390_v49 = vadd.f32 %v11357_v13, %v10683_v63 }
0x18fd   : > { %v4381_v14 = vpop.f32.mrf.mxu1 }
0x18fe   : > { %v4382_v42 = vadd.f32 %v11354_v33, %v4381_v14 }
0x18ff   : > { %v10684_v37 = vpop.f32.mrf.mxu1 }
0x1900   : > { %4396 = vmax.xlane.f32.xlu1 %v4382_v42  ;;  %v4393_v61 = vadd.f32 %v11355_v0, %v10684_v37 }
0x1901   : > { %v4384_v35 = vpop.f32.mrf.mxu1 }
0x1902   : > { %v4385_v55 = vadd.f32 %v11356_v60, %v4384_v35 }
0x1904   : > { %4398 = vmax.xlane.f32.xlu0 %v4385_v55  ;;  %4402 = vmax.xlane.f32.xlu1 %v4393_v61 }
0x1908   : > { %4400 = vmax.xlane.f32.xlu0 %v4390_v49 }
0x1989   : > { %v4397_v11 = vpop.xlane.xlu1 %4396 }
0x198a   : > { %v4404_v9 = vsub.f32 %v4382_v42, %v4397_v11  ;;  %v4589_v42 = vrot.slane %v13722_v45, %v13101_v31 }
0x198c   : > { %v4408_v22 = vmul.f32 1.442695, %v4404_v9 }
0x198d   : > { %v4399_v47 = vpop.xlane.xlu0 %4398  ;;  %v4403_v51 = vpop.xlane.xlu1 %4402 }
0x198e   : > { %11211 = vpow2.f32 %v4408_v22  ;;  %v4405_v52 = vsub.f32 %v4385_v55, %v4399_v47  ;;  %v4407_v56 = vsub.f32 %v4393_v61, %v4403_v51 }
0x1990   : > { %v4410_v26 = vmul.f32 1.442695, %v4405_v52  ;;  %v4414_v36 = vmul.f32 1.442695, %v4407_v56 }
0x1991   : > { %v4401_v4 = vpop.xlane.xlu0 %4400 }
0x1992   : > { %11213 = vpow2.f32 %v4410_v26  ;;  %v4406_v1 = vsub.f32 %v4390_v49, %v4401_v4 }
0x1994   : > { %v4412_v58 = vmul.f32 1.442695, %v4406_v1 }
0x1996   : > { %11215 = vpow2.f32 %v4412_v58 }
0x1997   : > { %11217 = vpow2.f32 %v4414_v36 }
0x199b   : > { %v11212_v19 = vpop.eup %11211 }
0x199c   : > { %10717 = vmatprep.mubr.f32.mxu0 %v11212_v19 }
0x199f   : > { %v11214_v43 = vpop.eup %11213 }
0x19a0   : > { %10718 = vmatmul.mubr.f32.vlgmr.msra.gmra.mxu0 %v11214_v43 }
0x19a1   : > { %10744 = vmatpush3.bf16.msra.mxu0 %v11015_v48 }
0x19a2   : > { %10745 = vmatprep.subr.bf16.mxu0 %v11016_v2 }
0x19a3   : > { %v11216_v5 = vpop.eup %11215 }
0x19a4   : > { %v11218_v3 = vpop.eup %11217  ;;  %10720 = vmatprep.mubr.f32.mxu0 %v11216_v5 }
0x19a5   : > { %10721 = vmatmul.mubr.f32.gmra.mxu0 %v11218_v3 }
0x19a6   : > { %10746 = vmatpush3.bf16.msra.mxu0 %v11016_v2 }
0x19a7   : > { %10747 = vmatprep.subr.bf16.mxu0 %v11017_v17 }
0x19aa   : > { %10748 = vmatpush3.bf16.msra.mxu0 %v11017_v17  ;;  %v11033_v17 = vld [vmem:[%s11885_s23 + $0x124] ss:$16 sps:$4 sm:$0xff]  }
0x19ab   : > { %10749 = vmatprep.subr.bf16.mxu0 %v11018_v6 }
0x19ae   : > { %10750 = vmatpush3.bf16.msra.mxu0 %v11018_v6  ;;  %v11036_v6 = vld [vmem:[%s11885_s23 + $0x12c] ss:$16 sps:$4 sm:$0xff]  }
0x1a60   : > { %v10719_v28 = vpop.f32.mrf.mxu0 }
0x1a61   : > { %11219 = vrcp.f32 %v10719_v28 }
0x1a62   : > { %v4482_v30 = vpop.f32.mrf.mxu0 }
0x1a63   : > { %11221 = vrcp.f32 %v4482_v30 }
0x1a65   : > { %v10722_v18 = vpop.f32.mrf.mxu0 }
0x1a66   : > { %11223 = vrcp.f32 %v10722_v18 }
0x1a67   : > { %v4492_v8 = vpop.f32.mrf.mxu0 }
0x1a68   : > { %11225 = vrcp.f32 %v4492_v8 }
0x1a6e   : > { %v11220_v24 = vpop.eup %11219 }
0x1a6f   : > { %v4506_v23 = vmul.f32 %v11220_v24, %v11214_v43 }
0x1a70   : > { %v11222_v10 = vpop.eup %11221 }
0x1a71   : > { %v4505_v57 = vmul.f32 %v11222_v10, %v11212_v19 }
0x1a73   : > { %v11224_v50 = vpop.eup %11223  ;;  %v4509_v40 = vpack.c.bf16 %v4506_v23, %v4505_v57  ;;  %v11021_v57 = vld [vmem:[%s11885_s23 + $0x164] ss:$16 sps:$4 sm:$0xff]   ;;  %v11024_v23 = vld [vmem:[%s11885_s23 + $0x16c] ss:$16 sps:$4 sm:$0xff]  }
0x1a74   : > { %v4508_v32 = vmul.f32 %v11224_v50, %v11218_v3  ;;  %v11019_v50 = vld [vmem:[%s11885_s23 + $0x160] ss:$16 sps:$4 sm:$0xff]   ;;  %4853 = vmatprep.subr.bf16.mxu1 %v11021_v57  ;;  %4906 = vmatprep.subr.bf16.mxu0 %v11024_v23  ;;  %v11051_v23 = vld [vmem:[%s11890_s13 + $0x268] sm:$0xff]  }
0x1a75   : > { %v11226_v38 = vpop.eup %11225  ;;  %10739 = vmatprep.mubr.bf16.mxu1 %v4509_v40  ;;  %v11022_v40 = vld [vmem:[%s11885_s23 + $0x168] ss:$16 sps:$4 sm:$0xff]   ;;  %v11050_v57 = vld [vmem:[%s11890_s13 + $0x2b0] sm:$0xff]  }
0x1a76   : > { %v4507_v12 = vmul.f32 %v11226_v38, %v11216_v5  ;;  %v11027_v38 = vld [vmem:[%s11885_s23 + $0x144] ss:$16 sps:$4 sm:$0xff]  }
0x1a78   : > { %v4510_v15 = vpack.c.bf16 %v4508_v32, %v4507_v12  ;;  %v11030_v12 = vld [vmem:[%s11885_s23 + $0x14c] ss:$16 sps:$4 sm:$0xff]   ;;  %v11025_v32 = vld [vmem:[%s11885_s23 + $0x140] ss:$16 sps:$4 sm:$0xff]  }
0x1a7a   : > { %10740 = vmatmul.mubr.bf16.vlgmr.msra.gmra.mxu1 %v4510_v15  ;;  %v11028_v15 = vld [vmem:[%s11885_s23 + $0x148] ss:$16 sps:$4 sm:$0xff]  }
0x1a7b   : > { %4877 = vmatprep.mubr.bf16.mxu1 %v11785_v39  ;;  %4854 = vmatpush1.bf16.msra.mxu1 %v11019_v50  ;;  %v11052_v50 = vld [vmem:[%s11890_s13 + $0x2e8] sm:$0xff]  }
0x1a7c   : > { %4855 = vmatprep.subr.bf16.mxu1 %v11027_v38 }
0x1a7f   : > { %4856 = vmatpush1.bf16.msra.mxu1 %v11025_v32  ;;  %v11054_v32 = vld [vmem:[%s11890_s13 + $0x2a8] sm:$0xff]  }
0x1a80   : > { %4857 = vmatprep.subr.bf16.mxu1 %v11033_v17  ;;  %v11056_v17 = vld [vmem:[%s11890_s13 + $0x2e0] sm:$0xff]  }
0x1b3a   : > { %v10741_v46 = vpop.f32.mrf.mxu1 }
0x1b3c   : > { %v4569_v41 = vpop.f32.mrf.mxu1 }
0x1b3e   : > { %v10742_v25 = vpop.f32.mrf.mxu1 }
0x1b3f   : > { %v4585_v33 = vpack.c.bf16 %v10742_v25, %v10741_v46  ;;  %v11031_v46 = vld [vmem:[%s11885_s23 + $0x120] ss:$16 sps:$4 sm:$0xff]   ;;  %v11039_v25 = vld [vmem:[%s11885_s23 + $0x104] ss:$16 sps:$4 sm:$0xff]  }
0x1b40   : > { %v4572_v63 = vpop.f32.mrf.mxu1  ;;  %4858 = vmatpush1.bf16.msra.mxu1 %v11031_v46  ;;  %v11058_v46 = vld [vmem:[%s11890_s13 + $0x2a0] sm:$0xff]  }
0x1b41   : > { %v4584_v14 = vpack.c.bf16 %v4572_v63, %v4569_v41  ;;  %v11034_v41 = vld [vmem:[%s11885_s23 + $0x128] ss:$16 sps:$4 sm:$0xff]   ;;  %v11042_v63 = vld [vmem:[%s11885_s23 + $0x10c] ss:$16 sps:$4 sm:$0xff]   ;;  %4859 = vmatprep.subr.bf16.mxu1 %v11039_v25 }
0x1b42   : > { %v11060_v25 = vld [vmem:[%s11890_s13 + $0x2d8] sm:$0xff]  }
0x1b43   : > { %10751 = vmatprep.mubr.msk.bf16.mxu0 %vm1308_vm1, %v4584_v14  ;;  %v11037_v14 = vld [vmem:[%s11885_s23 + $0x100] ss:$16 sps:$4 sm:$0xff]  }
0x1b44   : > { %10752 = vmatmul.mubr.msk.bf16.vlgmr.msra.gmra.mxu0 %vm1308_vm1, %v4585_v33  ;;  %v11040_v33 = vld [vmem:[%s11885_s23 + $0x108] ss:$16 sps:$4 sm:$0xff]   ;;  %4860 = vmatpush1.bf16.msra.mxu1 %v11037_v14 }
0x1b45   : > { %4930 = vmatprep.mubr.bf16.mxu0 %v11785_v39  ;;  %4907 = vmatpush1.bf16.msra.mxu0 %v11022_v40  ;;  %v11062_v14 = vld [vmem:[%s11890_s13 + $0x298] sm:$0xff]  }
0x1b46   : > { %4908 = vmatprep.subr.bf16.mxu0 %v11030_v12  ;;  %v11053_v12 = vld [vmem:[%s11890_s13 + $0x228] sm:$0xff]  }
0x1b49   : > { %4909 = vmatpush1.bf16.msra.mxu0 %v11028_v15  ;;  %v11055_v15 = vld [vmem:[%s11890_s13 + $0x260] sm:$0xff]  }
0x1b4a   : > { %4910 = vmatprep.subr.bf16.mxu0 %v11036_v6  ;;  %v11057_v6 = vld [vmem:[%s11890_s13 + $0x220] sm:$0xff]  }
0x1b4d   : > { %4911 = vmatpush1.bf16.msra.mxu0 %v11034_v41  ;;  %v11059_v41 = vld [vmem:[%s11890_s13 + $0x258] sm:$0xff]  }
0x1b4e   : > { %4912 = vmatprep.subr.bf16.mxu0 %v11042_v63  ;;  %v11061_v63 = vld [vmem:[%s11890_s13 + $0x218] sm:$0xff]  }
0x1b51   : > { %4913 = vmatpush1.bf16.msra.mxu0 %v11040_v33  ;;  %v11063_v33 = vld [vmem:[%s11890_s13 + $0x250] sm:$0xff]  }
0x1c04   : > { %v10753_v37 = vpop.f32.mrf.mxu0 }
0x1c05   : > { %v4663_v0 = vadd.f32 %v10753_v37, %v4589_v42  ;;  %v11044_v37 = vld [vmem:[%s11890_s13 + $0x2f8] sm:$0xff]  }
0x1c06   : > { %v4654_v35 = vpop.f32.mrf.mxu0  ;;  %10339 = vmatprep.subr.bf16.mxu0 %v11044_v37  ;;  %v11065_v37 = vld [vmem:[%s11890_s13 + $0x210] sm:$0xff]  }
0x1c07   : > { %v4655_v61 = vadd.f32 %v4654_v35, %v4589_v42  ;;  %v4671_v49 = vadd.f32 %v4663_v0, %v13672_v59 }
0x1c08   : > { %v10754_v60 = vpop.f32.mrf.mxu0 }
0x1c09   : > { %v4669_v55 = vadd.f32 %v4655_v61, %v13661_v7  ;;  %v4666_v11 = vadd.f32 %v10754_v60, %v4589_v42  ;;  %v4679_v56 = vsel %vm1308_vm1, %v4671_v49, 0.0 }
0x1c0a   : > { %v4657_v13 = vpop.f32.mrf.mxu0 }
0x1c0b   : > { %v4658_v9 = vadd.f32 %v4657_v13, %v4589_v42  ;;  %v4673_v22 = vsel %vm1308_vm1, %v4669_v55, 0.0  ;;  %v4672_v51 = vadd.f32 %v4666_v11, %v13674_v53  ;;  %v11043_v42 = vld [vmem:[%s11890_s13 + $0x278] sm:$0xff]  }
0x1c0c   : > { %4674 = vadd.xlane.f32.xlu0 %v4673_v22  ;;  %10311 = vmatprep.subr.bf16.mxu1 %v11043_v42  ;;  %v11064_v42 = vld [vmem:[%s11890_s13 + $0x2d0] sm:$0xff]  }
0x1c0d   : > { %v4670_v47 = vadd.f32 %v4658_v9, %v13663_v62  ;;  %v4682_v7 = vsel %vm1308_vm1, %v4672_v51, 0.0 }
0x1c0f   : > { %v4676_v52 = vsel %vm1308_vm1, %v4670_v47, 0.0 }
0x1c10   : > { %4677 = vadd.xlane.f32.xlu1 %v4676_v52  ;;  %4680 = vadd.xlane.f32.xlu0 %v4679_v56 }
0x1c14   : > { %4683 = vadd.xlane.f32.xlu1 %v4682_v7  ;;  %v4728_v7 = vrot.slane %v13722_v45, %v13148_v20 }
0x1c95   : > { %v4675_v26 = vpop.xlane.xlu0 %4674 }
0x1c96   : > { %v4685_v59 = vmul.f32 0.015625, %v4675_v26 }
0x1c98   : > { %v13941_v4 = vsub.f32 %v4669_v55, %v4685_v59 }
0x1c99   : > { %v4678_v1 = vpop.xlane.xlu1 %4677  ;;  %v4681_v36 = vpop.xlane.xlu0 %4680 }
0x1c9a   : > { %v4686_v58 = vmul.f32 0.015625, %v4678_v1  ;;  %v4687_v19 = vmul.f32 0.015625, %v4681_v36  ;;  %v4693_v62 = vmul.f32 %v13941_v4, %v13941_v4  ;;  %v4736_v36 = vrot.slane %v13722_v45, %v13154_v16 }
0x1c9c   : > { %v13945_v53 = vsub.f32 %v4670_v47, %v4686_v58  ;;  %v13947_v43 = vsub.f32 %v4671_v49, %v4687_v19  ;;  %v4697_v5 = vsel %vm1308_vm1, %v4693_v62, 0.0 }
0x1c9d   : > { %v4684_v3 = vpop.xlane.xlu1 %4683  ;;  %4698 = vadd.xlane.f32.xlu0 %v4697_v5 }
0x1c9e   : > { %v4688_v48 = vmul.f32 0.015625, %v4684_v3  ;;  %v4694_v2 = vmul.f32 %v13945_v53, %v13945_v53  ;;  %v4695_v28 = vmul.f32 %v13947_v43, %v13947_v43 }
0x1ca0   : > { %v13954_v30 = vsub.f32 %v4672_v51, %v4688_v48  ;;  %v4700_v18 = vsel %vm1308_vm1, %v4694_v2, 0.0  ;;  %v4703_v8 = vsel %vm1308_vm1, %v4695_v28, 0.0  ;;  %v11045_v28 = vld [vmem:[%s11890_s13 + $0x238] sm:$0xff]  }
0x1ca1   : > { %4701 = vadd.xlane.f32.xlu1 %v4700_v18  ;;  %4704 = vadd.xlane.f32.xlu0 %v4703_v8  ;;  %v11046_v18 = vld [vmem:[%s11890_s13 + $0x2b8] sm:$0xff]   ;;  %v11047_v8 = vld [vmem:[%s11890_s13 + $0x270] sm:$0xff]  }
0x1ca2   : > { %v4696_v24 = vmul.f32 %v13954_v30, %v13954_v30 }
0x1ca4   : > { %v4706_v10 = vsel %vm1308_vm1, %v4696_v24, 0.0  ;;  %v11048_v24 = vld [vmem:[%s11890_s13 + $0x2f0] sm:$0xff]  }
0x1ca5   : > { %4707 = vadd.xlane.f32.xlu1 %v4706_v10 }
0x1d26   : > { %v4699_v35 = vpop.xlane.xlu0 %4698 }
0x1d27   : > { %v4709_v0 = vmul.f32 0.015625, %v4699_v35  ;;  %v11066_v35 = vld [vmem:[%s11890_s13 + $0x290] sm:$0xff]  }
0x1d29   : > { %v4713_v61 = vadd.f32 1e-05, %v4709_v0  ;;  %v11067_v0 = vld [vmem:[%s11890_s13 + $0x248] sm:$0xff]  }
0x1d2a   : > { %v4702_v60 = vpop.xlane.xlu1 %4701  ;;  %v4705_v55 = vpop.xlane.xlu0 %4704 }
0x1d2b   : > { %11227 = vrsqrt.f32 %v4713_v61  ;;  %v4710_v13 = vmul.f32 0.015625, %v4702_v60  ;;  %v4711_v49 = vmul.f32 0.015625, %v4705_v55  ;;  %v11068_v61 = vld [vmem:[%s11890_s13 + $0x2c8] sm:$0xff]  }
0x1d2c   : > { %v11069_v60 = vld [vmem:[%s11890_s13 + $0x208] sm:$0xff]  }
0x1d2d   : > { %v4714_v11 = vadd.f32 1e-05, %v4710_v13  ;;  %v4715_v9 = vadd.f32 1e-05, %v4711_v49  ;;  %v11070_v55 = vld [vmem:[%s11890_s13 + $0x288] sm:$0xff]   ;;  %v11071_v13 = vld [vmem:[%s11890_s13 + $0x240] sm:$0xff]  }
0x1d2e   : > { %v4708_v22 = vpop.xlane.xlu1 %4707  ;;  %v11072_v49 = vld [vmem:[%s11890_s13 + $0x2c0] sm:$0xff]  }
0x1d2f   : > { %11229 = vrsqrt.f32 %v4714_v11  ;;  %v4712_v47 = vmul.f32 0.015625, %v4708_v22  ;;  %v11073_v11 = vld [vmem:[%s11890_s13 + $0x200] sm:$0xff]   ;;  %v9532_v22 = vld [vmem:[%s11895_s14 + $0x58] sm:$0xff] }
0x1d30   : > { %11231 = vrsqrt.f32 %v4715_v9  ;;  %v11074_v9 = vld [vmem:[%s11890_s13 + $0x280] sm:$0xff]  }
0x1d31   : > { %v4716_v51 = vadd.f32 1e-05, %v4712_v47  ;;  %v9531_v47 = vld [vmem:[%s11895_s14 + $0x50] sm:$0xff] }
0x1d33   : > { %11233 = vrsqrt.f32 %v4716_v51 }
0x1d38   : > { %v11228_v52 = vpop.eup %11227 }
0x1d39   : > { %v4721_v56 = vmul.f32 %v11228_v52, %v13941_v4 }
0x1d3b   : > { %v4729_v1 = vmul.f32 %v4728_v7, %v4721_v56  ;;  %v4750_v56 = vrot.slane %v13727_v44, %v13210_v29 }
0x1d3c   : > { %v11230_v26 = vpop.eup %11229 }
0x1d3d   : > { %v4722_v59 = vmul.f32 %v11230_v26, %v13945_v53  ;;  %v11232_v58 = vpop.eup %11231  ;;  %v13985_v5 = vadd.f32 %v4736_v36, %v4729_v1  ;;  %v4746_v26 = vrot.slane %v13722_v45, %v13210_v29 }
0x1d3e   : > { %v4723_v4 = vmul.f32 %v11232_v58, %v13947_v43 }
0x1d3f   : > { %v4730_v19 = vmul.f32 %v4728_v7, %v4722_v59  ;;  %v4754_v59 = vrot.slane %v9531_v47, %v13210_v29 }
0x1d40   : > { %v11234_v62 = vpop.eup %11233  ;;  %v4731_v10 = vmul.f32 %v4728_v7, %v4723_v4 }
0x1d41   : > { %v13987_v3 = vadd.f32 %v4736_v36, %v4730_v19  ;;  %v4724_v48 = vmul.f32 %v11234_v62, %v13954_v30  ;;  %v11049_v30 = vld [vmem:[%s11890_s13 + $0x230] sm:$0xff]  }
0x1d42   : > { %v14007_v40 = vadd.f32 %v4736_v36, %v4731_v10 }
0x1d43   : > { %v4741_v53 = vpack.c.bf16 %v13987_v3, %v13985_v5  ;;  %v4732_v2 = vmul.f32 %v4728_v7, %v4724_v48  ;;  %v4758_v7 = vrot.slane %v9532_v22, %v13210_v29 }
0x1d45   : > { %9567 = vmatmul.mubr.msk.bf16.vlgmr.msra.gmra.mxu1 %vm1308_vm1, %v4741_v53  ;;  %9569 = vmatmul.mubr.msk.bf16.vlgmr.msra.gmra.mxu0 %vm1308_vm1, %v4741_v53  ;;  %v14001_v43 = vadd.f32 %v4736_v36, %v4732_v2 }
0x1d46   : > { %4887 = vmatprep.mubr.bf16.mxu1 %v11785_v39  ;;  %4940 = vmatprep.mubr.bf16.mxu0 %v11785_v39 }
0x1d47   : > { %10312 = vmatpush3.bf16.msra.mxu1 %v11045_v28  ;;  %10340 = vmatpush3.bf16.msra.mxu0 %v11046_v18  ;;  %v4742_v38 = vpack.c.bf16 %v14001_v43, %v14007_v40 }
0x1d48   : > { %10313 = vmatprep.subr.bf16.mxu1 %v11047_v8  ;;  %10341 = vmatprep.subr.bf16.mxu0 %v11048_v24 }
0x1d4b   : > { %10314 = vmatpush3.bf16.msra.mxu1 %v11049_v30  ;;  %10342 = vmatpush3.bf16.msra.mxu0 %v11050_v57 }
0x1d4c   : > { %10315 = vmatprep.subr.bf16.mxu1 %v11051_v23  ;;  %10343 = vmatprep.subr.bf16.mxu0 %v11052_v50 }
0x1d4d   : > { %9568 = vmatmul.mubr.msk.bf16.gmra.mxu1 %vm1308_vm1, %v4742_v38  ;;  %9570 = vmatmul.mubr.msk.bf16.gmra.mxu0 %vm1308_vm1, %v4742_v38 }
0x1d4f   : > { %10316 = vmatpush3.bf16.msra.mxu1 %v11053_v12  ;;  %10344 = vmatpush3.bf16.msra.mxu0 %v11054_v32 }
0x1d50   : > { %10317 = vmatprep.subr.bf16.mxu1 %v11055_v15  ;;  %10345 = vmatprep.subr.bf16.mxu0 %v11056_v17 }
0x1d53   : > { %10318 = vmatpush3.bf16.msra.mxu1 %v11057_v6  ;;  %10346 = vmatpush3.bf16.msra.mxu0 %v11058_v46 }
0x1d54   : > { %10319 = vmatprep.subr.bf16.mxu1 %v11059_v41  ;;  %10347 = vmatprep.subr.bf16.mxu0 %v11060_v25 }
0x1d57   : > { %10320 = vmatpush3.bf16.msra.mxu1 %v11061_v63  ;;  %10348 = vmatpush3.bf16.msra.mxu0 %v11062_v14 }
0x1d58   : > { %10321 = vmatprep.subr.bf16.mxu1 %v11063_v33  ;;  %10349 = vmatprep.subr.bf16.mxu0 %v11064_v42 }
0x1d5b   : > { %10322 = vmatpush3.bf16.msra.mxu1 %v11065_v37  ;;  %10350 = vmatpush3.bf16.msra.mxu0 %v11066_v35 }
0x1d5c   : > { %10323 = vmatprep.subr.bf16.mxu1 %v11067_v0  ;;  %10351 = vmatprep.subr.bf16.mxu0 %v11068_v61 }
0x1d5f   : > { %10324 = vmatpush3.bf16.msra.mxu1 %v11069_v60  ;;  %10352 = vmatpush3.bf16.msra.mxu0 %v11070_v55 }
0x1d60   : > { %10325 = vmatprep.subr.bf16.mxu1 %v11071_v13  ;;  %10353 = vmatprep.subr.bf16.mxu0 %v11072_v49 }
0x1d63   : > { %10326 = vmatpush3.bf16.msra.mxu1 %v11073_v11  ;;  %10354 = vmatpush3.bf16.msra.mxu0 %v11074_v9 }
0x1e05   : > { %v4879_v51 = vpop.f32.mrf.mxu1  ;;  %v4932_v52 = vpop.f32.mrf.mxu0 }
0x1e06   : > { %v4880_v2 = vadd.f32 %v4879_v51, %v4746_v26  ;;  %v4933_v28 = vadd.f32 %v4932_v52, %v4754_v59 }
0x1e07   : > { %v4881_v1 = vpop.f32.mrf.mxu1  ;;  %v4934_v36 = vpop.f32.mrf.mxu0 }
0x1e08   : > { %v4882_v62 = vadd.f32 %v4881_v1, %v4750_v56  ;;  %v4935_v4 = vadd.f32 %v4934_v36, %v4758_v7  ;;  %v4951_v15 = vmax.f32 %v4880_v2, 0.0  ;;  %v4953_v17 = vmax.f32 %v4933_v28, 0.0 }
0x1e09   : > { %v4883_v58 = vpop.f32.mrf.mxu1  ;;  %v4936_v19 = vpop.f32.mrf.mxu0 }
0x1e0a   : > { %v4884_v48 = vadd.f32 %v4883_v58, %v4746_v26  ;;  %v4937_v53 = vadd.f32 %v4936_v19, %v4754_v59  ;;  %v4952_v50 = vmax.f32 %v4882_v62, 0.0  ;;  %v4954_v38 = vmax.f32 %v4935_v4, 0.0 }
0x1e0b   : > { %v4885_v18 = vpop.f32.mrf.mxu1  ;;  %v4938_v8 = vpop.f32.mrf.mxu0 }
0x1e0c   : > { %v4886_v44 = vadd.f32 %v4885_v18, %v4750_v56  ;;  %v4939_v24 = vadd.f32 %v4938_v8, %v4758_v7  ;;  %v4955_v10 = vmax.f32 %v4884_v48, 0.0  ;;  %v4957_v30 = vmax.f32 %v4937_v53, 0.0 }
0x1e0d   : > { %v4889_v57 = vpop.f32.mrf.mxu1  ;;  %v4942_v23 = vpop.f32.mrf.mxu0 }
0x1e0e   : > { %v4956_v12 = vmax.f32 %v4886_v44, 0.0  ;;  %v4958_v32 = vmax.f32 %v4939_v24, 0.0  ;;  %v4967_v63 = vpack.c.bf16 %v4955_v10, %v4951_v15  ;;  %v4969_v14 = vpack.c.bf16 %v4957_v30, %v4953_v17 }
0x1e0f   : > { %v4891_v6 = vpop.f32.mrf.mxu1  ;;  %v4944_v46 = vpop.f32.mrf.mxu0  ;;  %v4890_v60 = vadd.f32 %v4889_v57, %v4746_v26  ;;  %v4943_v55 = vadd.f32 %v4942_v23, %v4754_v59 }
0x1e10   : > { %v4968_v41 = vpack.c.bf16 %v4956_v12, %v4952_v50  ;;  %v4970_v25 = vpack.c.bf16 %v4958_v32, %v4954_v38  ;;  %v4892_v33 = vadd.f32 %v4891_v6, %v4750_v56  ;;  %v4945_v35 = vadd.f32 %v4944_v46, %v4758_v7 }
0x1e11   : > { %v4893_v42 = vpop.f32.mrf.mxu1  ;;  %v4946_v37 = vpop.f32.mrf.mxu0  ;;  %v4959_v58 = vmax.f32 %v4890_v60, 0.0  ;;  %v4961_v19 = vmax.f32 %v4943_v55, 0.0 }
0x1e12   : > { %v4894_v0 = vadd.f32 %v4893_v42, %v4746_v26  ;;  %v4947_v61 = vadd.f32 %v4946_v37, %v4754_v59  ;;  %5203 = vmatprep.mubr.bf16.mxu1 %v4968_v41  ;;  %5252 = vmatprep.mubr.bf16.mxu0 %v4970_v25  ;;  %v4960_v51 = vmax.f32 %v4892_v33, 0.0  ;;  %v4962_v52 = vmax.f32 %v4945_v35, 0.0 }
0x1e13   : > { %v4895_v13 = vpop.f32.mrf.mxu1  ;;  %v4948_v49 = vpop.f32.mrf.mxu0  ;;  %5204 = vmatmul.mubr.bf16.vlgmr.msra.gmra.mxu1 %v4967_v63  ;;  %5253 = vmatmul.mubr.bf16.vlgmr.msra.gmra.mxu0 %v4969_v14  ;;  %v4978_v26 = vrot.slane %v13722_v45, %v13225_v27 }
0x1e14   : > { %v4896_v11 = vadd.f32 %v4895_v13, %v4750_v56  ;;  %v4949_v9 = vadd.f32 %v4948_v49, %v4758_v7  ;;  %v4963_v22 = vmax.f32 %v4894_v0, 0.0  ;;  %v4965_v47 = vmax.f32 %v4947_v61, 0.0 }
0x1e16   : > { %v4964_v1 = vmax.f32 %v4896_v11, 0.0  ;;  %v4966_v36 = vmax.f32 %v4949_v9, 0.0  ;;  %v4971_v48 = vpack.c.bf16 %v4963_v22, %v4959_v58  ;;  %v4973_v53 = vpack.c.bf16 %v4965_v47, %v4961_v19 }
0x1e18   : > { %v4972_v62 = vpack.c.bf16 %v4964_v1, %v4960_v51  ;;  %v4974_v4 = vpack.c.bf16 %v4966_v36, %v4962_v52 }
0x1e1a   : > { %5211 = vmatprep.mubr.bf16.mxu1 %v4972_v62  ;;  %5260 = vmatprep.mubr.bf16.mxu0 %v4974_v4 }
0x1e1b   : > { %5212 = vmatmul.mubr.bf16.gmra.mxu1 %v4971_v48  ;;  %5261 = vmatmul.mubr.bf16.gmra.mxu0 %v4973_v53 }
0x1e1c   : > { %5534 = vmatprep.mubr.bf16.mxu1 %v11785_v39 }
0x1ed3   : > { %v10327_v56 = vpop.f32.mrf.mxu1  ;;  %v10355_v7 = vpop.f32.mrf.mxu0 }
0x1ed5   : > { %v10328_v59 = vpop.f32.mrf.mxu1  ;;  %v10356_v2 = vpop.f32.mrf.mxu0 }
0x1ed6   : > { %v10329_v28 = vadd.f32 %v10328_v59, %v10327_v56  ;;  %v10357_v24 = vadd.f32 %v10356_v2, %v10355_v7 }
0x1ed7   : > { %v10330_v18 = vpop.f32.mrf.mxu1  ;;  %v10358_v8 = vpop.f32.mrf.mxu0 }
0x1ed8   : > { %v5206_v44 = vadd.f32 %v10329_v28, %v4978_v26 }
0x1ed9   : > { %v10331_v10 = vpop.f32.mrf.mxu1  ;;  %v10359_v30 = vpop.f32.mrf.mxu0 }
0x1eda   : > { %v5255_v57 = vadd.f32 %v10357_v24, %v5206_v44  ;;  %v10332_v23 = vadd.f32 %v10331_v10, %v10330_v18  ;;  %v10360_v32 = vadd.f32 %v10359_v30, %v10358_v8  ;;  %v11077_v18 = vld [vmem:[%s11875_s15 + $0xf4] ss:$8 sps:$4 sm:$0xff]   ;;  %v11075_v8 = vld [vmem:[%s11875_s15 + $0xf0] ss:$8 sps:$4 sm:$0xff]   ;;  %v11080_v44 = vld [vmem:[%s11875_s15 + $0xe4] ss:$8 sps:$4 sm:$0xff]  }
0x1edb   : > { %v10333_v50 = vpop.f32.mrf.mxu1  ;;  %v10361_v38 = vpop.f32.mrf.mxu0  ;;  %5510 = vmatprep.subr.bf16.mxu1 %v11077_v18  ;;  %v11078_v24 = vld [vmem:[%s11875_s15 + $0xe0] ss:$8 sps:$4 sm:$0xff]   ;;  %v11083_v10 = vld [vmem:[%s11875_s15 + $0xd4] ss:$8 sps:$4 sm:$0xff]   ;;  %v11081_v30 = vld [vmem:[%s11875_s15 + $0xd0] ss:$8 sps:$4 sm:$0xff]  }
0x1edc   : > { %v5209_v12 = vadd.f32 %v10332_v23, %v4978_v26  ;;  %v5269_v15 = vadd.f32 %v5255_v57, %v13985_v5  ;;  %5511 = vmatpush1.bf16.msra.mxu1 %v11075_v8  ;;  %v11084_v57 = vld [vmem:[%s11875_s15 + $0xc0] ss:$8 sps:$4 sm:$0xff]   ;;  %v11086_v23 = vld [vmem:[%s11875_s15 + $0xc4] ss:$8 sps:$4 sm:$0xff]  }
0x1edd   : > { %v10334_v17 = vpop.f32.mrf.mxu1  ;;  %v10362_v6 = vpop.f32.mrf.mxu0  ;;  %5512 = vmatprep.subr.bf16.mxu1 %v11080_v44  ;;  %v11373_v18 = vld [vmem:[%s14567_s9 + $0x8] sm:$0xff]  ;;  %v11374_v8 = vld [vmem:[%s14567_s9] sm:$0xff] }
0x1ede   : > { %v5258_v45 = vadd.f32 %v10360_v32, %v5209_v12  ;;  %v10335_v46 = vadd.f32 %v10334_v17, %v10333_v50  ;;  %v5273_v41 = vsel %vm1308_vm1, %v5269_v15, 0.0  ;;  %v10363_v33 = vadd.f32 %v10362_v6, %v10361_v38  ;;  %v11358_v50 = vld [vmem:[%s14567_s9 + $0x78] sm:$0xff]  ;;  %v14133_v44 = vld [vmem:[%s11895_s14 + $0x60] sm:$0xff] }
0x1edf   : > { %v10364_v25 = vpop.f32.mrf.mxu0  ;;  %5274 = vadd.xlane.f32.xlu0 %v5273_v41  ;;  %v10336_v63 = vpop.f32.mrf.mxu1 }
0x1ee0   : > { %v5214_v14 = vadd.f32 %v10335_v46, %v4978_v26  ;;  %v5270_v42 = vadd.f32 %v5258_v45, %v13987_v3  ;;  %5513 = vmatpush1.bf16.msra.mxu1 %v11078_v24  ;;  %v5451_v24 = vrot.slane %v14133_v44, %v12789_v54 }
0x1ee1   : > { %v10337_v37 = vpop.f32.mrf.mxu1  ;;  %v10365_v35 = vpop.f32.mrf.mxu0  ;;  %5514 = vmatprep.subr.bf16.mxu1 %v11083_v10  ;;  %v14138_v10 = vld [vmem:[%s11895_s14 + $0x68] sm:$0xff] }
0x1ee2   : > { %v5263_v0 = vadd.f32 %v10363_v33, %v5214_v14  ;;  %v10338_v61 = vadd.f32 %v10337_v37, %v10336_v63  ;;  %v5276_v60 = vsel %vm1308_vm1, %v5270_v42, 0.0  ;;  %v10366_v55 = vadd.f32 %v10365_v35, %v10364_v25 }
0x1ee3   : > { %5277 = vadd.xlane.f32.xlu1 %v5276_v60 }
0x1ee4   : > { %v5217_v5 = vadd.f32 %v10338_v61, %v4978_v26  ;;  %v5271_v13 = vadd.f32 %v5263_v0, %v14007_v40  ;;  %5515 = vmatpush1.bf16.msra.mxu1 %v11081_v30 }
0x1ee5   : > { %5516 = vmatprep.subr.bf16.mxu1 %v11086_v23 }
0x1ee6   : > { %v5266_v49 = vadd.f32 %v10366_v55, %v5217_v5  ;;  %v5279_v11 = vsel %vm1308_vm1, %v5271_v13, 0.0 }
0x1ee7   : > { %5280 = vadd.xlane.f32.xlu0 %v5279_v11 }
0x1ee8   : > { %v5272_v9 = vadd.f32 %v5266_v49, %v14001_v43  ;;  %5517 = vmatpush1.bf16.msra.mxu1 %v11084_v57  ;;  %v14142_v57 = vrot.slane %v14138_v10, %v12789_v54 }
0x1ee9   : > { %10767 = vmatprep.subr.mxu1 %v11358_v50 }
0x1eea   : > { %v5282_v22 = vsel %vm1308_vm1, %v5272_v9, 0.0 }
0x1eeb   : > { %5283 = vadd.xlane.f32.xlu1 %v5282_v22 }
0x1f68   : > { %v5275_v3 = vpop.xlane.xlu0 %5274 }
0x1f69   : > { %v5285_v47 = vmul.f32 0.015625, %v5275_v3 }
0x1f6b   : > { %v5289_v51 = vsub.f32 %v5269_v15, %v5285_v47 }
0x1f6c   : > { %v5278_v52 = vpop.xlane.xlu1 %5277 }
0x1f6d   : > { %v5286_v1 = vmul.f32 0.015625, %v5278_v52  ;;  %v5293_v36 = vmul.f32 %v5289_v51, %v5289_v51 }
0x1f6f   : > { %v5290_v58 = vsub.f32 %v5270_v42, %v5286_v1  ;;  %v5297_v19 = vsel %vm1308_vm1, %v5293_v36, 0.0  ;;  %v11359_v42 = vld [vmem:[%s11895_s14 + $0x40] sm:$0xff]  ;;  %v11360_v1 = vld [vmem:[%s14567_s9 + $0x70] sm:$0xff] }
0x1f70   : > { %5298 = vadd.xlane.f32.xlu0 %v5297_v19  ;;  %v5281_v40 = vpop.xlane.xlu0 %5280  ;;  %v5328_v37 = vrot.slane %v11359_v42, %v13251_v34  ;;  %v5336_v5 = vrot.slane %v11359_v42, %v13256_v21  ;;  %v11361_v19 = vld [vmem:[%s14567_s9 + $0x68] sm:$0xff] }
0x1f71   : > { %v5287_v62 = vmul.f32 0.015625, %v5281_v40  ;;  %v5294_v4 = vmul.f32 %v5290_v58, %v5290_v58 }
0x1f73   : > { %v5291_v48 = vsub.f32 %v5271_v13, %v5287_v62  ;;  %v5300_v43 = vsel %vm1308_vm1, %v5294_v4, 0.0  ;;  %v11362_v62 = vld [vmem:[%s14567_s9 + $0x60] sm:$0xff]  ;;  %v11363_v4 = vld [vmem:[%s14567_s9 + $0x58] sm:$0xff] }
0x1f74   : > { %5301 = vadd.xlane.f32.xlu1 %v5300_v43  ;;  %v5284_v53 = vpop.xlane.xlu1 %5283  ;;  %v11365_v43 = vld [vmem:[%s14567_s9 + $0x48] sm:$0xff] }
0x1f75   : > { %v5288_v56 = vmul.f32 0.015625, %v5284_v53  ;;  %v5295_v7 = vmul.f32 %v5291_v48, %v5291_v48  ;;  %v11366_v53 = vld [vmem:[%s14567_s9 + $0x40] sm:$0xff] }
0x1f77   : > { %v5292_v26 = vsub.f32 %v5272_v9, %v5288_v56  ;;  %v5303_v59 = vsel %vm1308_vm1, %v5295_v7, 0.0  ;;  %v11367_v56 = vld [vmem:[%s14567_s9 + $0x38] sm:$0xff]  ;;  %v11368_v7 = vld [vmem:[%s14567_s9 + $0x30] sm:$0xff] }
0x1f78   : > { %5304 = vadd.xlane.f32.xlu0 %v5303_v59  ;;  %v11370_v59 = vld [vmem:[%s14567_s9 + $0x20] sm:$0xff] }
0x1f79   : > { %v5296_v2 = vmul.f32 %v5292_v26, %v5292_v26 }
0x1f7b   : > { %v5306_v28 = vsel %vm1308_vm1, %v5296_v2, 0.0  ;;  %v11371_v2 = vld [vmem:[%s14567_s9 + $0x18] sm:$0xff] }
0x1f7c   : > { %5307 = vadd.xlane.f32.xlu1 %v5306_v28  ;;  %v11372_v28 = vld [vmem:[%s14567_s9 + $0x10] sm:$0xff] }
0x1ff9   : > { %v5299_v38 = vpop.xlane.xlu0 %5298 }
0x1ffa   : > { %v5309_v12 = vmul.f32 0.015625, %v5299_v38 }
0x1ffc   : > { %v5313_v32 = vadd.f32 1e-05, %v5309_v12 }
0x1ffd   : > { %v5302_v15 = vpop.xlane.xlu1 %5301 }
0x1ffe   : > { %11235 = vrsqrt.f32 %v5313_v32  ;;  %v5310_v17 = vmul.f32 0.015625, %v5302_v15 }
0x2000   : > { %v5314_v6 = vadd.f32 1e-05, %v5310_v17 }
0x2001   : > { %v5305_v45 = vpop.xlane.xlu0 %5304 }
0x2002   : > { %11237 = vrsqrt.f32 %v5314_v6  ;;  %v5311_v46 = vmul.f32 0.015625, %v5305_v45 }
0x2004   : > { %v5315_v41 = vadd.f32 1e-05, %v5311_v46  ;;  %v11375_v46 = vld [vmem:[%s14566_s8 + $0x60] sm:$0xff] }
0x2005   : > { %v5308_v25 = vpop.xlane.xlu1 %5307 }
0x2006   : > { %11239 = vrsqrt.f32 %v5315_v41  ;;  %v5312_v63 = vmul.f32 0.015625, %v5308_v25  ;;  %v11376_v25 = vld [vmem:[%s14566_s8 + $0x40] sm:$0xff] }
0x2008   : > { %v5316_v14 = vadd.f32 1e-05, %v5312_v63 }
0x200a   : > { %11241 = vrsqrt.f32 %v5316_v14  ;;  %v11377_v14 = vld [vmem:[%s14566_s8 + $0x20] sm:$0xff] }
0x200b   : > { %v11236_v33 = vpop.eup %11235 }
0x200c   : > { %v5321_v35 = vmul.f32 %v11236_v33, %v5289_v51 }
0x200e   : > { %v5329_v61 = vmul.f32 %v5328_v37, %v5321_v35 }
0x200f   : > { %v11238_v0 = vpop.eup %11237 }
0x2010   : > { %v5322_v60 = vmul.f32 %v11238_v0, %v5290_v58  ;;  %v14072_v49 = vadd.f32 %v5336_v5, %v5329_v61  ;;  %v11379_v0 = vld [vmem:[%s14566_s8 + $0x48] sm:$0xff] }
0x2012   : > { %v5330_v55 = vmul.f32 %v5328_v37, %v5322_v60  ;;  %v11380_v60 = vld [vmem:[%s14566_s8 + $0x28] sm:$0xff] }
0x2013   : > { %v11240_v13 = vpop.eup %11239 }
0x2014   : > { %v14074_v11 = vadd.f32 %v5336_v5, %v5330_v55  ;;  %v5323_v9 = vmul.f32 %v11240_v13, %v5291_v48  ;;  %v11364_v48 = vld [vmem:[%s14567_s9 + $0x50] sm:$0xff]  ;;  %v11381_v13 = vld [vmem:[%s14566_s8] sm:$0xff] }
0x2016   : > { %v5446_v22 = vpack.c.bf16 %v14074_v11, %v14072_v49  ;;  %v5331_v51 = vmul.f32 %v5328_v37, %v5323_v9 }
0x2017   : > { %v11242_v3 = vpop.eup %11241 }
0x2018   : > { %9711 = vmatmul.mubr.msk.bf16.vlgmr.msra.gmra.mxu1 %vm1308_vm1, %v5446_v22  ;;  %v5324_v47 = vmul.f32 %v11242_v3, %v5292_v26  ;;  %v14083_v36 = vadd.f32 %v5336_v5, %v5331_v51  ;;  %v11369_v26 = vld [vmem:[%s14567_s9 + $0x28] sm:$0xff] }
0x2019   : > { %5544 = vmatprep.mubr.bf16.mxu1 %v11785_v39  ;;  %10768 = vmatpush3.msra.mxu1 %v11358_v50  ;;  %v11382_v22 = vld [vmem:[%s14566_s8 + $0x8] sm:$0xff] }
0x201a   : > { %v5332_v52 = vmul.f32 %v5328_v37, %v5324_v47  ;;  %10769 = vmatprep.subr.mxu1 %v11360_v1  ;;  %v11378_v37 = vld [vmem:[%s14566_s8 + $0x68] sm:$0xff] }
0x201b   : > { %10770 = vmatpush3.msra.mxu1 %v11360_v1 }
0x201c   : > { %v14085_v58 = vadd.f32 %v5336_v5, %v5332_v52  ;;  %10771 = vmatprep.subr.mxu1 %v11361_v19 }
0x201d   : > { %10772 = vmatpush3.msra.mxu1 %v11361_v19 }
0x201e   : > { %v5447_v40 = vpack.c.bf16 %v14085_v58, %v14083_v36  ;;  %10773 = vmatprep.subr.mxu1 %v11362_v62 }
0x201f   : > { %10774 = vmatpush3.msra.mxu1 %v11362_v62 }
0x2020   : > { %9712 = vmatmul.mubr.msk.bf16.gmra.mxu1 %vm1308_vm1, %v5447_v40  ;;  %10775 = vmatprep.subr.mxu1 %v11363_v4 }
0x2021   : > { %10776 = vmatpush3.msra.mxu1 %v11363_v4 }
0x2022   : > { %10777 = vmatprep.subr.mxu1 %v11364_v48 }
0x2023   : > { %10778 = vmatpush3.msra.mxu1 %v11364_v48 }
0x2024   : > { %10779 = vmatprep.subr.mxu1 %v11365_v43 }
0x2025   : > { %10780 = vmatpush3.msra.mxu1 %v11365_v43 }
0x2026   : > { %10781 = vmatprep.subr.mxu1 %v11366_v53 }
0x2027   : > { %10782 = vmatpush3.msra.mxu1 %v11366_v53 }
0x2028   : > { %10783 = vmatprep.subr.mxu1 %v11367_v56 }
0x2029   : > { %10784 = vmatpush3.msra.mxu1 %v11367_v56 }
0x202a   : > { %10785 = vmatprep.subr.mxu1 %v11368_v7 }
0x202b   : > { %10786 = vmatpush3.msra.mxu1 %v11368_v7 }
0x202c   : > { %10787 = vmatprep.subr.mxu1 %v11369_v26 }
0x202d   : > { %10788 = vmatpush3.msra.mxu1 %v11369_v26 }
0x202e   : > { %10789 = vmatprep.subr.mxu1 %v11370_v59 }
0x202f   : > { %10790 = vmatpush3.msra.mxu1 %v11370_v59 }
0x2030   : > { %10791 = vmatprep.subr.mxu1 %v11371_v2 }
0x2031   : > { %10792 = vmatpush3.msra.mxu1 %v11371_v2 }
0x2032   : > { %10793 = vmatprep.subr.mxu1 %v11372_v28 }
0x2033   : > { %10794 = vmatpush3.msra.mxu1 %v11372_v28 }
0x2034   : > { %10795 = vmatprep.subr.mxu1 %v11373_v18 }
0x2035   : > { %10796 = vmatpush3.msra.mxu1 %v11373_v18 }
0x2036   : > { %10797 = vmatprep.subr.mxu1 %v11374_v8 }
0x2037   : > { %10798 = vmatpush3.msra.mxu1 %v11374_v8 }
0x20d8   : > { %v5536_v30 = vpop.f32.mrf.mxu1 }
0x20d9   : > { %v5537_v23 = vadd.f32 %v5536_v30, %v5451_v24 }
0x20da   : > { %v5538_v50 = vpop.f32.mrf.mxu1 }
0x20db   : > { %5559 = vrot.lane.b32.xlu0 %v5537_v23, %s11786_s22  ;;  %v5539_v38 = vadd.f32 %v5538_v50, %v14142_v57 }
0x20dc   : > { %v5540_v12 = vpop.f32.mrf.mxu1 }
0x20dd   : > { %v5541_v32 = vadd.f32 %v5540_v12, %v5451_v24  ;;  %v5903_v41 = vmul.f32 %v11375_v46, %v5539_v38  ;;  %v5899_v63 = vmul.f32 %v11376_v25, %v5539_v38  ;;  %v5895_v33 = vmul.f32 %v11377_v14, %v5539_v38 }
0x20de   : > { %v5542_v15 = vpop.f32.mrf.mxu1  ;;  %v5891_v9 = vmul.f32 %v11381_v13, %v5539_v38 }
0x20df   : > { %v5719_v17 = vpack.c.bf16 %v5541_v32, %v5537_v23  ;;  %v5543_v6 = vadd.f32 %v5542_v15, %v14142_v57  ;;  %5561 = vrot.lane.b32.xlu1 %v5541_v32, %s11786_s22 }
0x20e0   : > { %v5546_v45 = vpop.f32.mrf.mxu1 }
0x20e1   : > { %v14157_v42 = vadd.f32 %v5546_v45, %v5451_v24  ;;  %10763 = vmatprep.mubr.msk.bf16.mxu0 %vm1308_vm1, %v5719_v17  ;;  %v5904_v35 = vmul.f32 %v11378_v37, %v5543_v6  ;;  %v5900_v61 = vmul.f32 %v11379_v0, %v5543_v6  ;;  %v5896_v5 = vmul.f32 %v11380_v60, %v5543_v6 }
0x20e2   : > { %v14169_v55 = vpop.f32.mrf.mxu1  ;;  %v5892_v3 = vmul.f32 %v11382_v22, %v5543_v6 }
0x20e3   : > { %5563 = vrot.lane.b32.xlu1 %v14157_v42, %s11786_s22  ;;  %v14179_v47 = vpack.c.bf16 %v5904_v35, %v5903_v41  ;;  %v14181_v51 = vpack.c.bf16 %v5900_v61, %v5899_v63  ;;  %v14183_v52 = vpack.c.bf16 %v5896_v5, %v5895_v33  ;;  %v11383_v33 = vld [vmem:[%s14565_s7 + $0x10] sm:$0xff]  ;;  %v11384_v35 = vld [vmem:[%s14565_s7 + $0x18] sm:$0xff] }
0x20e4   : > { %v5550_v1 = vpop.f32.mrf.mxu1  ;;  %v14185_v19 = vpack.c.bf16 %v5892_v3, %v5891_v9 }
0x20e5   : > { %v14187_v40 = vadd.f32 %v5550_v1, %v5451_v24 }
0x20e7   : > { %v5720_v62 = vpack.c.bf16 %v14187_v40, %v14157_v42  ;;  %5565 = vrot.lane.b32.xlu1 %v14187_v40, %s11786_s22  ;;  %v11395_v42 = vld [vmem:[%s14566_s8 + $0x38] sm:$0xff] }
0x214d   : > { %v5560_v4 = vpop.permute.xlu0 %5559 }
0x214e   : > { %5571 = vxpose.xlu0.b32.start [1/4] (short) (narrow) %v5560_v4, 64 }
0x2151   : > { %v5562_v48 = vpop.permute.xlu1 %5561 }
0x2152   : > { %5572 = vxpose.xlu0.b32.cont [2/4] (short) (narrow) %v5562_v48, 64 }
0x2155   : > { %v5564_v43 = vpop.permute.xlu1 %5563 }
0x2156   : > { %5573 = vxpose.xlu0.b32.cont [3/4] (short) (narrow) %v5564_v43, 64 }
0x2159   : > { %v5566_v53 = vpop.permute.xlu1 %5565 }
0x215a   : > { %5574 = vxpose.xlu0.b32.end [4/4] (short) (narrow) %v5566_v53, 64 }
0x21ca   : > { %v14193_v56 = vpop.trf.xlu0 }
0x21ce   : > { %v14195_v7 = vpop.trf.xlu0 }
0x21d2   : > { %v5589_v26 = vpop.trf.xlu0 }
0x21d6   : > { %v5590_v59 = vpop.trf.xlu0 }
0x21da   : > { %v5591_v2 = vpop.trf.xlu0 }
0x21db   : > { %5667 = vrot.lane.b32.xlu0 %v5591_v2, %s11788_s19  ;;  %5619 = vrot.lane.b32.xlu1 %v5591_v2, %s11787_s17 }
0x21de   : > { %v5592_v28 = vpop.trf.xlu0 }
0x21df   : > { %5643 = vrot.lane.b32.xlu1 %v5591_v2, %s11786_s22 }
0x21e2   : > { %v5593_v18 = vpop.trf.xlu0 }
0x21e3   : > { %5615 = vrot.lane.b32.xlu1 %v5589_v26, %s11787_s17 }
0x21e6   : > { %v5594_v8 = vpop.trf.xlu0 }
0x21e7   : > { %5617 = vrot.lane.b32.xlu1 %v5590_v59, %s11787_s17 }
0x21eb   : > { %5639 = vrot.lane.b32.xlu1 %v5589_v26, %s11786_s22 }
0x21ef   : > { %5641 = vrot.lane.b32.xlu1 %v5590_v59, %s11786_s22 }
0x21f3   : > { %5663 = vrot.lane.b32.xlu1 %v5589_v26, %s11788_s19 }
0x21f7   : > { %5665 = vrot.lane.b32.xlu1 %v5590_v59, %s11788_s19 }
0x21fb   : > { %5611 = vrot.lane.b32.xlu1 %v14193_v56, %s11787_s17 }
0x21ff   : > { %5613 = vrot.lane.b32.xlu1 %v14195_v7, %s11787_s17 }
0x2203   : > { %5635 = vrot.lane.b32.xlu1 %v14193_v56, %s11786_s22 }
0x2207   : > { %5621 = vrot.lane.b32.xlu1 %v5592_v28, %s11787_s17 }
0x220b   : > { %5645 = vrot.lane.b32.xlu1 %v5592_v28, %s11786_s22 }
0x220f   : > { %5669 = vrot.lane.b32.xlu1 %v5592_v28, %s11788_s19 }
0x2213   : > { %5623 = vrot.lane.b32.xlu1 %v5593_v18, %s11787_s17 }
0x2217   : > { %5647 = vrot.lane.b32.xlu1 %v5593_v18, %s11786_s22 }
0x221b   : > { %5671 = vrot.lane.b32.xlu1 %v5593_v18, %s11788_s19 }
0x221f   : > { %5625 = vrot.lane.b32.xlu1 %v5594_v8, %s11787_s17 }
0x2223   : > { %5649 = vrot.lane.b32.xlu1 %v5594_v8, %s11786_s22 }
0x2227   : > { %5673 = vrot.lane.b32.xlu1 %v5594_v8, %s11788_s19 }
0x222b   : > { %5637 = vrot.lane.b32.xlu1 %v14195_v7, %s11786_s22 }
0x222f   : > { %5659 = vrot.lane.b32.xlu1 %v14193_v56, %s11788_s19 }
0x2233   : > { %5661 = vrot.lane.b32.xlu1 %v14195_v7, %s11788_s19 }
0x224d   : > { %v5620_v24 = vpop.permute.xlu1 %5619 }
0x224e   : > { %v5687_v30 = vsel %vm1496_vm2, %v5591_v2, %v5620_v24 }
0x2251   : > { %v5644_v23 = vpop.permute.xlu1 %5643 }
0x2252   : > { %v5695_v50 = vsel %vm1308_vm1, %v5687_v30, %v5644_v23 }
0x2255   : > { %v5616_v38 = vpop.permute.xlu1 %5615 }
0x2256   : > { %v5685_v32 = vsel %vm1496_vm2, %v5589_v26, %v5616_v38 }
0x2259   : > { %v5618_v12 = vpop.permute.xlu1 %5617 }
0x225a   : > { %v5686_v46 = vsel %vm1496_vm2, %v5590_v59, %v5618_v12  ;;  %v5668_v12 = vpop.permute.xlu0 %5667 }
0x225d   : > { %v5640_v15 = vpop.permute.xlu1 %5639 }
0x225e   : > { %v5693_v17 = vsel %vm1308_vm1, %v5685_v32, %v5640_v15 }
0x2261   : > { %v5642_v6 = vpop.permute.xlu1 %5641 }
0x2262   : > { %v5694_v25 = vsel %vm1308_vm1, %v5686_v46, %v5642_v6 }
0x2265   : > { %v5664_v45 = vpop.permute.xlu1 %5663 }
0x2266   : > { %v5701_v41 = vsel %vm1513_vm3, %v5693_v17, %v5664_v45  ;;  %v5703_v17 = vsel %vm1513_vm3, %v5695_v50, %v5668_v12  ;;  %v11386_v45 = vld [vmem:[%s14565_s7 + $0x30] sm:$0xff]  ;;  %v11388_v50 = vld [vmem:[%s14565_s7 + $0x20] sm:$0xff] }
0x2267   : > { %v5709_v37 = vmul.f32 %v11383_v33, %v5701_v41 }
0x2269   : > { %v5666_v63 = vpop.permute.xlu1 %5665 }
0x226a   : > { %v5702_v14 = vsel %vm1513_vm3, %v5694_v25, %v5666_v63  ;;  %v5711_v25 = vmul.f32 %v11388_v50, %v5703_v17  ;;  %v11398_v17 = vld [vmem:[%s14566_s8 + $0x10] sm:$0xff] }
0x226b   : > { %v5710_v0 = vmul.f32 %v11384_v35, %v5702_v14 }
0x226d   : > { %v5612_v61 = vpop.permute.xlu1 %5611  ;;  %v5716_v60 = vpack.c.bf16 %v5710_v0, %v5709_v37  ;;  %v5552_v37 = vpop.f32.mrf.mxu1 }
0x226e   : > { %v5683_v0 = vsel %vm1496_vm2, %v14193_v56, %v5612_v61  ;;  %v11389_v56 = vld [vmem:[%s14565_s7] sm:$0xff] }
0x2271   : > { %v5614_v5 = vpop.permute.xlu1 %5613 }
0x2275   : > { %v5636_v13 = vpop.permute.xlu1 %5635 }
0x2279   : > { %v5622_v9 = vpop.permute.xlu1 %5621 }
0x227a   : > { %v5688_v26 = vsel %vm1496_vm2, %v5592_v28, %v5622_v9  ;;  %v5553_v9 = vadd.f32 %v5552_v37, %v14142_v57 }
0x227c   : > { %v5898_v40 = vmul.f32 %v11395_v42, %v5553_v9 }
0x227d   : > { %v5646_v22 = vpop.permute.xlu1 %5645 }
0x227e   : > { %v5696_v2 = vsel %vm1308_vm1, %v5688_v26, %v5646_v22  ;;  %v5691_v22 = vsel %vm1308_vm1, %v5683_v0, %v5636_v13  ;;  %v11392_v26 = vld [vmem:[%s14566_s8 + $0x70] sm:$0xff] }
0x2281   : > { %v5670_v3 = vpop.permute.xlu1 %5669 }
0x2282   : > { %v5704_v30 = vsel %vm1513_vm3, %v5696_v2, %v5670_v3  ;;  %v5684_v3 = vsel %vm1496_vm2, %v14195_v7, %v5614_v5  ;;  %v11390_v7 = vld [vmem:[%s14565_s7 + $0x8] sm:$0xff] }
0x2285   : > { %v5624_v1 = vpop.permute.xlu1 %5623 }
0x2286   : > { %v5689_v59 = vsel %vm1496_vm2, %v5593_v18, %v5624_v1  ;;  %v11385_v18 = vld [vmem:[%s14565_s7 + $0x28] sm:$0xff] }
0x2287   : > { %v5712_v6 = vmul.f32 %v11385_v18, %v5704_v30  ;;  %v11394_v30 = vld [vmem:[%s14566_s8 + $0x50] sm:$0xff] }
0x2289   : > { %v5648_v4 = vpop.permute.xlu1 %5647  ;;  %v5717_v33 = vpack.c.bf16 %v5712_v6, %v5711_v25  ;;  %v11401_v25 = vld [vmem:[%s14564_s6 + $0x8] sm:$0xff] }
0x228a   : > { %v5697_v24 = vsel %vm1308_vm1, %v5689_v59, %v5648_v4  ;;  %v5549_v4 = vadd.f32 %v14169_v55, %v14142_v57  ;;  %v11391_v57 = vld [vmem:[%s14566_s8 + $0x78] sm:$0xff] }
0x228b   : > { %v5906_v55 = vmul.f32 %v11391_v57, %v5553_v9  ;;  %v11087_v57 = vld [vmem:[%s11880_s18 + $0x78] sm:$0xff]  }
0x228c   : > { %v5905_v59 = vmul.f32 %v11392_v26, %v5549_v4  ;;  %10825 = vmatprep.subr.bf16.mxu1 %v11087_v57 }
0x228d   : > { %v5672_v48 = vpop.permute.xlu1 %5671 }
0x228e   : > { %v5705_v23 = vsel %vm1513_vm3, %v5697_v24, %v5672_v48  ;;  %v5914_v2 = vpack.c.bf16 %v5906_v55, %v5905_v59  ;;  %v11393_v24 = vld [vmem:[%s14566_s8 + $0x58] sm:$0xff]  ;;  %v11088_v55 = vld [vmem:[%s11880_s18 + $0x70] sm:$0xff]  }
0x228f   : > { %v5713_v46 = vmul.f32 %v11386_v45, %v5705_v23  ;;  %v5901_v23 = vmul.f32 %v11394_v30, %v5549_v4  ;;  %v11399_v45 = vld [vmem:[%s14564_s6] sm:$0xff] }
0x2291   : > { %v5626_v43 = vpop.permute.xlu1 %5625 }
0x2292   : > { %v5690_v38 = vsel %vm1496_vm2, %v5594_v8, %v5626_v43  ;;  %v11387_v8 = vld [vmem:[%s14565_s7 + $0x38] sm:$0xff] }
0x2295   : > { %v5650_v53 = vpop.permute.xlu1 %5649 }
0x2296   : > { %v5698_v32 = vsel %vm1308_vm1, %v5690_v38, %v5650_v53 }
0x2299   : > { %v5674_v15 = vpop.permute.xlu1 %5673 }
0x229a   : > { %v5706_v28 = vsel %vm1513_vm3, %v5698_v32, %v5674_v15 }
0x229b   : > { %v5714_v41 = vmul.f32 %v11387_v8, %v5706_v28  ;;  %v5893_v28 = vmul.f32 %v11398_v17, %v5549_v4 }
0x229d   : > { %v5638_v63 = vpop.permute.xlu1 %5637  ;;  %v5718_v14 = vpack.c.bf16 %v5714_v41, %v5713_v46 }
0x229e   : > { %v5692_v48 = vsel %vm1308_vm1, %v5684_v3, %v5638_v63  ;;  %v11402_v63 = vld [vmem:[%s14564_s6 + $0x10] sm:$0xff] }
0x229f   : > { %10755 = vmatprep.subr.bf16.mxu0 %v5718_v14 }
0x22a0   : > { %10756 = vmatpush3.bf16.msra.mxu0 %v5718_v14 }
0x22a1   : > { %v5660_v35 = vpop.permute.xlu1 %5659  ;;  %10757 = vmatprep.subr.bf16.mxu0 %v5717_v33 }
0x22a2   : > { %v5699_v1 = vsel %vm1513_vm3, %v5691_v22, %v5660_v35 }
0x22a3   : > { %v5707_v61 = vmul.f32 %v11389_v56, %v5699_v1 }
0x22a4   : > { %10758 = vmatpush3.bf16.msra.mxu0 %v5717_v33 }
0x22a5   : > { %v5662_v43 = vpop.permute.xlu1 %5661  ;;  %10759 = vmatprep.subr.bf16.mxu0 %v5716_v60 }
0x22a6   : > { %v5700_v53 = vsel %vm1513_vm3, %v5692_v48, %v5662_v43 }
0x22a7   : > { %v5708_v5 = vmul.f32 %v11390_v7, %v5700_v53 }
0x22a8   : > { %10760 = vmatpush3.bf16.msra.mxu0 %v5716_v60  ;;  %v5902_v60 = vmul.f32 %v11393_v24, %v5553_v9 }
0x22a9   : > { %v5715_v13 = vpack.c.bf16 %v5708_v5, %v5707_v61 }
0x22aa   : > { %v5912_v38 = vpack.c.bf16 %v5902_v60, %v5901_v23 }
0x22ab   : > { %10761 = vmatprep.subr.bf16.mxu0 %v5715_v13 }
0x22ac   : > { %10762 = vmatpush3.bf16.msra.mxu0 %v5715_v13 }
0x22ad   : > { %10805 = vmatprep.subr.bf16.mxu0 %v5914_v2 }
0x22af   : > { %10764 = vmatmul.mubr.msk.bf16.vlgmr.msra.gmra.mxu0 %vm1308_vm1, %v5720_v62  ;;  %v11396_v62 = vld [vmem:[%s14566_s8 + $0x30] sm:$0xff] }
0x22b0   : > { %10806 = vmatpush3.bf16.msra.mxu0 %v5914_v2  ;;  %v5897_v12 = vmul.f32 %v11396_v62, %v5549_v4 }
0x22b1   : > { %10807 = vmatprep.subr.bf16.mxu0 %v14179_v47 }
0x22b2   : > { %v5910_v32 = vpack.c.bf16 %v5898_v40, %v5897_v12 }
0x22b4   : > { %10808 = vmatpush3.bf16.msra.mxu0 %v14179_v47  ;;  %v11397_v47 = vld [vmem:[%s14566_s8 + $0x18] sm:$0xff] }
0x22b5   : > { %10809 = vmatprep.subr.bf16.mxu0 %v5912_v38  ;;  %v5894_v15 = vmul.f32 %v11397_v47, %v5553_v9  ;;  %v11089_v47 = vld [vmem:[%s11880_s18 + $0x68] sm:$0xff]  }
0x22b7   : > { %v5908_v18 = vpack.c.bf16 %v5894_v15, %v5893_v28  ;;  %v11090_v15 = vld [vmem:[%s11880_s18 + $0x60] sm:$0xff]  }
0x22b8   : > { %10810 = vmatpush3.bf16.msra.mxu0 %v5912_v38 }
0x22b9   : > { %10811 = vmatprep.subr.bf16.mxu0 %v14181_v51 }
0x22bc   : > { %10812 = vmatpush3.bf16.msra.mxu0 %v14181_v51 }
0x22bd   : > { %10813 = vmatprep.subr.bf16.mxu0 %v5910_v32 }
0x22c0   : > { %10814 = vmatpush3.bf16.msra.mxu0 %v5910_v32 }
0x22c1   : > { %10815 = vmatprep.subr.bf16.mxu0 %v14183_v52 }
0x22c4   : > { %10816 = vmatpush3.bf16.msra.mxu0 %v14183_v52  ;;  %v11400_v52 = vld [vmem:[%s14564_s6 + $0x18] sm:$0xff] }
0x22c5   : > { %10817 = vmatprep.subr.bf16.mxu0 %v5908_v18 }
0x22c8   : > { %10818 = vmatpush3.bf16.msra.mxu0 %v5908_v18 }
0x22c9   : > { %10819 = vmatprep.subr.bf16.mxu0 %v14185_v19 }
0x22cc   : > { %10820 = vmatpush3.bf16.msra.mxu0 %v14185_v19 }
0x236f   : > { %v10765_v51 = vpop.f32.mrf.mxu0 }
0x2370   : > { %v5770_v14 = vadd.f32 %v11402_v63, %v10765_v51 }
0x2371   : > { %v5761_v6 = vpop.f32.mrf.mxu0 }
0x2372   : > { %v5762_v46 = vadd.f32 %v11399_v45, %v5761_v6 }
0x2373   : > { %v10766_v8 = vpop.f32.mrf.mxu0 }
0x2374   : > { %5776 = vmax.xlane.f32.xlu1 %v5762_v46  ;;  %v5773_v50 = vadd.f32 %v11400_v52, %v10766_v8 }
0x2375   : > { %v5764_v41 = vpop.f32.mrf.mxu0 }
0x2376   : > { %v5765_v19 = vadd.f32 %v11401_v25, %v5764_v41 }
0x2378   : > { %5778 = vmax.xlane.f32.xlu0 %v5765_v19  ;;  %5782 = vmax.xlane.f32.xlu1 %v5773_v50 }
0x237c   : > { %5780 = vmax.xlane.f32.xlu0 %v5770_v14 }
0x23fd   : > { %v5777_v33 = vpop.xlane.xlu1 %5776 }
0x23fe   : > { %v5784_v37 = vsub.f32 %v5762_v46, %v5777_v33  ;;  %v5969_v46 = vrot.slane %v14133_v44, %v13101_v31 }
0x2400   : > { %v5788_v35 = vmul.f32 1.442695, %v5784_v37 }
0x2401   : > { %v5779_v0 = vpop.xlane.xlu0 %5778  ;;  %v5783_v9 = vpop.xlane.xlu1 %5782 }
0x2402   : > { %11243 = vpow2.f32 %v5788_v35  ;;  %v5785_v22 = vsub.f32 %v5765_v19, %v5779_v0  ;;  %v5787_v3 = vsub.f32 %v5773_v50, %v5783_v9 }
0x2404   : > { %v5790_v1 = vmul.f32 1.442695, %v5785_v22  ;;  %v5794_v43 = vmul.f32 1.442695, %v5787_v3 }
0x2405   : > { %v5781_v4 = vpop.xlane.xlu0 %5780 }
0x2406   : > { %11245 = vpow2.f32 %v5790_v1  ;;  %v5786_v48 = vsub.f32 %v5770_v14, %v5781_v4 }
0x2408   : > { %v5792_v53 = vmul.f32 1.442695, %v5786_v48 }
0x240a   : > { %11247 = vpow2.f32 %v5792_v53 }
0x240b   : > { %11249 = vpow2.f32 %v5794_v43 }
0x240f   : > { %v11244_v56 = vpop.eup %11243 }
0x2410   : > { %10799 = vmatprep.mubr.f32.mxu1 %v11244_v56 }
0x2413   : > { %v11246_v61 = vpop.eup %11245 }
0x2414   : > { %10800 = vmatmul.mubr.f32.vlgmr.msra.gmra.mxu1 %v11246_v61 }
0x2415   : > { %10826 = vmatpush3.bf16.msra.mxu1 %v11087_v57 }
0x2416   : > { %10827 = vmatprep.subr.bf16.mxu1 %v11088_v55 }
0x2417   : > { %v11248_v7 = vpop.eup %11247 }
0x2418   : > { %v11250_v5 = vpop.eup %11249  ;;  %10802 = vmatprep.mubr.f32.mxu1 %v11248_v7 }
0x2419   : > { %10803 = vmatmul.mubr.f32.gmra.mxu1 %v11250_v5 }
0x241a   : > { %10828 = vmatpush3.bf16.msra.mxu1 %v11088_v55 }
0x241b   : > { %10829 = vmatprep.subr.bf16.mxu1 %v11089_v47 }
0x241e   : > { %10830 = vmatpush3.bf16.msra.mxu1 %v11089_v47  ;;  %v11108_v47 = vld [vmem:[%s11885_s23 + $0x1ac] ss:$16 sps:$4 sm:$0xff]  }
0x241f   : > { %10831 = vmatprep.subr.bf16.mxu1 %v11090_v15 }
0x2422   : > { %10832 = vmatpush3.bf16.msra.mxu1 %v11090_v15  ;;  %v11103_v15 = vld [vmem:[%s11885_s23 + $0x1a0] ss:$16 sps:$4 sm:$0xff]  }
0x24d4   : > { %v10801_v13 = vpop.f32.mrf.mxu1 }
0x24d5   : > { %11251 = vrcp.f32 %v10801_v13 }
0x24d6   : > { %v5862_v26 = vpop.f32.mrf.mxu1 }
0x24d7   : > { %11253 = vrcp.f32 %v5862_v26 }
0x24d9   : > { %v10804_v59 = vpop.f32.mrf.mxu1 }
0x24da   : > { %11255 = vrcp.f32 %v10804_v59 }
0x24db   : > { %v5872_v2 = vpop.f32.mrf.mxu1 }
0x24dc   : > { %11257 = vrcp.f32 %v5872_v2 }
0x24e2   : > { %v11252_v24 = vpop.eup %11251 }
0x24e3   : > { %v5886_v23 = vmul.f32 %v11252_v24, %v11246_v61 }
0x24e4   : > { %v11254_v60 = vpop.eup %11253 }
0x24e5   : > { %v5885_v30 = vmul.f32 %v11254_v60, %v11244_v56  ;;  %v11093_v60 = vld [vmem:[%s11885_s23 + $0x1e4] ss:$16 sps:$4 sm:$0xff]  }
0x24e6   : > { %6233 = vmatprep.subr.bf16.mxu0 %v11093_v60 }
0x24e7   : > { %v11256_v38 = vpop.eup %11255  ;;  %v5889_v42 = vpack.c.bf16 %v5886_v23, %v5885_v30  ;;  %v11096_v30 = vld [vmem:[%s11885_s23 + $0x1ec] ss:$16 sps:$4 sm:$0xff]   ;;  %v11091_v23 = vld [vmem:[%s11885_s23 + $0x1e0] ss:$16 sps:$4 sm:$0xff]  }
0x24e8   : > { %v5888_v12 = vmul.f32 %v11256_v38, %v11250_v5  ;;  %v11094_v38 = vld [vmem:[%s11885_s23 + $0x1e8] ss:$16 sps:$4 sm:$0xff]   ;;  %6286 = vmatprep.subr.bf16.mxu1 %v11096_v30 }
0x24e9   : > { %v11258_v40 = vpop.eup %11257  ;;  %10821 = vmatprep.mubr.bf16.mxu0 %v5889_v42  ;;  %v11099_v42 = vld [vmem:[%s11885_s23 + $0x1c4] ss:$16 sps:$4 sm:$0xff]  }
0x24ea   : > { %v5887_v62 = vmul.f32 %v11258_v40, %v11248_v7  ;;  %v11102_v40 = vld [vmem:[%s11885_s23 + $0x1cc] ss:$16 sps:$4 sm:$0xff]  }
0x24ec   : > { %v5890_v32 = vpack.c.bf16 %v5888_v12, %v5887_v62  ;;  %v11097_v62 = vld [vmem:[%s11885_s23 + $0x1c0] ss:$16 sps:$4 sm:$0xff]   ;;  %v11100_v12 = vld [vmem:[%s11885_s23 + $0x1c8] ss:$16 sps:$4 sm:$0xff]  }
0x24ee   : > { %10822 = vmatmul.mubr.bf16.vlgmr.msra.gmra.mxu0 %v5890_v32  ;;  %v11105_v32 = vld [vmem:[%s11885_s23 + $0x1a4] ss:$16 sps:$4 sm:$0xff]  }
0x24ef   : > { %6257 = vmatprep.mubr.bf16.mxu0 %v11785_v39  ;;  %6234 = vmatpush1.bf16.msra.mxu0 %v11091_v23  ;;  %v11126_v23 = vld [vmem:[%s11890_s13 + $0x3a8] sm:$0xff]  }
0x24f0   : > { %6235 = vmatprep.subr.bf16.mxu0 %v11099_v42  ;;  %v11128_v42 = vld [vmem:[%s11890_s13 + $0x3e0] sm:$0xff]  }
0x24f3   : > { %6236 = vmatpush1.bf16.msra.mxu0 %v11097_v62  ;;  %v11130_v62 = vld [vmem:[%s11890_s13 + $0x3a0] sm:$0xff]  }
0x24f4   : > { %6237 = vmatprep.subr.bf16.mxu0 %v11105_v32  ;;  %v11132_v32 = vld [vmem:[%s11890_s13 + $0x3d8] sm:$0xff]  }
0x24f7   : > { %6238 = vmatpush1.bf16.msra.mxu0 %v11103_v15  ;;  %v11134_v15 = vld [vmem:[%s11890_s13 + $0x398] sm:$0xff]  }
0x25ae   : > { %v10823_v17 = vpop.f32.mrf.mxu0 }
0x25b0   : > { %v5949_v28 = vpop.f32.mrf.mxu0 }
0x25b2   : > { %v10824_v18 = vpop.f32.mrf.mxu0 }
0x25b3   : > { %v5965_v45 = vpack.c.bf16 %v10824_v18, %v10823_v17  ;;  %v11106_v17 = vld [vmem:[%s11885_s23 + $0x1a8] ss:$16 sps:$4 sm:$0xff]   ;;  %v11114_v18 = vld [vmem:[%s11885_s23 + $0x18c] ss:$16 sps:$4 sm:$0xff]  }
0x25b4   : > { %v5952_v51 = vpop.f32.mrf.mxu0 }
0x25b5   : > { %v5964_v6 = vpack.c.bf16 %v5952_v51, %v5949_v28  ;;  %v11111_v28 = vld [vmem:[%s11885_s23 + $0x184] ss:$16 sps:$4 sm:$0xff]   ;;  %v11109_v51 = vld [vmem:[%s11885_s23 + $0x180] ss:$16 sps:$4 sm:$0xff]  }
0x25b6   : > { %6239 = vmatprep.subr.bf16.mxu0 %v11111_v28  ;;  %v11136_v28 = vld [vmem:[%s11890_s13 + $0x3d0] sm:$0xff]  }
0x25b7   : > { %10833 = vmatprep.mubr.msk.bf16.mxu1 %vm1308_vm1, %v5964_v6  ;;  %v11112_v6 = vld [vmem:[%s11885_s23 + $0x188] ss:$16 sps:$4 sm:$0xff]   ;;  %6240 = vmatpush1.bf16.msra.mxu0 %v11109_v51  ;;  %v11138_v51 = vld [vmem:[%s11890_s13 + $0x390] sm:$0xff]  }
0x25b8   : > { %10834 = vmatmul.mubr.msk.bf16.vlgmr.msra.gmra.mxu1 %vm1308_vm1, %v5965_v45  ;;  %v11115_v45 = vld [vmem:[%s11890_s13 + $0x378] sm:$0xff]  }
0x25b9   : > { %6310 = vmatprep.mubr.bf16.mxu1 %v11785_v39  ;;  %6287 = vmatpush1.bf16.msra.mxu1 %v11094_v38  ;;  %v11127_v38 = vld [vmem:[%s11890_s13 + $0x360] sm:$0xff]  }
0x25ba   : > { %6288 = vmatprep.subr.bf16.mxu1 %v11102_v40  ;;  %10409 = vmatprep.subr.bf16.mxu0 %v11115_v45  ;;  %v11129_v40 = vld [vmem:[%s11890_s13 + $0x320] sm:$0xff]   ;;  %v11140_v45 = vld [vmem:[%s11890_s13 + $0x3c8] sm:$0xff]  }
0x25bd   : > { %6289 = vmatpush1.bf16.msra.mxu1 %v11100_v12  ;;  %v11131_v12 = vld [vmem:[%s11890_s13 + $0x358] sm:$0xff]  }
0x25be   : > { %6290 = vmatprep.subr.bf16.mxu1 %v11108_v47  ;;  %v11133_v47 = vld [vmem:[%s11890_s13 + $0x318] sm:$0xff]  }
0x25c1   : > { %6291 = vmatpush1.bf16.msra.mxu1 %v11106_v17  ;;  %v11135_v17 = vld [vmem:[%s11890_s13 + $0x350] sm:$0xff]  }
0x25c2   : > { %6292 = vmatprep.subr.bf16.mxu1 %v11114_v18  ;;  %v11137_v18 = vld [vmem:[%s11890_s13 + $0x310] sm:$0xff]  }
0x25c5   : > { %6293 = vmatpush1.bf16.msra.mxu1 %v11112_v6  ;;  %v11139_v6 = vld [vmem:[%s11890_s13 + $0x348] sm:$0xff]  }
0x2678   : > { %v10835_v8 = vpop.f32.mrf.mxu1 }
0x2679   : > { %v6043_v52 = vadd.f32 %v10835_v8, %v5969_v46 }
0x267a   : > { %v6034_v41 = vpop.f32.mrf.mxu1 }
0x267b   : > { %v6035_v50 = vadd.f32 %v6034_v41, %v5969_v46  ;;  %v6051_v14 = vadd.f32 %v6043_v52, %v14083_v36 }
0x267c   : > { %v10836_v25 = vpop.f32.mrf.mxu1 }
0x267d   : > { %v6049_v19 = vadd.f32 %v6035_v50, %v14072_v49  ;;  %v6046_v33 = vadd.f32 %v10836_v25, %v5969_v46  ;;  %v6059_v22 = vsel %vm1308_vm1, %v6051_v14, 0.0 }
0x267e   : > { %v6037_v63 = vpop.f32.mrf.mxu1 }
0x267f   : > { %v6038_v37 = vadd.f32 %v6037_v63, %v5969_v46  ;;  %v6053_v35 = vsel %vm1308_vm1, %v6049_v19, 0.0  ;;  %v6052_v9 = vadd.f32 %v6046_v33, %v14085_v58  ;;  %v11116_v46 = vld [vmem:[%s11890_s13 + $0x3f8] sm:$0xff]  }
0x2680   : > { %6054 = vadd.xlane.f32.xlu0 %v6053_v35  ;;  %10437 = vmatprep.subr.bf16.mxu1 %v11116_v46  ;;  %v11141_v46 = vld [vmem:[%s11890_s13 + $0x308] sm:$0xff]  }
0x2681   : > { %v6050_v0 = vadd.f32 %v6038_v37, %v14074_v11  ;;  %v6062_v49 = vsel %vm1308_vm1, %v6052_v9, 0.0 }
0x2683   : > { %v6056_v31 = vsel %vm1308_vm1, %v6050_v0, 0.0 }
0x2684   : > { %6057 = vadd.xlane.f32.xlu1 %v6056_v31  ;;  %6060 = vadd.xlane.f32.xlu0 %v6059_v22  ;;  %v6108_v22 = vrot.slane %v14133_v44, %v13148_v20 }
0x2688   : > { %6063 = vadd.xlane.f32.xlu1 %v6062_v49 }
0x2709   : > { %v6055_v3 = vpop.xlane.xlu0 %6054 }
0x270a   : > { %v6065_v36 = vmul.f32 0.015625, %v6055_v3 }
0x270c   : > { %v14346_v1 = vsub.f32 %v6049_v19, %v6065_v36 }
0x270d   : > { %v6058_v4 = vpop.xlane.xlu1 %6057  ;;  %v6061_v48 = vpop.xlane.xlu0 %6060 }
0x270e   : > { %v6066_v43 = vmul.f32 0.015625, %v6058_v4  ;;  %v6067_v53 = vmul.f32 0.015625, %v6061_v48  ;;  %v6073_v11 = vmul.f32 %v14346_v1, %v14346_v1  ;;  %v6116_v4 = vrot.slane %v14133_v44, %v13154_v16  ;;  %v11118_v16 = vld [vmem:[%s11890_s13 + $0x3b8] sm:$0xff]  }
0x2710   : > { %v14350_v58 = vsub.f32 %v6050_v0, %v6066_v43  ;;  %v14352_v56 = vsub.f32 %v6051_v14, %v6067_v53  ;;  %v6077_v61 = vsel %vm1308_vm1, %v6073_v11, 0.0 }
0x2711   : > { %v6064_v7 = vpop.xlane.xlu1 %6063  ;;  %6078 = vadd.xlane.f32.xlu0 %v6077_v61 }
0x2712   : > { %v6068_v5 = vmul.f32 0.015625, %v6064_v7  ;;  %v6074_v57 = vmul.f32 %v14350_v58, %v14350_v58  ;;  %v6075_v55 = vmul.f32 %v14352_v56, %v14352_v56 }
0x2714   : > { %v14359_v13 = vsub.f32 %v6052_v9, %v6068_v5  ;;  %v6080_v26 = vsel %vm1308_vm1, %v6074_v57, 0.0  ;;  %v6083_v59 = vsel %vm1308_vm1, %v6075_v55, 0.0  ;;  %v11117_v5 = vld [vmem:[%s11890_s13 + $0x338] sm:$0xff]   ;;  %v11119_v57 = vld [vmem:[%s11890_s13 + $0x370] sm:$0xff]  }
0x2715   : > { %6081 = vadd.xlane.f32.xlu1 %v6080_v26  ;;  %6084 = vadd.xlane.f32.xlu0 %v6083_v59  ;;  %v11120_v55 = vld [vmem:[%s11890_s13 + $0x3f0] sm:$0xff]  }
0x2716   : > { %v6076_v2 = vmul.f32 %v14359_v13, %v14359_v13  ;;  %v11122_v59 = vld [vmem:[%s11890_s13 + $0x3b0] sm:$0xff]  }
0x2718   : > { %v6086_v24 = vsel %vm1308_vm1, %v6076_v2, 0.0  ;;  %v11123_v2 = vld [vmem:[%s11890_s13 + $0x368] sm:$0xff]  }
0x2719   : > { %6087 = vadd.xlane.f32.xlu1 %v6086_v24  ;;  %v11124_v24 = vld [vmem:[%s11890_s13 + $0x3e8] sm:$0xff]  }
0x279a   : > { %v6079_v8 = vpop.xlane.xlu0 %6078 }
0x279b   : > { %v6089_v41 = vmul.f32 0.015625, %v6079_v8  ;;  %v11142_v8 = vld [vmem:[%s11890_s13 + $0x388] sm:$0xff]  }
0x279d   : > { %v6093_v52 = vadd.f32 1e-05, %v6089_v41  ;;  %v11143_v41 = vld [vmem:[%s11890_s13 + $0x340] sm:$0xff]  }
0x279e   : > { %v6082_v50 = vpop.xlane.xlu1 %6081  ;;  %v6085_v25 = vpop.xlane.xlu0 %6084 }
0x279f   : > { %11259 = vrsqrt.f32 %v6093_v52  ;;  %v6090_v19 = vmul.f32 0.015625, %v6082_v50  ;;  %v6091_v63 = vmul.f32 0.015625, %v6085_v25  ;;  %v11144_v52 = vld [vmem:[%s11890_s13 + $0x3c0] sm:$0xff]  }
0x27a0   : > { %v11145_v50 = vld [vmem:[%s11890_s13 + $0x300] sm:$0xff]  }
0x27a1   : > { %v6094_v14 = vadd.f32 1e-05, %v6090_v19  ;;  %v6095_v33 = vadd.f32 1e-05, %v6091_v63  ;;  %v11146_v25 = vld [vmem:[%s11890_s13 + $0x380] sm:$0xff]   ;;  %v9702_v19 = vld [vmem:[%s11895_s14 + $0x78] sm:$0xff] }
0x27a2   : > { %v6088_v37 = vpop.xlane.xlu1 %6087  ;;  %v9701_v63 = vld [vmem:[%s11895_s14 + $0x70] sm:$0xff] }
0x27a3   : > { %11261 = vrsqrt.f32 %v6094_v14  ;;  %v6092_v35 = vmul.f32 0.015625, %v6088_v37  ;;  %v6130_v37 = vrot.slane %v14138_v10, %v13210_v29 }
0x27a4   : > { %11263 = vrsqrt.f32 %v6095_v33 }
0x27a5   : > { %v6096_v0 = vadd.f32 1e-05, %v6092_v35  ;;  %v6138_v35 = vrot.slane %v9702_v19, %v13210_v29 }
0x27a7   : > { %11265 = vrsqrt.f32 %v6096_v0  ;;  %v6126_v0 = vrot.slane %v14133_v44, %v13210_v29 }
0x27ac   : > { %v11260_v9 = vpop.eup %11259 }
0x27ad   : > { %v6101_v31 = vmul.f32 %v11260_v9, %v14346_v1  ;;  %v6134_v9 = vrot.slane %v9701_v63, %v13210_v29 }
0x27af   : > { %v6109_v36 = vmul.f32 %v6108_v22, %v6101_v31 }
0x27b0   : > { %v11262_v49 = vpop.eup %11261 }
0x27b1   : > { %v6102_v3 = vmul.f32 %v11262_v49, %v14350_v58  ;;  %v11264_v48 = vpop.eup %11263  ;;  %v14390_v11 = vadd.f32 %v6116_v4, %v6109_v36 }
0x27b2   : > { %v6103_v1 = vmul.f32 %v11264_v48, %v14352_v56 }
0x27b3   : > { %v6110_v43 = vmul.f32 %v6108_v22, %v6102_v3 }
0x27b4   : > { %v11266_v53 = vpop.eup %11265  ;;  %v6111_v26 = vmul.f32 %v6108_v22, %v6103_v1 }
0x27b5   : > { %v14392_v61 = vadd.f32 %v6116_v4, %v6110_v43  ;;  %v6104_v20 = vmul.f32 %v11266_v53, %v14359_v13  ;;  %v11121_v13 = vld [vmem:[%s11890_s13 + $0x330] sm:$0xff]  }
0x27b6   : > { %v14412_v60 = vadd.f32 %v6116_v4, %v6111_v26 }
0x27b7   : > { %v6121_v58 = vpack.c.bf16 %v14392_v61, %v14390_v11  ;;  %v6112_v7 = vmul.f32 %v6108_v22, %v6104_v20 }
0x27b9   : > { %9737 = vmatmul.mubr.msk.bf16.vlgmr.msra.gmra.mxu0 %vm1308_vm1, %v6121_v58  ;;  %9739 = vmatmul.mubr.msk.bf16.vlgmr.msra.gmra.mxu1 %vm1308_vm1, %v6121_v58  ;;  %v14406_v56 = vadd.f32 %v6116_v4, %v6112_v7 }
0x27ba   : > { %6267 = vmatprep.mubr.bf16.mxu0 %v11785_v39  ;;  %6320 = vmatprep.mubr.bf16.mxu1 %v11785_v39  ;;  %v11125_v39 = vld [vmem:[%s11890_s13 + $0x328] sm:$0xff]  }
0x27bb   : > { %10410 = vmatpush3.bf16.msra.mxu0 %v11117_v5  ;;  %10438 = vmatpush3.bf16.msra.mxu1 %v11118_v16  ;;  %v6122_v30 = vpack.c.bf16 %v14406_v56, %v14412_v60 }
0x27bc   : > { %10411 = vmatprep.subr.bf16.mxu0 %v11119_v57  ;;  %10439 = vmatprep.subr.bf16.mxu1 %v11120_v55 }
0x27bf   : > { %10412 = vmatpush3.bf16.msra.mxu0 %v11121_v13  ;;  %10440 = vmatpush3.bf16.msra.mxu1 %v11122_v59 }
0x27c0   : > { %10413 = vmatprep.subr.bf16.mxu0 %v11123_v2  ;;  %10441 = vmatprep.subr.bf16.mxu1 %v11124_v24 }
0x27c1   : > { %9738 = vmatmul.mubr.msk.bf16.gmra.mxu0 %vm1308_vm1, %v6122_v30  ;;  %9740 = vmatmul.mubr.msk.bf16.gmra.mxu1 %vm1308_vm1, %v6122_v30 }
0x27c3   : > { %10414 = vmatpush3.bf16.msra.mxu0 %v11125_v39  ;;  %10442 = vmatpush3.bf16.msra.mxu1 %v11126_v23 }
0x27c4   : > { %10415 = vmatprep.subr.bf16.mxu0 %v11127_v38  ;;  %10443 = vmatprep.subr.bf16.mxu1 %v11128_v42 }
0x27c7   : > { %10416 = vmatpush3.bf16.msra.mxu0 %v11129_v40  ;;  %10444 = vmatpush3.bf16.msra.mxu1 %v11130_v62 }
0x27c8   : > { %10417 = vmatprep.subr.bf16.mxu0 %v11131_v12  ;;  %10445 = vmatprep.subr.bf16.mxu1 %v11132_v32 }
0x27cb   : > { %10418 = vmatpush3.bf16.msra.mxu0 %v11133_v47  ;;  %10446 = vmatpush3.bf16.msra.mxu1 %v11134_v15 }
0x27cc   : > { %10419 = vmatprep.subr.bf16.mxu0 %v11135_v17  ;;  %10447 = vmatprep.subr.bf16.mxu1 %v11136_v28 }
0x27cf   : > { %10420 = vmatpush3.bf16.msra.mxu0 %v11137_v18  ;;  %10448 = vmatpush3.bf16.msra.mxu1 %v11138_v51 }
0x27d0   : > { %10421 = vmatprep.subr.bf16.mxu0 %v11139_v6  ;;  %10449 = vmatprep.subr.bf16.mxu1 %v11140_v45 }
0x27d3   : > { %10422 = vmatpush3.bf16.msra.mxu0 %v11141_v46  ;;  %10450 = vmatpush3.bf16.msra.mxu1 %v11142_v8 }
0x27d4   : > { %10423 = vmatprep.subr.bf16.mxu0 %v11143_v41  ;;  %10451 = vmatprep.subr.bf16.mxu1 %v11144_v52 }
0x27d7   : > { %10424 = vmatpush3.bf16.msra.mxu0 %v11145_v50  ;;  %10452 = vmatpush3.bf16.msra.mxu1 %v11146_v25 }
0x2879   : > { %v6259_v14 = vpop.f32.mrf.mxu0  ;;  %v6312_v33 = vpop.f32.mrf.mxu1 }
0x287a   : > { %v6260_v53 = vadd.f32 %v6259_v14, %v6126_v0  ;;  %v6313_v1 = vadd.f32 %v6312_v33, %v6134_v9 }
0x287b   : > { %v6261_v31 = vpop.f32.mrf.mxu0  ;;  %v6314_v22 = vpop.f32.mrf.mxu1 }
0x287c   : > { %v6262_v36 = vadd.f32 %v6261_v31, %v6130_v37  ;;  %v6315_v4 = vadd.f32 %v6314_v22, %v6138_v35  ;;  %v6331_v24 = vmax.f32 %v6260_v53, 0.0  ;;  %v6333_v30 = vmax.f32 %v6313_v1, 0.0 }
0x287d   : > { %v6263_v49 = vpop.f32.mrf.mxu0  ;;  %v6316_v3 = vpop.f32.mrf.mxu1 }
0x287e   : > { %v6264_v48 = vadd.f32 %v6263_v49, %v6126_v0  ;;  %v6317_v43 = vadd.f32 %v6316_v3, %v6134_v9  ;;  %v6332_v26 = vmax.f32 %v6262_v36, 0.0  ;;  %v6334_v13 = vmax.f32 %v6315_v4, 0.0 }
0x287f   : > { %v6265_v20 = vpop.f32.mrf.mxu0  ;;  %v6318_v58 = vpop.f32.mrf.mxu1 }
0x2880   : > { %v6266_v10 = vadd.f32 %v6265_v20, %v6130_v37  ;;  %v6319_v7 = vadd.f32 %v6318_v58, %v6138_v35  ;;  %v6335_v5 = vmax.f32 %v6264_v48, 0.0  ;;  %v6337_v16 = vmax.f32 %v6317_v43, 0.0 }
0x2881   : > { %v6269_v57 = vpop.f32.mrf.mxu0  ;;  %v6322_v55 = vpop.f32.mrf.mxu1 }
0x2882   : > { %v6336_v59 = vmax.f32 %v6266_v10, 0.0  ;;  %v6338_v2 = vmax.f32 %v6319_v7, 0.0  ;;  %v6347_v40 = vpack.c.bf16 %v6335_v5, %v6331_v24  ;;  %v6349_v62 = vpack.c.bf16 %v6337_v16, %v6333_v30 }
0x2883   : > { %v6271_v39 = vpop.f32.mrf.mxu0  ;;  %v6324_v23 = vpop.f32.mrf.mxu1  ;;  %v6270_v18 = vadd.f32 %v6269_v57, %v6126_v0  ;;  %v6323_v51 = vadd.f32 %v6322_v55, %v6134_v9 }
0x2884   : > { %v6348_v38 = vpack.c.bf16 %v6336_v59, %v6332_v26  ;;  %v6350_v42 = vpack.c.bf16 %v6338_v2, %v6334_v13  ;;  %v6272_v12 = vadd.f32 %v6271_v39, %v6130_v37  ;;  %v6325_v15 = vadd.f32 %v6324_v23, %v6138_v35 }
0x2885   : > { %v6273_v32 = vpop.f32.mrf.mxu0  ;;  %v6326_v47 = vpop.f32.mrf.mxu1  ;;  %v6339_v14 = vmax.f32 %v6270_v18, 0.0  ;;  %v6341_v33 = vmax.f32 %v6323_v51, 0.0 }
0x2886   : > { %v6274_v17 = vadd.f32 %v6273_v32, %v6126_v0  ;;  %v6327_v28 = vadd.f32 %v6326_v47, %v6134_v9  ;;  %6583 = vmatprep.mubr.bf16.mxu0 %v6348_v38  ;;  %6632 = vmatprep.mubr.bf16.mxu1 %v6350_v42  ;;  %v6340_v50 = vmax.f32 %v6272_v12, 0.0  ;;  %v6342_v25 = vmax.f32 %v6325_v15, 0.0 }
0x2887   : > { %v6275_v6 = vpop.f32.mrf.mxu0  ;;  %v6328_v45 = vpop.f32.mrf.mxu1  ;;  %6584 = vmatmul.mubr.bf16.vlgmr.msra.gmra.mxu0 %v6347_v40  ;;  %6633 = vmatmul.mubr.bf16.vlgmr.msra.gmra.mxu1 %v6349_v62 }
0x2888   : > { %v6276_v46 = vadd.f32 %v6275_v6, %v6130_v37  ;;  %v6329_v8 = vadd.f32 %v6328_v45, %v6138_v35  ;;  %v6343_v41 = vmax.f32 %v6274_v17, 0.0  ;;  %v6345_v52 = vmax.f32 %v6327_v28, 0.0 }
0x2889   : > { %v6358_v37 = vrot.slane %v14133_v44, %v13225_v27 }
0x288a   : > { %v6344_v19 = vmax.f32 %v6276_v46, 0.0  ;;  %v6346_v63 = vmax.f32 %v6329_v8, 0.0  ;;  %v6351_v49 = vpack.c.bf16 %v6343_v41, %v6339_v14  ;;  %v6353_v3 = vpack.c.bf16 %v6345_v52, %v6341_v33 }
0x288c   : > { %v6352_v31 = vpack.c.bf16 %v6344_v19, %v6340_v50  ;;  %v6354_v22 = vpack.c.bf16 %v6346_v63, %v6342_v25 }
0x288e   : > { %6591 = vmatprep.mubr.bf16.mxu0 %v6352_v31  ;;  %6640 = vmatprep.mubr.bf16.mxu1 %v6354_v22 }
0x288f   : > { %6592 = vmatmul.mubr.bf16.gmra.mxu0 %v6351_v49  ;;  %6641 = vmatmul.mubr.bf16.gmra.mxu1 %v6353_v3 }
0x2947   : > { %v10425_v0 = vpop.f32.mrf.mxu0  ;;  %v10453_v9 = vpop.f32.mrf.mxu1 }
0x2949   : > { %v10426_v35 = vpop.f32.mrf.mxu0  ;;  %v10454_v36 = vpop.f32.mrf.mxu1 }
0x294a   : > { %v10427_v4 = vadd.f32 %v10426_v35, %v10425_v0  ;;  %v10455_v1 = vadd.f32 %v10454_v36, %v10453_v9 }
0x294b   : > { %v10428_v48 = vpop.f32.mrf.mxu0  ;;  %v10456_v43 = vpop.f32.mrf.mxu1 }
0x294c   : > { %v6586_v53 = vadd.f32 %v10427_v4, %v6358_v37 }
0x294d   : > { %v10429_v20 = vpop.f32.mrf.mxu0  ;;  %v10457_v58 = vpop.f32.mrf.mxu1 }
0x294e   : > { %v6635_v10 = vadd.f32 %v10455_v1, %v6586_v53  ;;  %v10430_v7 = vadd.f32 %v10429_v20, %v10428_v48  ;;  %v10458_v55 = vadd.f32 %v10457_v58, %v10456_v43 }
0x294f   : > { %v10431_v5 = vpop.f32.mrf.mxu0  ;;  %v10459_v16 = vpop.f32.mrf.mxu1 }
0x2950   : > { %v6589_v57 = vadd.f32 %v10430_v7, %v6358_v37  ;;  %v6649_v26 = vadd.f32 %v6635_v10, %v14390_v11  ;;  %v11403_v7 = vld [vmem:[%s11895_s14 + $0x60] sm:$0xff] }
0x2951   : > { %v10432_v13 = vpop.f32.mrf.mxu0  ;;  %v10460_v59 = vpop.f32.mrf.mxu1 }
0x2952   : > { %v6638_v27 = vadd.f32 %v10458_v55, %v6589_v57  ;;  %v10433_v44 = vadd.f32 %v10432_v13, %v10431_v5  ;;  %v6653_v2 = vsel %vm1308_vm1, %v6649_v26, 0.0  ;;  %v10461_v23 = vadd.f32 %v10460_v59, %v10459_v16 }
0x2953   : > { %v10462_v24 = vpop.f32.mrf.mxu1  ;;  %6654 = vadd.xlane.f32.xlu0 %v6653_v2  ;;  %v10434_v30 = vpop.f32.mrf.mxu0  ;;  %v6708_v5 = vrot.slane %v11403_v7, %v13251_v34  ;;  %v6716_v57 = vrot.slane %v11403_v7, %v13256_v21 }
0x2954   : > { %v6594_v39 = vadd.f32 %v10433_v44, %v6358_v37  ;;  %v6650_v38 = vadd.f32 %v6638_v27, %v14392_v61 }
0x2955   : > { %v10435_v42 = vpop.f32.mrf.mxu0  ;;  %v10463_v40 = vpop.f32.mrf.mxu1 }
0x2956   : > { %v6643_v62 = vadd.f32 %v10461_v23, %v6594_v39  ;;  %v10436_v12 = vadd.f32 %v10435_v42, %v10434_v30  ;;  %v6656_v32 = vsel %vm1308_vm1, %v6650_v38, 0.0  ;;  %v10464_v47 = vadd.f32 %v10463_v40, %v10462_v24 }
0x2957   : > { %6657 = vadd.xlane.f32.xlu1 %v6656_v32 }
0x2958   : > { %v6597_v11 = vadd.f32 %v10436_v12, %v6358_v37  ;;  %v6651_v15 = vadd.f32 %v6643_v62, %v14412_v60 }
0x295a   : > { %v6646_v17 = vadd.f32 %v10464_v47, %v6597_v11  ;;  %v6659_v28 = vsel %vm1308_vm1, %v6651_v15, 0.0 }
0x295b   : > { %6660 = vadd.xlane.f32.xlu0 %v6659_v28 }
0x295c   : > { %v6652_v18 = vadd.f32 %v6646_v17, %v14406_v56 }
0x295e   : > { %v6662_v51 = vsel %vm1308_vm1, %v6652_v18, 0.0 }
0x295f   : > { %6663 = vadd.xlane.f32.xlu1 %v6662_v51 }
0x29dc   : > { %v6655_v61 = vpop.xlane.xlu0 %6654 }
0x29dd   : > { %v6665_v6 = vmul.f32 0.015625, %v6655_v61 }
0x29df   : > { %v6669_v45 = vsub.f32 %v6649_v26, %v6665_v6 }
0x29e0   : > { %v6658_v46 = vpop.xlane.xlu1 %6657 }
0x29e1   : > { %v6666_v8 = vmul.f32 0.015625, %v6658_v46  ;;  %v6673_v41 = vmul.f32 %v6669_v45, %v6669_v45 }
0x29e3   : > { %v6670_v52 = vsub.f32 %v6650_v38, %v6666_v8  ;;  %v6677_v50 = vsel %vm1308_vm1, %v6673_v41, 0.0 }
0x29e4   : > { %6678 = vadd.xlane.f32.xlu0 %v6677_v50  ;;  %v6661_v60 = vpop.xlane.xlu0 %6660 }
0x29e5   : > { %v6667_v25 = vmul.f32 0.015625, %v6661_v60  ;;  %v6674_v19 = vmul.f32 %v6670_v52, %v6670_v52 }
0x29e7   : > { %v6671_v63 = vsub.f32 %v6651_v15, %v6667_v25  ;;  %v6680_v14 = vsel %vm1308_vm1, %v6674_v19, 0.0 }
0x29e8   : > { %6681 = vadd.xlane.f32.xlu1 %v6680_v14  ;;  %v6664_v56 = vpop.xlane.xlu1 %6663 }
0x29e9   : > { %v6668_v33 = vmul.f32 0.015625, %v6664_v56  ;;  %v6675_v31 = vmul.f32 %v6671_v63, %v6671_v63 }
0x29eb   : > { %v6672_v22 = vsub.f32 %v6652_v18, %v6668_v33  ;;  %v6683_v49 = vsel %vm1308_vm1, %v6675_v31, 0.0 }
0x29ec   : > { %6684 = vadd.xlane.f32.xlu0 %v6683_v49 }
0x29ed   : > { %v6676_v3 = vmul.f32 %v6672_v22, %v6672_v22 }
0x29ef   : > { %v6686_v0 = vsel %vm1308_vm1, %v6676_v3, 0.0 }
0x29f0   : > { %6687 = vadd.xlane.f32.xlu1 %v6686_v0 }
0x2a6d   : > { %v6679_v9 = vpop.xlane.xlu0 %6678 }
0x2a6e   : > { %v6689_v37 = vmul.f32 0.015625, %v6679_v9 }
0x2a70   : > { %v6693_v35 = vadd.f32 1e-05, %v6689_v37 }
0x2a71   : > { %v6682_v36 = vpop.xlane.xlu1 %6681 }
0x2a72   : > { %11267 = vrsqrt.f32 %v6693_v35  ;;  %v6690_v4 = vmul.f32 0.015625, %v6682_v36 }
0x2a74   : > { %v6694_v48 = vadd.f32 1e-05, %v6690_v4 }
0x2a75   : > { %v6685_v43 = vpop.xlane.xlu0 %6684 }
0x2a76   : > { %11269 = vrsqrt.f32 %v6694_v48  ;;  %v6691_v53 = vmul.f32 0.015625, %v6685_v43 }
0x2a78   : > { %v6695_v1 = vadd.f32 1e-05, %v6691_v53 }
0x2a79   : > { %v6688_v20 = vpop.xlane.xlu1 %6687 }
0x2a7a   : > { %11271 = vrsqrt.f32 %v6695_v1  ;;  %v6692_v58 = vmul.f32 0.015625, %v6688_v20 }
0x2a7c   : > { %v6696_v10 = vadd.f32 1e-05, %v6692_v58 }
0x2a7e   : > { %11273 = vrsqrt.f32 %v6696_v10 }
0x2a7f   : > { %v11268_v16 = vpop.eup %11267 }
0x2a80   : > { %v6701_v55 = vmul.f32 %v11268_v16, %v6669_v45 }
0x2a82   : > { %v6709_v26 = vmul.f32 %v6708_v5, %v6701_v55 }
0x2a83   : > { %v11270_v13 = vpop.eup %11269 }
0x2a84   : > { %v6717_v59 = vadd.f32 %v6716_v57, %v6709_v26  ;;  %v6702_v27 = vmul.f32 %v11270_v13, %v6670_v52 }
0x2a86   : > { %6721 = vst.msk [vmem:[#allocation2] sm:$0xff] %vm1308_vm1, %v6717_v59  ;;  %v6710_v44 = vmul.f32 %v6708_v5, %v6702_v27 }
0x2a87   : > { %v11272_v2 = vpop.eup %11271 }
0x2a88   : > { %v6718_v24 = vadd.f32 %v6716_v57, %v6710_v44  ;;  %v6703_v30 = vmul.f32 %v11272_v2, %v6671_v63 }
0x2a8a   : > { %6722 = vst.msk [vmem:[#allocation2 + $0x8] sm:$0xff] %vm1308_vm1, %v6718_v24  ;;  %v6711_v39 = vmul.f32 %v6708_v5, %v6703_v30 }
0x2a8b   : > { %v11274_v23 = vpop.eup %11273 }
0x2a8c   : > { %v6719_v34 = vadd.f32 %v6716_v57, %v6711_v39  ;;  %v6704_v38 = vmul.f32 %v11274_v23, %v6672_v22 }
0x2a8e   : > { %6723 = vst.msk [vmem:[#allocation2 + $0x10] sm:$0xff] %vm1308_vm1, %v6719_v34  ;;  %v6712_v21 = vmul.f32 %v6708_v5, %v6704_v38  ;;  %6728 = sbr.rel (%p9773_p5) target bundleno = 11625 (0x2d69), region = 140 }
0x2a90   : > { %v6720_v42 = vadd.f32 %v6716_v57, %v6712_v21 }
0x2a92   : > { %6724 = vst.msk [vmem:[#allocation2 + $0x18] sm:$0xff] %vm1308_vm1, %v6720_v42 }
0x2a93   : > { %11772 = dma.done.wait [#allocation5], 32768 }
0x2a94   : > { %11773 = vsyncadd [#allocation5], 4294934528 }
0x2a95   : > { %11774 = dma.done.wait [#allocation5 + $0x1], 4096 }
0x2a96   : > { %11775 = vsyncadd [#allocation5 + $0x1], 4294963200  ;;  %v6740_v40 = vld [vmem:[#allocation2 + $0x1] ss:$16 sm:$0x3]  ;;  %s11789_s13 = smov 64  }
0x2a97   : > { %v6744_v62 = vld [vmem:[#allocation2 + $0x3] ss:$16 sm:$0x3]  ;;  %v6748_v32 = vld [vmem:[#allocation2 + $0x5] ss:$16 sm:$0x3] }
0x2a98   : > { %v11404_v12 = vpack.i.bf16 %v6740_v40, %v6744_v62  ;;  %v6752_v11 = vld [vmem:[#allocation2 + $0x7] ss:$16 sm:$0x3]  ;;  %v11426_v17 = vld [vmem:[#allocation3 + $0x138] ss:$136 sps:$4 sm:$0xff]   ;;  %v6909_v41 = vld [vmem:[#allocation3 + $0x628] sm:$0xff] }
0x2a99   : > { %v11424_v47 = vld [vmem:[#allocation3 + $0x13c] ss:$136 sps:$4 sm:$0xff]   ;;  %v11409_v15 = vpack.i.bf16 %v6748_v32, %v6752_v11  ;;  %v11427_v28 = vld [vmem:[#allocation3 + $0x3ec] ss:$680 sps:$4 sm:$0xff]   ;;  %v11431_v51 = vld [vmem:[#allocation3 + $0x3e8] ss:$680 sps:$4 sm:$0xff]  }
0x2a9a   : > { %11405 = vrot.lane.b32.xlu0 %v11404_v12, %s11789_s13  ;;  %8373 = vmatprep.subr.bf16.mxu0 %v11424_v47  ;;  %v11429_v18 = vld [vmem:[#allocation3 + $0x47c] ss:$-688 sps:$4 sm:$0xff]   ;;  %v11432_v61 = vld [vmem:[#allocation3 + $0x478] ss:$-688 sps:$4 sm:$0xff]   ;;  %v6825_v20 = vld [vmem:[#allocation3 + $0x450] sm:$0xff] }
0x2a9b   : > { %8374 = vmatpush1.bf16.msra.mxu0 %v11426_v17  ;;  %v6756_v6 = vld [vmem:[#allocation2 + $0x9] ss:$16 sm:$0x3]  ;;  %v6760_v45 = vld [vmem:[#allocation2 + $0xb] ss:$16 sm:$0x3]  ;;  %8414 = vmatprep.subr.bf16.mxu1 %v11429_v18 }
0x2a9c   : > { %8375 = vmatprep.subr.bf16.mxu0 %v11427_v28  ;;  %v11414_v46 = vpack.i.bf16 %v6756_v6, %v6760_v45  ;;  %v11433_v8 = vld [vmem:[#allocation3 + $0x2e4] ss:$728 sps:$4 sm:$0xff]   ;;  %8415 = vmatpush1.bf16.msra.mxu1 %v11432_v61  ;;  %v6911_v52 = vld [vmem:[#allocation3 + $0x388] sm:$0xff]  ;;  %v11435_v50 = vld [vmem:[#allocation3 + $0x2e0] ss:$728 sps:$4 sm:$0xff]  }
0x2a9d   : > { %v9863_v60 = vcombine.high %v6909_v41, %v6911_v52  ;;  %v9862_v25 = vcombine.low %v6909_v41, %v6911_v52  ;;  %v6764_v19 = vld [vmem:[#allocation2 + $0xd] ss:$16 sm:$0x3]  ;;  %v6768_v63 = vld [vmem:[#allocation2 + $0xf] ss:$16 sm:$0x3] }
0x2a9e   : > { %11410 = vrot.lane.b32.xlu0 %v11409_v15, %s11789_s13  ;;  %11415 = vrot.lane.b32.xlu1 %v11414_v46, %s11789_s13  ;;  %v11419_v14 = vpack.i.bf16 %v6764_v19, %v6768_v63  ;;  %v11436_v56 = vld [vmem:[#allocation3 + $0x6e4] ss:$-936 sps:$4 sm:$0xff]   ;;  %v11438_v3 = vld [vmem:[#allocation3 + $0x6e0] ss:$-936 sps:$4 sm:$0xff]   ;;  %v6827_v58 = vld [vmem:[#allocation3 + $0x330] sm:$0xff] }
0x2a9f   : > { %8376 = vmatpush1.bf16.msra.mxu0 %v11431_v51  ;;  %8416 = vmatprep.subr.bf16.mxu1 %v9863_v60  ;;  %v6905_v33 = vld [vmem:[#allocation3 + $0x5d8] sm:$0xff]  ;;  %v11439_v37 = vld [vmem:[#allocation3 + $0x324] ss:$488 sps:$4 sm:$0xff]   ;;  %v11441_v43 = vld [vmem:[#allocation3 + $0x320] ss:$488 sps:$4 sm:$0xff]   ;;  %v9779_v16 = vcombine.high %v6825_v20, %v6827_v58  ;;  %v9778_v55 = vcombine.low %v6825_v20, %v6827_v58 }
0x2aa0   : > { %8377 = vmatprep.subr.bf16.mxu0 %v11433_v8  ;;  %v6907_v31 = vld [vmem:[#allocation3 + $0x218] sm:$0xff]  ;;  %8417 = vmatpush1.bf16.msra.mxu1 %v9862_v25  ;;  %v6877_v30 = vld [vmem:[#allocation3 + $0x148] sm:$0xff]  ;;  %v11465_v40 = vld [vmem:[#allocation3 + $0x34] ss:$368 sps:$4 sm:$0xff]  }
0x2aa1   : > { %v9859_v22 = vcombine.high %v6905_v33, %v6907_v31  ;;  %v9858_v49 = vcombine.low %v6905_v33, %v6907_v31  ;;  %v6901_v0 = vld [vmem:[#allocation3 + $0x398] sm:$0xff]  ;;  %v6879_v39 = vld [vmem:[#allocation3 + $0x4e8] sm:$0xff]  ;;  %v11468_v32 = vld [vmem:[#allocation3 + $0x30] ss:$368 sps:$4 sm:$0xff]  }
0x2aa2   : > { %11420 = vrot.lane.b32.xlu1 %v11419_v14, %s11789_s13  ;;  %v6903_v9 = vld [vmem:[#allocation3 + $0x698] sm:$0xff]  ;;  %v9831_v38 = vcombine.high %v6877_v30, %v6879_v39  ;;  %v9830_v42 = vcombine.low %v6877_v30, %v6879_v39  ;;  %v11463_v62 = vld [vmem:[#allocation3 + $0x34c] ss:$-616 sps:$4 sm:$0xff]   ;;  %v11467_v12 = vld [vmem:[#allocation3 + $0x348] ss:$-616 sps:$4 sm:$0xff]  }
0x2aa3   : > { %8378 = vmatpush1.bf16.msra.mxu0 %v11435_v50  ;;  %8418 = vmatprep.subr.bf16.mxu1 %v9859_v22  ;;  %v9855_v35 = vcombine.high %v6901_v0, %v6903_v9  ;;  %v6897_v36 = vld [vmem:[#allocation3 + $0x738] sm:$0xff]  ;;  %v9854_v48 = vcombine.low %v6901_v0, %v6903_v9  ;;  %v11469_v11 = vld [vmem:[#allocation3 + $0x774] ss:$-304 sps:$4 sm:$0xff]   ;;  %v6865_v28 = vld [vmem:[#allocation3 + $0x6c8] sm:$0xff] }
0x2aa4   : > { %8379 = vmatprep.subr.bf16.mxu0 %v11436_v56  ;;  %v6899_v4 = vld [vmem:[#allocation3 + $0x7d8] sm:$0xff]  ;;  %8419 = vmatpush1.bf16.msra.mxu1 %v9858_v49  ;;  %v6933_v15 = vld [vmem:[#allocation3 + $0x370] sm:$0xff]  ;;  %v6867_v18 = vld [vmem:[#allocation3 + $0x5e8] sm:$0xff] }
0x2aa5   : > { %8420 = vmatprep.subr.bf16.mxu1 %v9855_v35  ;;  %v11442_v53 = vld [vmem:[#allocation3 + $0x384] ss:$408 sps:$4 sm:$0xff]   ;;  %v9851_v1 = vcombine.high %v6897_v36, %v6899_v4  ;;  %v11444_v10 = vld [vmem:[#allocation3 + $0x380] ss:$408 sps:$4 sm:$0xff]   ;;  %v9850_v7 = vcombine.low %v6897_v36, %v6899_v4  ;;  %v6935_v17 = vld [vmem:[#allocation3 + $0x7b0] sm:$0xff]  ;;  %v9819_v45 = vcombine.high %v6865_v28, %v6867_v18  ;;  %v9818_v8 = vcombine.low %v6865_v28, %v6867_v18 }
0x2aa6   : > { %v11445_v5 = vld [vmem:[#allocation3 + $0x6f4] ss:$104 sps:$4 sm:$0xff]   ;;  %v11447_v57 = vld [vmem:[#allocation3 + $0x6f0] ss:$104 sps:$4 sm:$0xff]   ;;  %v9887_v6 = vcombine.high %v6933_v15, %v6935_v17  ;;  %v9886_v46 = vcombine.low %v6933_v15, %v6935_v17  ;;  %v7041_v0 = vld [vmem:[#allocation3 + $0x60] sm:$0xff] }
0x2aa7   : > { %8380 = vmatpush1.bf16.msra.mxu0 %v11438_v3  ;;  %v11450_v26 = vld [vmem:[#allocation3 + $0xbc] ss:$24 sps:$4 sm:$0xff]   ;;  %v11452_v59 = vld [vmem:[#allocation3 + $0x2b0] ss:$552 sps:$4 sm:$0xff]   ;;  %v7043_v9 = vld [vmem:[#allocation3 + $0x4a0] sm:$0xff] }
0x2aa8   : > { %8381 = vmatprep.subr.bf16.mxu0 %v11439_v37  ;;  %8421 = vmatpush1.bf16.msra.mxu1 %v9854_v48  ;;  %v11448_v13 = vld [vmem:[#allocation3 + $0x2b4] ss:$552 sps:$4 sm:$0xff]   ;;  %v11453_v27 = vld [vmem:[#allocation3 + $0xb8] ss:$24 sps:$4 sm:$0xff]   ;;  %v9995_v35 = vcombine.high %v7041_v0, %v7043_v9  ;;  %v11507_v28 = vld [vmem:[#allocation3 + $0x464] ss:$200 sps:$4 sm:$0xff]  }
0x2aa9   : > { %8422 = vmatprep.subr.bf16.mxu1 %v9851_v1  ;;  %v11456_v44 = vld [vmem:[#allocation3 + $0x53c] ss:$600 sps:$4 sm:$0xff]   ;;  %v11458_v24 = vld [vmem:[#allocation3 + $0x38] ss:$24 sps:$4 sm:$0xff]  }
0x2aaa   : > { %v11454_v2 = vld [vmem:[#allocation3 + $0x3c] ss:$24 sps:$4 sm:$0xff]   ;;  %v11459_v23 = vld [vmem:[#allocation3 + $0x538] ss:$600 sps:$4 sm:$0xff]  }
0x2aab   : > { %8382 = vmatpush1.bf16.msra.mxu0 %v11441_v43  ;;  %v11460_v34 = vld [vmem:[#allocation3 + $0x674] ss:$-1368 sps:$4 sm:$0xff]   ;;  %v11462_v21 = vld [vmem:[#allocation3 + $0x670] ss:$-1368 sps:$4 sm:$0xff]  }
0x2aac   : > { %8383 = vmatprep.subr.bf16.mxu0 %v11442_v53  ;;  %8423 = vmatpush1.bf16.msra.mxu1 %v9850_v7  ;;  %v11471_v47 = vld [vmem:[#allocation3 + $0xdc] ss:$104 sps:$4 sm:$0xff]   ;;  %v11474_v51 = vld [vmem:[#allocation3 + $0xd8] ss:$104 sps:$4 sm:$0xff]   ;;  %v11477_v41 = vld [vmem:[#allocation3 + $0x3ac] ss:$648 sps:$4 sm:$0xff]  }
0x2aad   : > { %8424 = vmatprep.subr.bf16.mxu1 %v11445_v5  ;;  %v11473_v61 = vld [vmem:[#allocation3 + $0x770] ss:$-304 sps:$4 sm:$0xff]   ;;  %v11475_v52 = vld [vmem:[#allocation3 + $0x404] ss:$-8 sps:$4 sm:$0xff]   ;;  %v11486_v14 = vld [vmem:[#allocation3 + $0x58] ss:$16 sps:$4 sm:$0xff]  }
0x2aae   : > { %v11479_v50 = vld [vmem:[#allocation3 + $0x400] ss:$-8 sps:$4 sm:$0xff]   ;;  %v11480_v60 = vld [vmem:[#allocation3 + $0x3a8] ss:$648 sps:$4 sm:$0xff]   ;;  %v11483_v25 = vld [vmem:[#allocation3 + $0x5c] ss:$16 sps:$4 sm:$0xff]  }
0x2aaf   : > { %8384 = vmatpush1.bf16.msra.mxu0 %v11444_v10  ;;  %v11481_v19 = vld [vmem:[#allocation3 + $0x61c] ss:$-1448 sps:$4 sm:$0xff]   ;;  %v11485_v63 = vld [vmem:[#allocation3 + $0x618] ss:$-1448 sps:$4 sm:$0xff]  }
0x2ab0   : > { %8385 = vmatprep.subr.bf16.mxu0 %v9779_v16  ;;  %8425 = vmatpush1.bf16.msra.mxu1 %v11447_v57  ;;  %v11489_v56 = vld [vmem:[#allocation3 + $0x94] ss:$1272 sps:$4 sm:$0xff]   ;;  %v11487_v33 = vld [vmem:[#allocation3 + $0x104] ss:$1112 sps:$4 sm:$0xff]   ;;  %v11491_v31 = vld [vmem:[#allocation3 + $0x100] ss:$1112 sps:$4 sm:$0xff]  }
0x2ab1   : > { %8426 = vmatprep.subr.bf16.mxu1 %v11450_v26  ;;  %v11492_v22 = vld [vmem:[#allocation3 + $0x90] ss:$1272 sps:$4 sm:$0xff]   ;;  %v11493_v49 = vld [vmem:[#allocation3 + $0x41c] ss:$152 sps:$4 sm:$0xff]  }
0x2ab2   : > { %v11497_v3 = vld [vmem:[#allocation3 + $0x594] ss:$-568 sps:$4 sm:$0xff]   ;;  %v11498_v37 = vld [vmem:[#allocation3 + $0x418] ss:$152 sps:$4 sm:$0xff]  }
0x2ab3   : > { %8386 = vmatpush1.bf16.msra.mxu0 %v9778_v55  ;;  %v6738_v36 = vld [vmem:[#allocation2] ss:$16 sm:$0x3]  ;;  %v6742_v48 = vld [vmem:[#allocation2 + $0x2] ss:$16 sm:$0x3] }
0x2ab4   : > { %8387 = vmatprep.subr.bf16.mxu0 %v11448_v13  ;;  %8427 = vmatpush1.bf16.msra.mxu1 %v11453_v27  ;;  %v6746_v1 = vld [vmem:[#allocation2 + $0x4] ss:$16 sm:$0x3]  ;;  %v11495_v20 = vld [vmem:[#allocation3 + $0x590] ss:$-568 sps:$4 sm:$0xff]   ;;  %v7039_v27 = vld [vmem:[#allocation3 + $0x7e8] sm:$0xff] }
0x2ab5   : > { %8428 = vmatprep.subr.bf16.mxu1 %v11456_v44  ;;  %v6750_v58 = vld [vmem:[#allocation2 + $0x6] ss:$16 sm:$0x3]  ;;  %v11499_v44 = vld [vmem:[#allocation3 + $0x10] ss:$1944 sps:$4 sm:$0xff]  }
0x2ab6   : > { %v11501_v5 = vld [vmem:[#allocation3 + $0x14] ss:$1944 sps:$4 sm:$0xff]  }
0x2ab7   : > { %8388 = vmatpush1.bf16.msra.mxu0 %v11452_v59  ;;  %v7037_v59 = vld [vmem:[#allocation3 + $0xe8] sm:$0xff]  ;;  %v11510_v18 = vld [vmem:[#allocation3 + $0x184] ss:$1008 sps:$4 sm:$0xff]  }
0x2ab8   : > { %8389 = vmatprep.subr.bf16.mxu0 %v11454_v2  ;;  %8429 = vmatpush1.bf16.msra.mxu1 %v11459_v23  ;;  %v6758_v2 = vld [vmem:[#allocation2 + $0xa] ss:$16 sm:$0x3]  ;;  %v11504_v23 = vld [vmem:[#allocation3 + $0x4d4] ss:$-1112 sps:$4 sm:$0xff]   ;;  %v9990_v17 = vcombine.low %v7037_v59, %v7039_v27 }
0x2ab9   : > { %8430 = vmatprep.subr.bf16.mxu1 %v11460_v34 }
0x2abb   : > { %8390 = vmatpush2.bf16.msra.mxu0 %v11458_v24 }
0x2abc   : > { %8391 = vmatprep.subr.bf16.mxu0 %v9831_v38  ;;  %8431 = vmatpush2.bf16.msra.mxu1 %v11462_v21 }
0x2abd   : > { %8432 = vmatprep.subr.bf16.mxu1 %v11465_v40  ;;  %v9991_v40 = vcombine.high %v7037_v59, %v7039_v27  ;;  %v11546_v59 = vld [vmem:[#allocation3 + $0x5d4] ss:$-968 sps:$4 sm:$0xff]  }
0x2abe   : > { %v11549_v27 = vld [vmem:[#allocation3 + $0x3dc] ss:$1016 sps:$4 sm:$0xff]  }
0x2abf   : > { %8392 = vmatpush2.bf16.msra.mxu0 %v9830_v42  ;;  %v9994_v42 = vcombine.low %v7041_v0, %v7043_v9  ;;  %v11525_v0 = vld [vmem:[#allocation3 + $0x4ac] ss:$-112 sps:$4 sm:$0xff]  }
0x2ac0   : > { %8393 = vmatprep.subr.bf16.mxu0 %v11463_v62  ;;  %8433 = vmatpush2.bf16.msra.mxu1 %v11468_v32  ;;  %v11528_v9 = vld [vmem:[#allocation3 + $0x24c] ss:$-40 sps:$4 sm:$0xff]  }
0x2ac1   : > { %8434 = vmatprep.subr.bf16.mxu1 %v11471_v47  ;;  %v11502_v47 = vld [vmem:[#allocation3 + $0x4d0] ss:$-1112 sps:$4 sm:$0xff]  }
0x2ac3   : > { %8394 = vmatpush2.bf16.msra.mxu0 %v11467_v12  ;;  %v6766_v12 = vld [vmem:[#allocation2 + $0xe] ss:$16 sm:$0x3] }
0x2ac4   : > { %8395 = vmatprep.subr.bf16.mxu0 %v11469_v11  ;;  %8435 = vmatpush2.bf16.msra.mxu1 %v11474_v51 }
0x2ac5   : > { %8436 = vmatprep.subr.bf16.mxu1 %v9887_v6  ;;  %v11505_v6 = vld [vmem:[#allocation3 + $0x460] ss:$200 sps:$4 sm:$0xff]  }
0x2ac7   : > { %8396 = vmatpush2.bf16.msra.mxu0 %v11473_v61 }
0x2ac8   : > { %8397 = vmatprep.subr.bf16.mxu0 %v9819_v45  ;;  %8437 = vmatpush2.bf16.msra.mxu1 %v9886_v46  ;;  %v11508_v45 = vld [vmem:[#allocation3 + $0x180] ss:$1008 sps:$4 sm:$0xff]   ;;  %v11513_v46 = vld [vmem:[#allocation3 + $0x734] ss:$-728 sps:$4 sm:$0xff]  }
0x2ac9   : > { %8438 = vmatprep.subr.bf16.mxu1 %v11477_v41  ;;  %v11511_v41 = vld [vmem:[#allocation3 + $0x730] ss:$-728 sps:$4 sm:$0xff]  }
0x2acb   : > { %8398 = vmatpush2.bf16.msra.mxu0 %v9818_v8  ;;  %v11516_v8 = vld [vmem:[#allocation3 + $0x6ec] ss:$-1000 sps:$4 sm:$0xff]  }
0x2acc   : > { %8399 = vmatprep.subr.bf16.mxu0 %v11475_v52  ;;  %8439 = vmatpush2.bf16.msra.mxu1 %v11480_v60  ;;  %v11514_v52 = vld [vmem:[#allocation3 + $0x6e8] ss:$-1000 sps:$4 sm:$0xff]   ;;  %v11522_v60 = vld [vmem:[#allocation3 + $0x7e4] ss:$-1240 sps:$4 sm:$0xff]  }
0x2acd   : > { %8440 = vmatprep.subr.bf16.mxu1 %v11483_v25  ;;  %v6953_v25 = vld [vmem:[#allocation3 + $0x2c8] sm:$0xff] }
0x2acf   : > { %8400 = vmatpush2.bf16.msra.mxu0 %v11479_v50  ;;  %v11519_v50 = vld [vmem:[#allocation3 + $0x3cc] ss:$776 sps:$4 sm:$0xff]  }
0x2ad0   : > { %8401 = vmatprep.subr.bf16.mxu0 %v11481_v19  ;;  %8441 = vmatpush2.bf16.msra.mxu1 %v11486_v14  ;;  %v6955_v19 = vld [vmem:[#allocation3 + $0x488] sm:$0xff] }
0x2ad1   : > { %8442 = vmatprep.subr.bf16.mxu1 %v11489_v56  ;;  %v7023_v14 = vld [vmem:[#allocation3 + $0x428] sm:$0xff] }
0x2ad2   : > { %v11517_v56 = vld [vmem:[#allocation3 + $0x3c8] ss:$776 sps:$4 sm:$0xff]  }
0x2ad3   : > { %8402 = vmatpush2.bf16.msra.mxu0 %v11485_v63  ;;  %v7021_v63 = vld [vmem:[#allocation3 + $0x708] sm:$0xff] }
0x2ad4   : > { %8403 = vmatprep.subr.bf16.mxu0 %v11487_v33  ;;  %8443 = vmatpush2.bf16.msra.mxu1 %v11492_v22  ;;  %v11520_v33 = vld [vmem:[#allocation3 + $0x7e0] ss:$-1240 sps:$4 sm:$0xff]   ;;  %v9975_v22 = vcombine.high %v7021_v63, %v7023_v14 }
0x2ad5   : > { %8444 = vmatprep.subr.bf16.mxu1 %v11493_v49  ;;  %v9906_v49 = vcombine.low %v6953_v25, %v6955_v19 }
0x2ad7   : > { %8404 = vmatpush2.bf16.msra.mxu0 %v11491_v31  ;;  %v9907_v31 = vcombine.high %v6953_v25, %v6955_v19  ;;  %v6850_v25 = vld [vmem:[#allocation3 + $0xc0] sm:$0xff] }
0x2ad8   : > { %8455 = vmatprep.subr.bf16.mxu0 %v11497_v3  ;;  %8445 = vmatpush2.bf16.msra.mxu1 %v11498_v37  ;;  %v9974_v3 = vcombine.low %v7021_v63, %v7023_v14  ;;  %v7009_v37 = vld [vmem:[#allocation3 + $0x728] sm:$0xff]  ;;  %v6852_v19 = vld [vmem:[#allocation3 + $0x280] sm:$0xff] }
0x2ad9   : > { %8496 = vmatprep.subr.bf16.mxu1 %v9995_v35  ;;  %v7011_v35 = vld [vmem:[#allocation3 + $0x188] sm:$0xff]  ;;  %v11562_v14 = vld [vmem:[#allocation3 + $0x340] ss:$144 sps:$4 sm:$0xff]  }
0x2b0c   : > { %v11406_v4 = vpop.permute.xlu0 %11405 }
0x2b0d   : > { %v11408_v43 = vunpack.i.h.bf16 %v11406_v4  ;;  %v11407_v53 = vunpack.i.l.bf16 %v11406_v4  ;;  %v11526_v4 = vld [vmem:[#allocation3 + $0x248] ss:$-40 sps:$4 sm:$0xff]  }
0x2b0f   : > { %v6801_v10 = vsel %vm1308_vm1, %v6738_v36, %v11408_v43  ;;  %v6802_v7 = vsel %vm1308_vm1, %v6742_v48, %v11407_v53  ;;  %v11523_v36 = vld [vmem:[#allocation3 + $0x4a8] ss:$-112 sps:$4 sm:$0xff]   ;;  %v9963_v48 = vcombine.high %v7009_v37, %v7011_v35  ;;  %v11531_v43 = vld [vmem:[#allocation3 + $0x67c] ss:$-520 sps:$4 sm:$0xff]   ;;  %v9962_v53 = vcombine.low %v7009_v37, %v7011_v35 }
0x2b10   : > { %v11411_v16 = vpop.permute.xlu0 %11410  ;;  %v14476_v57 = vpack.c.bf16 %v6802_v7, %v6802_v7  ;;  %v14478_v55 = vpack.c.bf16 %v6801_v10, %v6801_v10  ;;  %v14481_v24 = vpop.permute.xlu1 %11415  ;;  %v11532_v10 = vld [vmem:[#allocation3 + $0x798] ss:$-1592 sps:$4 sm:$0xff]   ;;  %v11565_v37 = vld [vmem:[#allocation3 + $0x168] ss:$264 sps:$4 sm:$0xff]   ;;  %v9804_v35 = vcombine.low %v6850_v25, %v6852_v19 }
0x2b11   : > { %v11413_v26 = vunpack.i.h.bf16 %v11411_v16  ;;  %v11412_v13 = vunpack.i.l.bf16 %v11411_v16  ;;  %v11417_v34 = vunpack.i.l.bf16 %v14481_v24  ;;  %v11535_v7 = vld [vmem:[#allocation3 + $0x1b0] ss:$976 sps:$4 sm:$0xff]   ;;  %v11543_v16 = vld [vmem:[#allocation3 + $0x714] ss:$-1112 sps:$4 sm:$0xff]  }
0x2b12   : > { %8405 = vmatprep.mubr.bf16.mxu0 %v14476_v57 }
0x2b13   : > { %v6803_v30 = vsel %vm1308_vm1, %v6746_v1, %v11413_v26  ;;  %8406 = vmatmul.mubr.bf16.vlgmr.msra.gmra.mxu0 %v14478_v55  ;;  %v6804_v39 = vsel %vm1308_vm1, %v6750_v58, %v11412_v13  ;;  %v6806_v62 = vsel %vm1308_vm1, %v6758_v2, %v11417_v34  ;;  %v11529_v1 = vld [vmem:[#allocation3 + $0x678] ss:$-520 sps:$4 sm:$0xff]   ;;  %v11537_v58 = vld [vmem:[#allocation3 + $0x1b4] ss:$976 sps:$4 sm:$0xff]   ;;  %v11538_v26 = vld [vmem:[#allocation3 + $0x7a0] ss:$-728 sps:$4 sm:$0xff]  }
0x2b14   : > { %v14487_v38 = vpack.c.bf16 %v6803_v30, %v6803_v30  ;;  %8456 = vmatpush1.bf16.msra.mxu0 %v11495_v20  ;;  %v14489_v21 = vpack.c.bf16 %v6804_v39, %v6804_v39  ;;  %v14493_v32 = vpop.permute.xlu1 %11420  ;;  %v14495_v11 = vpack.c.bf16 %v6806_v62, %v6806_v62  ;;  %v11534_v20 = vld [vmem:[#allocation3 + $0x79c] ss:$-1592 sps:$4 sm:$0xff]   ;;  %v11541_v13 = vld [vmem:[#allocation3 + $0x710] ss:$-1112 sps:$4 sm:$0xff]   ;;  %v11552_v30 = vld [vmem:[#allocation3 + $0x754] ss:$-1832 sps:$4 sm:$0xff]  }
0x2b15   : > { %8457 = vmatprep.subr.bf16.mxu0 %v11501_v5  ;;  %v11422_v15 = vunpack.i.l.bf16 %v14493_v32  ;;  %v11540_v5 = vld [vmem:[#allocation3 + $0x7a4] ss:$-728 sps:$4 sm:$0xff]   ;;  %v11547_v2 = vld [vmem:[#allocation3 + $0x3d8] ss:$1016 sps:$4 sm:$0xff]  }
0x2b16   : > { %8446 = vmatprep.mubr.bf16.mxu1 %v14489_v21  ;;  %8487 = vmatprep.mubr.bf16.mxu0 %v14495_v11  ;;  %v11555_v39 = vld [vmem:[#allocation3 + $0x4] ss:$1616 sps:$4 sm:$0xff]   ;;  %v7059_v34 = vld [vmem:[#allocation3 + $0x298] sm:$0xff] }
0x2b17   : > { %8447 = vmatmul.mubr.bf16.vlgmr.msra.gmra.mxu1 %v14487_v38  ;;  %v6808_v51 = vsel %vm1308_vm1, %v6766_v12, %v11422_v15  ;;  %v11558_v62 = vld [vmem:[#allocation3 + $0x46c] ss:$-664 sps:$4 sm:$0xff]   ;;  %v6987_v15 = vld [vmem:[#allocation3 + $0x4e0] sm:$0xff] }
0x2b18   : > { %8458 = vmatpush1.bf16.msra.mxu0 %v11499_v44  ;;  %8497 = vmatpush1.bf16.msra.mxu1 %v9994_v42  ;;  %v14500_v61 = vpack.c.bf16 %v6808_v51, %v6808_v51  ;;  %v11544_v44 = vld [vmem:[#allocation3 + $0x5d0] ss:$-968 sps:$4 sm:$0xff]   ;;  %v11561_v51 = vld [vmem:[#allocation3 + $0x7cc] ss:$-592 sps:$4 sm:$0xff]  }
0x2b19   : > { %8459 = vmatprep.subr.bf16.mxu0 %v11504_v23  ;;  %8498 = vmatprep.subr.bf16.mxu1 %v9991_v40  ;;  %v7057_v23 = vld [vmem:[#allocation3 + $0x638] sm:$0xff]  ;;  %v11550_v42 = vld [vmem:[#allocation3 + $0x750] ss:$-1832 sps:$4 sm:$0xff]  }
0x2b1a   : > { %8528 = vmatprep.mubr.bf16.mxu1 %v14500_v61  ;;  %v11553_v40 = vld [vmem:[#allocation3] ss:$1616 sps:$4 sm:$0xff]   ;;  %v10011_v12 = vcombine.high %v7057_v23, %v7059_v34 }
0x2b1c   : > { %8460 = vmatpush1.bf16.msra.mxu0 %v11502_v47  ;;  %8499 = vmatpush1.bf16.msra.mxu1 %v9990_v17  ;;  %v6985_v47 = vld [vmem:[#allocation3 + $0x560] sm:$0xff]  ;;  %v11556_v17 = vld [vmem:[#allocation3 + $0x468] ss:$-664 sps:$4 sm:$0xff]  }
0x2b1d   : > { %8461 = vmatprep.subr.bf16.mxu0 %v11507_v28  ;;  %8500 = vmatprep.subr.bf16.mxu1 %v11510_v18  ;;  %v10010_v28 = vcombine.low %v7057_v23, %v7059_v34  ;;  %v9939_v18 = vcombine.high %v6985_v47, %v6987_v15  ;;  %v11580_v23 = vld [vmem:[#allocation3 + $0x1a8] ss:$528 sps:$4 sm:$0xff]  }
0x2b20   : > { %8462 = vmatpush1.bf16.msra.mxu0 %v11505_v6  ;;  %8501 = vmatpush1.bf16.msra.mxu1 %v11508_v45  ;;  %v7049_v6 = vld [vmem:[#allocation3 + $0xc8] sm:$0xff] }
0x2b21   : > { %8463 = vmatprep.subr.bf16.mxu0 %v11513_v46  ;;  %8502 = vmatprep.subr.bf16.mxu1 %v11516_v8  ;;  %v7051_v45 = vld [vmem:[#allocation3 + $0x48] sm:$0xff]  ;;  %v9938_v46 = vcombine.low %v6985_v47, %v6987_v15  ;;  %v11583_v47 = vld [vmem:[#allocation3 + $0x110] ss:$904 sps:$4 sm:$0xff]  }
0x2b22   : > { %v11559_v8 = vld [vmem:[#allocation3 + $0x7c8] ss:$-592 sps:$4 sm:$0xff]  }
0x2b24   : > { %8464 = vmatpush1.bf16.msra.mxu0 %v11511_v41  ;;  %8503 = vmatpush1.bf16.msra.mxu1 %v11514_v52  ;;  %v11418_v41 = vunpack.i.h.bf16 %v14481_v24  ;;  %v6754_v52 = vld [vmem:[#allocation2 + $0x8] ss:$16 sm:$0x3]  ;;  %v9805_v24 = vcombine.high %v6850_v25, %v6852_v19  ;;  %v11589_v25 = vld [vmem:[#allocation3 + $0x440] ss:$-176 sps:$4 sm:$0xff]  }
0x2b25   : > { %8465 = vmatprep.subr.bf16.mxu0 %v11519_v50  ;;  %8504 = vmatprep.subr.bf16.mxu1 %v11522_v60  ;;  %v11564_v50 = vld [vmem:[#allocation3 + $0x344] ss:$144 sps:$4 sm:$0xff]   ;;  %v10003_v60 = vcombine.high %v7049_v6, %v7051_v45  ;;  %v11592_v19 = vld [vmem:[#allocation3 + $0xf0] ss:$1424 sps:$4 sm:$0xff]  }
0x2b26   : > { %v6805_v63 = vsel %vm1308_vm1, %v6754_v52, %v11418_v41  ;;  %v11586_v41 = vld [vmem:[#allocation3 + $0x3b0] ss:$-920 sps:$4 sm:$0xff]  }
0x2b28   : > { %8466 = vmatpush1.bf16.msra.mxu0 %v11517_v56  ;;  %8505 = vmatpush1.bf16.msra.mxu1 %v11520_v33  ;;  %v10002_v56 = vcombine.low %v7049_v6, %v7051_v45  ;;  %v11423_v33 = vunpack.i.h.bf16 %v14493_v32  ;;  %v6842_v32 = vld [vmem:[#allocation3 + $0x5a8] sm:$0xff] }
0x2b29   : > { %8467 = vmatprep.subr.bf16.mxu0 %v9907_v31  ;;  %8506 = vmatprep.subr.bf16.mxu1 %v9975_v22  ;;  %v6762_v31 = vld [vmem:[#allocation2 + $0xc] ss:$16 sm:$0x3] }
0x2b2a   : > { %v11567_v22 = vld [vmem:[#allocation3 + $0x16c] ss:$264 sps:$4 sm:$0xff]  }
0x2b2c   : > { %8468 = vmatpush1.bf16.msra.mxu0 %v9906_v49  ;;  %8507 = vmatpush1.bf16.msra.mxu1 %v9974_v3  ;;  %v14507_v49 = vpack.c.bf16 %v6805_v63, %v6805_v63  ;;  %v6914_v3 = vld [vmem:[#allocation3 + $0x2c0] sm:$0xff] }
0x2b2d   : > { %8469 = vmatprep.subr.bf16.mxu0 %v11525_v0  ;;  %8508 = vmatprep.subr.bf16.mxu1 %v11528_v9  ;;  %v6916_v0 = vld [vmem:[#allocation3 + $0x7c0] sm:$0xff]  ;;  %v6807_v9 = vsel %vm1308_vm1, %v6762_v31, %v11423_v33 }
0x2b2e   : > { %v11597_v63 = vld [vmem:[#allocation3 + $0x3a4] ss:$-144 sps:$4 sm:$0xff]   ;;  %v11595_v31 = vld [vmem:[#allocation3 + $0x3a0] ss:$-144 sps:$4 sm:$0xff]  }
0x2b2f   : > { %v6876_v33 = vld [vmem:[#allocation3 + $0x620] sm:$0xff] }
0x2b30   : > { %8470 = vmatpush1.bf16.msra.mxu0 %v11523_v36  ;;  %8509 = vmatpush1.bf16.msra.mxu1 %v11526_v4  ;;  %v11570_v36 = vld [vmem:[#allocation3 + $0x6fc] ss:$-912 sps:$4 sm:$0xff]   ;;  %v9869_v4 = vcombine.high %v6914_v3, %v6916_v0 }
0x2b31   : > { %8471 = vmatprep.subr.bf16.mxu0 %v9963_v48  ;;  %8510 = vmatprep.subr.bf16.mxu1 %v11531_v43  ;;  %v6844_v48 = vld [vmem:[#allocation3 + $0x568] sm:$0xff]  ;;  %v14510_v43 = vpack.c.bf16 %v6807_v9, %v6807_v9 }
0x2b32   : > { %v11601_v9 = vld [vmem:[#allocation3 + $0x128] ss:$1224 sps:$4 sm:$0xff]  }
0x2b34   : > { %8472 = vmatpush2.bf16.msra.mxu0 %v9962_v53  ;;  %8511 = vmatpush1.bf16.msra.mxu1 %v11529_v1  ;;  %v6910_v53 = vld [vmem:[#allocation3 + $0x1f8] sm:$0xff] }
0x2b35   : > { %8473 = vmatprep.subr.bf16.mxu0 %v11534_v20  ;;  %8512 = vmatprep.subr.bf16.mxu1 %v11537_v58  ;;  %v6912_v1 = vld [vmem:[#allocation3 + $0x278] sm:$0xff]  ;;  %v9868_v58 = vcombine.low %v6914_v3, %v6916_v0  ;;  %v11603_v3 = vld [vmem:[#allocation3 + $0x12c] ss:$1224 sps:$4 sm:$0xff]  }
0x2b36   : > { %v11568_v20 = vld [vmem:[#allocation3 + $0x6f8] ss:$-912 sps:$4 sm:$0xff]  }
0x2b38   : > { %8474 = vmatpush2.bf16.msra.mxu0 %v11532_v10  ;;  %8513 = vmatpush2.bf16.msra.mxu1 %v11535_v7  ;;  %v9797_v10 = vcombine.high %v6842_v32, %v6844_v48  ;;  %v9865_v7 = vcombine.high %v6910_v53, %v6912_v1 }
0x2b39   : > { %8475 = vmatprep.subr.bf16.mxu0 %v11540_v5  ;;  %8514 = vmatprep.subr.bf16.mxu1 %v11543_v16  ;;  %v9796_v5 = vcombine.low %v6842_v32, %v6844_v48  ;;  %v9864_v16 = vcombine.low %v6910_v53, %v6912_v1  ;;  %v11604_v32 = vld [vmem:[#allocation3 + $0x520] ss:$-720 sps:$4 sm:$0xff]   ;;  %v11612_v53 = vld [vmem:[#allocation3 + $0x5c4] ss:$56 sps:$4 sm:$0xff]  }
0x2b3a   : > { %v11607_v48 = vld [vmem:[#allocation3 + $0x6b8] ss:$-264 sps:$4 sm:$0xff]  }
0x2b3c   : > { %8476 = vmatpush2.bf16.msra.mxu0 %v11538_v26  ;;  %8515 = vmatpush2.bf16.msra.mxu1 %v11541_v13  ;;  %v11573_v26 = vld [vmem:[#allocation3 + $0x78c] ss:$-72 sps:$4 sm:$0xff]   ;;  %v11576_v13 = vld [vmem:[#allocation3 + $0x614] ss:$-1080 sps:$4 sm:$0xff]  }
0x2b3d   : > { %8477 = vmatprep.subr.bf16.mxu0 %v11546_v59  ;;  %8516 = vmatprep.subr.bf16.mxu1 %v11549_v27  ;;  %v11571_v59 = vld [vmem:[#allocation3 + $0x788] ss:$-72 sps:$4 sm:$0xff]   ;;  %v11579_v27 = vld [vmem:[#allocation3 + $0x554] ss:$464 sps:$4 sm:$0xff]  }
0x2b40   : > { %8478 = vmatpush2.bf16.msra.mxu0 %v11544_v44  ;;  %8517 = vmatpush2.bf16.msra.mxu1 %v11547_v2  ;;  %v11582_v44 = vld [vmem:[#allocation3 + $0x1ac] ss:$528 sps:$4 sm:$0xff]  }
0x2b41   : > { %8479 = vmatprep.subr.bf16.mxu0 %v11552_v30  ;;  %8518 = vmatprep.subr.bf16.mxu1 %v11555_v39  ;;  %v6898_v2 = vld [vmem:[#allocation3 + $0x598] sm:$0xff]  ;;  %v11577_v39 = vld [vmem:[#allocation3 + $0x550] ss:$464 sps:$4 sm:$0xff]  }
0x2b42   : > { %v6900_v30 = vld [vmem:[#allocation3 + $0x6d8] sm:$0xff] }
0x2b43   : > { %v9853_v34 = vcombine.high %v6898_v2, %v6900_v30  ;;  %v9852_v15 = vcombine.low %v6898_v2, %v6900_v30  ;;  %v11616_v2 = vld [vmem:[#allocation3 + $0x4c0] ss:$760 sps:$4 sm:$0xff]  }
0x2b44   : > { %8480 = vmatpush2.bf16.msra.mxu0 %v11550_v42  ;;  %8519 = vmatpush2.bf16.msra.mxu1 %v11553_v40  ;;  %v6826_v42 = vld [vmem:[#allocation3 + $0x768] sm:$0xff]  ;;  %v11619_v30 = vld [vmem:[#allocation3 + $0x198] ss:$1128 sps:$4 sm:$0xff]  }
0x2b45   : > { %8481 = vmatprep.subr.bf16.mxu0 %v11558_v62  ;;  %8520 = vmatprep.subr.bf16.mxu1 %v10011_v12  ;;  %v6828_v40 = vld [vmem:[#allocation3 + $0x448] sm:$0xff]  ;;  %v6894_v62 = vld [vmem:[#allocation3 + $0x2f8] sm:$0xff] }
0x2b46   : > { %v6896_v12 = vld [vmem:[#allocation3 + $0x178] sm:$0xff]  ;;  %v9780_v6 = vcombine.low %v6826_v42, %v6828_v40 }
0x2b47   : > { %v9848_v45 = vcombine.low %v6894_v62, %v6896_v12 }
0x2b48   : > { %8482 = vmatpush2.bf16.msra.mxu0 %v11556_v17  ;;  %8521 = vmatpush2.bf16.msra.mxu1 %v10010_v28  ;;  %v9781_v17 = vcombine.high %v6826_v42, %v6828_v40  ;;  %v9849_v28 = vcombine.high %v6894_v62, %v6896_v12  ;;  %v11622_v40 = vld [vmem:[#allocation3 + $0x540] ss:$264 sps:$4 sm:$0xff]   ;;  %v11627_v62 = vld [vmem:[#allocation3 + $0x7f4] ss:$-1240 sps:$4 sm:$0xff]  }
0x2b49   : > { %8483 = vmatprep.subr.bf16.mxu0 %v9939_v18  ;;  %8522 = vmatprep.subr.bf16.mxu1 %v11561_v51  ;;  %v6890_v18 = vld [vmem:[#allocation3 + $0x120] sm:$0xff] }
0x2b4a   : > { %v6892_v51 = vld [vmem:[#allocation3 + $0x40] sm:$0xff] }
0x2b4b   : > { %v9844_v52 = vcombine.low %v6890_v18, %v6892_v51 }
0x2b4c   : > { %8484 = vmatpush2.bf16.msra.mxu0 %v9938_v46  ;;  %8523 = vmatpush2.bf16.msra.mxu1 %v11559_v8  ;;  %v11588_v46 = vld [vmem:[#allocation3 + $0x3b4] ss:$-920 sps:$4 sm:$0xff]   ;;  %v9845_v8 = vcombine.high %v6890_v18, %v6892_v51  ;;  %v11628_v18 = vld [vmem:[#allocation3 + $0x778] ss:$-584 sps:$4 sm:$0xff]  }
0x2b4d   : > { %8485 = vmatprep.subr.bf16.mxu0 %v11564_v50  ;;  %8524 = vmatprep.subr.bf16.mxu1 %v10003_v60  ;;  %v11591_v50 = vld [vmem:[#allocation3 + $0x444] ss:$-176 sps:$4 sm:$0xff]   ;;  %v11631_v51 = vld [vmem:[#allocation3 + $0x210] ss:$1336 sps:$4 sm:$0xff]  }
0x2b4e   : > { %v11594_v60 = vld [vmem:[#allocation3 + $0xf4] ss:$1424 sps:$4 sm:$0xff]  }
0x2b50   : > { %8486 = vmatpush2.bf16.msra.mxu0 %v11562_v14  ;;  %8525 = vmatpush2.bf16.msra.mxu1 %v10002_v56  ;;  %v11600_v14 = vld [vmem:[#allocation3 + $0x244] ss:$40 sps:$4 sm:$0xff]  }
0x2b51   : > { %8526 = vmatprep.subr.bf16.mxu1 %v11567_v22  ;;  %8537 = vmatprep.subr.bf16.mxu0 %v9805_v24  ;;  %v6874_v56 = vld [vmem:[#allocation3 + $0x420] sm:$0xff] }
0x2b52   : > { %v11598_v22 = vld [vmem:[#allocation3 + $0x240] ss:$40 sps:$4 sm:$0xff]   ;;  %v9829_v24 = vcombine.high %v6874_v56, %v6876_v33  ;;  %v9828_v0 = vcombine.low %v6874_v56, %v6876_v33  ;;  %v11651_v33 = vld [vmem:[#allocation3 + $0x24] ss:$104 sps:$4 sm:$0xff]  }
0x2b53   : > { %8488 = vmatmul.mubr.bf16.vlgmr.msra.gmra.mxu0 %v14507_v49 }
0x2b54   : > { %8527 = vmatpush2.bf16.msra.mxu1 %v11565_v37  ;;  %8538 = vmatpush1.bf16.msra.mxu0 %v9804_v35  ;;  %v11606_v37 = vld [vmem:[#allocation3 + $0x524] ss:$-720 sps:$4 sm:$0xff]  }
0x2b55   : > { %8569 = vmatprep.mubr.bf16.mxu0 %v14476_v57  ;;  %8539 = vmatprep.subr.bf16.mxu0 %v11570_v36  ;;  %v11574_v57 = vld [vmem:[#allocation3 + $0x610] ss:$-1080 sps:$4 sm:$0xff]   ;;  %v11609_v35 = vld [vmem:[#allocation3 + $0x6bc] ss:$-264 sps:$4 sm:$0xff]   ;;  %v6934_v36 = vld [vmem:[#allocation3 + $0x1e0] sm:$0xff] }
0x2b56   : > { %8578 = vmatprep.subr.bf16.mxu1 %v9869_v4  ;;  %v6936_v4 = vld [vmem:[#allocation3 + $0x6c0] sm:$0xff] }
0x2b57   : > { %8529 = vmatmul.mubr.bf16.vlgmr.msra.gmra.mxu1 %v14510_v43  ;;  %v9889_v1 = vcombine.high %v6934_v36, %v6936_v4 }
0x2b58   : > { %8540 = vmatpush1.bf16.msra.mxu0 %v11568_v20  ;;  %8579 = vmatpush1.bf16.msra.mxu1 %v9868_v58  ;;  %v6862_v20 = vld [vmem:[#allocation3 + $0x6a8] sm:$0xff] }
0x2b59   : > { %8610 = vmatprep.mubr.bf16.mxu1 %v14489_v21  ;;  %8541 = vmatprep.subr.bf16.mxu0 %v9797_v10  ;;  %v11585_v21 = vld [vmem:[#allocation3 + $0x114] ss:$904 sps:$4 sm:$0xff]   ;;  %v6864_v58 = vld [vmem:[#allocation3 + $0x2e8] sm:$0xff]  ;;  %v11610_v10 = vld [vmem:[#allocation3 + $0x5c0] ss:$56 sps:$4 sm:$0xff]  }
0x2b5a   : > { %8580 = vmatprep.subr.bf16.mxu1 %v9865_v7  ;;  %v9888_v7 = vcombine.low %v6934_v36, %v6936_v4  ;;  %v7010_v36 = vld [vmem:[#allocation3 + $0x288] sm:$0xff] }
0x2b5b   : > { %v7012_v4 = vld [vmem:[#allocation3 + $0x408] sm:$0xff] }
0x2b5c   : > { %8542 = vmatpush1.bf16.msra.mxu0 %v9796_v5  ;;  %8581 = vmatpush1.bf16.msra.mxu1 %v9864_v16  ;;  %v9817_v5 = vcombine.high %v6862_v20, %v6864_v58  ;;  %v11615_v16 = vld [vmem:[#allocation3 + $0xb4] ss:$168 sps:$4 sm:$0xff]  }
0x2b5d   : > { %8543 = vmatprep.subr.bf16.mxu0 %v11573_v26  ;;  %8582 = vmatprep.subr.bf16.mxu1 %v11576_v13  ;;  %v9816_v26 = vcombine.low %v6862_v20, %v6864_v58  ;;  %v11613_v13 = vld [vmem:[#allocation3 + $0xb0] ss:$168 sps:$4 sm:$0xff]   ;;  %v9964_v20 = vcombine.low %v7010_v36, %v7012_v4 }
0x2b5e   : > { %v11664_v58 = vld [vmem:[#allocation3 + $0x98] ss:$888 sps:$4 sm:$0xff]  }
0x2b60   : > { %8544 = vmatpush1.bf16.msra.mxu0 %v11571_v59  ;;  %8583 = vmatpush1.bf16.msra.mxu1 %v11574_v57  ;;  %v11618_v59 = vld [vmem:[#allocation3 + $0x4c4] ss:$760 sps:$4 sm:$0xff]  }
0x2b61   : > { %8545 = vmatprep.subr.bf16.mxu0 %v11579_v27  ;;  %8584 = vmatprep.subr.bf16.mxu1 %v11582_v44  ;;  %v11621_v57 = vld [vmem:[#allocation3 + $0x19c] ss:$1128 sps:$4 sm:$0xff]  }
0x2b62   : > { %v6854_v27 = vld [vmem:[#allocation3 + $0x3c0] sm:$0xff] }
0x2b63   : > { %v6856_v44 = vld [vmem:[#allocation3 + $0x3e0] sm:$0xff] }
0x2b64   : > { %8546 = vmatpush1.bf16.msra.mxu0 %v11577_v39  ;;  %8585 = vmatpush1.bf16.msra.mxu1 %v11580_v23  ;;  %v9809_v39 = vcombine.high %v6854_v27, %v6856_v44  ;;  %v11624_v23 = vld [vmem:[#allocation3 + $0x544] ss:$264 sps:$4 sm:$0xff]   ;;  %v9808_v42 = vcombine.low %v6854_v27, %v6856_v44  ;;  %v11684_v44 = vld [vmem:[#allocation3 + $0x71c] ss:$-1416 sps:$4 sm:$0xff]  }
0x2b65   : > { %8547 = vmatprep.subr.bf16.mxu0 %v11585_v21  ;;  %8586 = vmatprep.subr.bf16.mxu1 %v9853_v34  ;;  %v6978_v21 = vld [vmem:[#allocation3 + $0x660] sm:$0xff]  ;;  %v11681_v27 = vld [vmem:[#allocation3 + $0x22c] ss:$104 sps:$4 sm:$0xff]  }
0x2b66   : > { %v6980_v34 = vld [vmem:[#allocation3 + $0x700] sm:$0xff] }
0x2b67   : > { %v9933_v12 = vcombine.high %v6978_v21, %v6980_v34 }
0x2b68   : > { %8548 = vmatpush1.bf16.msra.mxu0 %v11583_v47  ;;  %8587 = vmatpush1.bf16.msra.mxu1 %v9852_v15  ;;  %v11625_v47 = vld [vmem:[#allocation3 + $0x7f0] ss:$-1240 sps:$4 sm:$0xff]   ;;  %v9932_v15 = vcombine.low %v6978_v21, %v6980_v34 }
0x2b69   : > { %8549 = vmatprep.subr.bf16.mxu0 %v9781_v17  ;;  %8588 = vmatprep.subr.bf16.mxu1 %v9849_v28  ;;  %v11630_v17 = vld [vmem:[#allocation3 + $0x77c] ss:$-584 sps:$4 sm:$0xff]   ;;  %v11685_v21 = vld [vmem:[#allocation3 + $0x130] ss:$1584 sps:$4 sm:$0xff]  }
0x2b6a   : > { %v11633_v28 = vld [vmem:[#allocation3 + $0x214] ss:$1336 sps:$4 sm:$0xff]   ;;  %v11688_v34 = vld [vmem:[#allocation3 + $0x2d0] ss:$432 sps:$4 sm:$0xff]  }
0x2b6c   : > { %8550 = vmatpush1.bf16.msra.mxu0 %v9780_v6  ;;  %8589 = vmatpush1.bf16.msra.mxu1 %v9848_v45  ;;  %v11636_v6 = vld [vmem:[#allocation3 + $0x4fc] ss:$-600 sps:$4 sm:$0xff]  }
0x2b6d   : > { %8551 = vmatprep.subr.bf16.mxu0 %v11588_v46  ;;  %8590 = vmatprep.subr.bf16.mxu1 %v9845_v8  ;;  %v11639_v45 = vld [vmem:[#allocation3 + $0x2f4] ss:$112 sps:$4 sm:$0xff]   ;;  %v11634_v46 = vld [vmem:[#allocation3 + $0x4f8] ss:$-600 sps:$4 sm:$0xff]  }
0x2b6e   : > { %v11637_v8 = vld [vmem:[#allocation3 + $0x2f0] ss:$112 sps:$4 sm:$0xff]  }
0x2b70   : > { %8552 = vmatpush1.bf16.msra.mxu0 %v11586_v41  ;;  %8591 = vmatpush1.bf16.msra.mxu1 %v9844_v52  ;;  %v11645_v41 = vld [vmem:[#allocation3 + $0x494] ss:$112 sps:$4 sm:$0xff]   ;;  %v6962_v52 = vld [vmem:[#allocation3 + $0x658] sm:$0xff] }
0x2b71   : > { %8553 = vmatprep.subr.bf16.mxu0 %v11591_v50  ;;  %8592 = vmatprep.subr.bf16.mxu1 %v11594_v60  ;;  %v6964_v50 = vld [vmem:[#allocation3 + $0x1b8] sm:$0xff]  ;;  %v11643_v60 = vld [vmem:[#allocation3 + $0x490] ss:$112 sps:$4 sm:$0xff]  }
0x2b74   : > { %8554 = vmatpush2.bf16.msra.mxu0 %v11589_v25  ;;  %8593 = vmatpush1.bf16.msra.mxu1 %v11592_v19  ;;  %v9917_v25 = vcombine.high %v6962_v52, %v6964_v50  ;;  %v6958_v19 = vld [vmem:[#allocation3 + $0x1e8] sm:$0xff] }
0x2b75   : > { %8555 = vmatprep.subr.bf16.mxu0 %v11597_v63  ;;  %8594 = vmatprep.subr.bf16.mxu1 %v11600_v14  ;;  %v6960_v63 = vld [vmem:[#allocation3 + $0x688] sm:$0xff]  ;;  %v9916_v14 = vcombine.low %v6962_v52, %v6964_v50  ;;  %v11714_v52 = vld [vmem:[#allocation4 + $0x70] sm:$0xff]  }
0x2b76   : > { %v9913_v56 = vcombine.high %v6958_v19, %v6960_v63 }
0x2b78   : > { %8556 = vmatpush2.bf16.msra.mxu0 %v11595_v31  ;;  %8595 = vmatpush2.bf16.msra.mxu1 %v11598_v22  ;;  %v9912_v31 = vcombine.low %v6958_v19, %v6960_v63  ;;  %v11649_v22 = vld [vmem:[#allocation3 + $0x20] ss:$104 sps:$4 sm:$0xff]  }
0x2b79   : > { %8557 = vmatprep.subr.bf16.mxu0 %v9829_v24  ;;  %8596 = vmatprep.subr.bf16.mxu1 %v11603_v3  ;;  %v11654_v24 = vld [vmem:[#allocation3 + $0xfc] ss:$1448 sps:$4 sm:$0xff]   ;;  %v11657_v3 = vld [vmem:[#allocation3 + $0xc] ss:$360 sps:$4 sm:$0xff]  }
0x2b7a   : > { %v11717_v63 = vld [vmem:[#allocation4 + $0x28] sm:$0xff]  }
0x2b7c   : > { %8558 = vmatpush2.bf16.msra.mxu0 %v9828_v0  ;;  %8597 = vmatpush2.bf16.msra.mxu1 %v11601_v9  ;;  %v11652_v0 = vld [vmem:[#allocation3 + $0xf8] ss:$1448 sps:$4 sm:$0xff]   ;;  %v11655_v9 = vld [vmem:[#allocation3 + $0x8] ss:$360 sps:$4 sm:$0xff]  }
0x2b7d   : > { %8559 = vmatprep.subr.bf16.mxu0 %v11606_v37  ;;  %8598 = vmatprep.subr.bf16.mxu1 %v11609_v35  ;;  %v11660_v37 = vld [vmem:[#allocation3 + $0x5cc] ss:$-632 sps:$4 sm:$0xff]  }
0x2b7e   : > { %v11663_v35 = vld [vmem:[#allocation3 + $0x54c] ss:$568 sps:$4 sm:$0xff]  }
0x2b80   : > { %8560 = vmatpush2.bf16.msra.mxu0 %v11604_v32  ;;  %8599 = vmatpush2.bf16.msra.mxu1 %v11607_v48  ;;  %v11658_v32 = vld [vmem:[#allocation3 + $0x5c8] ss:$-632 sps:$4 sm:$0xff]  }
0x2b81   : > { %8561 = vmatprep.subr.bf16.mxu0 %v11612_v53  ;;  %8600 = vmatprep.subr.bf16.mxu1 %v9889_v1  ;;  %v11661_v48 = vld [vmem:[#allocation3 + $0x548] ss:$568 sps:$4 sm:$0xff]   ;;  %v9965_v53 = vcombine.high %v7010_v36, %v7012_v4  ;;  %v11666_v1 = vld [vmem:[#allocation3 + $0x9c] ss:$888 sps:$4 sm:$0xff]  }
0x2b82   : > { %v11723_v36 = vld [vmem:[#allocation4 + $0x10] sm:$0xff]   ;;  %v11733_v4 = vld [vmem:[#allocation4 + $0xa8] sm:$0xff]  }
0x2b84   : > { %8562 = vmatpush2.bf16.msra.mxu0 %v11610_v10  ;;  %8601 = vmatpush2.bf16.msra.mxu1 %v9888_v7  ;;  %v11669_v10 = vld [vmem:[#allocation3 + $0x37c] ss:$-280 sps:$4 sm:$0xff]  }
0x2b85   : > { %8563 = vmatprep.subr.bf16.mxu0 %v9817_v5  ;;  %8602 = vmatprep.subr.bf16.mxu1 %v11615_v16  ;;  %v11672_v7 = vld [vmem:[#allocation3 + $0x5e4] ss:$-1168 sps:$4 sm:$0xff]   ;;  %v11667_v5 = vld [vmem:[#allocation3 + $0x378] ss:$-280 sps:$4 sm:$0xff]  }
0x2b86   : > { %v11670_v16 = vld [vmem:[#allocation3 + $0x5e0] ss:$-1168 sps:$4 sm:$0xff]  }
0x2b88   : > { %8564 = vmatpush2.bf16.msra.mxu0 %v9816_v26  ;;  %8603 = vmatpush2.bf16.msra.mxu1 %v11613_v13  ;;  %v11675_v26 = vld [vmem:[#allocation3 + $0x84] ss:$880 sps:$4 sm:$0xff]   ;;  %v11678_v13 = vld [vmem:[#allocation3 + $0xac] ss:$400 sps:$4 sm:$0xff]  }
0x2b89   : > { %8565 = vmatprep.subr.bf16.mxu0 %v11618_v59  ;;  %8604 = vmatprep.subr.bf16.mxu1 %v11621_v57  ;;  %v11673_v59 = vld [vmem:[#allocation3 + $0x80] ss:$880 sps:$4 sm:$0xff]   ;;  %v11676_v57 = vld [vmem:[#allocation3 + $0xa8] ss:$400 sps:$4 sm:$0xff]  }
0x2b8c   : > { %8566 = vmatpush2.bf16.msra.mxu0 %v11616_v2  ;;  %8605 = vmatpush2.bf16.msra.mxu1 %v11619_v30  ;;  %v11679_v2 = vld [vmem:[#allocation3 + $0x228] ss:$104 sps:$4 sm:$0xff]  }
0x2b8d   : > { %8567 = vmatprep.subr.bf16.mxu0 %v9809_v39  ;;  %8606 = vmatprep.subr.bf16.mxu1 %v11624_v23  ;;  %v11682_v30 = vld [vmem:[#allocation3 + $0x718] ss:$-1416 sps:$4 sm:$0xff]   ;;  %v11687_v39 = vld [vmem:[#allocation3 + $0x134] ss:$1584 sps:$4 sm:$0xff]  }
0x2b8e   : > { %v11690_v23 = vld [vmem:[#allocation3 + $0x2d4] ss:$432 sps:$4 sm:$0xff]  }
0x2b90   : > { %8568 = vmatpush2.bf16.msra.mxu0 %v9808_v42  ;;  %8607 = vmatpush2.bf16.msra.mxu1 %v11622_v40  ;;  %v11693_v42 = vld [vmem:[#allocation3 + $0x2ac] ss:$616 sps:$4 sm:$0xff]  }
0x2b91   : > { %8608 = vmatprep.subr.bf16.mxu1 %v11627_v62  ;;  %8619 = vmatprep.subr.bf16.mxu0 %v9933_v12  ;;  %v11696_v40 = vld [vmem:[#allocation3 + $0x4bc] ss:$-712 sps:$4 sm:$0xff]   ;;  %v11691_v62 = vld [vmem:[#allocation3 + $0x2a8] ss:$616 sps:$4 sm:$0xff]  }
0x2b92   : > { %v11694_v12 = vld [vmem:[#allocation3 + $0x4b8] ss:$-712 sps:$4 sm:$0xff]  }
0x2b93   : > { %8570 = vmatmul.mubr.bf16.vlgmr.msra.gmra.mxu0 %v14478_v55  ;;  %v11642_v55 = vld [vmem:[#allocation3 + $0x4f4] ss:$-664 sps:$4 sm:$0xff]  }
0x2b94   : > { %8609 = vmatpush2.bf16.msra.mxu1 %v11625_v47  ;;  %8620 = vmatpush1.bf16.msra.mxu0 %v9932_v15  ;;  %v11699_v47 = vld [vmem:[#allocation3 + $0x7fc] ss:$-1528 sps:$4 sm:$0xff]   ;;  %v11702_v15 = vld [vmem:[#allocation3 + $0x434] ss:$472 sps:$4 sm:$0xff]  }
0x2b95   : > { %8651 = vmatprep.mubr.bf16.mxu0 %v14495_v11  ;;  %8621 = vmatprep.subr.bf16.mxu0 %v11630_v17  ;;  %v11640_v11 = vld [vmem:[#allocation3 + $0x4f0] ss:$-664 sps:$4 sm:$0xff]  }
0x2b96   : > { %8660 = vmatprep.subr.bf16.mxu1 %v11633_v28  ;;  %v11697_v17 = vld [vmem:[#allocation3 + $0x7f8] ss:$-1528 sps:$4 sm:$0xff]   ;;  %v11700_v28 = vld [vmem:[#allocation3 + $0x430] ss:$472 sps:$4 sm:$0xff]  }
0x2b97   : > { %8611 = vmatmul.mubr.bf16.vlgmr.msra.gmra.mxu1 %v14487_v38  ;;  %v11648_v38 = vld [vmem:[#allocation3 + $0x6b4] ss:$-1448 sps:$4 sm:$0xff]  }
0x2b98   : > { %8622 = vmatpush1.bf16.msra.mxu0 %v11628_v18  ;;  %8661 = vmatpush1.bf16.msra.mxu1 %v11631_v51  ;;  %v11705_v18 = vld [vmem:[#allocation3 + $0x5a4] ss:$-880 sps:$4 sm:$0xff]  }
0x2b99   : > { %8692 = vmatprep.mubr.bf16.mxu1 %v14500_v61  ;;  %8623 = vmatprep.subr.bf16.mxu0 %v11636_v6  ;;  %v11646_v61 = vld [vmem:[#allocation3 + $0x6b0] ss:$-1448 sps:$4 sm:$0xff]   ;;  %v11708_v51 = vld [vmem:[#allocation3 + $0xa4] ss:$648 sps:$4 sm:$0xff]  }
0x2b9a   : > { %8662 = vmatprep.subr.bf16.mxu1 %v11639_v45  ;;  %v11703_v6 = vld [vmem:[#allocation3 + $0x5a0] ss:$-880 sps:$4 sm:$0xff]  }
0x2b9b   : > { %v11706_v45 = vld [vmem:[#allocation3 + $0xa0] ss:$648 sps:$4 sm:$0xff]  }
0x2b9c   : > { %8624 = vmatpush1.bf16.msra.mxu0 %v11634_v46  ;;  %8663 = vmatpush1.bf16.msra.mxu1 %v11637_v8  ;;  %v11711_v46 = vld [vmem:[#allocation3 + $0x66c] ss:$-912 sps:$4 sm:$0xff]  }
0x2b9d   : > { %8625 = vmatprep.subr.bf16.mxu0 %v11642_v55  ;;  %8664 = vmatprep.subr.bf16.mxu1 %v11645_v41  ;;  %v11712_v8 = vld [vmem:[#allocation4 + $0x78] sm:$0xff]  }
0x2b9e   : > { %v11709_v55 = vld [vmem:[#allocation3 + $0x668] ss:$-912 sps:$4 sm:$0xff]  }
0x2b9f   : > { %v11713_v41 = vld [vmem:[#allocation4 + $0x38] sm:$0xff]  }
0x2ba0   : > { %8626 = vmatpush1.bf16.msra.mxu0 %v11640_v11  ;;  %8665 = vmatpush1.bf16.msra.mxu1 %v11643_v60  ;;  %v11715_v11 = vld [vmem:[#allocation4 + $0x30] sm:$0xff]  }
0x2ba1   : > { %8627 = vmatprep.subr.bf16.mxu0 %v9917_v25  ;;  %8666 = vmatprep.subr.bf16.mxu1 %v11648_v38  ;;  %v11716_v25 = vld [vmem:[#allocation4 + $0x68] sm:$0xff]  }
0x2ba4   : > { %8628 = vmatpush1.bf16.msra.mxu0 %v9916_v14  ;;  %8667 = vmatpush1.bf16.msra.mxu1 %v11646_v61 }
0x2ba5   : > { %8629 = vmatprep.subr.bf16.mxu0 %v9913_v56  ;;  %8668 = vmatprep.subr.bf16.mxu1 %v11651_v33  ;;  %v11718_v56 = vld [vmem:[#allocation4 + $0x60] sm:$0xff]  }
0x2ba8   : > { %8630 = vmatpush1.bf16.msra.mxu0 %v9912_v31  ;;  %8669 = vmatpush1.bf16.msra.mxu1 %v11649_v22  ;;  %v11720_v31 = vld [vmem:[#allocation4 + $0x58] sm:$0xff]  }
0x2ba9   : > { %8631 = vmatprep.subr.bf16.mxu0 %v11654_v24  ;;  %8670 = vmatprep.subr.bf16.mxu1 %v11657_v3  ;;  %v11728_v24 = vld [vmem:[#allocation4 + $0xf8] sm:$0xff]  }
0x2baa   : > { %v11729_v3 = vld [vmem:[#allocation4 + $0xb8] sm:$0xff]  }
0x2bac   : > { %8632 = vmatpush1.bf16.msra.mxu0 %v11652_v0  ;;  %8671 = vmatpush1.bf16.msra.mxu1 %v11655_v9  ;;  %v11730_v0 = vld [vmem:[#allocation4 + $0xf0] sm:$0xff]  }
0x2bad   : > { %8633 = vmatprep.subr.bf16.mxu0 %v11660_v37  ;;  %8672 = vmatprep.subr.bf16.mxu1 %v11663_v35  ;;  %v11731_v9 = vld [vmem:[#allocation4 + $0xb0] sm:$0xff]   ;;  %v11732_v35 = vld [vmem:[#allocation4 + $0xe8] sm:$0xff]  }
0x2bae   : > { %v11722_v37 = vld [vmem:[#allocation4 + $0x50] sm:$0xff]  }
0x2bb0   : > { %8634 = vmatpush1.bf16.msra.mxu0 %v11658_v32  ;;  %8673 = vmatpush1.bf16.msra.mxu1 %v11661_v48  ;;  %v11724_v32 = vld [vmem:[#allocation4 + $0x48] sm:$0xff]   ;;  %v11734_v48 = vld [vmem:[#allocation4 + $0xe0] sm:$0xff]  }
0x2bb1   : > { %8635 = vmatprep.subr.bf16.mxu0 %v9965_v53  ;;  %8674 = vmatprep.subr.bf16.mxu1 %v11666_v1  ;;  %v11725_v53 = vld [vmem:[#allocation4 + $0x8] sm:$0xff]   ;;  %v11735_v1 = vld [vmem:[#allocation4 + $0xa0] sm:$0xff]  }
0x2bb4   : > { %8636 = vmatpush2.bf16.msra.mxu0 %v9964_v20  ;;  %8675 = vmatpush1.bf16.msra.mxu1 %v11664_v58  ;;  %v11726_v20 = vld [vmem:[#allocation4 + $0x40] sm:$0xff]   ;;  %v11736_v58 = vld [vmem:[#allocation4 + $0xd8] sm:$0xff]  }
0x2bb5   : > { %8637 = vmatprep.subr.bf16.mxu0 %v11669_v10  ;;  %8676 = vmatprep.subr.bf16.mxu1 %v11672_v7  ;;  %v11727_v10 = vld [vmem:[#allocation4] sm:$0xff]   ;;  %v11737_v7 = vld [vmem:[#allocation4 + $0x98] sm:$0xff]  }
0x2bb8   : > { %8638 = vmatpush2.bf16.msra.mxu0 %v11667_v5  ;;  %8677 = vmatpush2.bf16.msra.mxu1 %v11670_v16  ;;  %v14525_v5 = vld [vmem:[%s14568_s10] sm:$0xff]  ;;  %v6810_v16 = vld [vmem:[%s14568_s10 + $0x8] sm:$0xff] }
0x2bb9   : > { %8639 = vmatprep.subr.bf16.mxu0 %v11675_v26  ;;  %8678 = vmatprep.subr.bf16.mxu1 %v11678_v13  ;;  %v7080_v26 = vrot.slane %v14525_v5, %v13210_v29  ;;  %v7084_v13 = vrot.slane %v6810_v16, %v13210_v29 }
0x2bbc   : > { %8640 = vmatpush2.bf16.msra.mxu0 %v11673_v59  ;;  %8679 = vmatpush2.bf16.msra.mxu1 %v11676_v57 }
0x2bbd   : > { %8641 = vmatprep.subr.bf16.mxu0 %v11681_v27  ;;  %8680 = vmatprep.subr.bf16.mxu1 %v11684_v44 }
0x2bc0   : > { %8642 = vmatpush2.bf16.msra.mxu0 %v11679_v2  ;;  %8681 = vmatpush2.bf16.msra.mxu1 %v11682_v30  ;;  %v11738_v2 = vld [vmem:[#allocation4 + $0xd0] sm:$0xff]  }
0x2bc1   : > { %8643 = vmatprep.subr.bf16.mxu0 %v11687_v39  ;;  %8682 = vmatprep.subr.bf16.mxu1 %v11690_v23  ;;  %v11739_v39 = vld [vmem:[#allocation4 + $0x90] sm:$0xff]  }
0x2bc4   : > { %8644 = vmatpush2.bf16.msra.mxu0 %v11685_v21  ;;  %8683 = vmatpush2.bf16.msra.mxu1 %v11688_v34 }
0x2bc5   : > { %8645 = vmatprep.subr.bf16.mxu0 %v11693_v42  ;;  %8684 = vmatprep.subr.bf16.mxu1 %v11696_v40 }
0x2bc8   : > { %8646 = vmatpush2.bf16.msra.mxu0 %v11691_v62  ;;  %8685 = vmatpush2.bf16.msra.mxu1 %v11694_v12  ;;  %v11740_v12 = vld [vmem:[#allocation4 + $0xc8] sm:$0xff]  }
0x2bc9   : > { %8647 = vmatprep.subr.bf16.mxu0 %v11699_v47  ;;  %8686 = vmatprep.subr.bf16.mxu1 %v11702_v15 }
0x2bcc   : > { %8648 = vmatpush2.bf16.msra.mxu0 %v11697_v17  ;;  %8687 = vmatpush2.bf16.msra.mxu1 %v11700_v28  ;;  %v11741_v17 = vld [vmem:[#allocation4 + $0x88] sm:$0xff]  }
0x2bcd   : > { %8649 = vmatprep.subr.bf16.mxu0 %v11705_v18  ;;  %8688 = vmatprep.subr.bf16.mxu1 %v11708_v51 }
0x2bd0   : > { %8650 = vmatpush2.bf16.msra.mxu0 %v11703_v6  ;;  %8689 = vmatpush2.bf16.msra.mxu1 %v11706_v45  ;;  %v11742_v45 = vld [vmem:[#allocation4 + $0xc0] sm:$0xff]  }
0x2bd1   : > { %8690 = vmatprep.subr.bf16.mxu1 %v11711_v46  ;;  %10465 = vmatprep.subr.bf16.mxu0 %v11712_v8  ;;  %v11743_v8 = vld [vmem:[#allocation4 + $0x80] sm:$0xff]  }
0x2bd3   : > { %8652 = vmatmul.mubr.bf16.vlgmr.msra.gmra.mxu0 %v14507_v49  ;;  %v8407_v50 = vpop.f32.mrf.mxu0  ;;  %v11719_v49 = vld [vmem:[#allocation4 + $0x20] sm:$0xff]  }
0x2bd4   : > { %8691 = vmatpush2.bf16.msra.mxu1 %v11709_v55  ;;  %10466 = vmatpush3.bf16.msra.mxu0 %v11713_v41  ;;  %v8408_v59 = vadd.f32 %v8407_v50, %v7080_v26 }
0x2bd5   : > { %v8409_v60 = vpop.f32.mrf.mxu0  ;;  %10467 = vmatprep.subr.bf16.mxu0 %v11714_v52  ;;  %10487 = vmatprep.subr.bf16.mxu1 %v11728_v24 }
0x2bd6   : > { %v8410_v27 = vadd.f32 %v8409_v60, %v7084_v13 }
0x2bd7   : > { %8693 = vmatmul.mubr.bf16.vlgmr.msra.gmra.mxu1 %v14510_v43  ;;  %v8411_v38 = vpop.f32.mrf.mxu0  ;;  %v8448_v19 = vpop.f32.mrf.mxu1  ;;  %v11721_v43 = vld [vmem:[#allocation4 + $0x18] sm:$0xff]  }
0x2bd8   : > { %10468 = vmatpush3.bf16.msra.mxu0 %v11715_v11  ;;  %10488 = vmatpush3.bf16.msra.mxu1 %v11729_v3  ;;  %v8449_v44 = vadd.f32 %v8448_v19, %v8408_v59 }
0x2bd9   : > { %v8412_v14 = vpop.f32.mrf.mxu0  ;;  %v8450_v61 = vpop.f32.mrf.mxu1  ;;  %10469 = vmatprep.subr.bf16.mxu0 %v11716_v25  ;;  %10489 = vmatprep.subr.bf16.mxu1 %v11730_v0 }
0x2bda   : > { %v8451_v23 = vadd.f32 %v8450_v61, %v8410_v27  ;;  %v6811_v14 = vld [vmem:[%s14568_s10 + $0x10] sm:$0xff]  ;;  %v6812_v61 = vld [vmem:[%s14568_s10 + $0x18] sm:$0xff] }
0x2bdb   : > { %v8452_v33 = vpop.f32.mrf.mxu1 }
0x2bdc   : > { %10470 = vmatpush3.bf16.msra.mxu0 %v11717_v63  ;;  %10490 = vmatpush3.bf16.msra.mxu1 %v11731_v9  ;;  %v7092_v33 = vrot.slane %v6812_v61, %v13210_v29 }
0x2bdd   : > { %v8453_v22 = vpop.f32.mrf.mxu1  ;;  %10471 = vmatprep.subr.bf16.mxu0 %v11718_v56  ;;  %10491 = vmatprep.subr.bf16.mxu1 %v11732_v35  ;;  %v7088_v56 = vrot.slane %v6811_v14, %v13210_v29 }
0x2be0   : > { %10472 = vmatpush3.bf16.msra.mxu0 %v11719_v49  ;;  %10492 = vmatpush3.bf16.msra.mxu1 %v11733_v4 }
0x2be1   : > { %10473 = vmatprep.subr.bf16.mxu0 %v11720_v31  ;;  %10493 = vmatprep.subr.bf16.mxu1 %v11734_v48 }
0x2be4   : > { %10474 = vmatpush3.bf16.msra.mxu0 %v11721_v43  ;;  %10494 = vmatpush3.bf16.msra.mxu1 %v11735_v1 }
0x2be5   : > { %10475 = vmatprep.subr.bf16.mxu0 %v11722_v37  ;;  %10495 = vmatprep.subr.bf16.mxu1 %v11736_v58 }
0x2be8   : > { %10476 = vmatpush3.bf16.msra.mxu0 %v11723_v36  ;;  %10496 = vmatpush3.bf16.msra.mxu1 %v11737_v7 }
0x2be9   : > { %10477 = vmatprep.subr.bf16.mxu0 %v11724_v32  ;;  %10497 = vmatprep.subr.bf16.mxu1 %v11738_v2 }
0x2bec   : > { %10478 = vmatpush3.bf16.msra.mxu0 %v11725_v53  ;;  %10498 = vmatpush3.bf16.msra.mxu1 %v11739_v39 }
0x2bed   : > { %10479 = vmatprep.subr.bf16.mxu0 %v11726_v20  ;;  %10499 = vmatprep.subr.bf16.mxu1 %v11740_v12 }
0x2bf0   : > { %10480 = vmatpush3.bf16.msra.mxu0 %v11727_v10  ;;  %10500 = vmatpush3.bf16.msra.mxu1 %v11741_v17 }
0x2bf1   : > { %10501 = vmatprep.subr.bf16.mxu1 %v11742_v45 }
0x2bf4   : > { %10502 = vmatpush3.bf16.msra.mxu1 %v11743_v8 }
0x2c13   : > { %v8489_v57 = vpop.f32.mrf.mxu0 }
0x2c14   : > { %v8490_v21 = vadd.f32 %v8489_v57, %v8449_v44  ;;  %v8776_v57 = vrot.slane %v14525_v5, %v12789_v54 }
0x2c15   : > { %v8491_v30 = vpop.f32.mrf.mxu0 }
0x2c16   : > { %v8492_v40 = vadd.f32 %v8491_v30, %v8451_v23 }
0x2c17   : > { %v8493_v34 = vpop.f32.mrf.mxu0  ;;  %v8530_v42 = vpop.f32.mrf.mxu1 }
0x2c18   : > { %v8531_v62 = vadd.f32 %v8530_v42, %v8490_v21 }
0x2c19   : > { %v8494_v47 = vpop.f32.mrf.mxu0  ;;  %v8532_v15 = vpop.f32.mrf.mxu1 }
0x2c1a   : > { %v8533_v28 = vadd.f32 %v8532_v15, %v8492_v40  ;;  %v8701_v18 = vmax.f32 %v8531_v62, 0.0 }
0x2c1b   : > { %v8534_v51 = vpop.f32.mrf.mxu1 }
0x2c1c   : > { %v8702_v6 = vmax.f32 %v8533_v28, 0.0  ;;  %v8705_v41 = vpack.c.bf16 %v8701_v18, %v8701_v18 }
0x2c1d   : > { %v8535_v46 = vpop.f32.mrf.mxu1 }
0x2c1e   : > { %v8706_v55 = vpack.c.bf16 %v8702_v6, %v8702_v6 }
0x2c20   : > { %9001 = vmatprep.mubr.bf16.mxu0 %v8706_v55 }
0x2c21   : > { %9002 = vmatmul.mubr.bf16.vlgmr.msra.gmra.mxu0 %v8705_v41 }
0x2c53   : > { %v8571_v52 = vpop.f32.mrf.mxu0 }
0x2c54   : > { %v8572_v49 = vadd.f32 %v8571_v52, %v7088_v56 }
0x2c55   : > { %v8573_v50 = vpop.f32.mrf.mxu0 }
0x2c56   : > { %v8574_v22 = vadd.f32 %v8573_v50, %v7092_v33 }
0x2c57   : > { %v8575_v11 = vpop.f32.mrf.mxu0  ;;  %v8612_v60 = vpop.f32.mrf.mxu1 }
0x2c58   : > { %v8613_v24 = vadd.f32 %v8612_v60, %v8572_v49 }
0x2c59   : > { %v8576_v25 = vpop.f32.mrf.mxu0  ;;  %v8614_v38 = vpop.f32.mrf.mxu1 }
0x2c5a   : > { %v8615_v0 = vadd.f32 %v8614_v38, %v8574_v22 }
0x2c5b   : > { %v8616_v19 = vpop.f32.mrf.mxu1 }
0x2c5d   : > { %v8617_v63 = vpop.f32.mrf.mxu1 }
0x2c93   : > { %v8653_v31 = vpop.f32.mrf.mxu0 }
0x2c94   : > { %v8654_v43 = vadd.f32 %v8653_v31, %v8613_v24 }
0x2c95   : > { %v8655_v3 = vpop.f32.mrf.mxu0 }
0x2c96   : > { %v8656_v35 = vadd.f32 %v8655_v3, %v8615_v0 }
0x2c97   : > { %v8657_v9 = vpop.f32.mrf.mxu0  ;;  %v8694_v37 = vpop.f32.mrf.mxu1 }
0x2c98   : > { %v8695_v36 = vadd.f32 %v8694_v37, %v8654_v43 }
0x2c99   : > { %v8658_v4 = vpop.f32.mrf.mxu0  ;;  %v8696_v32 = vpop.f32.mrf.mxu1 }
0x2c9a   : > { %v8697_v48 = vadd.f32 %v8696_v32, %v8656_v35  ;;  %v8703_v53 = vmax.f32 %v8695_v36, 0.0 }
0x2c9b   : > { %v8698_v1 = vpop.f32.mrf.mxu1 }
0x2c9c   : > { %v8704_v20 = vmax.f32 %v8697_v48, 0.0  ;;  %v8707_v29 = vpack.c.bf16 %v8703_v53, %v8703_v53 }
0x2c9d   : > { %v8699_v58 = vpop.f32.mrf.mxu1 }
0x2c9e   : > { %v8708_v10 = vpack.c.bf16 %v8704_v20, %v8704_v20 }
0x2ca0   : > { %9041 = vmatprep.mubr.bf16.mxu1 %v8708_v10 }
0x2ca1   : > { %9042 = vmatmul.mubr.bf16.vlgmr.msra.gmra.mxu1 %v8707_v29 }
0x2ce1   : > { %v10481_v7 = vpop.f32.mrf.mxu0 }
0x2ce3   : > { %v10482_v16 = vpop.f32.mrf.mxu0 }
0x2ce4   : > { %v10483_v26 = vadd.f32 %v10482_v16, %v10481_v7 }
0x2ce5   : > { %v10484_v13 = vpop.f32.mrf.mxu0 }
0x2ce6   : > { %v9004_v2 = vadd.f32 %v10483_v26, %v8776_v57 }
0x2ce7   : > { %v10485_v59 = vpop.f32.mrf.mxu0 }
0x2d61   : > { %v10503_v27 = vpop.f32.mrf.mxu1 }
0x2d63   : > { %v10504_v44 = vpop.f32.mrf.mxu1 }
0x2d64   : > { %v10505_v30 = vadd.f32 %v10504_v44, %v10503_v27 }
0x2d65   : > { %v10506_v39 = vpop.f32.mrf.mxu1 }
0x2d66   : > { %v9044_v23 = vadd.f32 %v10505_v30, %v9004_v2 }
0x2d67   : > { %v10507_v21 = vpop.f32.mrf.mxu1 }
0x2d68   : > { %9049 = vst [vmem:[#allocation6] sm:$0x3] %v9044_v23 }
0x2d69 PF: > { %p10841_p6 = scmp.eq.s32.totalorder %s11867_s26, 3  ;;  %s11790_s25 = smov [#allocation6]  }
0x2d6a   : > { %s9057_s15 = sshll.u32 %s11790_s25, 4  ;;  %s9058_s15 = int_to_ptr.vmem [resolvable:$true] %s9057_s15 }
0x2d6b   : > { %s11744_s20 = scalar_lea.vmem %s9058_s15, 32  ;;  %p11751_p10 = scmp.lt.s32.totalorder %s9058_s15, %s9058_s15 }
0x2d6c   : > { %p11745_p7 = scmp.ne.s32.totalorder %s9058_s15, %s11744_s20  ;;  %p11752_p11 = scmp.lt.s32.totalorder %s11744_s20, %s11744_s20 }
0x2d6e   : > { %p11746_p8 = pnand %p11745_p7, %p10841_p6  ;;  %p11753_p12 = por %p11752_p11, %p11751_p10 }
0x2d70   : > { %p11747_p9 = pneg %p11746_p8 }
0x2d72   : > { %p11754_p13 = pnand %p11753_p12, %p11747_p9 }
0x2d74   : > { %11757 = shalt.err (!%p11754_p13)
}
0x2d75   : > { %s14575_s24 = sld [smem:[#allocation14_spill]] }
0x2d7b   : > { %10838 = dma.vmem_to_hbm [thread:$0]  (%p10841_p6), %s9058_s15, 32, %s14575_s24, [#allocation7]  }
0x2d7c   : > { %11777 = dma.done.wait (%p10841_p6), [#allocation7], 32  }
0x2d7d   : > { %11779 = vsyncadd (%p10841_p6), [#allocation7], 4294967264 }
0x2d7e PF: > { %s14576_s30 = sld [smem:[#allocation13_spill]] }
0x2d84   : > { %s24_s25 = sadd.s32 1, %s14576_s30  }
0x2d85   : > { %p21_p0 = scmp.ge.s32.totalorder %s24_s25, 6  }
0x2d87   :  { %23 = sbr.rel (!%p21_p0) target bundleno = 3 (0x3), region = 228 }
0x2d8c   :  { %9070 = vsyncpa [#allocation7], 1 }
0x2d8d   :  { %9072 = vsyncpa [#allocation7 + $0x1], 1 }
0x2d8e   :  { %9073 = vsyncmov [#allocation5] }
0x2d91   :  { %s9074_s22 = vpop.sfrf %9073 }
0x2d92   :  { %p10066_p1 = scmp.ne.s32.totalorder %s9074_s22, 0 }
0x2d94   :  { %9078 = shalt.err (%p10066_p1)  }
0x2d95   :  { %9080 = vsyncmov [#allocation5 + $0x1] }
0x2d98   :  { %s9081_s13 = vpop.sfrf %9080 }
0x2d99   :  { %p10067_p2 = scmp.ne.s32.totalorder %s9081_s13, 0 }
0x2d9b   :  { %9085 = shalt.err (%p10067_p2)  }

</bundles_post_ra>
